<compile_context>
chip_gen: v7x
topology: tpu7x:2x2x1
jax: 0.10.0
libtpu: 0.0.40
codegen_flags: <defaults>
</compile_context>

<pallas_src>
import functools

import jax
import jax.numpy as jnp
from jax import lax
from jax.experimental import pallas as pl
from jax.experimental.pallas import tpu as pltpu

BN_EPS = 1e-5


# ----------------------------------------------------------------------------
# Fused kernel: conv tower (conv+bn+pool+relu x2) + spatial mean + MLP head
# ----------------------------------------------------------------------------
def _vis_head_kernel(patches_ref, w1_ref, a1_ref, w2_ref, a2_ref,
                     emb1_ref, img3d_ref, w2d_ref, wfc2_ref, bfc2_ref,
                     w3_ref, b3_ref, o_ref, buf_ref,
                     *, H, W, C1, C2, H_TILE, MARGIN):
    H2, W2 = H // 2, W // 2
    H4, W4 = H2 // 2, W2 // 2
    P = H2 * W2                       # pooled pixels after stage 1

    # ---- stage 1: conv1 (im2col matmul) + BN + maxpool(2) + ReLU ------------
    # M-tiled (H_TILE image rows per tile) so the f32 activation tile stays
    # small; every pooled tile is written directly into the conv2 staging
    # buffer (aligned, no padded columns needed).
    n_tiles = H // H_TILE
    rows_t = H_TILE * W               # flattened input pixels per tile
    out_t = (H_TILE // 2) * W2        # flattened pooled pixels per tile
    for t in range(n_tiles):
        r0 = t * rows_t
        y = jnp.dot(patches_ref[0, r0:r0 + rows_t, :], w1_ref[...],
                    preferred_element_type=jnp.float32)          # (rows_t, C1)
        y = y * a1_ref[0:1, :] + a1_ref[1:2, :]                  # bias+BN folded
        y = jnp.max(y.reshape(H_TILE * W2, 2, C1), axis=1)       # pool along W
        y = jnp.max(y.reshape(H_TILE // 2, 2, W2, C1), axis=1)   # pool along H
        y = jnp.maximum(y, 0.0)                                  # ReLU
        buf_ref[MARGIN + t * out_t:MARGIN + (t + 1) * out_t, :] = \
            y.reshape(out_t, C1)

    # Zero only the top/bottom margins (interior is fully overwritten above;
    # left/right image borders are handled by the column masks below).
    buf_ref[0:MARGIN, :] = jnp.zeros((MARGIN, C1), jnp.float32)
    buf_ref[MARGIN + P:MARGIN + P + MARGIN, :] = jnp.zeros((MARGIN, C1),
                                                           jnp.float32)

    # ---- stage 2: conv2 as 9 shifted-window matmuls + BN + pool + ReLU ------
    col = lax.broadcasted_iota(jnp.int32, (H2, W2, 1), 1)
    mask_l = (col > 0).astype(jnp.float32).reshape(P, 1)       # tap reads x-1
    mask_r = (col < W2 - 1).astype(jnp.float32).reshape(P, 1)  # tap reads x+1

    acc = jnp.zeros((P, C2), jnp.float32)
    for dy in range(3):
        for dx in range(3):
            off = MARGIN + (dy - 1) * W2 + (dx - 1)
            win = buf_ref[off:off + P, :]                       # (P, C1)
            if dx == 0:
                win = win * mask_l
            elif dx == 2:
                win = win * mask_r
            acc = acc + jnp.dot(win, w2_ref[3 * dy + dx],
                                preferred_element_type=jnp.float32)
    y2 = acc * a2_ref[0:1, :] + a2_ref[1:2, :]                  # (P, C2)
    y2 = jnp.max(y2.reshape(H2, W4, 2, C2), axis=2)             # pool along W
    y2 = jnp.max(y2.reshape(H4, 2, W4, C2), axis=1)             # pool along H
    y2 = jnp.maximum(y2, 0.0)                                   # (H4, W4, C2)
    sp = y2.reshape(H4 * W4, C2)                                # (H4*W4, C2)

    # ---- stage 3: fused MLP head --------------------------------------------
    # fc1 split:  h1 = ReLU(joint_emb@W_emb + mean_sp(conv)@W_2d + f3d@W_3d+b1)
    # (spatial mean folded into the matmul: mean(x) @ W == mean(x @ W))
    img = jnp.mean(jnp.dot(sp, w2d_ref[...],
                           preferred_element_type=jnp.float32),
                   axis=0, keepdims=True) + img3d_ref[0]        # (1, D1)
    h1 = jnp.maximum(emb1_ref[...] + img, 0.0)                  # (J, D1)
    h2 = jnp.dot(h1, wfc2_ref[...],
                 preferred_element_type=jnp.float32) + bfc2_ref[...]
    h2 = jnp.maximum(h2, 0.0)                                   # (J, D2)
    # fc3 (D2 -> 1) as VPU multiply + lane reduction (no 1-wide MXU matmul).
    s = jnp.sum(h2 * w3_ref[...], axis=-1, keepdims=True) + b3_ref[...]  # (J,1)
    # Overflow-safe sigmoid; result is guaranteed to stay in [0, 1].
    z = jnp.exp(-jnp.abs(s))
    o_ref[0] = jnp.where(s >= 0.0, 1.0, z) / (1.0 + z)


# ----------------------------------------------------------------------------
# Parameter initialization (deterministic, synthetic)
# ----------------------------------------------------------------------------
def init_params(key, in_channels=4, n_joints=92):
    C1, C2 = 256, 64
    ks = jax.random.split(key, 20)
    p = {}
    # conv weights stored in HWIO layout (3, 3, Cin, Cout)
    p["w_conv1"] = 0.05 * jax.random.normal(ks[0], (3, 3, in_channels, C1), jnp.float32)
    p["b_conv1"] = 0.05 * jax.random.normal(ks[1], (C1,), jnp.float32)
    p["bn1_gamma"] = 1.0 + 0.1 * jax.random.normal(ks[2], (C1,), jnp.float32)
    p["bn1_beta"] = 0.1 * jax.random.normal(ks[3], (C1,), jnp.float32)
    p["bn1_mean"] = 0.1 * jax.random.normal(ks[4], (C1,), jnp.float32)
    p["bn1_var"] = 1.0 + 0.1 * jnp.abs(jax.random.normal(ks[5], (C1,), jnp.float32))

    p["w_conv2"] = 0.02 * jax.random.normal(ks[6], (3, 3, C1, C2), jnp.float32)
    p["b_conv2"] = 0.05 * jax.random.normal(ks[7], (C2,), jnp.float32)
    p["bn2_gamma"] = 1.0 + 0.1 * jax.random.normal(ks[8], (C2,), jnp.float32)
    p["bn2_beta"] = 0.1 * jax.random.normal(ks[9], (C2,), jnp.float32)
    p["bn2_mean"] = 0.1 * jax.random.normal(ks[10], (C2,), jnp.float32)
    p["bn2_var"] = 1.0 + 0.1 * jnp.abs(jax.random.normal(ks[11], (C2,), jnp.float32))

    p["joint_emb"] = jax.random.normal(ks[12], (n_joints, 64), jnp.float32)

    # Linear weights stored as (in, out); biases as 1-D
    p["w_fc1"] = 0.05 * jax.random.normal(ks[13], (132, 256), jnp.float32)
    p["b_fc1"] = 0.05 * jax.random.normal(ks[14], (256,), jnp.float32)
    p["w_fc2"] = 0.05 * jax.random.normal(ks[15], (256, 128), jnp.float32)
    p["b_fc2"] = 0.05 * jax.random.normal(ks[16], (128,), jnp.float32)
    p["w_fc3"] = 0.05 * jax.random.normal(ks[17], (128, 1), jnp.float32)
    p["b_fc3"] = 0.05 * jax.random.normal(ks[18], (1,), jnp.float32)
    return p


# ----------------------------------------------------------------------------
# Forward pass (plain-JAX glue + one fused Pallas kernel over the batch)
# ----------------------------------------------------------------------------
def vis_head_forward(feat_2d, feat_3d, params, n_joints=92):
    if isinstance(feat_2d, (list, tuple)):       # mirrors _transform_inputs
        feat_2d = feat_2d[0]

    N, CIN, H, W = feat_2d.shape
    C1 = params["w_conv1"].shape[-1]             # 256
    C2 = params["w_conv2"].shape[-1]             # 64
    D1 = params["w_fc1"].shape[-1]               # 256
    D2 = params["w_fc2"].shape[-1]               # 128
    E = params["joint_emb"].shape[-1]            # 64
    J = n_joints
    assert H % 4 == 0 and W % 4 == 0, "two 2x maxpools need H, W % 4 == 0"
    H2, W2 = H // 2, W // 2
    P = H2 * W2
    MARGIN = ((W2 + 1 + 7) // 8) * 8             # zero halo rows around pooled buf
    H_TILE = 4 if (H % 4 == 0 and 4 * W <= 128) else 2
    K1 = 9 * CIN

    # --- im2col patches for conv1 (lane-dense K = 9*Cin instead of C = Cin) ---
    x = jnp.transpose(feat_2d, (0, 2, 3, 1)).astype(jnp.float32)    # NHWC
    xp = jnp.pad(x, ((0, 0), (1, 1), (1, 1), (0, 0)))               # pad=1
    taps = [xp[:, dy:dy + H, dx:dx + W, :] for dy in range(3) for dx in range(3)]
    patches = jnp.concatenate(taps, axis=-1).reshape(N, H * W, K1)

    # --- fold conv bias + BatchNorm (eval mode) into per-channel scale/shift --
    def fold_bn(bias, gamma, beta, mean, var):
        scale = gamma / jnp.sqrt(var + BN_EPS)
        shift = beta + (bias - mean) * scale
        return jnp.stack([scale, shift], axis=0)                    # (2, C)

    a1 = fold_bn(params["b_conv1"], params["bn1_gamma"], params["bn1_beta"],
                 params["bn1_mean"], params["bn1_var"])             # (2, C1)
    a2 = fold_bn(params["b_conv2"], params["bn2_gamma"], params["bn2_beta"],
                 params["bn2_mean"], params["bn2_var"])             # (2, C2)
    w1 = params["w_conv1"].reshape(K1, C1)                          # tap-major rows
    w2 = params["w_conv2"].reshape(9, C1, C2)

    # --- split fc1 so the (N*J, 132) feature tensor is never materialized ----
    w_fc1 = params["w_fc1"]                                         # (132, D1)
    w_2d = w_fc1[:C2, :]                                            # (C2, D1)
    w_emb = w_fc1[C2:C2 + E, :]                                     # (E,  D1)
    w_3d = w_fc1[C2 + E:, :]                                        # (4,  D1)
    emb1 = params["joint_emb"].astype(jnp.float32) @ w_emb          # (J, D1), batch-invariant
    img3d = (feat_3d.astype(jnp.float32) @ w_3d
             + params["b_fc1"]).reshape(N, 1, D1)                   # (N, 1, D1)

    kernel = functools.partial(_vis_head_kernel, H=H, W=W, C1=C1, C2=C2,
                               H_TILE=H_TILE, MARGIN=MARGIN)
    out = pl.pallas_call(
        kernel,
        out_shape=jax.ShapeDtypeStruct((N, J, 1), jnp.float32),
        grid=(N,),
        in_specs=[
            pl.BlockSpec((1, H * W, K1), lambda b: (b, 0, 0)),   # im2col patches
            pl.BlockSpec((K1, C1), lambda b: (0, 0)),            # conv1 weight
            pl.BlockSpec((2, C1), lambda b: (0, 0)),             # conv1 bn scale/shift
            pl.BlockSpec((9, C1, C2), lambda b: (0, 0, 0)),      # conv2 weight (taps)
            pl.BlockSpec((2, C2), lambda b: (0, 0)),             # conv2 bn scale/shift
            pl.BlockSpec((J, D1), lambda b: (0, 0)),             # joint_emb @ W_emb
            pl.BlockSpec((1, 1, D1), lambda b: (b, 0, 0)),       # f3d @ W_3d + b_fc1
            pl.BlockSpec((C2, D1), lambda b: (0, 0)),            # W_2d
            pl.BlockSpec((D1, D2), lambda b: (0, 0)),            # fc2 weight
            pl.BlockSpec((1, D2), lambda b: (0, 0)),             # fc2 bias
            pl.BlockSpec((1, D2), lambda b: (0, 0)),             # fc3 weight (row)
            pl.BlockSpec((1, 1), lambda b: (0, 0)),              # fc3 bias
        ],
        out_specs=pl.BlockSpec((1, J, 1), lambda b: (b, 0, 0)),
        scratch_shapes=[pltpu.VMEM((2 * MARGIN + P, C1), jnp.float32)],
        compiler_params=pltpu.CompilerParams(
            dimension_semantics=("parallel",)),                  # v7x megacore
    )(patches, w1, a1, w2, a2, emb1, img3d, w_2d,
      params["w_fc2"], params["b_fc2"].reshape(1, D2),
      params["w_fc3"].reshape(1, D2), params["b_fc3"].reshape(1, 1))

    return out[:, :, 0]                                             # (N, J)


if __name__ == "__main__":
    key = jax.random.PRNGKey(0)
    k_in, k_3d, k_par = jax.random.split(key, 3)

    N, CIN, H, W = 2, 4, 16, 16
    N_JOINTS = 92                  # 64 (conv feat) + 64 (embed) + 4 (3d) = 132

    feat_2d = jax.random.normal(k_in, (N, CIN, H, W), jnp.float32)   # NCHW
    feat_3d = jax.random.normal(k_3d, (N, 4), jnp.float32)

    params = init_params(k_par, in_channels=CIN, n_joints=N_JOINTS)

    fwd = jax.jit(functools.partial(vis_head_forward, n_joints=N_JOINTS))
    scores = fwd(feat_2d, feat_3d, params)
    scores = jax.block_until_ready(scores)

    assert scores.shape == (N, N_JOINTS)
    assert bool(jnp.all(jnp.isfinite(scores)))
    assert bool(jnp.all((scores >= 0.0) & (scores <= 1.0)))   # sigmoid range
    print("KERNEL_OK")
</pallas_src>

<mosaic_0001>
module attributes {stable_mosaic.version = 11 : i64} {
  func.func @_vis_head_kernel(%arg0: i32, %arg1: memref<1x256x36xf32, #tpu.memory_space<vmem>>, %arg2: memref<36x256xf32, #tpu.memory_space<vmem>>, %arg3: memref<2x256xf32, #tpu.memory_space<vmem>>, %arg4: memref<9x256x64xf32, #tpu.memory_space<vmem>>, %arg5: memref<2x64xf32, #tpu.memory_space<vmem>>, %arg6: memref<92x256xf32, #tpu.memory_space<vmem>>, %arg7: memref<1x1x256xf32, #tpu.memory_space<vmem>>, %arg8: memref<64x256xf32, #tpu.memory_space<vmem>>, %arg9: memref<256x128xf32, #tpu.memory_space<vmem>>, %arg10: memref<1x128xf32, #tpu.memory_space<vmem>>, %arg11: memref<1x128xf32, #tpu.memory_space<vmem>>, %arg12: memref<1x1xf32, #tpu.memory_space<vmem>>, %arg13: memref<1x92x1xf32, #tpu.memory_space<vmem>>, %arg14: memref<96x256xf32, #tpu.memory_space<vmem>>) attributes {dimension_semantics = [#tpu.dimension_semantics<parallel>], iteration_bounds = array<i64: 2>, scalar_prefetch = 0 : i64, scratch_operands = 1 : i64, tpu.core_type = #tpu.core_type<tc>, window_params = [{transform_indices = @transform_0, window_bounds = array<i64: 1, 256, 36>}, {pipeline_mode = #tpu.pipeline_mode<synchronous>, transform_indices = @transform_1, window_bounds = array<i64: 36, 256>}, {pipeline_mode = #tpu.pipeline_mode<synchronous>, transform_indices = @transform_2, window_bounds = array<i64: 2, 256>}, {pipeline_mode = #tpu.pipeline_mode<synchronous>, transform_indices = @transform_3, window_bounds = array<i64: 9, 256, 64>}, {pipeline_mode = #tpu.pipeline_mode<synchronous>, transform_indices = @transform_4, window_bounds = array<i64: 2, 64>}, {pipeline_mode = #tpu.pipeline_mode<synchronous>, transform_indices = @transform_5, window_bounds = array<i64: 92, 256>}, {transform_indices = @transform_6, window_bounds = array<i64: 1, 1, 256>}, {pipeline_mode = #tpu.pipeline_mode<synchronous>, transform_indices = @transform_7, window_bounds = array<i64: 64, 256>}, {pipeline_mode = #tpu.pipeline_mode<synchronous>, transform_indices = @transform_8, window_bounds = array<i64: 256, 128>}, {pipeline_mode = #tpu.pipeline_mode<synchronous>, transform_indices = @transform_9, window_bounds = array<i64: 1, 128>}, {pipeline_mode = #tpu.pipeline_mode<synchronous>, transform_indices = @transform_10, window_bounds = array<i64: 1, 128>}, {pipeline_mode = #tpu.pipeline_mode<synchronous>, transform_indices = @transform_11, window_bounds = array<i64: 1, 1>}, {transform_indices = @transform_12, window_bounds = array<i64: 1, 92, 1>}]} {
    %c0 = arith.constant 0 : index
    %c0_0 = arith.constant 0 : index
    %c0_1 = arith.constant 0 : index
    %0 = vector.load %arg1[%c0, %c0_0, %c0_1] : memref<1x256x36xf32, #tpu.memory_space<vmem>>, vector<1x64x36xf32>
    %1 = vector.shape_cast %0 : vector<1x64x36xf32> to vector<64x36xf32>
    %c0_2 = arith.constant 0 : index
    %c0_3 = arith.constant 0 : index
    %2 = vector.load %arg2[%c0_2, %c0_3] : memref<36x256xf32, #tpu.memory_space<vmem>>, vector<36x256xf32>
    %cst = arith.constant dense<0.000000e+00> : vector<64x256xf32>
    %3 = tpu.matmul %1, %2, %cst {dimension_numbers = #tpu.dot_dimension_numbers<[1], [0], [0], [1], [0, 0, 1, 1], [], []>} : vector<64x36xf32>, vector<36x256xf32>, vector<64x256xf32> -> vector<64x256xf32>
    %c0_4 = arith.constant 0 : index
    %c0_5 = arith.constant 0 : index
    %4 = vector.load %arg3[%c0_4, %c0_5] : memref<2x256xf32, #tpu.memory_space<vmem>>, vector<1x256xf32>
    %5 = vector.broadcast %4 : vector<1x256xf32> to vector<64x256xf32>
    %6 = arith.mulf %3, %5 : vector<64x256xf32>
    %c1 = arith.constant 1 : index
    %c0_6 = arith.constant 0 : index
    %7 = vector.load %arg3[%c1, %c0_6] : memref<2x256xf32, #tpu.memory_space<vmem>>, vector<1x256xf32>
    %8 = vector.broadcast %7 : vector<1x256xf32> to vector<64x256xf32>
    %9 = arith.addf %6, %8 : vector<64x256xf32>
    %10 = vector.shape_cast %9 : vector<64x256xf32> to vector<32x2x256xf32>
    %cst_7 = arith.constant dense<0xFF800000> : vector<32x256xf32>
    %11 = vector.multi_reduction <maximumf>, %10, %cst_7 [1] : vector<32x2x256xf32> to vector<32x256xf32>
    %12 = vector.shape_cast %11 : vector<32x256xf32> to vector<2x2x8x256xf32>
    %cst_8 = arith.constant dense<0xFF800000> : vector<2x8x256xf32>
    %13 = vector.multi_reduction <maximumf>, %12, %cst_8 [1] : vector<2x2x8x256xf32> to vector<2x8x256xf32>
    %cst_9 = arith.constant 0.000000e+00 : f32
    %14 = vector.broadcast %cst_9 : f32 to vector<2x8x256xf32>
    %15 = arith.maximumf %13, %14 : vector<2x8x256xf32>
    %16 = vector.shape_cast %15 : vector<2x8x256xf32> to vector<16x256xf32>
    %c16 = arith.constant 16 : index
    %c0_10 = arith.constant 0 : index
    %17 = vector.load %arg14[%c16, %c0_10] : memref<96x256xf32, #tpu.memory_space<vmem>>, vector<16x256xf32>
    tpu.vector_store %arg14[%c16, %c0_10], %16 {strides = array<i32>} : memref<96x256xf32, #tpu.memory_space<vmem>>, vector<16x256xf32>,
    %c0_11 = arith.constant 0 : index
    %c64 = arith.constant 64 : index
    %c0_12 = arith.constant 0 : index
    %18 = vector.load %arg1[%c0_11, %c64, %c0_12] : memref<1x256x36xf32, #tpu.memory_space<vmem>>, vector<1x64x36xf32>
    %19 = vector.shape_cast %18 : vector<1x64x36xf32> to vector<64x36xf32>
    %c0_13 = arith.constant 0 : index
    %c0_14 = arith.constant 0 : index
    %20 = vector.load %arg2[%c0_13, %c0_14] : memref<36x256xf32, #tpu.memory_space<vmem>>, vector<36x256xf32>
    %cst_15 = arith.constant dense<0.000000e+00> : vector<64x256xf32>
    %21 = tpu.matmul %19, %20, %cst_15 {dimension_numbers = #tpu.dot_dimension_numbers<[1], [0], [0], [1], [0, 0, 1, 1], [], []>} : vector<64x36xf32>, vector<36x256xf32>, vector<64x256xf32> -> vector<64x256xf32>
    %c0_16 = arith.constant 0 : index
    %c0_17 = arith.constant 0 : index
    %22 = vector.load %arg3[%c0_16, %c0_17] : memref<2x256xf32, #tpu.memory_space<vmem>>, vector<1x256xf32>
    %23 = vector.broadcast %22 : vector<1x256xf32> to vector<64x256xf32>
    %24 = arith.mulf %21, %23 : vector<64x256xf32>
    %c1_18 = arith.constant 1 : index
    %c0_19 = arith.constant 0 : index
    %25 = vector.load %arg3[%c1_18, %c0_19] : memref<2x256xf32, #tpu.memory_space<vmem>>, vector<1x256xf32>
    %26 = vector.broadcast %25 : vector<1x256xf32> to vector<64x256xf32>
    %27 = arith.addf %24, %26 : vector<64x256xf32>
    %28 = vector.shape_cast %27 : vector<64x256xf32> to vector<32x2x256xf32>
    %cst_20 = arith.constant dense<0xFF800000> : vector<32x256xf32>
    %29 = vector.multi_reduction <maximumf>, %28, %cst_20 [1] : vector<32x2x256xf32> to vector<32x256xf32>
    %30 = vector.shape_cast %29 : vector<32x256xf32> to vector<2x2x8x256xf32>
    %cst_21 = arith.constant dense<0xFF800000> : vector<2x8x256xf32>
    %31 = vector.multi_reduction <maximumf>, %30, %cst_21 [1] : vector<2x2x8x256xf32> to vector<2x8x256xf32>
    %cst_22 = arith.constant 0.000000e+00 : f32
    %32 = vector.broadcast %cst_22 : f32 to vector<2x8x256xf32>
    %33 = arith.maximumf %31, %32 : vector<2x8x256xf32>
    %34 = vector.shape_cast %33 : vector<2x8x256xf32> to vector<16x256xf32>
    %c32 = arith.constant 32 : index
    %c0_23 = arith.constant 0 : index
    %35 = vector.load %arg14[%c32, %c0_23] : memref<96x256xf32, #tpu.memory_space<vmem>>, vector<16x256xf32>
    tpu.vector_store %arg14[%c32, %c0_23], %34 {strides = array<i32>} : memref<96x256xf32, #tpu.memory_space<vmem>>, vector<16x256xf32>,
    %c0_24 = arith.constant 0 : index
    %c128 = arith.constant 128 : index
    %c0_25 = arith.constant 0 : index
    %36 = vector.load %arg1[%c0_24, %c128, %c0_25] : memref<1x256x36xf32, #tpu.memory_space<vmem>>, vector<1x64x36xf32>
    %37 = vector.shape_cast %36 : vector<1x64x36xf32> to vector<64x36xf32>
    %c0_26 = arith.constant 0 : index
    %c0_27 = arith.constant 0 : index
    %38 = vector.load %arg2[%c0_26, %c0_27] : memref<36x256xf32, #tpu.memory_space<vmem>>, vector<36x256xf32>
    %cst_28 = arith.constant dense<0.000000e+00> : vector<64x256xf32>
    %39 = tpu.matmul %37, %38, %cst_28 {dimension_numbers = #tpu.dot_dimension_numbers<[1], [0], [0], [1], [0, 0, 1, 1], [], []>} : vector<64x36xf32>, vector<36x256xf32>, vector<64x256xf32> -> vector<64x256xf32>
    %c0_29 = arith.constant 0 : index
    %c0_30 = arith.constant 0 : index
    %40 = vector.load %arg3[%c0_29, %c0_30] : memref<2x256xf32, #tpu.memory_space<vmem>>, vector<1x256xf32>
    %41 = vector.broadcast %40 : vector<1x256xf32> to vector<64x256xf32>
    %42 = arith.mulf %39, %41 : vector<64x256xf32>
    %c1_31 = arith.constant 1 : index
    %c0_32 = arith.constant 0 : index
    %43 = vector.load %arg3[%c1_31, %c0_32] : memref<2x256xf32, #tpu.memory_space<vmem>>, vector<1x256xf32>
    %44 = vector.broadcast %43 : vector<1x256xf32> to vector<64x256xf32>
    %45 = arith.addf %42, %44 : vector<64x256xf32>
    %46 = vector.shape_cast %45 : vector<64x256xf32> to vector<32x2x256xf32>
    %cst_33 = arith.constant dense<0xFF800000> : vector<32x256xf32>
    %47 = vector.multi_reduction <maximumf>, %46, %cst_33 [1] : vector<32x2x256xf32> to vector<32x256xf32>
    %48 = vector.shape_cast %47 : vector<32x256xf32> to vector<2x2x8x256xf32>
    %cst_34 = arith.constant dense<0xFF800000> : vector<2x8x256xf32>
    %49 = vector.multi_reduction <maximumf>, %48, %cst_34 [1] : vector<2x2x8x256xf32> to vector<2x8x256xf32>
    %cst_35 = arith.constant 0.000000e+00 : f32
    %50 = vector.broadcast %cst_35 : f32 to vector<2x8x256xf32>
    %51 = arith.maximumf %49, %50 : vector<2x8x256xf32>
    %52 = vector.shape_cast %51 : vector<2x8x256xf32> to vector<16x256xf32>
    %c48 = arith.constant 48 : index
    %c0_36 = arith.constant 0 : index
    %53 = vector.load %arg14[%c48, %c0_36] : memref<96x256xf32, #tpu.memory_space<vmem>>, vector<16x256xf32>
    tpu.vector_store %arg14[%c48, %c0_36], %52 {strides = array<i32>} : memref<96x256xf32, #tpu.memory_space<vmem>>, vector<16x256xf32>,
    %c0_37 = arith.constant 0 : index
    %c192 = arith.constant 192 : index
    %c0_38 = arith.constant 0 : index
    %54 = vector.load %arg1[%c0_37, %c192, %c0_38] : memref<1x256x36xf32, #tpu.memory_space<vmem>>, vector<1x64x36xf32>
    %55 = vector.shape_cast %54 : vector<1x64x36xf32> to vector<64x36xf32>
    %c0_39 = arith.constant 0 : index
    %c0_40 = arith.constant 0 : index
    %56 = vector.load %arg2[%c0_39, %c0_40] : memref<36x256xf32, #tpu.memory_space<vmem>>, vector<36x256xf32>
    %cst_41 = arith.constant dense<0.000000e+00> : vector<64x256xf32>
    %57 = tpu.matmul %55, %56, %cst_41 {dimension_numbers = #tpu.dot_dimension_numbers<[1], [0], [0], [1], [0, 0, 1, 1], [], []>} : vector<64x36xf32>, vector<36x256xf32>, vector<64x256xf32> -> vector<64x256xf32>
    %c0_42 = arith.constant 0 : index
    %c0_43 = arith.constant 0 : index
    %58 = vector.load %arg3[%c0_42, %c0_43] : memref<2x256xf32, #tpu.memory_space<vmem>>, vector<1x256xf32>
    %59 = vector.broadcast %58 : vector<1x256xf32> to vector<64x256xf32>
    %60 = arith.mulf %57, %59 : vector<64x256xf32>
    %c1_44 = arith.constant 1 : index
    %c0_45 = arith.constant 0 : index
    %61 = vector.load %arg3[%c1_44, %c0_45] : memref<2x256xf32, #tpu.memory_space<vmem>>, vector<1x256xf32>
    %62 = vector.broadcast %61 : vector<1x256xf32> to vector<64x256xf32>
    %63 = arith.addf %60, %62 : vector<64x256xf32>
    %64 = vector.shape_cast %63 : vector<64x256xf32> to vector<32x2x256xf32>
    %cst_46 = arith.constant dense<0xFF800000> : vector<32x256xf32>
    %65 = vector.multi_reduction <maximumf>, %64, %cst_46 [1] : vector<32x2x256xf32> to vector<32x256xf32>
    %66 = vector.shape_cast %65 : vector<32x256xf32> to vector<2x2x8x256xf32>
    %cst_47 = arith.constant dense<0xFF800000> : vector<2x8x256xf32>
    %67 = vector.multi_reduction <maximumf>, %66, %cst_47 [1] : vector<2x2x8x256xf32> to vector<2x8x256xf32>
    %cst_48 = arith.constant 0.000000e+00 : f32
    %68 = vector.broadcast %cst_48 : f32 to vector<2x8x256xf32>
    %69 = arith.maximumf %67, %68 : vector<2x8x256xf32>
    %70 = vector.shape_cast %69 : vector<2x8x256xf32> to vector<16x256xf32>
    %c64_49 = arith.constant 64 : index
    %c0_50 = arith.constant 0 : index
    %71 = vector.load %arg14[%c64_49, %c0_50] : memref<96x256xf32, #tpu.memory_space<vmem>>, vector<16x256xf32>
    tpu.vector_store %arg14[%c64_49, %c0_50], %70 {strides = array<i32>} : memref<96x256xf32, #tpu.memory_space<vmem>>, vector<16x256xf32>,
    %cst_51 = arith.constant 0.000000e+00 : f32
    %72 = vector.broadcast %cst_51 : f32 to vector<16x256xf32>
    %c0_52 = arith.constant 0 : index
    %c0_53 = arith.constant 0 : index
    %73 = vector.load %arg14[%c0_52, %c0_53] : memref<96x256xf32, #tpu.memory_space<vmem>>, vector<16x256xf32>
    tpu.vector_store %arg14[%c0_52, %c0_53], %72 {strides = array<i32>} : memref<96x256xf32, #tpu.memory_space<vmem>>, vector<16x256xf32>,
    %cst_54 = arith.constant 0.000000e+00 : f32
    %74 = vector.broadcast %cst_54 : f32 to vector<16x256xf32>
    %c80 = arith.constant 80 : index
    %c0_55 = arith.constant 0 : index
    %75 = vector.load %arg14[%c80, %c0_55] : memref<96x256xf32, #tpu.memory_space<vmem>>, vector<16x256xf32>
    tpu.vector_store %arg14[%c80, %c0_55], %74 {strides = array<i32>} : memref<96x256xf32, #tpu.memory_space<vmem>>, vector<16x256xf32>,
    %76 = tpu.iota {dimensions = array<i32: 1>} : vector<8x8x1xi32>
    %c0_i32 = arith.constant 0 : i32
    %77 = vector.broadcast %c0_i32 : i32 to vector<8x8x1xi32>
    %78 = arith.cmpi sgt, %76, %77 : vector<8x8x1xi32>
    %79 = arith.extui %78 : vector<8x8x1xi1> to vector<8x8x1xi32>
    %80 = arith.sitofp %79 : vector<8x8x1xi32> to vector<8x8x1xf32>
    %81 = vector.shape_cast %80 : vector<8x8x1xf32> to vector<64x1xf32>
    %c7_i32 = arith.constant 7 : i32
    %82 = vector.broadcast %c7_i32 : i32 to vector<8x8x1xi32>
    %83 = arith.cmpi slt, %76, %82 : vector<8x8x1xi32>
    %84 = arith.extui %83 : vector<8x8x1xi1> to vector<8x8x1xi32>
    %85 = arith.sitofp %84 : vector<8x8x1xi32> to vector<8x8x1xf32>
    %86 = vector.shape_cast %85 : vector<8x8x1xf32> to vector<64x1xf32>
    %cst_56 = arith.constant 0.000000e+00 : f32
    %87 = vector.broadcast %cst_56 : f32 to vector<64x64xf32>
    %c7 = arith.constant 7 : index
    %c0_57 = arith.constant 0 : index
    %88 = vector.load %arg14[%c7, %c0_57] : memref<96x256xf32, #tpu.memory_space<vmem>>, vector<64x256xf32>
    %89 = vector.broadcast %81 : vector<64x1xf32> to vector<64x256xf32>
    %90 = arith.mulf %88, %89 : vector<64x256xf32>
    %c0_58 = arith.constant 0 : index
    %c0_59 = arith.constant 0 : index
    %c0_60 = arith.constant 0 : index
    %91 = vector.load %arg4[%c0_58, %c0_59, %c0_60] : memref<9x256x64xf32, #tpu.memory_space<vmem>>, vector<1x256x64xf32>
    %92 = vector.shape_cast %91 : vector<1x256x64xf32> to vector<256x64xf32>
    %cst_61 = arith.constant dense<0.000000e+00> : vector<64x64xf32>
    %93 = tpu.matmul %90, %92, %cst_61 {dimension_numbers = #tpu.dot_dimension_numbers<[1], [0], [0], [1], [0, 0, 1, 1], [], []>} : vector<64x256xf32>, vector<256x64xf32>, vector<64x64xf32> -> vector<64x64xf32>
    %94 = arith.addf %87, %93 : vector<64x64xf32>
    %c8 = arith.constant 8 : index
    %c0_62 = arith.constant 0 : index
    %95 = vector.load %arg14[%c8, %c0_62] : memref<96x256xf32, #tpu.memory_space<vmem>>, vector<64x256xf32>
    %c1_63 = arith.constant 1 : index
    %c0_64 = arith.constant 0 : index
    %c0_65 = arith.constant 0 : index
    %96 = vector.load %arg4[%c1_63, %c0_64, %c0_65] : memref<9x256x64xf32, #tpu.memory_space<vmem>>, vector<1x256x64xf32>
    %97 = vector.shape_cast %96 : vector<1x256x64xf32> to vector<256x64xf32>
    %cst_66 = arith.constant dense<0.000000e+00> : vector<64x64xf32>
    %98 = tpu.matmul %95, %97, %cst_66 {dimension_numbers = #tpu.dot_dimension_numbers<[1], [0], [0], [1], [0, 0, 1, 1], [], []>} : vector<64x256xf32>, vector<256x64xf32>, vector<64x64xf32> -> vector<64x64xf32>
    %99 = arith.addf %94, %98 : vector<64x64xf32>
    %c9 = arith.constant 9 : index
    %c0_67 = arith.constant 0 : index
    %100 = vector.load %arg14[%c9, %c0_67] : memref<96x256xf32, #tpu.memory_space<vmem>>, vector<64x256xf32>
    %101 = vector.broadcast %86 : vector<64x1xf32> to vector<64x256xf32>
    %102 = arith.mulf %100, %101 : vector<64x256xf32>
    %c2 = arith.constant 2 : index
    %c0_68 = arith.constant 0 : index
    %c0_69 = arith.constant 0 : index
    %103 = vector.load %arg4[%c2, %c0_68, %c0_69] : memref<9x256x64xf32, #tpu.memory_space<vmem>>, vector<1x256x64xf32>
    %104 = vector.shape_cast %103 : vector<1x256x64xf32> to vector<256x64xf32>
    %cst_70 = arith.constant dense<0.000000e+00> : vector<64x64xf32>
    %105 = tpu.matmul %102, %104, %cst_70 {dimension_numbers = #tpu.dot_dimension_numbers<[1], [0], [0], [1], [0, 0, 1, 1], [], []>} : vector<64x256xf32>, vector<256x64xf32>, vector<64x64xf32> -> vector<64x64xf32>
    %106 = arith.addf %99, %105 : vector<64x64xf32>
    %c15 = arith.constant 15 : index
    %c0_71 = arith.constant 0 : index
    %107 = vector.load %arg14[%c15, %c0_71] : memref<96x256xf32, #tpu.memory_space<vmem>>, vector<64x256xf32>
    %108 = vector.broadcast %81 : vector<64x1xf32> to vector<64x256xf32>
    %109 = arith.mulf %107, %108 : vector<64x256xf32>
    %c3 = arith.constant 3 : index
    %c0_72 = arith.constant 0 : index
    %c0_73 = arith.constant 0 : index
    %110 = vector.load %arg4[%c3, %c0_72, %c0_73] : memref<9x256x64xf32, #tpu.memory_space<vmem>>, vector<1x256x64xf32>
    %111 = vector.shape_cast %110 : vector<1x256x64xf32> to vector<256x64xf32>
    %cst_74 = arith.constant dense<0.000000e+00> : vector<64x64xf32>
    %112 = tpu.matmul %109, %111, %cst_74 {dimension_numbers = #tpu.dot_dimension_numbers<[1], [0], [0], [1], [0, 0, 1, 1], [], []>} : vector<64x256xf32>, vector<256x64xf32>, vector<64x64xf32> -> vector<64x64xf32>
    %113 = arith.addf %106, %112 : vector<64x64xf32>
    %c16_75 = arith.constant 16 : index
    %c0_76 = arith.constant 0 : index
    %114 = vector.load %arg14[%c16_75, %c0_76] : memref<96x256xf32, #tpu.memory_space<vmem>>, vector<64x256xf32>
    %c4 = arith.constant 4 : index
    %c0_77 = arith.constant 0 : index
    %c0_78 = arith.constant 0 : index
    %115 = vector.load %arg4[%c4, %c0_77, %c0_78] : memref<9x256x64xf32, #tpu.memory_space<vmem>>, vector<1x256x64xf32>
    %116 = vector.shape_cast %115 : vector<1x256x64xf32> to vector<256x64xf32>
    %cst_79 = arith.constant dense<0.000000e+00> : vector<64x64xf32>
    %117 = tpu.matmul %114, %116, %cst_79 {dimension_numbers = #tpu.dot_dimension_numbers<[1], [0], [0], [1], [0, 0, 1, 1], [], []>} : vector<64x256xf32>, vector<256x64xf32>, vector<64x64xf32> -> vector<64x64xf32>
    %118 = arith.addf %113, %117 : vector<64x64xf32>
    %c17 = arith.constant 17 : index
    %c0_80 = arith.constant 0 : index
    %119 = vector.load %arg14[%c17, %c0_80] : memref<96x256xf32, #tpu.memory_space<vmem>>, vector<64x256xf32>
    %120 = vector.broadcast %86 : vector<64x1xf32> to vector<64x256xf32>
    %121 = arith.mulf %119, %120 : vector<64x256xf32>
    %c5 = arith.constant 5 : index
    %c0_81 = arith.constant 0 : index
    %c0_82 = arith.constant 0 : index
    %122 = vector.load %arg4[%c5, %c0_81, %c0_82] : memref<9x256x64xf32, #tpu.memory_space<vmem>>, vector<1x256x64xf32>
    %123 = vector.shape_cast %122 : vector<1x256x64xf32> to vector<256x64xf32>
    %cst_83 = arith.constant dense<0.000000e+00> : vector<64x64xf32>
    %124 = tpu.matmul %121, %123, %cst_83 {dimension_numbers = #tpu.dot_dimension_numbers<[1], [0], [0], [1], [0, 0, 1, 1], [], []>} : vector<64x256xf32>, vector<256x64xf32>, vector<64x64xf32> -> vector<64x64xf32>
    %125 = arith.addf %118, %124 : vector<64x64xf32>
    %c23 = arith.constant 23 : index
    %c0_84 = arith.constant 0 : index
    %126 = vector.load %arg14[%c23, %c0_84] : memref<96x256xf32, #tpu.memory_space<vmem>>, vector<64x256xf32>
    %127 = vector.broadcast %81 : vector<64x1xf32> to vector<64x256xf32>
    %128 = arith.mulf %126, %127 : vector<64x256xf32>
    %c6 = arith.constant 6 : index
    %c0_85 = arith.constant 0 : index
    %c0_86 = arith.constant 0 : index
    %129 = vector.load %arg4[%c6, %c0_85, %c0_86] : memref<9x256x64xf32, #tpu.memory_space<vmem>>, vector<1x256x64xf32>
    %130 = vector.shape_cast %129 : vector<1x256x64xf32> to vector<256x64xf32>
    %cst_87 = arith.constant dense<0.000000e+00> : vector<64x64xf32>
    %131 = tpu.matmul %128, %130, %cst_87 {dimension_numbers = #tpu.dot_dimension_numbers<[1], [0], [0], [1], [0, 0, 1, 1], [], []>} : vector<64x256xf32>, vector<256x64xf32>, vector<64x64xf32> -> vector<64x64xf32>
    %132 = arith.addf %125, %131 : vector<64x64xf32>
    %c24 = arith.constant 24 : index
    %c0_88 = arith.constant 0 : index
    %133 = vector.load %arg14[%c24, %c0_88] : memref<96x256xf32, #tpu.memory_space<vmem>>, vector<64x256xf32>
    %c7_89 = arith.constant 7 : index
    %c0_90 = arith.constant 0 : index
    %c0_91 = arith.constant 0 : index
    %134 = vector.load %arg4[%c7_89, %c0_90, %c0_91] : memref<9x256x64xf32, #tpu.memory_space<vmem>>, vector<1x256x64xf32>
    %135 = vector.shape_cast %134 : vector<1x256x64xf32> to vector<256x64xf32>
    %cst_92 = arith.constant dense<0.000000e+00> : vector<64x64xf32>
    %136 = tpu.matmul %133, %135, %cst_92 {dimension_numbers = #tpu.dot_dimension_numbers<[1], [0], [0], [1], [0, 0, 1, 1], [], []>} : vector<64x256xf32>, vector<256x64xf32>, vector<64x64xf32> -> vector<64x64xf32>
    %137 = arith.addf %132, %136 : vector<64x64xf32>
    %c25 = arith.constant 25 : index
    %c0_93 = arith.constant 0 : index
    %138 = vector.load %arg14[%c25, %c0_93] : memref<96x256xf32, #tpu.memory_space<vmem>>, vector<64x256xf32>
    %139 = vector.broadcast %86 : vector<64x1xf32> to vector<64x256xf32>
    %140 = arith.mulf %138, %139 : vector<64x256xf32>
    %c8_94 = arith.constant 8 : index
    %c0_95 = arith.constant 0 : index
    %c0_96 = arith.constant 0 : index
    %141 = vector.load %arg4[%c8_94, %c0_95, %c0_96] : memref<9x256x64xf32, #tpu.memory_space<vmem>>, vector<1x256x64xf32>
    %142 = vector.shape_cast %141 : vector<1x256x64xf32> to vector<256x64xf32>
    %cst_97 = arith.constant dense<0.000000e+00> : vector<64x64xf32>
    %143 = tpu.matmul %140, %142, %cst_97 {dimension_numbers = #tpu.dot_dimension_numbers<[1], [0], [0], [1], [0, 0, 1, 1], [], []>} : vector<64x256xf32>, vector<256x64xf32>, vector<64x64xf32> -> vector<64x64xf32>
    %144 = arith.addf %137, %143 : vector<64x64xf32>
    %c0_98 = arith.constant 0 : index
    %c0_99 = arith.constant 0 : index
    %145 = vector.load %arg5[%c0_98, %c0_99] : memref<2x64xf32, #tpu.memory_space<vmem>>, vector<1x64xf32>
    %146 = vector.broadcast %145 : vector<1x64xf32> to vector<64x64xf32>
    %147 = arith.mulf %144, %146 : vector<64x64xf32>
    %c1_100 = arith.constant 1 : index
    %c0_101 = arith.constant 0 : index
    %148 = vector.load %arg5[%c1_100, %c0_101] : memref<2x64xf32, #tpu.memory_space<vmem>>, vector<1x64xf32>
    %149 = vector.broadcast %148 : vector<1x64xf32> to vector<64x64xf32>
    %150 = arith.addf %147, %149 : vector<64x64xf32>
    %151 = vector.shape_cast %150 : vector<64x64xf32> to vector<8x4x2x64xf32>
    %cst_102 = arith.constant dense<0xFF800000> : vector<8x4x64xf32>
    %152 = vector.multi_reduction <maximumf>, %151, %cst_102 [2] : vector<8x4x2x64xf32> to vector<8x4x64xf32>
    %153 = vector.shape_cast %152 : vector<8x4x64xf32> to vector<4x2x4x64xf32>
    %cst_103 = arith.constant dense<0xFF800000> : vector<4x4x64xf32>
    %154 = vector.multi_reduction <maximumf>, %153, %cst_103 [1] : vector<4x2x4x64xf32> to vector<4x4x64xf32>
    %cst_104 = arith.constant 0.000000e+00 : f32
    %155 = vector.broadcast %cst_104 : f32 to vector<4x4x64xf32>
    %156 = arith.maximumf %154, %155 : vector<4x4x64xf32>
    %157 = vector.shape_cast %156 : vector<4x4x64xf32> to vector<16x64xf32>
    %c0_105 = arith.constant 0 : index
    %c0_106 = arith.constant 0 : index
    %158 = vector.load %arg8[%c0_105, %c0_106] : memref<64x256xf32, #tpu.memory_space<vmem>>, vector<64x256xf32>
    %cst_107 = arith.constant dense<0.000000e+00> : vector<16x256xf32>
    %159 = tpu.matmul %157, %158, %cst_107 {dimension_numbers = #tpu.dot_dimension_numbers<[1], [0], [0], [1], [0, 0, 1, 1], [], []>} : vector<16x64xf32>, vector<64x256xf32>, vector<16x256xf32> -> vector<16x256xf32>
    %cst_108 = arith.constant dense<0.000000e+00> : vector<256xf32>
    %160 = vector.multi_reduction <add>, %159, %cst_108 [0] : vector<16x256xf32> to vector<256xf32>
    %161 = vector.shape_cast %160 : vector<256xf32> to vector<1x256xf32>
    %cst_109 = arith.constant 1.600000e+01 : f32
    %162 = vector.broadcast %cst_109 : f32 to vector<1x256xf32>
    %163 = arith.divf %161, %162 : vector<1x256xf32>
    %c0_110 = arith.constant 0 : index
    %c0_111 = arith.constant 0 : index
    %c0_112 = arith.constant 0 : index
    %164 = vector.load %arg7[%c0_110, %c0_111, %c0_112] : memref<1x1x256xf32, #tpu.memory_space<vmem>>, vector<1x1x256xf32>
    %165 = vector.shape_cast %164 : vector<1x1x256xf32> to vector<1x256xf32>
    %166 = arith.addf %163, %165 : vector<1x256xf32>
    %c0_113 = arith.constant 0 : index
    %c0_114 = arith.constant 0 : index
    %167 = vector.load %arg6[%c0_113, %c0_114] : memref<92x256xf32, #tpu.memory_space<vmem>>, vector<92x256xf32>
    %168 = vector.broadcast %166 : vector<1x256xf32> to vector<92x256xf32>
    %169 = arith.addf %167, %168 : vector<92x256xf32>
    %cst_115 = arith.constant 0.000000e+00 : f32
    %170 = vector.broadcast %cst_115 : f32 to vector<92x256xf32>
    %171 = arith.maximumf %169, %170 : vector<92x256xf32>
    %c0_116 = arith.constant 0 : index
    %c0_117 = arith.constant 0 : index
    %172 = vector.load %arg9[%c0_116, %c0_117] : memref<256x128xf32, #tpu.memory_space<vmem>>, vector<256x128xf32>
    %cst_118 = arith.constant dense<0.000000e+00> : vector<92x128xf32>
    %173 = tpu.matmul %171, %172, %cst_118 {dimension_numbers = #tpu.dot_dimension_numbers<[1], [0], [0], [1], [0, 0, 1, 1], [], []>} : vector<92x256xf32>, vector<256x128xf32>, vector<92x128xf32> -> vector<92x128xf32>
    %c0_119 = arith.constant 0 : index
    %c0_120 = arith.constant 0 : index
    %174 = vector.load %arg10[%c0_119, %c0_120] : memref<1x128xf32, #tpu.memory_space<vmem>>, vector<1x128xf32>
    %175 = vector.broadcast %174 : vector<1x128xf32> to vector<92x128xf32>
    %176 = arith.addf %173, %175 : vector<92x128xf32>
    %cst_121 = arith.constant 0.000000e+00 : f32
    %177 = vector.broadcast %cst_121 : f32 to vector<92x128xf32>
    %178 = arith.maximumf %176, %177 : vector<92x128xf32>
    %c0_122 = arith.constant 0 : index
    %c0_123 = arith.constant 0 : index
    %179 = vector.load %arg11[%c0_122, %c0_123] : memref<1x128xf32, #tpu.memory_space<vmem>>, vector<1x128xf32>
    %180 = vector.broadcast %179 : vector<1x128xf32> to vector<92x128xf32>
    %181 = arith.mulf %178, %180 : vector<92x128xf32>
    %cst_124 = arith.constant dense<0.000000e+00> : vector<92xf32>
    %182 = vector.multi_reduction <add>, %181, %cst_124 [1] : vector<92x128xf32> to vector<92xf32>
    %183 = vector.shape_cast %182 : vector<92xf32> to vector<92x1xf32>
    %c0_125 = arith.constant 0 : index
    %c0_126 = arith.constant 0 : index
    %184 = vector.load %arg12[%c0_125, %c0_126] : memref<1x1xf32, #tpu.memory_space<vmem>>, vector<1x1xf32>
    %185 = vector.broadcast %184 : vector<1x1xf32> to vector<92x1xf32>
    %186 = arith.addf %183, %185 : vector<92x1xf32>
    %187 = math.absf %186 : vector<92x1xf32>
    %cst_127 = arith.constant 0.000000e+00 : f32
    %188 = vector.broadcast %cst_127 : f32 to vector<92x1xf32>
    %189 = arith.subf %188, %187 : vector<92x1xf32>
    %190 = math.exp %189 : vector<92x1xf32>
    %cst_128 = arith.constant 0.000000e+00 : f32
    %191 = vector.broadcast %cst_128 : f32 to vector<92x1xf32>
    %192 = arith.cmpf oge, %186, %191 : vector<92x1xf32>
    %cst_129 = arith.constant 1.000000e+00 : f32
    %193 = vector.broadcast %cst_129 : f32 to vector<92x1xf32>
    %194 = arith.select %192, %193, %190 : vector<92x1xi1>, vector<92x1xf32>
    %cst_130 = arith.constant 1.000000e+00 : f32
    %195 = vector.broadcast %cst_130 : f32 to vector<92x1xf32>
    %196 = arith.addf %195, %190 : vector<92x1xf32>
    %197 = arith.divf %194, %196 : vector<92x1xf32>
    %c0_131 = arith.constant 0 : index
    %c0_132 = arith.constant 0 : index
    %c0_133 = arith.constant 0 : index
    %198 = vector.load %arg13[%c0_131, %c0_132, %c0_133] : memref<1x92x1xf32, #tpu.memory_space<vmem>>, vector<1x92x1xf32>
    %199 = vector.shape_cast %198 : vector<1x92x1xf32> to vector<92x1xf32>
    %200 = vector.shape_cast %197 : vector<92x1xf32> to vector<1x92x1xf32>
    tpu.vector_store %arg13[%c0_131, %c0_132, %c0_133], %200 {strides = array<i32>} : memref<1x92x1xf32, #tpu.memory_space<vmem>>, vector<1x92x1xf32>,
    return
  }
  func.func @transform_0(%arg0: i32) -> (i32, i32, i32) {
    %c0_i32 = arith.constant 0 : i32
    %c0_i32_0 = arith.constant 0 : i32
    %c0_i32_1 = arith.constant 0 : i32
    return %arg0, %c0_i32, %c0_i32_0 : i32, i32, i32
  }
  func.func @transform_1(%arg0: i32) -> (i32, i32) {
    %c0_i32 = arith.constant 0 : i32
    %c0_i32_0 = arith.constant 0 : i32
    %c0_i32_1 = arith.constant 0 : i32
    return %c0_i32, %c0_i32_0 : i32, i32
  }
  func.func @transform_2(%arg0: i32) -> (i32, i32) {
    %c0_i32 = arith.constant 0 : i32
    %c0_i32_0 = arith.constant 0 : i32
    %c0_i32_1 = arith.constant 0 : i32
    return %c0_i32, %c0_i32_0 : i32, i32
  }
  func.func @transform_3(%arg0: i32) -> (i32, i32, i32) {
    %c0_i32 = arith.constant 0 : i32
    %c0_i32_0 = arith.constant 0 : i32
    %c0_i32_1 = arith.constant 0 : i32
    %c0_i32_2 = arith.constant 0 : i32
    return %c0_i32, %c0_i32_0, %c0_i32_1 : i32, i32, i32
  }
  func.func @transform_4(%arg0: i32) -> (i32, i32) {
    %c0_i32 = arith.constant 0 : i32
    %c0_i32_0 = arith.constant 0 : i32
    %c0_i32_1 = arith.constant 0 : i32
    return %c0_i32, %c0_i32_0 : i32, i32
  }
  func.func @transform_5(%arg0: i32) -> (i32, i32) {
    %c0_i32 = arith.constant 0 : i32
    %c0_i32_0 = arith.constant 0 : i32
    %c0_i32_1 = arith.constant 0 : i32
    return %c0_i32, %c0_i32_0 : i32, i32
  }
  func.func @transform_6(%arg0: i32) -> (i32, i32, i32) {
    %c0_i32 = arith.constant 0 : i32
    %c0_i32_0 = arith.constant 0 : i32
    %c0_i32_1 = arith.constant 0 : i32
    return %arg0, %c0_i32, %c0_i32_0 : i32, i32, i32
  }
  func.func @transform_7(%arg0: i32) -> (i32, i32) {
    %c0_i32 = arith.constant 0 : i32
    %c0_i32_0 = arith.constant 0 : i32
    %c0_i32_1 = arith.constant 0 : i32
    return %c0_i32, %c0_i32_0 : i32, i32
  }
  func.func @transform_8(%arg0: i32) -> (i32, i32) {
    %c0_i32 = arith.constant 0 : i32
    %c0_i32_0 = arith.constant 0 : i32
    %c0_i32_1 = arith.constant 0 : i32
    return %c0_i32, %c0_i32_0 : i32, i32
  }
  func.func @transform_9(%arg0: i32) -> (i32, i32) {
    %c0_i32 = arith.constant 0 : i32
    %c0_i32_0 = arith.constant 0 : i32
    %c0_i32_1 = arith.constant 0 : i32
    return %c0_i32, %c0_i32_0 : i32, i32
  }
  func.func @transform_10(%arg0: i32) -> (i32, i32) {
    %c0_i32 = arith.constant 0 : i32
    %c0_i32_0 = arith.constant 0 : i32
    %c0_i32_1 = arith.constant 0 : i32
    return %c0_i32, %c0_i32_0 : i32, i32
  }
  func.func @transform_11(%arg0: i32) -> (i32, i32) {
    %c0_i32 = arith.constant 0 : i32
    %c0_i32_0 = arith.constant 0 : i32
    %c0_i32_1 = arith.constant 0 : i32
    return %c0_i32, %c0_i32_0 : i32, i32
  }
  func.func @transform_12(%arg0: i32) -> (i32, i32, i32) {
    %c0_i32 = arith.constant 0 : i32
    %c0_i32_0 = arith.constant 0 : i32
    %c0_i32_1 = arith.constant 0 : i32
    return %arg0, %c0_i32, %c0_i32_0 : i32, i32, i32
  }
}

</mosaic_0001>

<bundles_post_ra>
// kernel: vis_head_forward.1
= control target key start
LH: loop header
LB: loop body
LE: loop exit
PB: predicated region body
PF: predicated region fallthrough
CT: control target
= control target key end

     0   :  { %s10056_s23 = smov 0   ;;  %s14208_s0 = inlined_call_operand.vmem [shape: f32[2,256,36], index: 0, kind: input, shape index: {}]   ;;  %s14209_s1 = inlined_call_operand.vmem [shape: f32[36,256], index: 1, kind: input, shape index: {}]   ;;  %s14210_s2 = inlined_call_operand.vmem [shape: f32[2,256], index: 2, kind: input, shape index: {}]   ;;  %s14211_s3 = inlined_call_operand.vmem [shape: f32[9,256,64], index: 3, kind: input, shape index: {}]   ;;  %s14212_s4 = inlined_call_operand.vmem [shape: f32[2,64], index: 4, kind: input, shape index: {}]   ;;  %s14213_s5 = inlined_call_operand.vmem [shape: f32[92,256], index: 5, kind: input, shape index: {}]   ;;  %s14214_s6 = inlined_call_operand.vmem [shape: f32[2,1,256], index: 6, kind: input, shape index: {}]   ;;  %s14215_s7 = inlined_call_operand.vmem [shape: f32[64,256], index: 7, kind: input, shape index: {}]   ;;  %s14216_s8 = inlined_call_operand.vmem [shape: f32[256,128], index: 8, kind: input, shape index: {}]   ;;  %s14217_s9 = inlined_call_operand.vmem [shape: f32[1,128], index: 9, kind: input, shape index: {}]   ;;  %s14218_s10 = inlined_call_operand.vmem [shape: f32[1,128], index: 10, kind: input, shape index: {}]   ;;  %s14219_s11 = inlined_call_operand.<no memory space> [shape: f32[1,1], index: 11, kind: input, shape index: {}]   ;;  %s14220_s12 = inlined_call_operand.vmem [shape: f32[2,92,1], index: 12, kind: output, shape index: {}]  }
   0x1   :  { %v17_v0 = vstv %s14219_s11 }
   0x2   :  { %18 = vst [vmem:[#allocation3] sm:$0x1] %v17_v0 }
   0x3 LB: > { %s8637_s24 = sadd.s32 4294967295, %s9984_s23   ;;  %p8641_p0 = scmp.ge.s32.totalorder %s9984_s23, 1  ;;  %s9984_s23 = sphi %s10056_s23, %s24_s23  }
   0x4   : > { %p373_p1 = scmp.lt.s32.totalorder %s9984_s23, 3 }
   0x6   : > { %p374_p2 = pnand %p8641_p0, %p373_p1 }
   0x8   : > { %377 = sbr.rel (%p374_p2) target bundleno = 2079 (0x81f), region = 68 }
   0xf   : > { %v442_v1 = vld [vmem:[%s14209_s1 + $0x8] sm:$0xff]  ;;  %v444_v2 = vld [vmem:[%s14209_s1 + $0x18] sm:$0xff]  ;;  %v441_v3 = vld [vmem:[%s14209_s1] sm:$0xff]  ;;  %p10073_p3 = scmp.lt.s32.totalorder %s8637_s24, 1  ;;  %v9986_v8 = vmov 0.0   ;;  %vm476_vm0 = vcmask 1043456   ;;  %v598_v60 = vlaneseq }
  0x10   : > { %v10077_v4 = vpack.c.bf16 %v444_v2, %v442_v1  ;;  %v443_v5 = vld [vmem:[%s14209_s1 + $0x10] sm:$0xff]  ;;  %v446_v6 = vld [vmem:[%s14209_s1 + $0x28] sm:$0xff]  ;;  %v448_v7 = vld [vmem:[%s14209_s1 + $0x38] sm:$0xff]  ;;  %547 = vmatprep.mubr.f32.mxu1 %v9986_v8  ;;  %5552 = vst [vmem:[#allocation2] sm:$0xff] %v9986_v8  ;;  %3110 = vmatprep.mubr.f32.mxu0 %v9986_v8  ;;  %vm451_vm1 = vcmask 293888   ;;  %vm1133_vm2 = vcmask 1041408  }
  0x11   : > { %5553 = vst [vmem:[#allocation2 + $0x8] sm:$0xff] %v9986_v8  ;;  %5554 = vst [vmem:[#allocation2 + $0x10] sm:$0xff] %v9986_v8  ;;  %v10098_v9 = vpack.c.bf16 %v443_v5, %v441_v3  ;;  %v10100_v10 = vpack.c.bf16 %v448_v7, %v446_v6  ;;  %v445_v11 = vld [vmem:[%s14209_s1 + $0x20] sm:$0xff]  ;;  %v447_v12 = vld [vmem:[%s14209_s1 + $0x30] sm:$0xff]  ;;  %s14407_s24 = smov (!%p10073_p3, %s8637_s24), 1  ;;  %v10275_v61 = vshrl.u32 %v598_v60, 7 }
  0x12   : > { %5555 = vst [vmem:[#allocation2 + $0x18] sm:$0xff] %v9986_v8  ;;  %5556 = vst [vmem:[#allocation2 + $0xa0] sm:$0xff] %v9986_v8  ;;  %9531 = vmatprep.subr.bf16.mxu1 %v10077_v4  ;;  %9547 = vmatprep.subr.bf16.mxu0 %v10077_v4  ;;  %v10115_v13 = vpack.c.bf16 %v447_v12, %v445_v11  ;;  %s8957_s25 = sshll.u32 %s14407_s24, 8  ;;  %v450_v14 = vld [vmem:[%s14209_s1 + $0x48] sm:$0xf]  ;;  %v8708_v54 = vld [vmem:[%s14211_s3 + $0x180] sm:$0xff] }
  0x13   : > { %5557 = vst [vmem:[#allocation2 + $0xa8] sm:$0xff] %v9986_v8  ;;  %5558 = vst [vmem:[#allocation2 + $0xb0] sm:$0xff] %v9986_v8  ;;  %9533 = vmatpush1.bf16.msra.mxu1 %v10098_v9  ;;  %9549 = vmatpush1.bf16.msra.mxu0 %v10098_v9  ;;  %v3015_v15 = vld [vmem:[%s14209_s1 + $0x48] sm:$0xf]  ;;  %s10130_s13 = scalar_lea.vmem %s14208_s0, %s8957_s25  ;;  %v449_v16 = vld [vmem:[%s14209_s1 + $0x40] sm:$0xf] }
  0x14   : > { %5559 = vst [vmem:[#allocation2 + $0xb8] sm:$0xff] %v9986_v8  ;;  %9535 = vmatprep.subr.bf16.mxu1 %v10100_v10  ;;  %9551 = vmatprep.subr.bf16.mxu0 %v10100_v10  ;;  %v3014_v17 = vld [vmem:[%s14209_s1 + $0x40] sm:$0xf]  ;;  %v434_v20 = vld [vmem:[%s10130_s13 + $0x8] sm:$0xff]  ;;  %v435_v23 = vld [vmem:[%s10130_s13 + $0x10] sm:$0xff]  ;;  %v10278_v62 = vsub.s32 0, %v10275_v61 }
  0x15   : > { %v433_v18 = vld [vmem:[%s10130_s13] sm:$0xff]  ;;  %v2999_v21 = vld [vmem:[%s10130_s13 + $0x88] sm:$0xff]  ;;  %v3000_v25 = vld [vmem:[%s10130_s13 + $0x90] sm:$0xff]  ;;  %14256 = vst [vmem:[#allocation4_spill] sm:$0xff] %v10275_v61  ;;  %v10284_v0 = vsub.s32 1, %v10275_v61  ;;  %vm1678_vm3 = vcmask 1041409  }
  0x16   : > { %v2998_v19 = vld [vmem:[%s10130_s13 + $0x80] sm:$0xff]  ;;  %v1738_v22 = vld [vmem:[%s14209_s1 + $0x48] sm:$0xf]  ;;  %v436_v26 = vld [vmem:[%s10130_s13 + $0x18] sm:$0xff]  ;;  %14257 = vst [vmem:[#allocation5_spill] sm:$0xff] %v10278_v62  ;;  %vm1680_vm4 = vcmask 1042434  }
  0x17   : > { %9537 = vmatpush1.bf16.msra.mxu1 %v10115_v13  ;;  %9553 = vmatpush1.bf16.msra.mxu0 %v10115_v13  ;;  %v1737_v24 = vld [vmem:[%s14209_s1 + $0x40] sm:$0xf]  ;;  %v3001_v27 = vld [vmem:[%s10130_s13 + $0x98] sm:$0xff]  ;;  %v438_v30 = vld [vmem:[%s10130_s13 + $0x28] sm:$0xff]  ;;  %14258 = vst [vmem:[#allocation6_spill] sm:$0xff] %v10284_v0  ;;  %vm1682_vm5 = vcmask 1043459  }
  0x18   : > { %8646 = vmatprep.subr.msk.mxu1 %vm476_vm0, %v450_v14  ;;  %8668 = vmatprep.subr.msk.mxu0 %vm476_vm0, %v3015_v15  ;;  %v437_v28 = vld [vmem:[%s10130_s13 + $0x20] sm:$0xff]  ;;  %v3003_v31 = vld [vmem:[%s10130_s13 + $0xa8] sm:$0xff]  ;;  %v439_v32 = vld [vmem:[%s10130_s13 + $0x30] sm:$0xff]  ;;  %v9987_v2 = vmov 1983009808   ;;  %vm1684_vm6 = vcmask 1044484  }
  0x19   : > { %v3002_v29 = vld [vmem:[%s10130_s13 + $0xa0] sm:$0xff]  ;;  %v3004_v33 = vld [vmem:[%s10130_s13 + $0xb0] sm:$0xff]  ;;  %v440_v34 = vld [vmem:[%s10130_s13 + $0x38] sm:$0xff]  ;;  %v672_v3 = vunpack.c.l.s4 %v9987_v2  ;;  %vm1686_vm7 = vcmask 1045509   ;;  %vm1688_vm8 = vcmask 1046534   ;;  %vm1690_vm9 = vcmask 1047559  }
  0x1a   : > { %v3005_v35 = vld [vmem:[%s10130_s13 + $0xb8] sm:$0xff]  ;;  %v1721_v36 = vld [vmem:[%s10130_s13 + $0x40] sm:$0xff]  ;;  %v1722_v37 = vld [vmem:[%s10130_s13 + $0x48] sm:$0xff]  ;;  %vm5800_vm11 = vcmask 1040384   ;;  %vm5587_vm13 = vcmask 1046528   ;;  %vm7681_vm14 = vcmask 517120  }
  0x1b   : > { %8647 = vmatpush1.msk.msra.mxu1 %vm476_vm0, %v449_v16  ;;  %8669 = vmatpush1.msk.msra.mxu0 %vm476_vm0, %v3014_v17  ;;  %v4292_v38 = vld [vmem:[%s14209_s1 + $0x48] sm:$0xf]  ;;  %v1723_v39 = vld [vmem:[%s10130_s13 + $0x50] sm:$0xff]  ;;  %v4291_v40 = vld [vmem:[%s14209_s1 + $0x40] sm:$0xf]  ;;  %v673_v12 = vunpack.c.0.s8 %v672_v3  ;;  %vm7906_vm15 = vcmask 523264  }
  0x1c   : > { %8648 = vmatmul.mubr.msk.f32.vlgmr.msra.gmra.mrb[0].mxu1 %vm451_vm1, %v433_v18  ;;  %9539 = vmatprep.subr.bf16.mxu1 %v10077_v4  ;;  %v1724_v41 = vld [vmem:[%s10130_s13 + $0x58] sm:$0xff]  ;;  %v1725_v42 = vld [vmem:[%s10130_s13 + $0x60] sm:$0xff]  ;;  %v1726_v43 = vld [vmem:[%s10130_s13 + $0x68] sm:$0xff]  ;;  %s8644_s21 = sshll.u32 %s14407_s24, 1  ;;  %s9900_s27 = smul.u32 96, %s14407_s24 }
  0x1d   : > { %9541 = vmatpush1.bf16.msra.mxu1 %v10098_v9  ;;  %553 = vmatprep.mubr.f32.mxu1 %v9986_v8  ;;  %v1727_v44 = vld [vmem:[%s10130_s13 + $0x70] sm:$0xff]  ;;  %v1728_v45 = vld [vmem:[%s10130_s13 + $0x78] sm:$0xff]  ;;  %v4275_v46 = vld [vmem:[%s10130_s13 + $0xc0] sm:$0xff]  ;;  %s427_s26 = scalar_lea.vmem %s14214_s6, %s8644_s21 }
  0x1e   : > { %9543 = vmatprep.subr.bf16.mxu1 %v10100_v10  ;;  %8670 = vmatmul.mubr.msk.f32.vlgmr.msra.gmra.mrb[0].mxu0 %vm451_vm1, %v2998_v19  ;;  %v4276_v47 = vld [vmem:[%s10130_s13 + $0xc8] sm:$0xff]  ;;  %v4277_v48 = vld [vmem:[%s10130_s13 + $0xd0] sm:$0xff]  ;;  %v4278_v49 = vld [vmem:[%s10130_s13 + $0xd8] sm:$0xff]  ;;  %s14157_s30 = scalar_lea.vmem %s14220_s12, %s9900_s27 }
  0x1f   : > { %3116 = vmatprep.mubr.f32.mxu0 %v9986_v8  ;;  %v4279_v50 = vld [vmem:[%s10130_s13 + $0xe0] sm:$0xff]  ;;  %v4280_v51 = vld [vmem:[%s10130_s13 + $0xe8] sm:$0xff]  ;;  %v4281_v52 = vld [vmem:[%s10130_s13 + $0xf0] sm:$0xff] }
  0x20   : > { %8649 = vmatmul.mubr.msk.f32.gmra.mrb[2].mxu1 %vm451_vm1, %v434_v20  ;;  %v4282_v53 = vld [vmem:[%s10130_s13 + $0xf8] sm:$0xff]  ;;  %v8709_v55 = vld [vmem:[%s14211_s3 + $0x188] sm:$0xff]  ;;  %v8692_v57 = vld [vmem:[%s14211_s3 + $0x100] sm:$0xff] }
  0x21   : > { %559 = vmatprep.mubr.f32.mxu1 %v9986_v8  ;;  %9545 = vmatpush1.bf16.msra.mxu1 %v10115_v13  ;;  %v9562_v56 = vpack.c.bf16 %v8709_v55, %v8708_v54  ;;  %v8693_v58 = vld [vmem:[%s14211_s3 + $0x108] sm:$0xff]  ;;  %v596_v63 = vld [vmem:[%s14210_s2] ss:$2 sm:$0x3] }
  0x22   : > { %8671 = vmatmul.mubr.msk.f32.gmra.mrb[2].mxu0 %vm451_vm1, %v2999_v21  ;;  %8657 = vmatprep.subr.msk.mxu1 %vm476_vm0, %v1738_v22  ;;  %v9564_v59 = vpack.c.bf16 %v8693_v58, %v8692_v57  ;;  %v8656_v1 = vld [vmem:[%s14210_s2 + $0x1] ss:$2 sm:$0x3]  ;;  %v10293_v5 = vrot.slane %v596_v63, %v10278_v62  ;;  %v10296_v6 = vrot.slane %v596_v63, %v10284_v0 }
  0x23   : > { %3122 = vmatprep.mubr.f32.mxu0 %v9986_v8  ;;  %9563 = vmatprep.subr.bf16.mxu0 %v9562_v56  ;;  %v8678_v7 = vld [vmem:[%s14210_s2 + $0x1] ss:$2 sm:$0x3]  ;;  %v10308_v11 = vrot.slane %v8656_v1, %v10284_v0 }
  0x24   : > { %8650 = vmatmul.mubr.msk.f32.gmra.mrb[4].mxu1 %vm451_vm1, %v435_v23  ;;  %9565 = vmatpush3.bf16.msra.mxu0 %v9564_v59  ;;  %v10315_v16 = vrot.slane %v8678_v7, %v10278_v62  ;;  %v10319_v19 = vrot.slane %v8678_v7, %v10284_v0 }
  0x25   : > { %565 = vmatprep.mubr.f32.mxu1 %v9986_v8  ;;  %8658 = vmatpush1.msk.msra.mxu1 %vm476_vm0, %v1737_v24  ;;  %v10325_v24 = vsub.s32 %v673_v12, %v10275_v61 }
  0x26   : > { %8672 = vmatmul.mubr.msk.f32.gmra.mrb[4].mxu0 %vm451_vm1, %v3000_v25  ;;  %9555 = vmatprep.subr.bf16.mxu1 %v10077_v4  ;;  %v3159_v4 = vld [vmem:[%s14210_s2] ss:$2 sm:$0x3]  ;;  %14260 = vst [vmem:[#allocation8_spill] sm:$0xff] %v10315_v16  ;;  %14261 = vst [vmem:[#allocation9_spill] sm:$0xff] %v10319_v19 }
  0x27   : > { %3128 = vmatprep.mubr.f32.mxu0 %v9986_v8  ;;  %14262 = vst [vmem:[#allocation10_spill] sm:$0xff] %v10325_v24 }
  0x28   : > { %8651 = vmatmul.mubr.msk.f32.gmra.mrb[6].mxu1 %vm451_vm1, %v436_v26 }
  0x29   : > { %571 = vmatprep.mubr.f32.mxu1 %v9986_v8 }
  0x2a   : > { %8673 = vmatmul.mubr.msk.f32.gmra.mrb[6].mxu0 %vm451_vm1, %v3001_v27 }
  0x2b   : > { %3134 = vmatprep.mubr.f32.mxu0 %v9986_v8 }
  0x2c   : > { %8652 = vmatmul.mubr.msk.f32.gmra.mrb[8].mxu1 %vm451_vm1, %v437_v28 }
  0x2d   : > { %577 = vmatprep.mubr.f32.mxu1 %v9986_v8 }
  0x2e   : > { %8674 = vmatmul.mubr.msk.f32.gmra.mrb[8].mxu0 %vm451_vm1, %v3002_v29 }
  0x2f   : > { %3140 = vmatprep.mubr.f32.mxu0 %v9986_v8 }
  0x30   : > { %8653 = vmatmul.mubr.msk.f32.gmra.mrb[10].mxu1 %vm451_vm1, %v438_v30 }
  0x31   : > { %583 = vmatprep.mubr.f32.mxu1 %v9986_v8 }
  0x32   : > { %8675 = vmatmul.mubr.msk.f32.gmra.mrb[10].mxu0 %vm451_vm1, %v3003_v31 }
  0x33   : > { %3146 = vmatprep.mubr.f32.mxu0 %v9986_v8 }
  0x34   : > { %8654 = vmatmul.mubr.msk.f32.gmra.mrb[12].mxu1 %vm451_vm1, %v439_v32 }
  0x35   : > { %589 = vmatprep.mubr.f32.mxu1 %v9986_v8 }
  0x36   : > { %8676 = vmatmul.mubr.msk.f32.gmra.mrb[12].mxu0 %vm451_vm1, %v3004_v33 }
  0x37   : > { %3152 = vmatprep.mubr.f32.mxu0 %v9986_v8 }
  0x38   : > { %8655 = vmatmul.mubr.msk.f32.gmra.mrb[14].mxu1 %vm451_vm1, %v440_v34 }
  0x39   : > { %1833 = vmatprep.mubr.f32.mxu1 %v9986_v8 }
  0x3a   : > { %8677 = vmatmul.mubr.msk.f32.gmra.mrb[14].mxu0 %vm451_vm1, %v3005_v35 }
  0x3b   : > { %5741 = vmatprep.mubr.f32.mxu0 %v9986_v8 }
  0x3c   : > { %8659 = vmatmul.mubr.msk.f32.vlgmr.msra.gmra.mrb[16].mxu1 %vm451_vm1, %v1721_v36 }
  0x3d   : > { %9557 = vmatpush1.bf16.msra.mxu1 %v10098_v9  ;;  %1839 = vmatprep.mubr.f32.mxu1 %v9986_v8  ;;  %v10305_v9 = vrot.slane %v3159_v4, %v10278_v62 }
  0x3e   : > { %9559 = vmatprep.subr.bf16.mxu1 %v10100_v10 }
  0x40   : > { %8660 = vmatmul.mubr.msk.f32.gmra.mrb[18].mxu1 %vm451_vm1, %v1722_v37 }
  0x41   : > { %1845 = vmatprep.mubr.f32.mxu1 %v9986_v8  ;;  %9561 = vmatpush1.bf16.msra.mxu1 %v10115_v13  ;;  %v10311_v13 = vrot.slane %v3159_v4, %v10284_v0 }
  0x42   : > { %8679 = vmatprep.subr.msk.mxu1 %vm476_vm0, %v4292_v38 }
  0x43   : > { %14259 = vst [vmem:[#allocation7_spill] sm:$0xff] %v10311_v13 }
  0x44   : > { %8661 = vmatmul.mubr.msk.f32.gmra.mrb[20].mxu1 %vm451_vm1, %v1723_v39 }
  0x45   : > { %1851 = vmatprep.mubr.f32.mxu1 %v9986_v8  ;;  %8680 = vmatpush1.msk.msra.mxu1 %vm476_vm0, %v4291_v40 }
  0x48   : > { %8662 = vmatmul.mubr.msk.f32.gmra.mrb[22].mxu1 %vm451_vm1, %v1724_v41 }
  0x49   : > { %1857 = vmatprep.mubr.f32.mxu1 %v9986_v8 }
  0x4c   : > { %8663 = vmatmul.mubr.msk.f32.gmra.mrb[24].mxu1 %vm451_vm1, %v1725_v42 }
  0x4d   : > { %1863 = vmatprep.mubr.f32.mxu1 %v9986_v8 }
  0x50   : > { %8664 = vmatmul.mubr.msk.f32.gmra.mrb[26].mxu1 %vm451_vm1, %v1726_v43 }
  0x51   : > { %1869 = vmatprep.mubr.f32.mxu1 %v9986_v8 }
  0x54   : > { %8665 = vmatmul.mubr.msk.f32.gmra.mrb[28].mxu1 %vm451_vm1, %v1727_v44 }
  0x55   : > { %1875 = vmatprep.mubr.f32.mxu1 %v9986_v8 }
  0x58   : > { %8666 = vmatmul.mubr.msk.f32.gmra.mrb[30].mxu1 %vm451_vm1, %v1728_v45 }
  0x59   : > { %4387 = vmatprep.mubr.f32.mxu1 %v9986_v8 }
  0x5c   : > { %8681 = vmatmul.mubr.msk.f32.vlgmr.msra.gmra.mrb[32].mxu1 %vm451_vm1, %v4275_v46 }
  0x5d   : > { %4393 = vmatprep.mubr.f32.mxu1 %v9986_v8 }
  0x60   : > { %8682 = vmatmul.mubr.msk.f32.gmra.mrb[34].mxu1 %vm451_vm1, %v4276_v47 }
  0x61   : > { %4399 = vmatprep.mubr.f32.mxu1 %v9986_v8 }
  0x64   : > { %8683 = vmatmul.mubr.msk.f32.gmra.mrb[36].mxu1 %vm451_vm1, %v4277_v48 }
  0x65   : > { %4405 = vmatprep.mubr.f32.mxu1 %v9986_v8 }
  0x68   : > { %8684 = vmatmul.mubr.msk.f32.gmra.mrb[38].mxu1 %vm451_vm1, %v4278_v49 }
  0x69   : > { %4411 = vmatprep.mubr.f32.mxu1 %v9986_v8 }
  0x6c   : > { %8685 = vmatmul.mubr.msk.f32.gmra.mrb[40].mxu1 %vm451_vm1, %v4279_v50 }
  0x6d   : > { %4417 = vmatprep.mubr.f32.mxu1 %v9986_v8 }
  0x70   : > { %8686 = vmatmul.mubr.msk.f32.gmra.mrb[42].mxu1 %vm451_vm1, %v4280_v51 }
  0x71   : > { %4423 = vmatprep.mubr.f32.mxu1 %v9986_v8 }
  0x74   : > { %8687 = vmatmul.mubr.msk.f32.gmra.mrb[44].mxu1 %vm451_vm1, %v4281_v52 }
  0x75   : > { %4429 = vmatprep.mubr.f32.mxu1 %v9986_v8  ;;  %v10302_v8 = vrot.slane %v8656_v1, %v10278_v62 }
  0x78   : > { %8688 = vmatmul.mubr.msk.f32.gmra.mrb[46].mxu1 %vm451_vm1, %v4282_v53  ;;  %vm8556_vm1 = vcmask 7168  }
  0xef   : > { %v549_v10 = vpop.f32.mrb[0].mxu1 }
  0xf0   : > { %v608_v14 = vmul.f32 %v10293_v5, %v549_v10  ;;  %v551_v15 = vpop.f32.mrb[1].mxu1 }
  0xf1   : > { %v609_v17 = vmul.f32 %v10296_v6, %v551_v15  ;;  %v3112_v18 = vpop.f32.mrb[0].mxu0 }
  0xf2   : > { %v637_v20 = vadd.f32 %v10302_v8, %v608_v14  ;;  %v3171_v21 = vmul.f32 %v10305_v9, %v3112_v18  ;;  %v3114_v22 = vpop.f32.mrb[1].mxu0 }
  0xf3   : > { %v638_v23 = vadd.f32 %v10308_v11, %v609_v17  ;;  %v555_v25 = vpop.f32.mrb[2].mxu1  ;;  %v3172_v26 = vmul.f32 %v10311_v13, %v3114_v22 }
  0xf4   : > { %v610_v27 = vmul.f32 %v10293_v5, %v555_v25  ;;  %v557_v28 = vpop.f32.mrb[3].mxu1  ;;  %v10330_v29 = vadd.f32 %v10315_v16, %v3171_v21 }
  0xf5   : > { %v669_v30 = vcombine.low %v637_v20, %v638_v23  ;;  %v670_v31 = vcombine.high %v637_v20, %v638_v23  ;;  %v611_v32 = vmul.f32 %v10296_v6, %v557_v28  ;;  %v10334_v33 = vadd.f32 %v10319_v19, %v3172_v26  ;;  %v10353_v51 = vpop.f32.mrb[2].mxu0 }
  0xf6   : > { %v639_v34 = vadd.f32 %v10302_v8, %v610_v27 }
  0xf7   : > { %v677_v35 = vrot.slane %v669_v30, %v10325_v24  ;;  %v684_v36 = vrot.slane %v670_v31, %v10325_v24  ;;  %v640_v37 = vadd.f32 %v10308_v11, %v611_v32  ;;  %v561_v38 = vpop.f32.mrb[4].mxu1 }
  0xf8   : > { %v612_v40 = vmul.f32 %v10293_v5, %v561_v38  ;;  %v563_v41 = vpop.f32.mrb[5].mxu1 }
  0xf9   : > { %v685_v43 = vcombine.high %v677_v35, %v677_v35  ;;  %v686_v44 = vcombine.high %v684_v36, %v684_v36  ;;  %v819_v45 = vrot.slane %v677_v35, %v10325_v24  ;;  %v835_v46 = vrot.slane %v684_v36, %v10325_v24 }
  0xfa   : > { %v687_v47 = vcombine.low %v639_v34, %v640_v37  ;;  %v688_v48 = vcombine.high %v639_v34, %v640_v37  ;;  %v10348_v49 = vadd.f32 %v10302_v8, %v612_v40  ;;  %v10351_v50 = vmul.f32 %v10296_v6, %v563_v41 }
  0xfb   : > { %v820_v52 = vcombine.high %v819_v45, %v819_v45  ;;  %v827_v53 = vrot.slane %v685_v43, %v10325_v24  ;;  %v836_v54 = vcombine.high %v835_v46, %v835_v46  ;;  %v843_v55 = vrot.slane %v686_v44, %v10325_v24  ;;  %v10357_v56 = vpop.f32.mrb[6].mxu1 }
  0xfc   : > { %v1134_v57 = vsel %vm1133_vm2, %v819_v45, -inf  ;;  %v1162_v58 = vsel %vm1133_vm2, %v835_v46, -inf  ;;  %v10362_v59 = vrot.slane %v687_v47, %v10325_v24  ;;  %v10365_v60 = vrot.slane %v688_v48, %v10325_v24  ;;  %v10367_v63 = vpop.f32.mrb[7].mxu1 }
  0xfd   : > { %v828_v1 = vcombine.high %v827_v53, %v827_v53  ;;  %v844_v2 = vcombine.high %v843_v55, %v843_v55  ;;  %v1135_v3 = vrot.slane %v1134_v57, 4  ;;  %v1141_v4 = vsel %vm1133_vm2, %v820_v52, -inf }
  0xfe   : > { %v1142_v7 = vrot.slane %v1141_v4, 4  ;;  %v1148_v10 = vsel %vm1133_vm2, %v827_v53, -inf  ;;  %v1163_v12 = vrot.slane %v1162_v58, 4  ;;  %v1169_v14 = vsel %vm1133_vm2, %v836_v54, -inf }
  0xff   : > { %v1136_v15 = vmax.f32 %v1134_v57, %v1135_v3  ;;  %v1149_v17 = vrot.slane %v1148_v10, 4  ;;  %v1155_v18 = vsel %vm1133_vm2, %v828_v1, -inf  ;;  %v1170_v20 = vrot.slane %v1169_v14, 4  ;;  %v10373_v21 = vpop.f32.mrb[8].mxu1 }
 0x100   : > { %v1143_v22 = vmax.f32 %v1141_v4, %v1142_v7  ;;  %v1156_v23 = vrot.slane %v1155_v18, 4  ;;  %v1164_v25 = vmax.f32 %v1162_v58, %v1163_v12  ;;  %v1176_v26 = vsel %vm1133_vm2, %v843_v55, -inf  ;;  %v10376_v27 = vpop.f32.mrb[9].mxu1 }
 0x101   : > { %v1137_v28 = vrot.slane %v1136_v15, 2  ;;  %v1150_v30 = vmax.f32 %v1148_v10, %v1149_v17  ;;  %v1171_v31 = vmax.f32 %v1169_v14, %v1170_v20  ;;  %v1177_v32 = vrot.slane %v1176_v26, 4 }
 0x102   : > { %v1144_v34 = vrot.slane %v1143_v22, 2  ;;  %v1157_v35 = vmax.f32 %v1155_v18, %v1156_v23  ;;  %v1165_v36 = vrot.slane %v1164_v25, 2  ;;  %v1183_v37 = vsel %vm1133_vm2, %v844_v2, -inf }
 0x103   : > { %v1138_v38 = vmax.f32 %v1136_v15, %v1137_v28  ;;  %v1151_v40 = vrot.slane %v1150_v30, 2  ;;  %v1172_v41 = vrot.slane %v1171_v31, 2  ;;  %v1178_v43 = vmax.f32 %v1176_v26, %v1177_v32  ;;  %v10379_v44 = vpop.f32.mrb[10].mxu1 }
 0x104   : > { %v1145_v45 = vmax.f32 %v1143_v22, %v1144_v34  ;;  %v1158_v46 = vrot.slane %v1157_v35, 2  ;;  %v1166_v47 = vmax.f32 %v1164_v25, %v1165_v36  ;;  %v1184_v48 = vrot.slane %v1183_v37, 4  ;;  %v10381_v52 = vpop.f32.mrb[11].mxu1 }
 0x105   : > { %v1139_v53 = vrot.slane %v1138_v38, 1  ;;  %v1152_v54 = vmax.f32 %v1150_v30, %v1151_v40  ;;  %v1173_v55 = vmax.f32 %v1171_v31, %v1172_v41  ;;  %v1179_v57 = vrot.slane %v1178_v43, 2 }
 0x106   : > { %v1146_v58 = vrot.slane %v1145_v45, 1  ;;  %v1159_v1 = vmax.f32 %v1157_v35, %v1158_v46  ;;  %v1167_v3 = vrot.slane %v1166_v47, 1  ;;  %v1185_v2 = vmax.f32 %v1183_v37, %v1184_v48 }
 0x107   : > { %v10383_v4 = vmax.f32 %v1138_v38, %v1139_v53  ;;  %v1153_v7 = vrot.slane %v1152_v54, 1  ;;  %v1174_v10 = vrot.slane %v1173_v55, 1  ;;  %v1180_v12 = vmax.f32 %v1178_v43, %v1179_v57  ;;  %v10385_v14 = vpop.f32.mrb[12].mxu1 }
 0x108   : > { %v10387_v15 = vmax.f32 %v1145_v45, %v1146_v58  ;;  %v1160_v17 = vrot.slane %v1159_v1, 1  ;;  %v10389_v18 = vmax.f32 %v1166_v47, %v1167_v3  ;;  %v1186_v20 = vrot.slane %v1185_v2, 2  ;;  %v10391_v22 = vpop.f32.mrb[13].mxu1 }
 0x109   : > { %v10393_v23 = vmax.f32 %v1152_v54, %v1153_v7  ;;  %v10395_v25 = vmax.f32 %v1173_v55, %v1174_v10  ;;  %v1181_v26 = vrot.slane %v1180_v12, 1  ;;  %v703_v28 = vcombine.high %v10362_v59, %v10362_v59 }
 0x10a   : > { %v10399_v30 = vmax.f32 %v1159_v1, %v1160_v17  ;;  %v1187_v31 = vmax.f32 %v1185_v2, %v1186_v20  ;;  %v704_v32 = vcombine.high %v10365_v60, %v10365_v60  ;;  %v851_v34 = vrot.slane %v10362_v59, %v10325_v24 }
 0x10b   : > { %v10405_v35 = vmax.f32 %v1180_v12, %v1181_v26  ;;  %v859_v36 = vrot.slane %v703_v28, %v10325_v24  ;;  %v867_v37 = vrot.slane %v10365_v60, %v10325_v24  ;;  %v10412_v38 = vadd.f32 %v10308_v11, %v10351_v50 }
 0x10c   : > { %v1188_v40 = vrot.slane %v1187_v31, 1  ;;  %v852_v41 = vcombine.high %v851_v34, %v851_v34  ;;  %v875_v43 = vrot.slane %v704_v32, %v10325_v24  ;;  %v1190_v45 = vsel %vm1133_vm2, %v851_v34, -inf }
 0x10d   : > { %v860_v46 = vcombine.high %v859_v36, %v859_v36  ;;  %v868_v47 = vcombine.high %v867_v37, %v867_v37  ;;  %v1191_v59 = vrot.slane %v1190_v45, 4  ;;  %v1204_v48 = vsel %vm1133_vm2, %v859_v36, -inf }
 0x10e   : > { %v10417_v53 = vmax.f32 %v1187_v31, %v1188_v40  ;;  %v876_v54 = vcombine.high %v875_v43, %v875_v43  ;;  %v1197_v60 = vsel %vm1133_vm2, %v852_v41, -inf  ;;  %v1205_v55 = vrot.slane %v1204_v48, 4 }
 0x10f   : > { %v1192_v57 = vmax.f32 %v1190_v45, %v1191_v59  ;;  %v1198_v50 = vrot.slane %v1197_v60, 4  ;;  %v1211_v58 = vsel %vm1133_vm2, %v860_v46, -inf  ;;  %v1218_v1 = vsel %vm1133_vm2, %v867_v37, -inf }
 0x110   : > { %v1206_v3 = vmax.f32 %v1204_v48, %v1205_v55  ;;  %v1212_v2 = vrot.slane %v1211_v58, 4  ;;  %v1219_v7 = vrot.slane %v1218_v1, 4  ;;  %v1225_v10 = vsel %vm1133_vm2, %v868_v47, -inf }
 0x111   : > { %v1193_v12 = vrot.slane %v1192_v57, 2  ;;  %v1199_v17 = vmax.f32 %v1197_v60, %v1198_v50  ;;  %v1226_v20 = vrot.slane %v1225_v10, 4  ;;  %v1232_v26 = vsel %vm1133_vm2, %v875_v43, -inf }
 0x112   : > { %v1207_v28 = vrot.slane %v1206_v3, 2  ;;  %v1213_v31 = vmax.f32 %v1211_v58, %v1212_v2  ;;  %v1220_v32 = vmax.f32 %v1218_v1, %v1219_v7  ;;  %v1233_v34 = vrot.slane %v1232_v26, 4  ;;  %v10425_v58 = vpop.f32.mrb[3].mxu0 }
 0x113   : > { %v1194_v36 = vmax.f32 %v1192_v57, %v1193_v12  ;;  %v1200_v40 = vrot.slane %v1199_v17, 2  ;;  %v1227_v41 = vmax.f32 %v1225_v10, %v1226_v20  ;;  %v1239_v45 = vsel %vm1133_vm2, %v876_v54, -inf  ;;  %14263 = vst [vmem:[#allocation11_spill] sm:$0xff] %v10425_v58  ;;  %v10431_v20 = vpop.f32.mrb[4].mxu0 }
 0x114   : > { %v1208_v37 = vmax.f32 %v1206_v3, %v1207_v28  ;;  %v1214_v46 = vrot.slane %v1213_v31, 2  ;;  %v1221_v59 = vrot.slane %v1220_v32, 2  ;;  %v1234_v48 = vmax.f32 %v1232_v26, %v1233_v34  ;;  %14264 = vst [vmem:[#allocation12_spill] sm:$0xff] %v10431_v20 }
 0x115   : > { %v1195_v55 = vrot.slane %v1194_v36, 1  ;;  %v1201_v47 = vmax.f32 %v1199_v17, %v1200_v40  ;;  %v1228_v42 = vrot.slane %v1227_v41, 2  ;;  %v1240_v60 = vrot.slane %v1239_v45, 4 }
 0x116   : > { %v1209_v50 = vrot.slane %v1208_v37, 1  ;;  %v1215_v39 = vmax.f32 %v1213_v31, %v1214_v46  ;;  %v1222_v43 = vmax.f32 %v1220_v32, %v1221_v59  ;;  %v1235_v0 = vrot.slane %v1234_v48, 2 }
 0x117   : > { %v10427_v1 = vmax.f32 %v1194_v36, %v1195_v55  ;;  %v1202_v57 = vrot.slane %v1201_v47, 1  ;;  %v1229_v2 = vmax.f32 %v1227_v41, %v1228_v42  ;;  %v1241_v7 = vmax.f32 %v1239_v45, %v1240_v60 }
 0x118   : > { %v10429_v54 = vmax.f32 %v1208_v37, %v1209_v50  ;;  %v1216_v3 = vrot.slane %v1215_v39, 1  ;;  %v1223_v10 = vrot.slane %v1222_v43, 1  ;;  %v1236_v12 = vmax.f32 %v1234_v48, %v1235_v0  ;;  %v10448_v37 = vpop.f32.mrb[5].mxu0 }
 0x119   : > { %v10433_v17 = vmax.f32 %v1201_v47, %v1202_v57  ;;  %v1230_v26 = vrot.slane %v1229_v2, 1  ;;  %v1242_v28 = vrot.slane %v1241_v7, 2  ;;  %v705_v31 = vcombine.low %v10348_v49, %v10412_v38  ;;  %14265 = vst [vmem:[#allocation13_spill] sm:$0xff] %v10448_v37 }
 0x11a   : > { %v10437_v32 = vmax.f32 %v1215_v39, %v1216_v3  ;;  %v10439_v34 = vmax.f32 %v1222_v43, %v1223_v10  ;;  %v1237_v42 = vrot.slane %v1236_v12, 1  ;;  %v706_v36 = vcombine.high %v10348_v49, %v10412_v38 }
 0x11b   : > { %v10443_v40 = vmax.f32 %v1229_v2, %v1230_v26  ;;  %v1243_v0 = vmax.f32 %v1241_v7, %v1242_v28  ;;  %v713_v41 = vrot.slane %v705_v31, %v10325_v24  ;;  %v614_v45 = vmul.f32 %v10293_v5, %v10357_v56  ;;  %v10474_v26 = vpop.f32.mrb[14].mxu1 }
 0x11c   : > { %v10450_v46 = vmax.f32 %v1236_v12, %v1237_v42  ;;  %v720_v39 = vrot.slane %v706_v36, %v10325_v24  ;;  %v615_v59 = vmul.f32 %v10296_v6, %v10367_v63  ;;  %v616_v49 = vmul.f32 %v10293_v5, %v10373_v21  ;;  %14266 = vst [vmem:[#allocation14_spill] sm:$0xff] %v10474_v26 }
 0x11d   : > { %v1244_v38 = vrot.slane %v1243_v0, 1  ;;  %v721_v48 = vcombine.high %v713_v41, %v713_v41  ;;  %v883_v55 = vrot.slane %v713_v41, %v10325_v24  ;;  %v10459_v47 = vadd.f32 %v10302_v8, %v614_v45 }
 0x11e   : > { %v722_v56 = vcombine.high %v720_v39, %v720_v39  ;;  %v899_v60 = vrot.slane %v720_v39, %v10325_v24  ;;  %v10463_v50 = vadd.f32 %v10308_v11, %v615_v59  ;;  %v10466_v43 = vadd.f32 %v10302_v8, %v616_v49 }
 0x11f   : > { %v10468_v63 = vmax.f32 %v1243_v0, %v1244_v38  ;;  %v884_v57 = vcombine.high %v883_v55, %v883_v55  ;;  %v891_v21 = vrot.slane %v721_v48, %v10325_v24  ;;  %v1246_v2 = vsel %vm1133_vm2, %v883_v55, -inf }
 0x120   : > { %v900_v7 = vcombine.high %v899_v60, %v899_v60  ;;  %v907_v3 = vrot.slane %v722_v56, %v10325_v24  ;;  %v1247_v10 = vrot.slane %v1246_v2, 4  ;;  %v1274_v12 = vsel %vm1133_vm2, %v899_v60, -inf }
 0x121   : > { %v892_v28 = vcombine.high %v891_v21, %v891_v21  ;;  %v1253_v31 = vsel %vm1133_vm2, %v884_v57, -inf  ;;  %v1260_v42 = vsel %vm1133_vm2, %v891_v21, -inf  ;;  %v1275_v36 = vrot.slane %v1274_v12, 4 }
 0x122   : > { %v908_v0 = vcombine.high %v907_v3, %v907_v3  ;;  %v1248_v41 = vmax.f32 %v1246_v2, %v1247_v10  ;;  %v1254_v45 = vrot.slane %v1253_v31, 4  ;;  %v1261_v39 = vrot.slane %v1260_v42, 4 }
 0x123   : > { %v1267_v59 = vsel %vm1133_vm2, %v892_v28, -inf  ;;  %v1276_v49 = vmax.f32 %v1274_v12, %v1275_v36  ;;  %v1281_v38 = vsel %vm1133_vm2, %v900_v7, -inf  ;;  %v1288_v48 = vsel %vm1133_vm2, %v907_v3, -inf }
 0x124   : > { %v1249_v55 = vrot.slane %v1248_v41, 2  ;;  %v1255_v56 = vmax.f32 %v1253_v31, %v1254_v45  ;;  %v1262_v60 = vmax.f32 %v1260_v42, %v1261_v39  ;;  %v1268_v62 = vrot.slane %v1267_v59, 4  ;;  %v10482_v42 = vpop.f32.mrb[15].mxu1 }
 0x125   : > { %v1277_v37 = vrot.slane %v1276_v49, 2  ;;  %v1282_v57 = vrot.slane %v1281_v38, 4  ;;  %v1289_v26 = vrot.slane %v1288_v48, 4  ;;  %v1295_v21 = vsel %vm1133_vm2, %v908_v0, -inf  ;;  %14267 = vst [vmem:[#allocation15_spill] sm:$0xff] %v10482_v42 }
 0x126   : > { %v1250_v20 = vmax.f32 %v1248_v41, %v1249_v55  ;;  %v1256_v2 = vrot.slane %v1255_v56, 2  ;;  %v1263_v10 = vrot.slane %v1262_v60, 2  ;;  %v1269_v19 = vmax.f32 %v1267_v59, %v1268_v62 }
 0x127   : > { %v1278_v13 = vmax.f32 %v1276_v49, %v1277_v37  ;;  %v1283_v28 = vmax.f32 %v1281_v38, %v1282_v57  ;;  %v1290_v12 = vmax.f32 %v1288_v48, %v1289_v26  ;;  %v1296_v36 = vrot.slane %v1295_v21, 4 }
 0x128   : > { %v1251_v7 = vrot.slane %v1250_v20, 1  ;;  %v1257_v3 = vmax.f32 %v1255_v56, %v1256_v2  ;;  %v1264_v58 = vmax.f32 %v1262_v60, %v1263_v10  ;;  %v1270_v31 = vrot.slane %v1269_v19, 2 }
 0x129   : > { %v1279_v45 = vrot.slane %v1278_v13, 1  ;;  %v1284_v39 = vrot.slane %v1283_v28, 2  ;;  %v1291_v16 = vrot.slane %v1290_v12, 2  ;;  %v1297_v0 = vmax.f32 %v1295_v21, %v1296_v36 }
 0x12a   : > { %v1252_v41 = vmax.f32 %v1250_v20, %v1251_v7  ;;  %v1258_v55 = vrot.slane %v1257_v3, 1  ;;  %v1265_v61 = vrot.slane %v1264_v58, 1  ;;  %v1271_v62 = vmax.f32 %v1269_v19, %v1270_v31 }
 0x12b   : > { %v1280_v37 = vmax.f32 %v1278_v13, %v1279_v45  ;;  %v1285_v26 = vmax.f32 %v1283_v28, %v1284_v39  ;;  %v1292_v59 = vmax.f32 %v1290_v12, %v1291_v16  ;;  %v1298_v49 = vrot.slane %v1297_v0, 2 }
 0x12c   : > { %v1259_v38 = vmax.f32 %v1257_v3, %v1258_v55  ;;  %v1266_v48 = vmax.f32 %v1264_v58, %v1265_v61  ;;  %v1272_v56 = vrot.slane %v1271_v62, 1  ;;  %v1582_v60 = vmax.f32 %v10383_v4, %v1252_v41 }
 0x12d   : > { %v1286_v57 = vrot.slane %v1285_v26, 1  ;;  %v1293_v2 = vrot.slane %v1292_v59, 1  ;;  %v1299_v10 = vmax.f32 %v1297_v0, %v1298_v49  ;;  %v1586_v42 = vmax.f32 %v10389_v18, %v1280_v37 }
 0x12e   : > { %v1273_v21 = vmax.f32 %v1271_v62, %v1272_v56  ;;  %v1583_v20 = vmax.f32 %v10387_v15, %v1259_v38  ;;  %v1584_v19 = vmax.f32 %v10393_v23, %v1266_v48  ;;  %v1614_v36 = vmax.f32 %v1582_v60, 0.0 }
 0x12f   : > { %v1287_v13 = vmax.f32 %v1285_v26, %v1286_v57  ;;  %v1294_v28 = vmax.f32 %v1292_v59, %v1293_v2  ;;  %v1300_v16 = vrot.slane %v1299_v10, 1  ;;  %v1618_v12 = vmax.f32 %v1586_v42, 0.0 }
 0x130   : > { %v1585_v61 = vmax.f32 %v10399_v30, %v1273_v21  ;;  %v1615_v58 = vmax.f32 %v1583_v20, 0.0  ;;  %v1616_v7 = vmax.f32 %v1584_v19, 0.0  ;;  %v723_v4 = vcombine.low %v10459_v47, %v10463_v50 }
 0x131   : > { %v1301_v3 = vmax.f32 %v1299_v10, %v1300_v16  ;;  %v1587_v18 = vmax.f32 %v10395_v25, %v1287_v13  ;;  %v1588_v31 = vmax.f32 %v10405_v35, %v1294_v28  ;;  %v724_v15 = vcombine.high %v10459_v47, %v10463_v50 }
 0x132   : > { %v1617_v23 = vmax.f32 %v1585_v61, 0.0  ;;  %v1679_v45 = vsel %vm1678_vm3, %v1616_v7, %v1614_v36  ;;  %v731_v42 = vrot.slane %v723_v4, %v10325_v24  ;;  %v617_v30 = vmul.f32 %v10296_v6, %v10376_v27 }
 0x133   : > { %v1589_v39 = vmax.f32 %v10417_v53, %v1301_v3  ;;  %v1619_v0 = vmax.f32 %v1587_v18, 0.0  ;;  %v1620_v41 = vmax.f32 %v1588_v31, 0.0  ;;  %v1681_v55 = vsel %vm1680_vm4, %v1618_v12, %v1679_v45 }
 0x134   : > { %v1692_v25 = vsel %vm1678_vm3, %v1617_v23, %v1615_v58  ;;  %v738_v35 = vrot.slane %v724_v15, %v10325_v24  ;;  %v739_v62 = vcombine.high %v731_v42, %v731_v42  ;;  %v915_v47 = vrot.slane %v731_v42, %v10325_v24 }
 0x135   : > { %v1621_v50 = vmax.f32 %v1589_v39, 0.0  ;;  %v10505_v37 = vsel %vm1682_vm5, %v1620_v41, %v1681_v55  ;;  %v1693_v26 = vsel %vm1680_vm4, %v1619_v0, %v1692_v25  ;;  %v10509_v27 = vadd.f32 %v10308_v11, %v617_v30 }
 0x136   : > { %v740_v53 = vcombine.high %v738_v35, %v738_v35  ;;  %v916_v59 = vcombine.high %v915_v47, %v915_v47  ;;  %v923_v49 = vrot.slane %v739_v62, %v10325_v24  ;;  %v931_v38 = vrot.slane %v738_v35, %v10325_v24  ;;  %v10532_v62 = vpop.f32.mrb[6].mxu0 }
 0x137   : > { %v10514_v48 = vsel %vm1682_vm5, %v1621_v50, %v1693_v26  ;;  %v1302_v56 = vsel %vm1133_vm2, %v915_v47, -inf  ;;  %v741_v60 = vcombine.low %v10466_v43, %v10509_v27  ;;  %v742_v57 = vcombine.high %v10466_v43, %v10509_v27 }
 0x138   : > { %v924_v2 = vcombine.high %v923_v49, %v923_v49  ;;  %v932_v10 = vcombine.high %v931_v38, %v931_v38  ;;  %v939_v21 = vrot.slane %v740_v53, %v10325_v24  ;;  %v1303_v20 = vrot.slane %v1302_v56, 4 }
 0x139   : > { %v1309_v19 = vsel %vm1133_vm2, %v916_v59, -inf  ;;  %v1316_v36 = vsel %vm1133_vm2, %v923_v49, -inf  ;;  %v1330_v13 = vsel %vm1133_vm2, %v931_v38, -inf  ;;  %v10526_v28 = vrot.slane %v741_v60, %v10325_v24  ;;  %v10534_v59 = vpop.f32.mrb[7].mxu0 }
 0x13a   : > { %v940_v16 = vcombine.high %v939_v21, %v939_v21  ;;  %v1304_v12 = vmax.f32 %v1302_v56, %v1303_v20  ;;  %v1310_v61 = vrot.slane %v1309_v19, 4  ;;  %v1317_v58 = vrot.slane %v1316_v36, 4 }
 0x13b   : > { %v1323_v7 = vsel %vm1133_vm2, %v924_v2, -inf  ;;  %v1331_v4 = vrot.slane %v1330_v13, 4  ;;  %v1337_v3 = vsel %vm1133_vm2, %v932_v10, -inf  ;;  %v1344_v18 = vsel %vm1133_vm2, %v939_v21, -inf }
 0x13c   : > { %v1305_v31 = vrot.slane %v1304_v12, 2  ;;  %v1311_v15 = vmax.f32 %v1309_v19, %v1310_v61  ;;  %v1318_v23 = vmax.f32 %v1316_v36, %v1317_v58  ;;  %v1324_v45 = vrot.slane %v1323_v7, 4 }
 0x13d   : > { %v1332_v42 = vmax.f32 %v1330_v13, %v1331_v4  ;;  %v1338_v30 = vrot.slane %v1337_v3, 4  ;;  %v1345_v39 = vrot.slane %v1344_v18, 4  ;;  %v1351_v0 = vsel %vm1133_vm2, %v940_v16, -inf }
 0x13e   : > { %v1306_v41 = vmax.f32 %v1304_v12, %v1305_v31  ;;  %v1312_v55 = vrot.slane %v1311_v15, 2  ;;  %v1319_v25 = vrot.slane %v1318_v23, 2  ;;  %v1325_v35 = vmax.f32 %v1323_v7, %v1324_v45 }
 0x13f   : > { %v1333_v47 = vrot.slane %v1332_v42, 2  ;;  %v1339_v50 = vmax.f32 %v1337_v3, %v1338_v30  ;;  %v1346_v26 = vmax.f32 %v1344_v18, %v1345_v39  ;;  %v1352_v53 = vrot.slane %v1351_v0, 4 }
 0x140   : > { %v1307_v49 = vrot.slane %v1306_v41, 1  ;;  %v1313_v38 = vmax.f32 %v1311_v15, %v1312_v55  ;;  %v1320_v56 = vmax.f32 %v1318_v23, %v1319_v25  ;;  %v1326_v60 = vrot.slane %v1325_v35, 2 }
 0x141   : > { %v1334_v2 = vmax.f32 %v1332_v42, %v1333_v47  ;;  %v1340_v10 = vrot.slane %v1339_v50, 2  ;;  %v1347_v21 = vrot.slane %v1346_v26, 2  ;;  %v1353_v20 = vmax.f32 %v1351_v0, %v1352_v53 }
 0x142   : > { %v1308_v19 = vmax.f32 %v1306_v41, %v1307_v49  ;;  %v1314_v36 = vrot.slane %v1313_v38, 1  ;;  %v1321_v13 = vrot.slane %v1320_v56, 1  ;;  %v1327_v16 = vmax.f32 %v1325_v35, %v1326_v60 }
 0x143   : > { %v1335_v12 = vrot.slane %v1334_v2, 1  ;;  %v1341_v61 = vmax.f32 %v1339_v50, %v1340_v10  ;;  %v1348_v58 = vmax.f32 %v1346_v26, %v1347_v21  ;;  %v1354_v7 = vrot.slane %v1353_v20, 2 }
 0x144   : > { %v1315_v4 = vmax.f32 %v1313_v38, %v1314_v36  ;;  %v1322_v3 = vmax.f32 %v1320_v56, %v1321_v13  ;;  %v1328_v18 = vrot.slane %v1327_v16, 1  ;;  %v1590_v31 = vmax.f32 %v10427_v1, %v1308_v19 }
 0x145   : > { %v1336_v15 = vmax.f32 %v1334_v2, %v1335_v12  ;;  %v1342_v23 = vrot.slane %v1341_v61, 1  ;;  %v1349_v45 = vrot.slane %v1348_v58, 1  ;;  %v1355_v42 = vmax.f32 %v1353_v20, %v1354_v7 }
 0x146   : > { %v1329_v30 = vmax.f32 %v1327_v16, %v1328_v18  ;;  %v1591_v39 = vmax.f32 %v10433_v17, %v1315_v4  ;;  %v1592_v0 = vmax.f32 %v10429_v54, %v1322_v3  ;;  %v1622_v41 = vmax.f32 %v1590_v31, 0.0 }
 0x147   : > { %v1343_v55 = vmax.f32 %v1341_v61, %v1342_v23  ;;  %v1350_v25 = vmax.f32 %v1348_v58, %v1349_v45  ;;  %v1356_v35 = vrot.slane %v1355_v42, 1  ;;  %v1594_v47 = vmax.f32 %v10439_v34, %v1336_v15 }
 0x148   : > { %v1593_v50 = vmax.f32 %v10437_v32, %v1329_v30  ;;  %v1623_v26 = vmax.f32 %v1591_v39, 0.0  ;;  %v1624_v53 = vmax.f32 %v1592_v0, 0.0  ;;  %v1685_v1 = vsel %vm1684_vm6, %v1622_v41, %v10505_v37 }
 0x149   : > { %v1357_v49 = vmax.f32 %v1355_v42, %v1356_v35  ;;  %v1595_v38 = vmax.f32 %v10443_v40, %v1343_v55  ;;  %v1596_v17 = vmax.f32 %v10450_v46, %v1350_v25  ;;  %v1626_v56 = vmax.f32 %v1594_v47, 0.0 }
 0x14a   : > { %v1625_v54 = vmax.f32 %v1593_v50, 0.0  ;;  %v1687_v60 = vsel %vm1686_vm7, %v1624_v53, %v1685_v1  ;;  %v1695_v2 = vsel %vm1684_vm6, %v1623_v26, %v10514_v48  ;;  %v756_v32 = vrot.slane %v742_v57, %v10325_v24 }
 0x14b   : > { %v1597_v34 = vmax.f32 %v10468_v63, %v1357_v49  ;;  %v1627_v37 = vmax.f32 %v1595_v38, 0.0  ;;  %v1628_v10 = vmax.f32 %v1596_v17, 0.0  ;;  %v1689_v40 = vsel %vm1688_vm8, %v1626_v56, %v1687_v60 }
 0x14c   : > { %v1696_v46 = vsel %vm1686_vm7, %v1625_v54, %v1695_v2  ;;  %v757_v21 = vcombine.high %v10526_v28, %v10526_v28  ;;  %v758_v20 = vcombine.high %v756_v32, %v756_v32  ;;  %v947_v48 = vrot.slane %v10526_v28, %v10325_v24 }
 0x14d   : > { %v1629_v19 = vmax.f32 %v1597_v34, 0.0  ;;  %v1691_v36 = vsel %vm1690_vm9, %v1628_v10, %v1689_v40  ;;  %v1697_v43 = vsel %vm1688_vm8, %v1627_v37, %v1696_v46  ;;  %v963_v63 = vrot.slane %v756_v32, %v10325_v24 }
 0x14e   : > { %1717 = vst [vmem:[#allocation2 + $0x20] sm:$0xff] %v1691_v36  ;;  %v948_v27 = vcombine.high %v947_v48, %v947_v48  ;;  %v955_v57 = vrot.slane %v757_v21, %v10325_v24  ;;  %v971_v13 = vrot.slane %v758_v20, %v10325_v24  ;;  %v1358_v16 = vsel %vm1133_vm2, %v947_v48, -inf }
 0x14f   : > { %v1698_v12 = vsel %vm1690_vm9, %v1629_v19, %v1697_v43  ;;  %v964_v61 = vcombine.high %v963_v63, %v963_v63  ;;  %v1359_v58 = vrot.slane %v1358_v16, 4  ;;  %v1386_v28 = vsel %vm1133_vm2, %v963_v63, -inf }
 0x150   : > { %1718 = vst [vmem:[#allocation2 + $0x28] sm:$0xff] %v1698_v12  ;;  %v956_v7 = vcombine.high %v955_v57, %v955_v57  ;;  %v972_v4 = vcombine.high %v971_v13, %v971_v13  ;;  %v1365_v3 = vsel %vm1133_vm2, %v948_v27, -inf  ;;  %v1372_v18 = vsel %vm1133_vm2, %v955_v57, -inf }
 0x151   : > { %v1360_v31 = vmax.f32 %v1358_v16, %v1359_v58  ;;  %v1366_v15 = vrot.slane %v1365_v3, 4  ;;  %v1373_v23 = vrot.slane %v1372_v18, 4  ;;  %v1387_v45 = vrot.slane %v1386_v28, 4 }
 0x152   : > { %v1379_v42 = vsel %vm1133_vm2, %v956_v7, -inf  ;;  %v1393_v30 = vsel %vm1133_vm2, %v964_v61, -inf  ;;  %v1400_v39 = vsel %vm1133_vm2, %v971_v13, -inf  ;;  %v1407_v0 = vsel %vm1133_vm2, %v972_v4, -inf }
 0x153   : > { %v1361_v41 = vrot.slane %v1360_v31, 2  ;;  %v1367_v55 = vmax.f32 %v1365_v3, %v1366_v15  ;;  %v1374_v25 = vmax.f32 %v1372_v18, %v1373_v23  ;;  %v1380_v35 = vrot.slane %v1379_v42, 4  ;;  %v10586_v15 = vpop.f32.mrb[8].mxu0 }
 0x154   : > { %v1388_v47 = vmax.f32 %v1386_v28, %v1387_v45  ;;  %v1394_v50 = vrot.slane %v1393_v30, 4  ;;  %v1401_v26 = vrot.slane %v1400_v39, 4  ;;  %v1408_v53 = vrot.slane %v1407_v0, 4  ;;  %14268 = vst [vmem:[#allocation16_spill] sm:$0xff] %v10586_v15 }
 0x155   : > { %v1362_v1 = vmax.f32 %v1360_v31, %v1361_v41  ;;  %v1368_v49 = vrot.slane %v1367_v55, 2  ;;  %v1375_v38 = vrot.slane %v1374_v25, 2  ;;  %v1381_v17 = vmax.f32 %v1379_v42, %v1380_v35 }
 0x156   : > { %v1389_v56 = vrot.slane %v1388_v47, 2  ;;  %v1395_v54 = vmax.f32 %v1393_v30, %v1394_v50  ;;  %v1402_v60 = vmax.f32 %v1400_v39, %v1401_v26  ;;  %v1409_v2 = vmax.f32 %v1407_v0, %v1408_v53 }
 0x157   : > { %v1369_v32 = vmax.f32 %v1367_v55, %v1368_v49  ;;  %v1376_v34 = vmax.f32 %v1374_v25, %v1375_v38  ;;  %v1382_v37 = vrot.slane %v1381_v17, 2  ;;  %v1363_v20 = vrot.slane %v1362_v1, 1 }
 0x158   : > { %v1390_v10 = vmax.f32 %v1388_v47, %v1389_v56  ;;  %v1396_v40 = vrot.slane %v1395_v54, 2  ;;  %v1403_v46 = vrot.slane %v1402_v60, 2  ;;  %v1410_v21 = vrot.slane %v1409_v2, 2 }
 0x159   : > { %v1370_v48 = vrot.slane %v1369_v32, 1  ;;  %v1377_v19 = vrot.slane %v1376_v34, 1  ;;  %v1383_v36 = vmax.f32 %v1381_v17, %v1382_v37  ;;  %v618_v16 = vmul.f32 %v10293_v5, %v10379_v44 }
 0x15a   : > { %v1391_v43 = vrot.slane %v1390_v10, 1  ;;  %v1397_v63 = vmax.f32 %v1395_v54, %v1396_v40  ;;  %v1404_v27 = vmax.f32 %v1402_v60, %v1403_v46  ;;  %v1411_v57 = vmax.f32 %v1409_v2, %v1410_v21  ;;  %v10635_v2 = vpop.f32.mrb[16].mxu1 }
 0x15b   : > { %v1384_v13 = vrot.slane %v1383_v36, 1  ;;  %v647_v28 = vadd.f32 %v10302_v8, %v618_v16  ;;  %v619_v7 = vmul.f32 %v10296_v6, %v10381_v52  ;;  %v10578_v4 = vmax.f32 %v1362_v1, %v1363_v20  ;;  %v10595_v52 = vpop.f32.mrb[9].mxu0  ;;  %14272 = vst [vmem:[#allocation18_spill] sm:$0xff] %v10635_v2 }
 0x15c   : > { %v1398_v12 = vrot.slane %v1397_v63, 1  ;;  %v1405_v61 = vrot.slane %v1404_v27, 1  ;;  %v1412_v58 = vrot.slane %v1411_v57, 1  ;;  %v10580_v3 = vmax.f32 %v1369_v32, %v1370_v48  ;;  %14269 = vst [vmem:[#allocation17_spill] sm:$0xff] %v10595_v52 }
 0x15d   : > { %v10582_v18 = vmax.f32 %v1376_v34, %v1377_v19  ;;  %v10584_v31 = vmax.f32 %v1390_v10, %v1391_v43  ;;  %v10588_v23 = vmax.f32 %v1383_v36, %v1384_v13  ;;  %v648_v45 = vadd.f32 %v10308_v11, %v619_v7 }
 0x15e   : > { %v10590_v44 = vmax.f32 %v1397_v63, %v1398_v12  ;;  %v620_v42 = vmul.f32 %v10293_v5, %v10385_v14  ;;  %v10597_v30 = vmax.f32 %v1404_v27, %v1405_v61  ;;  %v14270_v39 = vcombine.low %v10330_v29, %v10334_v33 }
 0x15f   : > { %v14271_v41 = vcombine.high %v10330_v29, %v10334_v33  ;;  %v621_v25 = vmul.f32 %v10296_v6, %v10391_v22  ;;  %v10609_v35 = vmax.f32 %v1411_v57, %v1412_v58  ;;  %v759_v14 = vcombine.low %v647_v28, %v648_v45 }
 0x160   : > { %v3239_v0 = vrot.slane %v14270_v39, %v10325_v24  ;;  %v760_v47 = vcombine.high %v647_v28, %v648_v45  ;;  %v10612_v50 = vadd.f32 %v10302_v8, %v620_v42  ;;  %v10625_v38 = vmul.f32 %v10305_v9, %v10353_v51 }
 0x161   : > { %v3246_v55 = vrot.slane %v14271_v41, %v10325_v24  ;;  %v767_v29 = vrot.slane %v759_v14, %v10325_v24  ;;  %v10621_v22 = vadd.f32 %v10308_v11, %v621_v25 }
 0x162   : > { %v3247_v26 = vcombine.high %v3239_v0, %v3239_v0  ;;  %v3381_v1 = vrot.slane %v3239_v0, %v10325_v24  ;;  %v774_v33 = vrot.slane %v760_v47, %v10325_v24 }
 0x163   : > { %v3248_v53 = vcombine.high %v3246_v55, %v3246_v55  ;;  %v10616_v49 = vrot.slane %v3246_v55, %v10325_v24  ;;  %v775_v32 = vcombine.high %v767_v29, %v767_v29  ;;  %v979_v37 = vrot.slane %v767_v29, %v10325_v24 }
 0x164   : > { %v3382_v17 = vcombine.high %v3381_v1, %v3381_v1  ;;  %v10628_v56 = vrot.slane %v3247_v26, %v10325_v24  ;;  %v776_v34 = vcombine.high %v774_v33, %v774_v33  ;;  %v995_v10 = vrot.slane %v774_v33, %v10325_v24 }
 0x165   : > { %v3398_v54 = vcombine.high %v10616_v49, %v10616_v49  ;;  %v10633_v60 = vrot.slane %v3248_v53, %v10325_v24  ;;  %v3695_v46 = vsel %vm1133_vm2, %v3381_v1, -inf  ;;  %v980_v20 = vcombine.high %v979_v37, %v979_v37 }
 0x166   : > { %v3390_v51 = vcombine.high %v10628_v56, %v10628_v56  ;;  %v10645_v21 = vsel %vm1133_vm2, %v3382_v17, -inf  ;;  %v987_v48 = vrot.slane %v775_v32, %v10325_v24  ;;  %v996_v19 = vcombine.high %v995_v10, %v995_v10 }
 0x167   : > { %v3406_v40 = vcombine.high %v10633_v60, %v10633_v60  ;;  %v1003_v36 = vrot.slane %v776_v34, %v10325_v24  ;;  %v1414_v43 = vsel %vm1133_vm2, %v979_v37, -inf  ;;  %v1442_v63 = vsel %vm1133_vm2, %v995_v10, -inf }
 0x168   : > { %v3696_v27 = vrot.slane %v3695_v46, 4  ;;  %v3703_v57 = vrot.slane %v10645_v21, 4  ;;  %v988_v13 = vcombine.high %v987_v48, %v987_v48  ;;  %v1415_v12 = vrot.slane %v1414_v43, 4 }
 0x169   : > { %v1004_v16 = vcombine.high %v1003_v36, %v1003_v36  ;;  %v1421_v61 = vsel %vm1133_vm2, %v980_v20, -inf  ;;  %v1428_v28 = vsel %vm1133_vm2, %v987_v48, -inf  ;;  %v1443_v7 = vrot.slane %v1442_v63, 4 }
 0x16a   : > { %v1422_v58 = vrot.slane %v1421_v61, 4  ;;  %v1449_v45 = vsel %vm1133_vm2, %v996_v19, -inf  ;;  %v1416_v42 = vmax.f32 %v1414_v43, %v1415_v12  ;;  %v1429_v39 = vrot.slane %v1428_v28, 4 }
 0x16b   : > { %v1435_v0 = vsel %vm1133_vm2, %v988_v13, -inf  ;;  %v1450_v41 = vrot.slane %v1449_v45, 4  ;;  %v1444_v14 = vmax.f32 %v1442_v63, %v1443_v7  ;;  %v1456_v47 = vsel %vm1133_vm2, %v1003_v36, -inf }
 0x16c   : > { %v1423_v55 = vmax.f32 %v1421_v61, %v1422_v58  ;;  %v1436_v25 = vrot.slane %v1435_v0, 4  ;;  %v1417_v26 = vrot.slane %v1416_v42, 2  ;;  %v1430_v53 = vmax.f32 %v1428_v28, %v1429_v39 }
 0x16d   : > { %v1451_v1 = vmax.f32 %v1449_v45, %v1450_v41  ;;  %v1457_v29 = vrot.slane %v1456_v47, 4  ;;  %v1445_v32 = vrot.slane %v1444_v14, 2  ;;  %v1463_v34 = vsel %vm1133_vm2, %v1004_v16, -inf }
 0x16e   : > { %v1424_v33 = vrot.slane %v1423_v55, 2  ;;  %v1437_v17 = vmax.f32 %v1435_v0, %v1436_v25  ;;  %v1418_v37 = vmax.f32 %v1416_v42, %v1417_v26  ;;  %v1431_v10 = vrot.slane %v1430_v53, 2 }
 0x16f   : > { %v1452_v20 = vrot.slane %v1451_v1, 2  ;;  %v1458_v48 = vmax.f32 %v1456_v47, %v1457_v29  ;;  %v1446_v13 = vmax.f32 %v1444_v14, %v1445_v32  ;;  %v1464_v12 = vrot.slane %v1463_v34, 4 }
 0x170   : > { %v1425_v19 = vmax.f32 %v1423_v55, %v1424_v33  ;;  %v1438_v43 = vrot.slane %v1437_v17, 2  ;;  %v1419_v63 = vrot.slane %v1418_v37, 1  ;;  %v1432_v61 = vmax.f32 %v1430_v53, %v1431_v10 }
 0x171   : > { %v1453_v36 = vmax.f32 %v1451_v1, %v1452_v20  ;;  %v1459_v58 = vrot.slane %v1458_v48, 2  ;;  %v1447_v45 = vrot.slane %v1446_v13, 1  ;;  %v1465_v39 = vmax.f32 %v1463_v34, %v1464_v12 }
 0x172   : > { %v1426_v28 = vrot.slane %v1425_v19, 1  ;;  %v1439_v7 = vmax.f32 %v1437_v17, %v1438_v43  ;;  %v10658_v0 = vmax.f32 %v1418_v37, %v1419_v63  ;;  %v1433_v41 = vrot.slane %v1432_v61, 1  ;;  %v10673_v37 = vpop.f32.mrb[17].mxu1 }
 0x173   : > { %v1454_v16 = vrot.slane %v1453_v36, 1  ;;  %v1460_v42 = vmax.f32 %v1458_v48, %v1459_v58  ;;  %v10662_v55 = vmax.f32 %v1446_v13, %v1447_v45  ;;  %v1466_v14 = vrot.slane %v1465_v39, 2  ;;  %14273 = vst [vmem:[#allocation19_spill] sm:$0xff] %v10673_v37 }
 0x174   : > { %v10660_v25 = vmax.f32 %v1425_v19, %v1426_v28  ;;  %v1440_v47 = vrot.slane %v1439_v7, 1  ;;  %v10664_v26 = vmax.f32 %v1432_v61, %v1433_v41  ;;  %v3697_v29 = vmax.f32 %v3695_v46, %v3696_v27 }
 0x175   : > { %v10666_v53 = vmax.f32 %v1453_v36, %v1454_v16  ;;  %v1461_v1 = vrot.slane %v1460_v42, 1  ;;  %v1467_v17 = vmax.f32 %v1465_v39, %v1466_v14  ;;  %v3704_v32 = vmax.f32 %v10645_v21, %v3703_v57 }
 0x176   : > { %v10668_v33 = vmax.f32 %v1439_v7, %v1440_v47  ;;  %v3709_v34 = vsel %vm1133_vm2, %v10628_v56, -inf  ;;  %v3698_v20 = vrot.slane %v3697_v29, 2  ;;  %v3716_v19 = vsel %vm1133_vm2, %v3390_v51, -inf }
 0x177   : > { %v10675_v10 = vmax.f32 %v1460_v42, %v1461_v1  ;;  %v3710_v48 = vrot.slane %v3709_v34, 4  ;;  %v1468_v46 = vrot.slane %v1467_v17, 1  ;;  %v3705_v27 = vrot.slane %v3704_v32, 2 }
 0x178   : > { %v3717_v43 = vrot.slane %v3716_v19, 4  ;;  %v3723_v21 = vsel %vm1133_vm2, %v10616_v49, -inf  ;;  %v3699_v57 = vmax.f32 %v3697_v29, %v3698_v20  ;;  %v3730_v63 = vsel %vm1133_vm2, %v3398_v54, -inf }
 0x179   : > { %v3711_v13 = vmax.f32 %v3709_v34, %v3710_v48  ;;  %v3724_v12 = vrot.slane %v3723_v21, 4  ;;  %v10687_v61 = vmax.f32 %v1467_v17, %v1468_v46  ;;  %v3706_v36 = vmax.f32 %v3704_v32, %v3705_v27 }
 0x17a   : > { %v3718_v56 = vmax.f32 %v3716_v19, %v3717_v43  ;;  %v3731_v58 = vrot.slane %v3730_v63, 4  ;;  %v3700_v51 = vrot.slane %v3699_v57, 1  ;;  %v3737_v45 = vsel %vm1133_vm2, %v10633_v60, -inf }
 0x17b   : > { %14274 = vst [vmem:[#allocation20_spill] sm:$0xff] %v10687_v61  ;;  %v3712_v28 = vrot.slane %v3711_v13, 2  ;;  %v3725_v7 = vmax.f32 %v3723_v21, %v3724_v12  ;;  %v3707_v39 = vrot.slane %v3706_v36, 1  ;;  %v3738_v42 = vrot.slane %v3737_v45, 4  ;;  %v14277_v61 = vld [vmem:[#allocation4_spill] sm:$0xff] }
 0x17c   : > { %v3719_v41 = vrot.slane %v3718_v56, 2  ;;  %v3732_v16 = vmax.f32 %v3730_v63, %v3731_v58  ;;  %v10691_v47 = vmax.f32 %v3699_v57, %v3700_v51  ;;  %v3744_v54 = vsel %vm1133_vm2, %v3406_v40, -inf }
 0x17d   : > { %v3713_v49 = vmax.f32 %v3711_v13, %v3712_v28  ;;  %v3726_v14 = vrot.slane %v3725_v7, 2  ;;  %v10697_v1 = vmax.f32 %v3706_v36, %v3707_v39  ;;  %v3739_v32 = vmax.f32 %v3737_v45, %v3738_v42  ;;  %v10712_v45 = vpop.f32.mrb[10].mxu0 }
 0x17e   : > { %v3720_v29 = vmax.f32 %v3718_v56, %v3719_v41  ;;  %v3733_v17 = vrot.slane %v3732_v16, 2  ;;  %v3745_v48 = vrot.slane %v3744_v54, 4  ;;  %v777_v19 = vcombine.low %v10612_v50, %v10621_v22  ;;  %14275 = vst [vmem:[#allocation21_spill] sm:$0xff] %v10712_v45 }
 0x17f   : > { %v3714_v34 = vrot.slane %v3713_v49, 1  ;;  %v3727_v20 = vmax.f32 %v3725_v7, %v3726_v14  ;;  %v3740_v43 = vrot.slane %v3739_v32, 2  ;;  %v778_v21 = vcombine.high %v10612_v50, %v10621_v22 }
 0x180   : > { %v3721_v46 = vrot.slane %v3720_v29, 1  ;;  %v3734_v27 = vmax.f32 %v3732_v16, %v3733_v17  ;;  %v3746_v57 = vmax.f32 %v3744_v54, %v3745_v48  ;;  %v785_v13 = vrot.slane %v777_v19, %v10325_v24 }
 0x181   : > { %v10703_v60 = vmax.f32 %v3713_v49, %v3714_v34  ;;  %v3728_v40 = vrot.slane %v3727_v20, 1  ;;  %v3741_v36 = vmax.f32 %v3739_v32, %v3740_v43  ;;  %v792_v56 = vrot.slane %v778_v21, %v10325_v24 }
 0x182   : > { %v10706_v12 = vmax.f32 %v3720_v29, %v3721_v46  ;;  %v3735_v63 = vrot.slane %v3734_v27, 1  ;;  %v3747_v51 = vrot.slane %v3746_v57, 2  ;;  %v793_v28 = vcombine.high %v785_v13, %v785_v13 }
 0x183   : > { %v10709_v58 = vmax.f32 %v3727_v20, %v3728_v40  ;;  %v1011_v7 = vrot.slane %v785_v13, %v10325_v24  ;;  %v3742_v22 = vrot.slane %v3741_v36, 1  ;;  %v794_v39 = vcombine.high %v792_v56, %v792_v56 }
 0x184   : > { %v10714_v50 = vmax.f32 %v3734_v27, %v3735_v63  ;;  %v1027_v41 = vrot.slane %v792_v56, %v10325_v24  ;;  %v3748_v16 = vmax.f32 %v3746_v57, %v3747_v51  ;;  %v1019_v49 = vrot.slane %v793_v28, %v10325_v24 }
 0x185   : > { %v1012_v42 = vcombine.high %v1011_v7, %v1011_v7  ;;  %v1470_v14 = vsel %vm1133_vm2, %v1011_v7, -inf  ;;  %v10719_v54 = vmax.f32 %v3741_v36, %v3742_v22  ;;  %v1035_v17 = vrot.slane %v794_v39, %v10325_v24 }
 0x186   : > { %v1028_v29 = vcombine.high %v1027_v41, %v1027_v41  ;;  %v1471_v32 = vrot.slane %v1470_v14, 4  ;;  %v3749_v34 = vrot.slane %v3748_v16, 1  ;;  %v1020_v20 = vcombine.high %v1019_v49, %v1019_v49 }
 0x187   : > { %v1477_v48 = vsel %vm1133_vm2, %v1012_v42, -inf  ;;  %v1484_v19 = vsel %vm1133_vm2, %v1019_v49, -inf  ;;  %v1036_v46 = vcombine.high %v1035_v17, %v1035_v17  ;;  %v1498_v13 = vsel %vm1133_vm2, %v1027_v41, -inf }
 0x188   : > { %v1472_v27 = vmax.f32 %v1470_v14, %v1471_v32  ;;  %v1478_v43 = vrot.slane %v1477_v48, 4  ;;  %v1485_v21 = vrot.slane %v1484_v19, 4  ;;  %v10724_v40 = vmax.f32 %v3748_v16, %v3749_v34  ;;  %v10731_v34 = vpop.f32.mrb[11].mxu0 }
 0x189   : > { %v1491_v57 = vsel %vm1133_vm2, %v1020_v20, -inf  ;;  %v1505_v63 = vsel %vm1133_vm2, %v1028_v29, -inf  ;;  %v1499_v7 = vrot.slane %v1498_v13, 4  ;;  %v1512_v39 = vsel %vm1133_vm2, %v1035_v17, -inf  ;;  %14276 = vst [vmem:[#allocation22_spill] sm:$0xff] %v10731_v34 }
 0x18a   : > { %v1473_v36 = vrot.slane %v1472_v27, 2  ;;  %v1479_v56 = vmax.f32 %v1477_v48, %v1478_v43  ;;  %v1486_v51 = vmax.f32 %v1484_v19, %v1485_v21  ;;  %v1492_v28 = vrot.slane %v1491_v57, 4 }
 0x18b   : > { %v1506_v22 = vrot.slane %v1505_v63, 4  ;;  %v1519_v42 = vsel %vm1133_vm2, %v1036_v46, -inf  ;;  %v1500_v20 = vmax.f32 %v1498_v13, %v1499_v7  ;;  %v1513_v45 = vrot.slane %v1512_v39, 4 }
 0x18c   : > { %v1474_v49 = vmax.f32 %v1472_v27, %v1473_v36  ;;  %v1480_v14 = vrot.slane %v1479_v56, 2  ;;  %v1487_v16 = vrot.slane %v1486_v51, 2  ;;  %v1493_v32 = vmax.f32 %v1491_v57, %v1492_v28 }
 0x18d   : > { %v1507_v41 = vmax.f32 %v1505_v63, %v1506_v22  ;;  %v1520_v29 = vrot.slane %v1519_v42, 4  ;;  %v1501_v21 = vrot.slane %v1500_v20, 2  ;;  %v1514_v2 = vmax.f32 %v1512_v39, %v1513_v45 }
 0x18e   : > { %v1475_v37 = vrot.slane %v1474_v49, 1  ;;  %v1481_v48 = vmax.f32 %v1479_v56, %v1480_v14  ;;  %v1488_v19 = vmax.f32 %v1486_v51, %v1487_v16  ;;  %v1494_v43 = vrot.slane %v1493_v32, 2 }
 0x18f   : > { %v1508_v52 = vrot.slane %v1507_v41, 2  ;;  %v1521_v17 = vmax.f32 %v1519_v42, %v1520_v29  ;;  %vm5562_vm10 = vcmp.gt.s32.totalorder %v14277_v61, 0  ;;  %v1502_v57 = vmax.f32 %v1500_v20, %v1501_v21  ;;  %v8710_v29 = vld [vmem:[%s14211_s3 + $0x190] sm:$0xff] }
 0x190   : > { %v1476_v15 = vmax.f32 %v1474_v49, %v1475_v37  ;;  %v1482_v46 = vrot.slane %v1481_v48, 1  ;;  %v1489_v27 = vrot.slane %v1488_v19, 1  ;;  %v1495_v36 = vmax.f32 %v1493_v32, %v1494_v43 }
 0x191   : > { %v1509_v28 = vmax.f32 %v1507_v41, %v1508_v52  ;;  %v1515_v13 = vrot.slane %v1514_v2, 2  ;;  %v1522_v63 = vrot.slane %v1521_v17, 2  ;;  %v1503_v51 = vrot.slane %v1502_v57, 1 }
 0x192   : > { %v1483_v7 = vmax.f32 %v1481_v48, %v1482_v46  ;;  %v1490_v22 = vmax.f32 %v1488_v19, %v1489_v27  ;;  %v1496_v34 = vrot.slane %v1495_v36, 1  ;;  %v1598_v56 = vmax.f32 %v10578_v4, %v1476_v15  ;;  %v8711_v4 = vld [vmem:[%s14211_s3 + $0x198] sm:$0xff]  ;;  %v8694_v48 = vld [vmem:[%s14211_s3 + $0x110] sm:$0xff] }
 0x193   : > { %v1510_v14 = vrot.slane %v1509_v28, 1  ;;  %v1516_v16 = vmax.f32 %v1514_v2, %v1515_v13  ;;  %v1523_v45 = vmax.f32 %v1521_v17, %v1522_v63  ;;  %v1504_v32 = vmax.f32 %v1502_v57, %v1503_v51  ;;  %v8695_v46 = vld [vmem:[%s14211_s3 + $0x118] sm:$0xff]  ;;  %v14281_v51 = vld [vmem:[#allocation9_spill] sm:$0xff] }
 0x194   : > { %v1497_v39 = vmax.f32 %v1495_v36, %v1496_v34  ;;  %v1599_v37 = vmax.f32 %v10580_v3, %v1483_v7  ;;  %v1600_v42 = vmax.f32 %v10582_v18, %v1490_v22  ;;  %v1630_v49 = vmax.f32 %v1598_v56, 0.0  ;;  %v14278_v3 = vld [vmem:[#allocation8_spill] sm:$0xff] }
 0x195   : > { %v1511_v20 = vmax.f32 %v1509_v28, %v1510_v14  ;;  %v1517_v52 = vrot.slane %v1516_v16, 1  ;;  %v1524_v41 = vrot.slane %v1523_v45, 1  ;;  %v3201_v18 = vadd.f32 %v14278_v3, %v10625_v38  ;;  %v5627_v38 = vld [vmem:[%s14211_s3 + $0x88] sm:$0xff]  ;;  %v14279_v28 = vld [vmem:[#allocation11_spill] sm:$0xff] }
 0x196   : > { %v1601_v15 = vmax.f32 %v10588_v23, %v1497_v39  ;;  %v1631_v2 = vmax.f32 %v1599_v37, 0.0  ;;  %v1632_v34 = vmax.f32 %v1600_v42, 0.0  ;;  %v1602_v21 = vmax.f32 %v10584_v31, %v1504_v32  ;;  %v5626_v23 = vld [vmem:[%s14211_s3 + $0x80] sm:$0xff]  ;;  %v5611_v37 = vld [vmem:[%s14211_s3 + $0x8] sm:$0xff] }
 0x197   : > { %v1518_v19 = vmax.f32 %v1516_v16, %v1517_v52  ;;  %v1525_v43 = vmax.f32 %v1523_v45, %v1524_v41  ;;  %v1603_v17 = vmax.f32 %v10590_v44, %v1511_v20  ;;  %v9566_v57 = vpack.c.bf16 %v8711_v4, %v8710_v29  ;;  %v14280_v31 = vld [vmem:[#allocation7_spill] sm:$0xff]  ;;  %v14283_v29 = vld [vmem:[#allocation12_spill] sm:$0xff] }
 0x198   : > { %v1633_v27 = vmax.f32 %v1601_v15, 0.0  ;;  %v1699_v36 = vsel %vm1678_vm3, %v1632_v34, %v1630_v49  ;;  %v3174_v13 = vmul.f32 %v14280_v31, %v14279_v28  ;;  %v1634_v7 = vmax.f32 %v1602_v21, 0.0  ;;  %v5610_v39 = vld [vmem:[%s14211_s3] sm:$0xff]  ;;  %v10795_v21 = vpop.f32.mrb[12].mxu0 }
 0x199   : > { %v1604_v44 = vmax.f32 %v10597_v30, %v1518_v19  ;;  %v1605_v63 = vmax.f32 %v10609_v35, %v1525_v43  ;;  %v1635_v22 = vmax.f32 %v1603_v17, 0.0  ;;  %9567 = vmatprep.subr.bf16.mxu0 %v9566_v57  ;;  %v9568_v16 = vpack.c.bf16 %v8695_v46, %v8694_v48  ;;  %v9959_v32 = vld [vmem:[#allocation2] sm:$0xff]  ;;  %v14284_v19 = vld [vmem:[#allocation14_spill] sm:$0xff]  ;;  %14285 = vst [vmem:[#allocation11_spill] sm:$0xff] %v10795_v21 }
 0x19a   : > { %v1706_v56 = vsel %vm1678_vm3, %v1633_v27, %v1631_v2  ;;  %v3202_v14 = vadd.f32 %v14281_v51, %v3174_v13  ;;  %v9594_v45 = vpack.c.bf16 %v5627_v38, %v5626_v23  ;;  %v1700_v35 = vsel %vm1680_vm4, %v1634_v7, %v1699_v36  ;;  %v8712_v15 = vld [vmem:[%s14211_s3 + $0x1a0] sm:$0xff]  ;;  %v8713_v2 = vld [vmem:[%s14211_s3 + $0x1a8] sm:$0xff] }
 0x19b   : > { %v1636_v30 = vmax.f32 %v1604_v44, 0.0  ;;  %v1637_v42 = vmax.f32 %v1605_v63, 0.0  ;;  %v1707_v49 = vsel %vm1680_vm4, %v1635_v22, %v1706_v56  ;;  %v10777_v20 = vsel %vm5562_vm10, 1.0, %v9959_v32  ;;  %9569 = vmatpush3.bf16.msra.mxu0 %v9568_v16  ;;  %v14286_v38 = vld [vmem:[#allocation13_spill] sm:$0xff]  ;;  %v14287_v57 = vld [vmem:[#allocation15_spill] sm:$0xff]  ;;  %v10811_v44 = vpop.f32.mrb[13].mxu0 }
 0x19c   : > { %14282 = vst [vmem:[#allocation8_spill] sm:$0xff] %v10777_v20  ;;  %v3249_v52 = vcombine.low %v3201_v18, %v3202_v14  ;;  %v3250_v41 = vcombine.high %v3201_v18, %v3202_v14  ;;  %9595 = vmatprep.subr.bf16.mxu1 %v9594_v45  ;;  %v3175_v4 = vmul.f32 %v10305_v9, %v14283_v29  ;;  %14288 = vst [vmem:[#allocation7_spill] sm:$0xff] %v10811_v44 }
 0x19d   : > { %v10788_v34 = vsel %vm1682_vm5, %v1636_v30, %v1700_v35  ;;  %v10791_v48 = vsel %vm1682_vm5, %v1637_v42, %v1707_v49  ;;  %v9596_v18 = vpack.c.bf16 %v5611_v37, %v5610_v39  ;;  %v622_v43 = vmul.f32 %v10293_v5, %v14284_v19 }
 0x19e   : > { %v3257_v17 = vrot.slane %v3249_v52, %v10325_v24  ;;  %v3264_v46 = vrot.slane %v3250_v41, %v10325_v24  ;;  %v10800_v23 = vadd.f32 %v14278_v3, %v3175_v4  ;;  %v3176_v27 = vmul.f32 %v14280_v31, %v14286_v38  ;;  %v10837_v41 = vpop.f32.mrb[18].mxu1 }
 0x19f   : > { %9597 = vmatpush3.bf16.msra.mxu1 %v9596_v18  ;;  %v10805_v36 = vadd.f32 %v10302_v8, %v622_v43  ;;  %v623_v28 = vmul.f32 %v10296_v6, %v14287_v57  ;;  %v3177_v5 = vmul.f32 %v10305_v9, %v10532_v62  ;;  %v9570_v13 = vpack.c.bf16 %v8713_v2, %v8712_v15 }
 0x1a0   : > { %v3265_v63 = vcombine.high %v3257_v17, %v3257_v17  ;;  %v3266_v7 = vcombine.high %v3264_v46, %v3264_v46  ;;  %v3413_v22 = vrot.slane %v3257_v17, %v10325_v24  ;;  %v3429_v56 = vrot.slane %v3264_v46, %v10325_v24  ;;  %14289 = vst [vmem:[#allocation9_spill] sm:$0xff] %v10837_v41 }
 0x1a1   : > { %v10816_v14 = vadd.f32 %v14281_v51, %v3176_v27  ;;  %v10819_v8 = vadd.f32 %v10308_v11, %v623_v28  ;;  %v10822_v6 = vadd.f32 %v14278_v3, %v3177_v5  ;;  %9571 = vmatprep.subr.bf16.mxu0 %v9570_v13  ;;  %v10826_v62 = vmul.f32 %v14280_v31, %v10534_v59 }
 0x1a2   : > { %v3414_v16 = vcombine.high %v3413_v22, %v3413_v22  ;;  %v3421_v45 = vrot.slane %v3265_v63, %v10325_v24  ;;  %v3430_v39 = vcombine.high %v3429_v56, %v3429_v56  ;;  %v3437_v37 = vrot.slane %v3266_v7, %v10325_v24 }
 0x1a3   : > { %v3751_v30 = vsel %vm1133_vm2, %v3413_v22, -inf  ;;  %v3779_v42 = vsel %vm1133_vm2, %v3429_v56, -inf  ;;  %v3267_v11 = vcombine.low %v10800_v23, %v10816_v14  ;;  %v3268_v35 = vcombine.high %v10800_v23, %v10816_v14 }
 0x1a4   : > { %v3422_v49 = vcombine.high %v3421_v45, %v3421_v45  ;;  %v3438_v32 = vcombine.high %v3437_v37, %v3437_v37  ;;  %v3752_v59 = vrot.slane %v3751_v30, 4  ;;  %v3758_v52 = vsel %vm1133_vm2, %v3414_v16, -inf }
 0x1a5   : > { %v3759_v29 = vrot.slane %v3758_v52, 4  ;;  %v3765_v4 = vsel %vm1133_vm2, %v3421_v45, -inf  ;;  %v3780_v15 = vrot.slane %v3779_v42, 4  ;;  %v3786_v2 = vsel %vm1133_vm2, %v3430_v39, -inf }
 0x1a6   : > { %v3753_v18 = vmax.f32 %v3751_v30, %v3752_v59  ;;  %v3766_v19 = vrot.slane %v3765_v4, 4  ;;  %v3772_v43 = vsel %vm1133_vm2, %v3422_v49, -inf  ;;  %v3787_v17 = vrot.slane %v3786_v2, 4 }
 0x1a7   : > { %v3760_v46 = vmax.f32 %v3758_v52, %v3759_v29  ;;  %v3773_v23 = vrot.slane %v3772_v43, 4  ;;  %v3781_v38 = vmax.f32 %v3779_v42, %v3780_v15  ;;  %v3793_v27 = vsel %vm1133_vm2, %v3437_v37, -inf }
 0x1a8   : > { %v3754_v57 = vrot.slane %v3753_v18, 2  ;;  %v3767_v28 = vmax.f32 %v3765_v4, %v3766_v19  ;;  %v3788_v5 = vmax.f32 %v3786_v2, %v3787_v17  ;;  %v3794_v13 = vrot.slane %v3793_v27, 4 }
 0x1a9   : > { %v3761_v63 = vrot.slane %v3760_v46, 2  ;;  %v3774_v7 = vmax.f32 %v3772_v43, %v3773_v23  ;;  %v3782_v22 = vrot.slane %v3781_v38, 2  ;;  %v3800_v56 = vsel %vm1133_vm2, %v3438_v32, -inf }
 0x1aa   : > { %v3755_v14 = vmax.f32 %v3753_v18, %v3754_v57  ;;  %v3768_v16 = vrot.slane %v3767_v28, 2  ;;  %v3789_v45 = vrot.slane %v3788_v5, 2  ;;  %v3795_v39 = vmax.f32 %v3793_v27, %v3794_v13 }
 0x1ab   : > { %v3762_v30 = vmax.f32 %v3760_v46, %v3761_v63  ;;  %v3775_v49 = vrot.slane %v3774_v7, 2  ;;  %v3783_v59 = vmax.f32 %v3781_v38, %v3782_v22  ;;  %v3801_v52 = vrot.slane %v3800_v56, 4 }
 0x1ac   : > { %v3756_v42 = vrot.slane %v3755_v14, 1  ;;  %v3769_v29 = vmax.f32 %v3767_v28, %v3768_v16  ;;  %v3790_v37 = vmax.f32 %v3788_v5, %v3789_v45  ;;  %v3796_v15 = vrot.slane %v3795_v39, 2 }
 0x1ad   : > { %v3763_v4 = vrot.slane %v3762_v30, 1  ;;  %v3776_v2 = vmax.f32 %v3774_v7, %v3775_v49  ;;  %v3784_v19 = vrot.slane %v3783_v59, 1  ;;  %v3802_v17 = vmax.f32 %v3800_v56, %v3801_v52 }
 0x1ae   : > { %v10844_v43 = vmax.f32 %v3755_v14, %v3756_v42  ;;  %v3770_v23 = vrot.slane %v3769_v29, 1  ;;  %v3791_v32 = vrot.slane %v3790_v37, 1  ;;  %v3797_v18 = vmax.f32 %v3795_v39, %v3796_v15  ;;  %v10874_v15 = vpop.f32.mrb[19].mxu1 }
 0x1af   : > { %v10846_v57 = vmax.f32 %v3762_v30, %v3763_v4  ;;  %v3777_v27 = vrot.slane %v3776_v2, 1  ;;  %v10848_v46 = vmax.f32 %v3783_v59, %v3784_v19  ;;  %v3803_v38 = vrot.slane %v3802_v17, 2  ;;  %14292 = vst [vmem:[#allocation13_spill] sm:$0xff] %v10874_v15 }
 0x1b0   : > { %v10850_v13 = vmax.f32 %v3769_v29, %v3770_v23  ;;  %v10852_v28 = vmax.f32 %v3790_v37, %v3791_v32  ;;  %v3798_v5 = vrot.slane %v3797_v18, 1  ;;  %v3275_v63 = vrot.slane %v3267_v11, %v10325_v24 }
 0x1b1   : > { %v10855_v7 = vmax.f32 %v3776_v2, %v3777_v27  ;;  %v3804_v22 = vmax.f32 %v3802_v17, %v3803_v38  ;;  %v3282_v56 = vrot.slane %v3268_v35, %v10325_v24  ;;  %v795_v14 = vcombine.low %v10805_v36, %v10819_v8 }
 0x1b2   : > { %v10860_v16 = vmax.f32 %v3797_v18, %v3798_v5  ;;  %v3283_v45 = vcombine.high %v3275_v63, %v3275_v63  ;;  %v3445_v39 = vrot.slane %v3275_v63, %v10325_v24  ;;  %v796_v30 = vcombine.high %v10805_v36, %v10819_v8 }
 0x1b3   : > { %14290 = vst [vmem:[#allocation12_spill] sm:$0xff] %v10855_v7  ;;  %v3805_v49 = vrot.slane %v3804_v22, 1  ;;  %v3284_v59 = vcombine.high %v3282_v56, %v3282_v56  ;;  %v3461_v11 = vrot.slane %v3282_v56, %v10325_v24  ;;  %v10867_v52 = vrot.slane %v795_v14, %v10325_v24 }
 0x1b4   : > { %14291 = vst [vmem:[#allocation14_spill] sm:$0xff] %v10860_v16  ;;  %v3446_v42 = vcombine.high %v3445_v39, %v3445_v39  ;;  %v3453_v35 = vrot.slane %v3283_v45, %v10325_v24  ;;  %v3807_v29 = vsel %vm1133_vm2, %v3445_v39, -inf  ;;  %v10872_v37 = vrot.slane %v796_v30, %v10325_v24 }
 0x1b5   : > { %v10876_v4 = vmax.f32 %v3804_v22, %v3805_v49  ;;  %v3462_v36 = vcombine.high %v3461_v11, %v3461_v11  ;;  %v3469_v8 = vrot.slane %v3284_v59, %v10325_v24  ;;  %v3808_v2 = vrot.slane %v3807_v29, 4 }
 0x1b6   : > { %v3454_v19 = vcombine.high %v3453_v35, %v3453_v35  ;;  %v3814_v17 = vsel %vm1133_vm2, %v3446_v42, -inf  ;;  %v3821_v23 = vsel %vm1133_vm2, %v3453_v35, -inf  ;;  %v3835_v32 = vsel %vm1133_vm2, %v3461_v11, -inf }
 0x1b7   : > { %14293 = vst [vmem:[#allocation15_spill] sm:$0xff] %v10876_v4  ;;  %v3470_v18 = vcombine.high %v3469_v8, %v3469_v8  ;;  %v3809_v27 = vmax.f32 %v3807_v29, %v3808_v2  ;;  %v3815_v38 = vrot.slane %v3814_v17, 4  ;;  %v3822_v5 = vrot.slane %v3821_v23, 4 }
 0x1b8   : > { %v3828_v63 = vsel %vm1133_vm2, %v3454_v19, -inf  ;;  %v3836_v56 = vrot.slane %v3835_v32, 4  ;;  %v3842_v22 = vsel %vm1133_vm2, %v3462_v36, -inf  ;;  %v3849_v14 = vsel %vm1133_vm2, %v3469_v8, -inf }
 0x1b9   : > { %v3810_v45 = vrot.slane %v3809_v27, 2  ;;  %v3816_v39 = vmax.f32 %v3814_v17, %v3815_v38  ;;  %v3823_v30 = vmax.f32 %v3821_v23, %v3822_v5  ;;  %v3829_v49 = vrot.slane %v3828_v63, 4 }
 0x1ba   : > { %v3837_v59 = vmax.f32 %v3835_v32, %v3836_v56  ;;  %v3843_v42 = vrot.slane %v3842_v22, 4  ;;  %v3850_v35 = vrot.slane %v3849_v14, 4  ;;  %v3856_v11 = vsel %vm1133_vm2, %v3470_v18, -inf }
 0x1bb   : > { %v3811_v61 = vmax.f32 %v3809_v27, %v3810_v45  ;;  %v3817_v29 = vrot.slane %v3816_v39, 2  ;;  %v3824_v2 = vrot.slane %v3823_v30, 2  ;;  %v3830_v20 = vmax.f32 %v3828_v63, %v3829_v49 }
 0x1bc   : > { %v3838_v15 = vrot.slane %v3837_v59, 2  ;;  %v3844_v19 = vmax.f32 %v3842_v22, %v3843_v42  ;;  %v3851_v44 = vmax.f32 %v3849_v14, %v3850_v35  ;;  %v3857_v41 = vrot.slane %v3856_v11, 4 }
 0x1bd   : > { %v3812_v36 = vrot.slane %v3811_v61, 1  ;;  %v3818_v21 = vmax.f32 %v3816_v39, %v3817_v29  ;;  %v3825_v8 = vmax.f32 %v3823_v30, %v3824_v2  ;;  %v3831_v4 = vrot.slane %v3830_v20, 2 }
 0x1be   : > { %v3839_v17 = vmax.f32 %v3837_v59, %v3838_v15  ;;  %v3845_v23 = vrot.slane %v3844_v19, 2  ;;  %v3852_v38 = vrot.slane %v3851_v44, 2  ;;  %v3858_v32 = vmax.f32 %v3856_v11, %v3857_v41 }
 0x1bf   : > { %v3813_v5 = vmax.f32 %v3811_v61, %v3812_v36  ;;  %v3819_v56 = vrot.slane %v3818_v21, 1  ;;  %v3826_v16 = vrot.slane %v3825_v8, 1  ;;  %v3832_v18 = vmax.f32 %v3830_v20, %v3831_v4 }
 0x1c0   : > { %v3840_v27 = vrot.slane %v3839_v17, 1  ;;  %v3846_v45 = vmax.f32 %v3844_v19, %v3845_v23  ;;  %v3853_v7 = vmax.f32 %v3851_v44, %v3852_v38  ;;  %v3859_v63 = vrot.slane %v3858_v32, 2 }
 0x1c1   : > { %v3820_v49 = vmax.f32 %v3818_v21, %v3819_v56  ;;  %v3827_v22 = vmax.f32 %v3825_v8, %v3826_v16  ;;  %v3833_v14 = vrot.slane %v3832_v18, 1  ;;  %v4143_v42 = vmax.f32 %v10691_v47, %v3813_v5 }
 0x1c2   : > { %v3841_v39 = vmax.f32 %v3839_v17, %v3840_v27  ;;  %v3847_v30 = vrot.slane %v3846_v45, 1  ;;  %v3854_v35 = vrot.slane %v3853_v7, 1  ;;  %v3860_v15 = vmax.f32 %v3858_v32, %v3859_v63 }
 0x1c3   : > { %v3834_v59 = vmax.f32 %v3832_v18, %v3833_v14  ;;  %v4144_v41 = vmax.f32 %v10697_v1, %v3820_v49  ;;  %v4145_v61 = vmax.f32 %v10703_v60, %v3827_v22  ;;  %v4175_v11 = vmax.f32 %v4143_v42, 0.0 }
 0x1c4   : > { %v3848_v20 = vmax.f32 %v3846_v45, %v3847_v30  ;;  %v3855_v4 = vmax.f32 %v3853_v7, %v3854_v35  ;;  %v3861_v29 = vrot.slane %v3860_v15, 1  ;;  %v4147_v44 = vmax.f32 %v10709_v58, %v3841_v39 }
 0x1c5   : > { %v4146_v21 = vmax.f32 %v10706_v12, %v3834_v59  ;;  %v4176_v16 = vmax.f32 %v4144_v41, 0.0  ;;  %v4177_v2 = vmax.f32 %v4145_v61, 0.0  ;;  %v811_v47 = vcombine.high %v10867_v52, %v10867_v52 }
 0x1c6   : > { %v3862_v19 = vmax.f32 %v3860_v15, %v3861_v29  ;;  %v4148_v36 = vmax.f32 %v10714_v50, %v3848_v20  ;;  %v4149_v1 = vmax.f32 %v10719_v54, %v3855_v4  ;;  %v4179_v8 = vmax.f32 %v4147_v44, 0.0 }
 0x1c7   : > { %v4178_v60 = vmax.f32 %v4146_v21, 0.0  ;;  %v4239_v17 = vsel %vm1678_vm3, %v4177_v2, %v4175_v11  ;;  %v812_v7 = vcombine.high %v10872_v37, %v10872_v37  ;;  %v1043_v12 = vrot.slane %v10867_v52, %v10325_v24 }
 0x1c8   : > { %v4150_v58 = vmax.f32 %v10724_v40, %v3862_v19  ;;  %v4180_v23 = vmax.f32 %v4148_v36, 0.0  ;;  %v4181_v38 = vmax.f32 %v4149_v1, 0.0  ;;  %v4240_v32 = vsel %vm1680_vm4, %v4179_v8, %v4239_v17 }
 0x1c9   : > { %v4246_v50 = vsel %vm1678_vm3, %v4178_v60, %v4176_v16  ;;  %v1044_v5 = vcombine.high %v1043_v12, %v1043_v12  ;;  %v1051_v54 = vrot.slane %v811_v47, %v10325_v24  ;;  %v1059_v56 = vrot.slane %v10872_v37, %v10325_v24 }
 0x1ca   : > { %v4182_v18 = vmax.f32 %v4150_v58, 0.0  ;;  %v10907_v27 = vsel %vm1682_vm5, %v4181_v38, %v4240_v32  ;;  %v4247_v52 = vsel %vm1680_vm4, %v4180_v23, %v4246_v50  ;;  %v1067_v40 = vrot.slane %v812_v7, %v10325_v24 }
 0x1cb   : > { %v1052_v45 = vcombine.high %v1051_v54, %v1051_v54  ;;  %v1060_v63 = vcombine.high %v1059_v56, %v1059_v56  ;;  %v1526_v49 = vsel %vm1133_vm2, %v1043_v12, -inf  ;;  %v1533_v22 = vsel %vm1133_vm2, %v1044_v5, -inf }
 0x1cc   : > { %v10914_v14 = vsel %vm1682_vm5, %v4182_v18, %v4247_v52  ;;  %v1068_v42 = vcombine.high %v1067_v40, %v1067_v40  ;;  %v1527_v39 = vrot.slane %v1526_v49, 4  ;;  %v1534_v37 = vrot.slane %v1533_v22, 4 }
 0x1cd   : > { %v1540_v30 = vsel %vm1133_vm2, %v1051_v54, -inf  ;;  %v1547_v35 = vsel %vm1133_vm2, %v1052_v45, -inf  ;;  %v1554_v15 = vsel %vm1133_vm2, %v1059_v56, -inf  ;;  %v1561_v59 = vsel %vm1133_vm2, %v1060_v63, -inf }
 0x1ce   : > { %v1528_v41 = vmax.f32 %v1526_v49, %v1527_v39  ;;  %v1535_v61 = vmax.f32 %v1533_v22, %v1534_v37  ;;  %v1541_v11 = vrot.slane %v1540_v30, 4  ;;  %v1548_v20 = vrot.slane %v1547_v35, 4 }
 0x1cf   : > { %v1555_v4 = vrot.slane %v1554_v15, 4  ;;  %v1562_v29 = vrot.slane %v1561_v59, 4  ;;  %v1568_v44 = vsel %vm1133_vm2, %v1067_v40, -inf  ;;  %v1575_v21 = vsel %vm1133_vm2, %v1068_v42, -inf }
 0x1d0   : > { %v1529_v16 = vrot.slane %v1528_v41, 2  ;;  %v1536_v2 = vrot.slane %v1535_v61, 2  ;;  %v1542_v47 = vmax.f32 %v1540_v30, %v1541_v11  ;;  %v1549_v19 = vmax.f32 %v1547_v35, %v1548_v20 }
 0x1d1   : > { %v1556_v36 = vmax.f32 %v1554_v15, %v1555_v4  ;;  %v1563_v1 = vmax.f32 %v1561_v59, %v1562_v29  ;;  %v1569_v8 = vrot.slane %v1568_v44, 4  ;;  %v1576_v60 = vrot.slane %v1575_v21, 4 }
 0x1d2   : > { %v1530_v17 = vmax.f32 %v1528_v41, %v1529_v16  ;;  %v1537_v7 = vmax.f32 %v1535_v61, %v1536_v2  ;;  %v1543_v12 = vrot.slane %v1542_v47, 2  ;;  %v1550_v58 = vrot.slane %v1549_v19, 2 }
 0x1d3   : > { %v1557_v23 = vrot.slane %v1556_v36, 2  ;;  %v1564_v38 = vrot.slane %v1563_v1, 2  ;;  %v1570_v32 = vmax.f32 %v1568_v44, %v1569_v8  ;;  %v1577_v50 = vmax.f32 %v1575_v21, %v1576_v60  ;;  %v10924_v21 = vpop.f32.mrb[14].mxu0  ;;  %v8696_v60 = vld [vmem:[%s14211_s3 + $0x120] sm:$0xff] }
 0x1d4   : > { %v1531_v5 = vrot.slane %v1530_v17, 1  ;;  %v1538_v54 = vrot.slane %v1537_v7, 1  ;;  %v1544_v56 = vmax.f32 %v1542_v47, %v1543_v12  ;;  %v1551_v18 = vmax.f32 %v1549_v19, %v1550_v58  ;;  %v14294_v58 = vld [vmem:[#allocation20_spill] sm:$0xff] }
 0x1d5   : > { %v1558_v52 = vmax.f32 %v1556_v36, %v1557_v23  ;;  %v1565_v40 = vmax.f32 %v1563_v1, %v1564_v38  ;;  %v1571_v45 = vrot.slane %v1570_v32, 2  ;;  %v1578_v63 = vrot.slane %v1577_v50, 2  ;;  %v10928_v36 = vpop.f32.mrb[15].mxu0 }
 0x1d6   : > { %v1532_v49 = vmax.f32 %v1530_v17, %v1531_v5  ;;  %v1539_v22 = vmax.f32 %v1537_v7, %v1538_v54  ;;  %v1545_v42 = vrot.slane %v1544_v56, 1  ;;  %v1552_v39 = vrot.slane %v1551_v18, 1  ;;  %v5612_v54 = vld [vmem:[%s14211_s3 + $0x10] sm:$0xff] }
 0x1d7   : > { %v1559_v37 = vrot.slane %v1558_v52, 1  ;;  %v1566_v30 = vrot.slane %v1565_v40, 1  ;;  %v1572_v35 = vmax.f32 %v1570_v32, %v1571_v45  ;;  %v1579_v15 = vmax.f32 %v1577_v50, %v1578_v63  ;;  %v5628_v32 = vld [vmem:[%s14211_s3 + $0x90] sm:$0xff]  ;;  %v5629_v50 = vld [vmem:[%s14211_s3 + $0x98] sm:$0xff] }
 0x1d8   : > { %v1546_v59 = vmax.f32 %v1544_v56, %v1545_v42  ;;  %v1553_v41 = vmax.f32 %v1551_v18, %v1552_v39  ;;  %v1606_v61 = vmax.f32 %v10658_v0, %v1532_v49  ;;  %v1607_v11 = vmax.f32 %v10660_v25, %v1539_v22  ;;  %v5613_v56 = vld [vmem:[%s14211_s3 + $0x18] sm:$0xff]  ;;  %v1882_v18 = vld [vmem:[%s14210_s2] ss:$2 sm:$0x3]  ;;  %v10968_v49 = vpop.f32.mrb[20].mxu1 }
 0x1d9   : > { %v1560_v20 = vmax.f32 %v1558_v52, %v1559_v37  ;;  %v1567_v4 = vmax.f32 %v1565_v40, %v1566_v30  ;;  %v1573_v29 = vrot.slane %v1572_v35, 1  ;;  %v1580_v44 = vrot.slane %v1579_v15, 1  ;;  %v14295_v37 = vld [vmem:[#allocation16_spill] sm:$0xff] }
 0x1da   : > { %v1608_v16 = vmax.f32 %v10664_v26, %v1546_v59  ;;  %v1609_v2 = vmax.f32 %v10668_v33, %v1553_v41  ;;  %v1638_v47 = vmax.f32 %v1606_v61, 0.0  ;;  %v1639_v19 = vmax.f32 %v1607_v11, 0.0  ;;  %v8697_v26 = vld [vmem:[%s14211_s3 + $0x128] sm:$0xff] }
 0x1db   : > { %v1574_v1 = vmax.f32 %v1572_v35, %v1573_v29  ;;  %v1581_v8 = vmax.f32 %v1579_v15, %v1580_v44  ;;  %v1610_v0 = vmax.f32 %v10662_v55, %v1560_v20  ;;  %v1611_v25 = vmax.f32 %v10666_v53, %v1567_v4  ;;  %v14296_v41 = vld [vmem:[#allocation5_spill] sm:$0xff]  ;;  %v14297_v29 = vld [vmem:[#allocation18_spill] sm:$0xff] }
 0x1dc   : > { %v1640_v17 = vmax.f32 %v1608_v16, 0.0  ;;  %v1641_v33 = vmax.f32 %v1609_v2, 0.0  ;;  %v1702_v7 = vsel %vm1684_vm6, %v1638_v47, %v10788_v34  ;;  %v1709_v12 = vsel %vm1684_vm6, %v1639_v19, %v10791_v48  ;;  %v14298_v16 = vld [vmem:[#allocation17_spill] sm:$0xff]  ;;  %v14299_v47 = vld [vmem:[#allocation6_spill] sm:$0xff] }
 0x1dd   : > { %v1612_v55 = vmax.f32 %v10675_v10, %v1574_v1  ;;  %v1613_v53 = vmax.f32 %v14294_v58, %v1581_v8  ;;  %v1642_v23 = vmax.f32 %v1610_v0, 0.0  ;;  %v1643_v38 = vmax.f32 %v1611_v25, 0.0 }
 0x1de   : > { %v1703_v5 = vsel %vm1686_vm7, %v1640_v17, %v1702_v7  ;;  %v1710_v34 = vsel %vm1686_vm7, %v1641_v33, %v1709_v12  ;;  %v3206_v48 = vadd.f32 %v14281_v51, %v10826_v62  ;;  %v9572_v10 = vpack.c.bf16 %v8697_v26, %v8696_v60  ;;  %v8667_v62 = vld [vmem:[%s14210_s2 + $0x1] ss:$2 sm:$0x3]  ;;  %v10999_v26 = vpop.f32.mrb[21].mxu1  ;;  %v14300_v7 = vld [vmem:[#allocation19_spill] sm:$0xff] }
 0x1df   : > { %v1644_v52 = vmax.f32 %v1612_v55, 0.0  ;;  %v1645_v40 = vmax.f32 %v1613_v53, 0.0  ;;  %v1704_v45 = vsel %vm1688_vm8, %v1642_v23, %v1703_v5  ;;  %v1711_v63 = vsel %vm1688_vm8, %v1643_v38, %v1710_v34  ;;  %v14301_v55 = vld [vmem:[#allocation21_spill] sm:$0xff] }
 0x1e0   : > { %v3285_v22 = vcombine.low %v10822_v6, %v3206_v48  ;;  %v3286_v42 = vcombine.high %v10822_v6, %v3206_v48  ;;  %9573 = vmatpush3.bf16.msra.mxu0 %v9572_v10  ;;  %v9598_v39 = vpack.c.bf16 %v5629_v50, %v5628_v32  ;;  %v3179_v30 = vmul.f32 %v10305_v9, %v14295_v37 }
 0x1e1   : > { %v1705_v35 = vsel %vm1690_vm9, %v1644_v52, %v1704_v45  ;;  %v1712_v15 = vsel %vm1690_vm9, %v1645_v40, %v1711_v63  ;;  %v9600_v59 = vpack.c.bf16 %v5613_v56, %v5612_v54  ;;  %v10977_v61 = vrot.slane %v1882_v18, %v14296_v41 }
 0x1e2   : > { %1719 = vst [vmem:[#allocation2 + $0x30] sm:$0xff] %v1705_v35  ;;  %1720 = vst [vmem:[#allocation2 + $0x38] sm:$0xff] %v1712_v15  ;;  %v3293_v11 = vrot.slane %v3285_v22, %v10325_v24  ;;  %v3300_v20 = vrot.slane %v3286_v42, %v10325_v24  ;;  %9599 = vmatprep.subr.bf16.mxu1 %v9598_v39  ;;  %v10982_v6 = vadd.f32 %v14278_v3, %v3179_v30 }
 0x1e3   : > { %v10985_v4 = vrot.slane %v8667_v62, %v14296_v41  ;;  %9601 = vmatpush3.bf16.msra.mxu1 %v9600_v59  ;;  %v1894_v44 = vmul.f32 %v10977_v61, %v14297_v29  ;;  %v3180_v2 = vmul.f32 %v14280_v31, %v14298_v16  ;;  %v10992_v19 = vrot.slane %v1882_v18, %v14299_v47 }
 0x1e4   : > { %v10995_v1 = vrot.slane %v8667_v62, %v14299_v47  ;;  %v3301_v8 = vcombine.high %v3293_v11, %v3293_v11  ;;  %v3302_v0 = vcombine.high %v3300_v20, %v3300_v20  ;;  %v3477_v25 = vrot.slane %v3293_v11, %v10325_v24 }
 0x1e5   : > { %v3493_v60 = vrot.slane %v3300_v20, %v10325_v24  ;;  %v11002_v17 = vadd.f32 %v10985_v4, %v1894_v44  ;;  %v11005_v33 = vadd.f32 %v14281_v51, %v3180_v2  ;;  %v11009_v12 = vmul.f32 %v10992_v19, %v14300_v7 }
 0x1e6   : > { %v11013_v58 = vmul.f32 %v10305_v9, %v14301_v55  ;;  %v3478_v53 = vcombine.high %v3477_v25, %v3477_v25  ;;  %v3485_v23 = vrot.slane %v3301_v8, %v10325_v24  ;;  %v3501_v32 = vrot.slane %v3302_v0, %v10325_v24 }
 0x1e7   : > { %v3494_v38 = vcombine.high %v3493_v60, %v3493_v60  ;;  %v3863_v50 = vsel %vm1133_vm2, %v3477_v25, -inf  ;;  %v3891_v5 = vsel %vm1133_vm2, %v3493_v60, -inf  ;;  %v3303_v34 = vcombine.low %v10982_v6, %v11005_v33 }
 0x1e8   : > { %v3304_v48 = vcombine.high %v10982_v6, %v11005_v33  ;;  %v3486_v10 = vcombine.high %v3485_v23, %v3485_v23  ;;  %v3502_v54 = vcombine.high %v3501_v32, %v3501_v32  ;;  %v3864_v56 = vrot.slane %v3863_v50, 4 }
 0x1e9   : > { %v3870_v18 = vsel %vm1133_vm2, %v3478_v53, -inf  ;;  %v3877_v40 = vsel %vm1133_vm2, %v3485_v23, -inf  ;;  %v3892_v45 = vrot.slane %v3891_v5, 4  ;;  %v3898_v63 = vsel %vm1133_vm2, %v3494_v38, -inf }
 0x1ea   : > { %v3871_v52 = vrot.slane %v3870_v18, 4  ;;  %v3865_v62 = vmax.f32 %v3863_v50, %v3864_v56  ;;  %v3878_v22 = vrot.slane %v3877_v40, 4  ;;  %v3884_v42 = vsel %vm1133_vm2, %v3486_v10, -inf }
 0x1eb   : > { %v3899_v39 = vrot.slane %v3898_v63, 4  ;;  %v3885_v30 = vrot.slane %v3884_v42, 4  ;;  %v3893_v35 = vmax.f32 %v3891_v5, %v3892_v45  ;;  %v3905_v15 = vsel %vm1133_vm2, %v3501_v32, -inf }
 0x1ec   : > { %v3872_v37 = vmax.f32 %v3870_v18, %v3871_v52  ;;  %v3866_v59 = vrot.slane %v3865_v62, 2  ;;  %v3879_v11 = vmax.f32 %v3877_v40, %v3878_v22  ;;  %v3906_v29 = vrot.slane %v3905_v15, 4 }
 0x1ed   : > { %v3900_v20 = vmax.f32 %v3898_v63, %v3899_v39  ;;  %v3886_v16 = vmax.f32 %v3884_v42, %v3885_v30  ;;  %v3894_v2 = vrot.slane %v3893_v35, 2  ;;  %v3912_v8 = vsel %vm1133_vm2, %v3502_v54, -inf }
 0x1ee   : > { %v3873_v44 = vrot.slane %v3872_v37, 2  ;;  %v3867_v0 = vmax.f32 %v3865_v62, %v3866_v59  ;;  %v3880_v25 = vrot.slane %v3879_v11, 2  ;;  %v3907_v7 = vmax.f32 %v3905_v15, %v3906_v29 }
 0x1ef   : > { %v3901_v60 = vrot.slane %v3900_v20, 2  ;;  %v3887_v53 = vrot.slane %v3886_v16, 2  ;;  %v3895_v23 = vmax.f32 %v3893_v35, %v3894_v2  ;;  %v3913_v38 = vrot.slane %v3912_v8, 4 }
 0x1f0   : > { %v3874_v55 = vmax.f32 %v3872_v37, %v3873_v44  ;;  %v3868_v50 = vrot.slane %v3867_v0, 1  ;;  %v3881_v5 = vmax.f32 %v3879_v11, %v3880_v25  ;;  %v3908_v10 = vrot.slane %v3907_v7, 2 }
 0x1f1   : > { %v3902_v32 = vmax.f32 %v3900_v20, %v3901_v60  ;;  %v3888_v18 = vmax.f32 %v3886_v16, %v3887_v53  ;;  %v3896_v52 = vrot.slane %v3895_v23, 1  ;;  %v3914_v40 = vmax.f32 %v3912_v8, %v3913_v38  ;;  %v14302_v60 = vld [vmem:[#allocation12_spill] sm:$0xff] }
 0x1f2   : > { %v3875_v56 = vrot.slane %v3874_v55, 1  ;;  %v3869_v45 = vmax.f32 %v3867_v0, %v3868_v50  ;;  %v3882_v63 = vrot.slane %v3881_v5, 1  ;;  %v3909_v54 = vmax.f32 %v3907_v7, %v3908_v10 }
 0x1f3   : > { %v3903_v22 = vrot.slane %v3902_v32, 1  ;;  %v3889_v42 = vrot.slane %v3888_v18, 1  ;;  %v3897_v39 = vmax.f32 %v3895_v23, %v3896_v52  ;;  %v3915_v30 = vrot.slane %v3914_v40, 2  ;;  %v14303_v23 = vld [vmem:[#allocation14_spill] sm:$0xff]  ;;  %v14304_v52 = vld [vmem:[#allocation15_spill] sm:$0xff] }
 0x1f4   : > { %v3876_v62 = vmax.f32 %v3874_v55, %v3875_v56  ;;  %v3883_v37 = vmax.f32 %v3881_v5, %v3882_v63  ;;  %v3910_v35 = vrot.slane %v3909_v54, 1  ;;  %v4151_v59 = vmax.f32 %v10844_v43, %v3869_v45 }
 0x1f5   : > { %v3904_v15 = vmax.f32 %v3902_v32, %v3903_v22  ;;  %v3890_v11 = vmax.f32 %v3888_v18, %v3889_v42  ;;  %v3916_v20 = vmax.f32 %v3914_v40, %v3915_v30  ;;  %v4155_v44 = vmax.f32 %v10848_v46, %v3897_v39  ;;  %v11044_v32 = vpop.f32.mrb[22].mxu1 }
 0x1f6   : > { %v4152_v29 = vmax.f32 %v10846_v57, %v3876_v62  ;;  %v3911_v16 = vmax.f32 %v3909_v54, %v3910_v35  ;;  %v4153_v2 = vmax.f32 %v10850_v13, %v3883_v37  ;;  %v4183_v0 = vmax.f32 %v4151_v59, 0.0 }
 0x1f7   : > { %v4156_v8 = vmax.f32 %v10852_v28, %v3904_v15  ;;  %v3917_v25 = vrot.slane %v3916_v20, 1  ;;  %v4154_v7 = vmax.f32 %v14302_v60, %v3890_v11  ;;  %v4187_v53 = vmax.f32 %v4155_v44, 0.0 }
 0x1f8   : > { %v4184_v55 = vmax.f32 %v4152_v29, 0.0  ;;  %v4157_v38 = vmax.f32 %v14303_v23, %v3911_v16  ;;  %v4185_v43 = vmax.f32 %v4153_v2, 0.0  ;;  %v4242_v57 = vsel %vm1684_vm6, %v4183_v0, %v10907_v27 }
 0x1f9   : > { %v4188_v50 = vmax.f32 %v4156_v8, 0.0  ;;  %v3918_v5 = vmax.f32 %v3916_v20, %v3917_v25  ;;  %v4186_v46 = vmax.f32 %v4154_v7, 0.0  ;;  %v3311_v28 = vrot.slane %v3303_v34, %v10325_v24 }
 0x1fa   : > { %v4249_v13 = vsel %vm1684_vm6, %v4184_v55, %v10914_v14  ;;  %v4189_v10 = vmax.f32 %v4157_v38, 0.0  ;;  %v4243_v56 = vsel %vm1686_vm7, %v4185_v43, %v4242_v57  ;;  %v3318_v27 = vrot.slane %v3304_v48, %v10325_v24  ;;  %v11055_v14 = vpop.f32.mrb[23].mxu1 }
 0x1fb   : > { %v11053_v18 = vadd.f32 %v10995_v1, %v11009_v12  ;;  %v4158_v40 = vmax.f32 %v14304_v52, %v3918_v5  ;;  %v4244_v34 = vsel %vm1688_vm8, %v4187_v53, %v4243_v56  ;;  %v4250_v45 = vsel %vm1686_vm7, %v4186_v46, %v4249_v13 }
 0x1fc   : > { %v3319_v63 = vcombine.high %v3311_v28, %v3311_v28  ;;  %v4245_v22 = vsel %vm1690_vm9, %v4189_v10, %v4244_v34  ;;  %v4251_v54 = vsel %vm1688_vm8, %v4188_v50, %v4250_v45  ;;  %v3320_v62 = vcombine.high %v3318_v27, %v3318_v27 }
 0x1fd   : > { %v3509_v6 = vrot.slane %v3311_v28, %v10325_v24  ;;  %v4190_v33 = vmax.f32 %v4158_v40, 0.0  ;;  %4271 = vst [vmem:[#allocation2 + $0x60] sm:$0xff] %v4245_v22  ;;  %v3525_v48 = vrot.slane %v3318_v27, %v10325_v24  ;;  %v1954_v42 = vcombine.low %v11002_v17, %v11053_v18 }
 0x1fe   : > { %v3517_v12 = vrot.slane %v3319_v63, %v10325_v24  ;;  %v3533_v30 = vrot.slane %v3320_v62, %v10325_v24  ;;  %v1955_v15 = vcombine.high %v11002_v17, %v11053_v18 }
 0x1ff   : > { %v3510_v39 = vcombine.high %v3509_v6, %v3509_v6  ;;  %v3919_v37 = vsel %vm1133_vm2, %v3509_v6, -inf  ;;  %v4252_v35 = vsel %vm1690_vm9, %v4190_v33, %v4251_v54  ;;  %v3526_v11 = vcombine.high %v3525_v48, %v3525_v48 }
 0x200   : > { %v3518_v59 = vcombine.high %v3517_v12, %v3517_v12  ;;  %v3920_v20 = vrot.slane %v3919_v37, 4  ;;  %4272 = vst [vmem:[#allocation2 + $0x68] sm:$0xff] %v4252_v35  ;;  %v3534_v29 = vcombine.high %v3533_v30, %v3533_v30  ;;  %v3933_v16 = vsel %vm1133_vm2, %v3517_v12, -inf }
 0x201   : > { %v3926_v44 = vsel %vm1133_vm2, %v3510_v39, -inf  ;;  %v3947_v2 = vsel %vm1133_vm2, %v3525_v48, -inf  ;;  %v3934_v25 = vrot.slane %v3933_v16, 4  ;;  %v3954_v55 = vsel %vm1133_vm2, %v3526_v11, -inf }
 0x202   : > { %v3921_v8 = vmax.f32 %v3919_v37, %v3920_v20  ;;  %v3927_v0 = vrot.slane %v3926_v44, 4  ;;  %v3940_v60 = vsel %vm1133_vm2, %v3518_v59, -inf  ;;  %v3948_v17 = vrot.slane %v3947_v2, 4 }
 0x203   : > { %v3941_v7 = vrot.slane %v3940_v60, 4  ;;  %v3961_v53 = vsel %vm1133_vm2, %v3533_v30, -inf  ;;  %v3935_v43 = vmax.f32 %v3933_v16, %v3934_v25  ;;  %v3955_v50 = vrot.slane %v3954_v55, 4 }
 0x204   : > { %v3922_v23 = vrot.slane %v3921_v8, 2  ;;  %v3928_v38 = vmax.f32 %v3926_v44, %v3927_v0  ;;  %v3949_v5 = vmax.f32 %v3947_v2, %v3948_v17  ;;  %v3962_v46 = vrot.slane %v3961_v53, 4  ;;  %v8715_v0 = vld [vmem:[%s14211_s3 + $0x1b8] sm:$0xff] }
 0x205   : > { %v3942_v57 = vmax.f32 %v3940_v60, %v3941_v7  ;;  %v3968_v13 = vsel %vm1133_vm2, %v3534_v29, -inf  ;;  %v3936_v56 = vrot.slane %v3935_v43, 2  ;;  %v3956_v27 = vmax.f32 %v3954_v55, %v3955_v50 }
 0x206   : > { %v3923_v28 = vmax.f32 %v3921_v8, %v3922_v23  ;;  %v3929_v10 = vrot.slane %v3928_v38, 2  ;;  %v3950_v52 = vrot.slane %v3949_v5, 2  ;;  %v3963_v40 = vmax.f32 %v3961_v53, %v3962_v46  ;;  %v8714_v8 = vld [vmem:[%s14211_s3 + $0x1b0] sm:$0xff] }
 0x207   : > { %v3943_v18 = vrot.slane %v3942_v57, 2  ;;  %v3969_v34 = vrot.slane %v3968_v13, 4  ;;  %v3937_v22 = vmax.f32 %v3935_v43, %v3936_v56  ;;  %v3957_v54 = vrot.slane %v3956_v27, 2  ;;  %v8699_v43 = vld [vmem:[%s14211_s3 + $0x138] sm:$0xff] }
 0x208   : > { %v3924_v45 = vrot.slane %v3923_v28, 1  ;;  %v3930_v63 = vmax.f32 %v3928_v38, %v3929_v10  ;;  %v3951_v6 = vmax.f32 %v3949_v5, %v3950_v52  ;;  %v3964_v33 = vrot.slane %v3963_v40, 2  ;;  %v8698_v38 = vld [vmem:[%s14211_s3 + $0x130] sm:$0xff] }
 0x209   : > { %v3944_v62 = vmax.f32 %v3942_v57, %v3943_v18  ;;  %v3970_v12 = vmax.f32 %v3968_v13, %v3969_v34  ;;  %v3938_v30 = vrot.slane %v3937_v22, 1  ;;  %v3958_v37 = vmax.f32 %v3956_v27, %v3957_v54  ;;  %v14305_v18 = vld [vmem:[#allocation22_spill] sm:$0xff] }
 0x20a   : > { %v11079_v48 = vmax.f32 %v3923_v28, %v3924_v45  ;;  %v3931_v39 = vrot.slane %v3930_v63, 1  ;;  %v3952_v59 = vrot.slane %v3951_v6, 1  ;;  %v3965_v11 = vmax.f32 %v3963_v40, %v3964_v33 }
 0x20b   : > { %v3945_v35 = vrot.slane %v3944_v62, 1  ;;  %v3971_v20 = vrot.slane %v3970_v12, 2  ;;  %v11083_v44 = vmax.f32 %v3937_v22, %v3938_v30  ;;  %v3959_v16 = vrot.slane %v3958_v37, 1 }
 0x20c   : > { %v11081_v29 = vmax.f32 %v3930_v63, %v3931_v39  ;;  %v1962_v2 = vrot.slane %v1954_v42, %v10325_v24  ;;  %v11094_v60 = vmax.f32 %v3951_v6, %v3952_v59  ;;  %v3966_v7 = vrot.slane %v3965_v11, 1 }
 0x20d   : > { %v11092_v25 = vmax.f32 %v3944_v62, %v3945_v35  ;;  %v3972_v17 = vmax.f32 %v3970_v12, %v3971_v20  ;;  %v11096_v55 = vmax.f32 %v3958_v37, %v3959_v16  ;;  %v1969_v53 = vrot.slane %v1955_v15, %v10325_v24 }
 0x20e   : > { %v1970_v23 = vcombine.high %v1962_v2, %v1962_v2  ;;  %v2104_v42 = vrot.slane %v1962_v2, %v10325_v24  ;;  %v11106_v50 = vmax.f32 %v3965_v11, %v3966_v7  ;;  %v11110_v5 = vadd.f32 %v14278_v3, %v11013_v58 }
 0x20f   : > { %v3973_v57 = vrot.slane %v3972_v17, 1  ;;  %v9574_v46 = vpack.c.bf16 %v8715_v0, %v8714_v8  ;;  %v1971_v15 = vcombine.high %v1969_v53, %v1969_v53  ;;  %v2120_v10 = vrot.slane %v1969_v53, %v10325_v24  ;;  %v11129_v0 = vpop.f32.mrb[24].mxu1 }
 0x210   : > { %v2105_v13 = vcombine.high %v2104_v42, %v2104_v42  ;;  %v2112_v28 = vrot.slane %v1970_v23, %v10325_v24  ;;  %v2418_v27 = vsel %vm1133_vm2, %v2104_v42, -inf  ;;  %v3182_v52 = vmul.f32 %v14280_v31, %v14305_v18  ;;  %14306 = vst [vmem:[#allocation20_spill] sm:$0xff] %v11129_v0 }
 0x211   : > { %v11114_v56 = vmax.f32 %v3972_v17, %v3973_v57  ;;  %9575 = vmatprep.subr.bf16.mxu0 %v9574_v46  ;;  %v9576_v40 = vpack.c.bf16 %v8699_v43, %v8698_v38  ;;  %v2121_v45 = vcombine.high %v2120_v10, %v2120_v10  ;;  %v2128_v58 = vrot.slane %v1971_v15, %v10325_v24 }
 0x212   : > { %v2113_v34 = vcombine.high %v2112_v28, %v2112_v28  ;;  %v2419_v63 = vrot.slane %v2418_v27, 4  ;;  %v2425_v22 = vsel %vm1133_vm2, %v2105_v13, -inf  ;;  %v2432_v54 = vsel %vm1133_vm2, %v2112_v28, -inf }
 0x213   : > { %v2446_v62 = vsel %vm1133_vm2, %v2120_v10, -inf  ;;  %v11124_v6 = vadd.f32 %v14281_v51, %v3182_v52  ;;  %9577 = vmatpush3.bf16.msra.mxu0 %v9576_v40  ;;  %v2129_v33 = vcombine.high %v2128_v58, %v2128_v58  ;;  %v2426_v39 = vrot.slane %v2425_v22, 4 }
 0x214   : > { %v2420_v12 = vmax.f32 %v2418_v27, %v2419_v63  ;;  %v2433_v30 = vrot.slane %v2432_v54, 4  ;;  %v2439_v37 = vsel %vm1133_vm2, %v2113_v34, -inf  ;;  %v2447_v35 = vrot.slane %v2446_v62, 4 }
 0x215   : > { %v2453_v59 = vsel %vm1133_vm2, %v2121_v45, -inf  ;;  %v2460_v11 = vsel %vm1133_vm2, %v2128_v58, -inf  ;;  %v2427_v16 = vmax.f32 %v2425_v22, %v2426_v39  ;;  %v2440_v8 = vrot.slane %v2439_v37, 4 }
 0x216   : > { %v2421_v20 = vrot.slane %v2420_v12, 2  ;;  %v2434_v2 = vmax.f32 %v2432_v54, %v2433_v30  ;;  %v2448_v7 = vmax.f32 %v2446_v62, %v2447_v35  ;;  %v2454_v17 = vrot.slane %v2453_v59, 4  ;;  %v5631_v35 = vld [vmem:[%s14211_s3 + $0xa8] sm:$0xff] }
 0x217   : > { %v2461_v53 = vrot.slane %v2460_v11, 4  ;;  %v2467_v23 = vsel %vm1133_vm2, %v2129_v33, -inf  ;;  %v2428_v38 = vrot.slane %v2427_v16, 2  ;;  %v2441_v57 = vmax.f32 %v2439_v37, %v2440_v8  ;;  %v5630_v37 = vld [vmem:[%s14211_s3 + $0xa0] sm:$0xff] }
 0x218   : > { %v2422_v42 = vmax.f32 %v2420_v12, %v2421_v20  ;;  %v2435_v43 = vrot.slane %v2434_v2, 2  ;;  %v2449_v46 = vrot.slane %v2448_v7, 2  ;;  %v2455_v15 = vmax.f32 %v2453_v59, %v2454_v17 }
 0x219   : > { %v2462_v13 = vmax.f32 %v2460_v11, %v2461_v53  ;;  %v2468_v28 = vrot.slane %v2467_v23, 4  ;;  %v2429_v27 = vmax.f32 %v2427_v16, %v2428_v38  ;;  %v2442_v52 = vrot.slane %v2441_v57, 2  ;;  %v5614_v53 = vld [vmem:[%s14211_s3 + $0x20] sm:$0xff] }
 0x21a   : > { %v2423_v10 = vrot.slane %v2422_v42, 1  ;;  %v2436_v18 = vmax.f32 %v2434_v2, %v2435_v43  ;;  %v2450_v40 = vmax.f32 %v2448_v7, %v2449_v46  ;;  %v2456_v34 = vrot.slane %v2455_v15, 2 }
 0x21b   : > { %v2463_v45 = vrot.slane %v2462_v13, 2  ;;  %v2469_v58 = vmax.f32 %v2467_v23, %v2468_v28  ;;  %v2430_v22 = vrot.slane %v2429_v27, 1  ;;  %v2443_v62 = vmax.f32 %v2441_v57, %v2442_v52  ;;  %v5615_v23 = vld [vmem:[%s14211_s3 + $0x28] sm:$0xff]  ;;  %v14314_v28 = vld [vmem:[#allocation11_spill] sm:$0xff] }
 0x21c   : > { %v11132_v63 = vmax.f32 %v2422_v42, %v2423_v10  ;;  %v2437_v54 = vrot.slane %v2436_v18, 1  ;;  %v2451_v33 = vrot.slane %v2450_v40, 1  ;;  %v2457_v12 = vmax.f32 %v2455_v15, %v2456_v34 }
 0x21d   : > { %v2464_v39 = vmax.f32 %v2462_v13, %v2463_v45  ;;  %v2470_v30 = vrot.slane %v2469_v58, 2  ;;  %v11140_v59 = vmax.f32 %v2429_v27, %v2430_v22  ;;  %v2444_v20 = vrot.slane %v2443_v62, 1 }
 0x21e   : > { %14307 = vst [vmem:[#allocation16_spill] sm:$0xff] %v11132_v63  ;;  %v11142_v11 = vmax.f32 %v2436_v18, %v2437_v54  ;;  %v3321_v16 = vcombine.low %v11110_v5, %v11124_v6  ;;  %v11146_v2 = vmax.f32 %v2450_v40, %v2451_v33  ;;  %v2458_v8 = vrot.slane %v2457_v12, 1 }
 0x21f   : > { %14308 = vst [vmem:[#allocation18_spill] sm:$0xff] %v11140_v59  ;;  %v2465_v7 = vrot.slane %v2464_v39, 1  ;;  %v2471_v17 = vmax.f32 %v2469_v58, %v2470_v30  ;;  %v11154_v42 = vmax.f32 %v2443_v62, %v2444_v20  ;;  %v3322_v38 = vcombine.high %v11110_v5, %v11124_v6  ;;  %v14316_v6 = vld [vmem:[#allocation9_spill] sm:$0xff]  ;;  %v14317_v58 = vld [vmem:[#allocation7_spill] sm:$0xff] }
 0x220   : > { %14309 = vst [vmem:[#allocation17_spill] sm:$0xff] %v11142_v11  ;;  %14310 = vst [vmem:[#allocation19_spill] sm:$0xff] %v11146_v2  ;;  %v3329_v43 = vrot.slane %v3321_v16, %v10325_v24  ;;  %v9602_v57 = vpack.c.bf16 %v5631_v35, %v5630_v37  ;;  %v11159_v46 = vmax.f32 %v2457_v12, %v2458_v8  ;;  %v14318_v35 = vld [vmem:[#allocation13_spill] sm:$0xff] }
 0x221   : > { %14311 = vst [vmem:[#allocation21_spill] sm:$0xff] %v11154_v42  ;;  %v11161_v15 = vmax.f32 %v2464_v39, %v2465_v7  ;;  %v2472_v13 = vrot.slane %v2471_v17, 1  ;;  %v3183_v10 = vmul.f32 %v10305_v9, %v14314_v28  ;;  %v3336_v27 = vrot.slane %v3322_v38, %v10325_v24 }
 0x222   : > { %14312 = vst [vmem:[#allocation12_spill] sm:$0xff] %v11159_v46  ;;  %v3337_v18 = vcombine.high %v3329_v43, %v3329_v43  ;;  %v3541_v52 = vrot.slane %v3329_v43, %v10325_v24  ;;  %9603 = vmatprep.subr.bf16.mxu1 %v9602_v57  ;;  %v9604_v40 = vpack.c.bf16 %v5615_v23, %v5614_v53  ;;  %v11190_v53 = vpop.f32.mrb[25].mxu1 }
 0x223   : > { %14313 = vst [vmem:[#allocation14_spill] sm:$0xff] %v11161_v15  ;;  %v11167_v34 = vmax.f32 %v2471_v17, %v2472_v13  ;;  %v11170_v5 = vadd.f32 %v14278_v3, %v3183_v10  ;;  %v1896_v45 = vmul.f32 %v10977_v61, %v14316_v6  ;;  %v3184_v22 = vmul.f32 %v14280_v31, %v14317_v58 }
 0x224   : > { %v3338_v54 = vcombine.high %v3336_v27, %v3336_v27  ;;  %v3542_v62 = vcombine.high %v3541_v52, %v3541_v52  ;;  %v3549_v33 = vrot.slane %v3337_v18, %v10325_v24  ;;  %v3557_v12 = vrot.slane %v3336_v27, %v10325_v24  ;;  %9605 = vmatpush3.bf16.msra.mxu1 %v9604_v40 }
 0x225   : > { %14315 = vst [vmem:[#allocation15_spill] sm:$0xff] %v11167_v34  ;;  %v3975_v39 = vsel %vm1133_vm2, %v3541_v52, -inf  ;;  %v11180_v30 = vadd.f32 %v10985_v4, %v1896_v45  ;;  %v11183_v37 = vadd.f32 %v14281_v51, %v3184_v22  ;;  %v11187_v20 = vmul.f32 %v10992_v19, %v14318_v35  ;;  %14319 = vst [vmem:[#allocation22_spill] sm:$0xff] %v11190_v53 }
 0x226   : > { %v3550_v16 = vcombine.high %v3549_v33, %v3549_v33  ;;  %v3558_v8 = vcombine.high %v3557_v12, %v3557_v12  ;;  %v3565_v7 = vrot.slane %v3338_v54, %v10325_v24  ;;  %v3976_v17 = vrot.slane %v3975_v39, 4 }
 0x227   : > { %v3982_v23 = vsel %vm1133_vm2, %v3542_v62, -inf  ;;  %v3989_v38 = vsel %vm1133_vm2, %v3549_v33, -inf  ;;  %v4003_v43 = vsel %vm1133_vm2, %v3557_v12, -inf  ;;  %v3339_v57 = vcombine.low %v11170_v5, %v11183_v37 }
 0x228   : > { %v3566_v13 = vcombine.high %v3565_v7, %v3565_v7  ;;  %v3977_v28 = vmax.f32 %v3975_v39, %v3976_v17  ;;  %v3983_v10 = vrot.slane %v3982_v23, 4  ;;  %v3990_v27 = vrot.slane %v3989_v38, 4 }
 0x229   : > { %v3996_v18 = vsel %vm1133_vm2, %v3550_v16, -inf  ;;  %v4004_v52 = vrot.slane %v4003_v43, 4  ;;  %v4010_v40 = vsel %vm1133_vm2, %v3558_v8, -inf  ;;  %v4017_v6 = vsel %vm1133_vm2, %v3565_v7, -inf }
 0x22a   : > { %v3978_v45 = vrot.slane %v3977_v28, 2  ;;  %v3984_v58 = vmax.f32 %v3982_v23, %v3983_v10  ;;  %v3991_v22 = vmax.f32 %v3989_v38, %v3990_v27  ;;  %v3997_v54 = vrot.slane %v3996_v18, 4  ;;  %v11201_v27 = vpop.f32.mrb[26].mxu1 }
 0x22b   : > { %v4005_v62 = vmax.f32 %v4003_v43, %v4004_v52  ;;  %v4011_v33 = vrot.slane %v4010_v40, 4  ;;  %v4018_v12 = vrot.slane %v4017_v6, 4  ;;  %v4024_v35 = vsel %vm1133_vm2, %v3566_v13, -inf  ;;  %14320 = vst [vmem:[#allocation11_spill] sm:$0xff] %v11201_v27 }
 0x22c   : > { %v3979_v47 = vmax.f32 %v3977_v28, %v3978_v45  ;;  %v3985_v39 = vrot.slane %v3984_v58, 2  ;;  %v3992_v17 = vrot.slane %v3991_v22, 2  ;;  %v3998_v41 = vmax.f32 %v3996_v18, %v3997_v54  ;;  %v11205_v18 = vpop.f32.mrb[27].mxu1 }
 0x22d   : > { %v4006_v53 = vrot.slane %v4005_v62, 2  ;;  %v4012_v16 = vmax.f32 %v4010_v40, %v4011_v33  ;;  %v4019_v0 = vmax.f32 %v4017_v6, %v4018_v12  ;;  %v4025_v34 = vrot.slane %v4024_v35, 4  ;;  %14321 = vst [vmem:[#allocation9_spill] sm:$0xff] %v11205_v18  ;;  %v11258_v27 = vpop.f32.mrb[28].mxu1 }
 0x22e   : > { %v3980_v8 = vrot.slane %v3979_v47, 1  ;;  %v3986_v15 = vmax.f32 %v3984_v58, %v3985_v39  ;;  %v3993_v7 = vmax.f32 %v3991_v22, %v3992_v17  ;;  %v3999_v46 = vrot.slane %v3998_v41, 2  ;;  %v8701_v17 = vld [vmem:[%s14211_s3 + $0x148] sm:$0xff]  ;;  %14324 = vst [vmem:[#allocation23_spill] sm:$0xff] %v11258_v27 }
 0x22f   : > { %v4007_v23 = vmax.f32 %v4005_v62, %v4006_v53  ;;  %v4013_v38 = vrot.slane %v4012_v16, 2  ;;  %v4020_v10 = vrot.slane %v4019_v0, 2  ;;  %v4026_v43 = vmax.f32 %v4024_v35, %v4025_v34 }
 0x230   : > { %v11203_v52 = vmax.f32 %v3979_v47, %v3980_v8  ;;  %v3987_v13 = vrot.slane %v3986_v15, 1  ;;  %v3994_v28 = vrot.slane %v3993_v7, 1  ;;  %v4000_v45 = vmax.f32 %v3998_v41, %v3999_v46  ;;  %v8716_v47 = vld [vmem:[%s14211_s3 + $0x1c0] sm:$0xff]  ;;  %v8717_v41 = vld [vmem:[%s14211_s3 + $0x1c8] sm:$0xff] }
 0x231   : > { %v4008_v40 = vrot.slane %v4007_v23, 1  ;;  %v4014_v6 = vmax.f32 %v4012_v16, %v4013_v38  ;;  %v4021_v54 = vmax.f32 %v4019_v0, %v4020_v10  ;;  %v4027_v33 = vrot.slane %v4026_v43, 2 }
 0x232   : > { %v11207_v58 = vmax.f32 %v3986_v15, %v3987_v13  ;;  %v11209_v22 = vmax.f32 %v3993_v7, %v3994_v28  ;;  %v4001_v53 = vrot.slane %v4000_v45, 1  ;;  %v3340_v34 = vcombine.high %v11170_v5, %v11183_v37  ;;  %v8700_v37 = vld [vmem:[%s14211_s3 + $0x140] sm:$0xff] }
 0x233   : > { %v11219_v46 = vmax.f32 %v4007_v23, %v4008_v40  ;;  %v4015_v0 = vrot.slane %v4014_v6, 1  ;;  %v4022_v62 = vrot.slane %v4021_v54, 1  ;;  %v4028_v15 = vmax.f32 %v4026_v43, %v4027_v33 }
 0x234   : > { %v11221_v12 = vmax.f32 %v4000_v45, %v4001_v53  ;;  %v3347_v35 = vrot.slane %v3339_v57, %v10325_v24  ;;  %v3354_v39 = vrot.slane %v3340_v34, %v10325_v24  ;;  %v1925_v5 = vadd.f32 %v10995_v1, %v11187_v20 }
 0x235   : > { %v11233_v16 = vmax.f32 %v4014_v6, %v4015_v0  ;;  %v11235_v8 = vmax.f32 %v4021_v54, %v4022_v62  ;;  %v4029_v7 = vrot.slane %v4028_v15, 1  ;;  %v9578_v23 = vpack.c.bf16 %v8717_v41, %v8716_v47 }
 0x236   : > { %v3355_v57 = vcombine.high %v3347_v35, %v3347_v35  ;;  %v3356_v38 = vcombine.high %v3354_v39, %v3354_v39  ;;  %v3573_v10 = vrot.slane %v3347_v35, %v10325_v24  ;;  %v3589_v20 = vrot.slane %v3354_v39, %v10325_v24 }
 0x237   : > { %14322 = vst [vmem:[#allocation7_spill] sm:$0xff] %v11235_v8  ;;  %v11239_v43 = vmax.f32 %v4028_v15, %v4029_v7  ;;  %v1972_v13 = vcombine.low %v11180_v30, %v1925_v5  ;;  %v1973_v28 = vcombine.high %v11180_v30, %v1925_v5  ;;  %9579 = vmatprep.subr.bf16.mxu0 %v9578_v23 }
 0x238   : > { %v9580_v45 = vpack.c.bf16 %v8701_v17, %v8700_v37  ;;  %v3574_v40 = vcombine.high %v3573_v10, %v3573_v10  ;;  %v3581_v6 = vrot.slane %v3355_v57, %v10325_v24  ;;  %v3590_v54 = vcombine.high %v3589_v20, %v3589_v20 }
 0x239   : > { %14323 = vst [vmem:[#allocation13_spill] sm:$0xff] %v11239_v43  ;;  %v3597_v33 = vrot.slane %v3356_v38, %v10325_v24  ;;  %v4031_v53 = vsel %vm1133_vm2, %v3573_v10, -inf  ;;  %v4059_v34 = vsel %vm1133_vm2, %v3589_v20, -inf  ;;  %v11248_v47 = vrot.slane %v1972_v13, %v10325_v24 }
 0x23a   : > { %v11251_v41 = vrot.slane %v1973_v28, %v10325_v24  ;;  %9581 = vmatpush3.bf16.msra.mxu0 %v9580_v45  ;;  %v3582_v30 = vcombine.high %v3581_v6, %v3581_v6  ;;  %v4032_v62 = vrot.slane %v4031_v53, 4  ;;  %v4038_v15 = vsel %vm1133_vm2, %v3574_v40, -inf }
 0x23b   : > { %v3598_v0 = vcombine.high %v3597_v33, %v3597_v33  ;;  %v4039_v35 = vrot.slane %v4038_v15, 4  ;;  %v4045_v39 = vsel %vm1133_vm2, %v3581_v6, -inf  ;;  %v4060_v5 = vrot.slane %v4059_v34, 4 }
 0x23c   : > { %v4066_v37 = vsel %vm1133_vm2, %v3590_v54, -inf  ;;  %v4033_v17 = vmax.f32 %v4031_v53, %v4032_v62  ;;  %v4046_v7 = vrot.slane %v4045_v39, 4  ;;  %v4052_v23 = vsel %vm1133_vm2, %v3582_v30, -inf  ;;  %v11261_v53 = vpop.f32.mrb[29].mxu1 }
 0x23d   : > { %v4067_v57 = vrot.slane %v4066_v37, 4  ;;  %v4040_v38 = vmax.f32 %v4038_v15, %v4039_v35  ;;  %v4053_v10 = vrot.slane %v4052_v23, 4  ;;  %v4061_v20 = vmax.f32 %v4059_v34, %v4060_v5  ;;  %14325 = vst [vmem:[#allocation24_spill] sm:$0xff] %v11261_v53 }
 0x23e   : > { %v4073_v13 = vsel %vm1133_vm2, %v3597_v33, -inf  ;;  %v4034_v28 = vrot.slane %v4033_v17, 2  ;;  %v4047_v45 = vmax.f32 %v4045_v39, %v4046_v7  ;;  %v4080_v54 = vsel %vm1133_vm2, %v3598_v0, -inf }
 0x23f   : > { %v4068_v18 = vmax.f32 %v4066_v37, %v4067_v57  ;;  %v4074_v40 = vrot.slane %v4073_v13, 4  ;;  %v4041_v6 = vrot.slane %v4040_v38, 2  ;;  %v4054_v2 = vmax.f32 %v4052_v23, %v4053_v10 }
 0x240   : > { %v4062_v42 = vrot.slane %v4061_v20, 2  ;;  %v4035_v30 = vmax.f32 %v4033_v17, %v4034_v28  ;;  %v4048_v62 = vrot.slane %v4047_v45, 2  ;;  %v4081_v11 = vrot.slane %v4080_v54, 4 }
 0x241   : > { %v4069_v15 = vrot.slane %v4068_v18, 2  ;;  %v4075_v35 = vmax.f32 %v4073_v13, %v4074_v40  ;;  %v4042_v34 = vmax.f32 %v4040_v38, %v4041_v6  ;;  %v4055_v5 = vrot.slane %v4054_v2, 2 }
 0x242   : > { %v4063_v33 = vmax.f32 %v4061_v20, %v4062_v42  ;;  %v4036_v39 = vrot.slane %v4035_v30, 1  ;;  %v4049_v37 = vmax.f32 %v4047_v45, %v4048_v62  ;;  %v4082_v10 = vmax.f32 %v4080_v54, %v4081_v11 }
 0x243   : > { %v4070_v7 = vmax.f32 %v4068_v18, %v4069_v15  ;;  %v4076_v57 = vrot.slane %v4075_v35, 2  ;;  %v4043_v27 = vrot.slane %v4042_v34, 1  ;;  %v4056_v59 = vmax.f32 %v4054_v2, %v4055_v5 }
 0x244   : > { %v4064_v23 = vrot.slane %v4063_v33, 1  ;;  %v4037_v63 = vmax.f32 %v4035_v30, %v4036_v39  ;;  %v4050_v0 = vrot.slane %v4049_v37, 1  ;;  %v4083_v13 = vrot.slane %v4082_v10, 2 }
 0x245   : > { %v4071_v43 = vrot.slane %v4070_v7, 1  ;;  %v4077_v53 = vmax.f32 %v4075_v35, %v4076_v57  ;;  %v4044_v17 = vmax.f32 %v4042_v34, %v4043_v27  ;;  %v4057_v28 = vrot.slane %v4056_v59, 1 }
 0x246   : > { %v4065_v8 = vmax.f32 %v4063_v33, %v4064_v23  ;;  %v4051_v38 = vmax.f32 %v4049_v37, %v4050_v0  ;;  %v4159_v20 = vmax.f32 %v11079_v48, %v4037_v63  ;;  %v4084_v18 = vmax.f32 %v4082_v10, %v4083_v13 }
 0x247   : > { %v4072_v40 = vmax.f32 %v4070_v7, %v4071_v43  ;;  %v4078_v42 = vrot.slane %v4077_v53, 1  ;;  %v4058_v45 = vmax.f32 %v4056_v59, %v4057_v28  ;;  %v4160_v6 = vmax.f32 %v11081_v29, %v4044_v17 }
 0x248   : > { %v4163_v2 = vmax.f32 %v11094_v60, %v4065_v8  ;;  %v4161_v54 = vmax.f32 %v11083_v44, %v4051_v38  ;;  %v4191_v27 = vmax.f32 %v4159_v20, 0.0  ;;  %v4085_v62 = vrot.slane %v4084_v18, 1 }
 0x249   : > { %v4079_v11 = vmax.f32 %v4077_v53, %v4078_v42  ;;  %v4164_v30 = vmax.f32 %v11096_v55, %v4072_v40  ;;  %v4162_v15 = vmax.f32 %v11092_v25, %v4058_v45  ;;  %v4192_v35 = vmax.f32 %v4160_v6, 0.0 }
 0x24a   : > { %v4195_v43 = vmax.f32 %v4163_v2, 0.0  ;;  %v4193_v48 = vmax.f32 %v4161_v54, 0.0  ;;  %v1988_v29 = vcombine.high %v11248_v47, %v11248_v47  ;;  %v4086_v59 = vmax.f32 %v4084_v18, %v4085_v62 }
 0x24b   : > { %v4165_v34 = vmax.f32 %v11106_v50, %v4079_v11  ;;  %v4196_v63 = vmax.f32 %v4164_v30, 0.0  ;;  %v4194_v60 = vmax.f32 %v4162_v15, 0.0  ;;  %v1989_v44 = vcombine.high %v11251_v41, %v11251_v41 }
 0x24c   : > { %v2136_v55 = vrot.slane %v11248_v47, %v10325_v24  ;;  %v4253_v25 = vsel %vm1678_vm3, %v4193_v48, %v4191_v27  ;;  %v2144_v53 = vrot.slane %v1988_v29, %v10325_v24  ;;  %v2152_v50 = vrot.slane %v11251_v41, %v10325_v24 }
 0x24d   : > { %v4197_v8 = vmax.f32 %v4165_v34, 0.0  ;;  %v4166_v5 = vmax.f32 %v11114_v56, %v4086_v59  ;;  %v4254_v33 = vsel %vm1680_vm4, %v4195_v43, %v4253_v25  ;;  %v4260_v39 = vsel %vm1678_vm3, %v4194_v60, %v4192_v35 }
 0x24e   : > { %v2137_v37 = vcombine.high %v2136_v55, %v2136_v55  ;;  %v4261_v47 = vsel %vm1680_vm4, %v4196_v63, %v4260_v39  ;;  %v2145_v57 = vcombine.high %v2144_v53, %v2144_v53  ;;  %v2153_v23 = vcombine.high %v2152_v50, %v2152_v50 }
 0x24f   : > { %v11284_v7 = vsel %vm1682_vm5, %v4197_v8, %v4254_v33  ;;  %v4198_v10 = vmax.f32 %v4166_v5, 0.0  ;;  %v2160_v0 = vrot.slane %v1989_v44, %v10325_v24  ;;  %v2474_v17 = vsel %vm1133_vm2, %v2136_v55, -inf }
 0x250   : > { %v2481_v41 = vsel %vm1133_vm2, %v2137_v37, -inf  ;;  %v2475_v56 = vrot.slane %v2474_v17, 4  ;;  %v2488_v13 = vsel %vm1133_vm2, %v2144_v53, -inf  ;;  %v2495_v38 = vsel %vm1133_vm2, %v2145_v57, -inf }
 0x251   : > { %v2482_v28 = vrot.slane %v2481_v41, 4  ;;  %v11293_v40 = vsel %vm1682_vm5, %v4198_v10, %v4261_v47  ;;  %v2161_v42 = vcombine.high %v2160_v0, %v2160_v0  ;;  %v2489_v20 = vrot.slane %v2488_v13, 4 }
 0x252   : > { %v2496_v45 = vrot.slane %v2495_v38, 4  ;;  %v2476_v18 = vmax.f32 %v2474_v17, %v2475_v56  ;;  %v2502_v2 = vsel %vm1133_vm2, %v2152_v50, -inf  ;;  %v2509_v11 = vsel %vm1133_vm2, %v2153_v23, -inf  ;;  %v5632_v17 = vld [vmem:[%s14211_s3 + $0xb0] sm:$0xff] }
 0x253   : > { %v2483_v6 = vmax.f32 %v2481_v41, %v2482_v28  ;;  %v2490_v54 = vmax.f32 %v2488_v13, %v2489_v20  ;;  %v2503_v27 = vrot.slane %v2502_v2, 4  ;;  %v2510_v62 = vrot.slane %v2509_v11, 4  ;;  %v5633_v41 = vld [vmem:[%s14211_s3 + $0xb8] sm:$0xff] }
 0x254   : > { %v2497_v30 = vmax.f32 %v2495_v38, %v2496_v45  ;;  %v2477_v15 = vrot.slane %v2476_v18, 2  ;;  %v2516_v43 = vsel %vm1133_vm2, %v2160_v0, -inf  ;;  %v2523_v34 = vsel %vm1133_vm2, %v2161_v42, -inf  ;;  %v5616_v42 = vld [vmem:[%s14211_s3 + $0x30] sm:$0xff]  ;;  %v5617_v20 = vld [vmem:[%s14211_s3 + $0x38] sm:$0xff] }
 0x255   : > { %v2484_v35 = vrot.slane %v2483_v6, 2  ;;  %v2491_v48 = vrot.slane %v2490_v54, 2  ;;  %v2504_v29 = vmax.f32 %v2502_v2, %v2503_v27  ;;  %v2511_v59 = vmax.f32 %v2509_v11, %v2510_v62  ;;  %v8718_v11 = vld [vmem:[%s14211_s3 + $0x1d0] sm:$0xff] }
 0x256   : > { %v2498_v63 = vrot.slane %v2497_v30, 2  ;;  %v2478_v60 = vmax.f32 %v2476_v18, %v2477_v15  ;;  %v2517_v55 = vrot.slane %v2516_v43, 4  ;;  %v2524_v8 = vrot.slane %v2523_v34, 4 }
 0x257   : > { %v2485_v44 = vmax.f32 %v2483_v6, %v2484_v35  ;;  %v2492_v25 = vmax.f32 %v2490_v54, %v2491_v48  ;;  %v2505_v50 = vrot.slane %v2504_v29, 2  ;;  %v2512_v5 = vrot.slane %v2511_v59, 2  ;;  %v11322_v54 = vpop.f32.mrb[30].mxu1  ;;  %v8719_v35 = vld [vmem:[%s14211_s3 + $0x1d8] sm:$0xff] }
 0x258   : > { %v2499_v53 = vmax.f32 %v2497_v30, %v2498_v63  ;;  %v2479_v33 = vrot.slane %v2478_v60, 1  ;;  %v2518_v37 = vmax.f32 %v2516_v43, %v2517_v55  ;;  %v2525_v47 = vmax.f32 %v2523_v34, %v2524_v8  ;;  %v8702_v43 = vld [vmem:[%s14211_s3 + $0x150] sm:$0xff]  ;;  %v8703_v34 = vld [vmem:[%s14211_s3 + $0x158] sm:$0xff]  ;;  %v11335_v48 = vpop.f32.mrb[31].mxu1 }
 0x259   : > { %v2486_v39 = vrot.slane %v2485_v44, 1  ;;  %v2493_v57 = vrot.slane %v2492_v25, 1  ;;  %v2506_v10 = vmax.f32 %v2504_v29, %v2505_v50  ;;  %v2513_v0 = vmax.f32 %v2511_v59, %v2512_v5 }
 0x25a   : > { %v2500_v23 = vrot.slane %v2499_v53, 1  ;;  %v11305_v56 = vmax.f32 %v2478_v60, %v2479_v33  ;;  %v2519_v13 = vrot.slane %v2518_v37, 2  ;;  %v2526_v38 = vrot.slane %v2525_v47, 2  ;;  %v5635_v60 = vld [vmem:[%s14211_s3 + $0xc8] sm:$0xff] }
 0x25b   : > { %v11307_v28 = vmax.f32 %v2485_v44, %v2486_v39  ;;  %v11315_v45 = vmax.f32 %v2492_v25, %v2493_v57  ;;  %v2507_v6 = vrot.slane %v2506_v10, 1  ;;  %v2514_v2 = vrot.slane %v2513_v0, 1 }
 0x25c   : > { %v11317_v18 = vmax.f32 %v2499_v53, %v2500_v23  ;;  %v2520_v30 = vmax.f32 %v2518_v37, %v2519_v13  ;;  %v2527_v27 = vmax.f32 %v2525_v47, %v2526_v38  ;;  %v9606_v62 = vpack.c.bf16 %v5633_v41, %v5632_v17  ;;  %v5619_v53 = vld [vmem:[%s14211_s3 + $0x48] sm:$0xff]  ;;  %v5637_v13 = vld [vmem:[%s14211_s3 + $0xd8] sm:$0xff] }
 0x25d   : > { %v3185_v15 = vmul.f32 %v10305_v9, %v10924_v21  ;;  %v11337_v63 = vmax.f32 %v2506_v10, %v2507_v6  ;;  %v11339_v29 = vmax.f32 %v2513_v0, %v2514_v2  ;;  %v9608_v59 = vpack.c.bf16 %v5617_v20, %v5616_v42  ;;  %v5634_v21 = vld [vmem:[%s14211_s3 + $0xc0] sm:$0xff]  ;;  %v8705_v41 = vld [vmem:[%s14211_s3 + $0x168] sm:$0xff] }
 0x25e   : > { %v1898_v9 = vmul.f32 %v10977_v61, %v10968_v49  ;;  %v2521_v44 = vrot.slane %v2520_v30, 1  ;;  %v2528_v55 = vrot.slane %v2527_v27, 1  ;;  %9607 = vmatprep.subr.bf16.mxu1 %v9606_v62  ;;  %v3186_v25 = vmul.f32 %v14280_v31, %v10928_v36  ;;  %v5618_v49 = vld [vmem:[%s14211_s3 + $0x40] sm:$0xff]  ;;  %v8721_v31 = vld [vmem:[%s14211_s3 + $0x1e8] sm:$0xff] }
 0x25f   : > { %v3213_v8 = vadd.f32 %v14278_v3, %v3185_v15  ;;  %9609 = vmatpush3.bf16.msra.mxu1 %v9608_v59  ;;  %v1899_v5 = vmul.f32 %v10992_v19, %v10999_v26  ;;  %v9582_v33 = vpack.c.bf16 %v8719_v35, %v8718_v11  ;;  %v9584_v39 = vpack.c.bf16 %v8703_v34, %v8702_v43  ;;  %v8720_v3 = vld [vmem:[%s14211_s3 + $0x1e0] sm:$0xff] }
 0x260   : > { %v1926_v50 = vadd.f32 %v10985_v4, %v1898_v9  ;;  %v11367_v36 = vmax.f32 %v2520_v30, %v2521_v44  ;;  %v11369_v37 = vmax.f32 %v2527_v27, %v2528_v55  ;;  %v3214_v47 = vadd.f32 %v14281_v51, %v3186_v25  ;;  %v8704_v26 = vld [vmem:[%s14211_s3 + $0x160] sm:$0xff]  ;;  %v5636_v51 = vld [vmem:[%s14211_s3 + $0xd0] sm:$0xff] }
 0x261   : > { %v9610_v57 = vpack.c.bf16 %v5635_v60, %v5634_v21  ;;  %v1927_v23 = vadd.f32 %v10995_v1, %v1899_v5  ;;  %9583 = vmatprep.subr.bf16.mxu0 %v9582_v33  ;;  %v9612_v10 = vpack.c.bf16 %v5619_v53, %v5618_v49  ;;  %v1900_v0 = vmul.f32 %v10977_v61, %v11044_v32  ;;  %v14326_v38 = vld [vmem:[#allocation8_spill] sm:$0xff] }
 0x262   : > { %v1901_v17 = vmul.f32 %v10992_v19, %v11055_v14  ;;  %v11390_v42 = vrot.slane %v14326_v38, 1  ;;  %v3357_v20 = vcombine.low %v3213_v8, %v3214_v47  ;;  %v3358_v32 = vcombine.high %v3213_v8, %v3214_v47  ;;  %9585 = vmatpush3.bf16.msra.mxu0 %v9584_v39 }
 0x263   : > { %9611 = vmatprep.subr.bf16.mxu1 %v9610_v57  ;;  %v9586_v14 = vpack.c.bf16 %v8721_v31, %v8720_v3  ;;  %v1990_v6 = vcombine.low %v1926_v50, %v1927_v23  ;;  %v1991_v2 = vcombine.high %v1926_v50, %v1927_v23  ;;  %v11393_v11 = vadd.f32 %v10985_v4, %v1900_v0 }
 0x264   : > { %14327 = vst [vmem:[#allocation8_spill] sm:$0xff] %v11390_v42  ;;  %9613 = vmatpush3.bf16.msra.mxu1 %v9612_v10  ;;  %v11396_v30 = vadd.f32 %v10995_v1, %v1901_v17  ;;  %v3365_v27 = vrot.slane %v3357_v20, %v10325_v24  ;;  %v3372_v62 = vrot.slane %v3358_v32, %v10325_v24 }
 0x265   : > { %9587 = vmatprep.subr.bf16.mxu0 %v9586_v14  ;;  %v9588_v15 = vpack.c.bf16 %v8705_v41, %v8704_v26  ;;  %v9614_v35 = vpack.c.bf16 %v5637_v13, %v5636_v51  ;;  %v1998_v43 = vrot.slane %v1990_v6, %v10325_v24  ;;  %v11402_v34 = vrot.slane %v1991_v2, %v10325_v24 }
 0x266   : > { %v3373_v21 = vcombine.high %v3365_v27, %v3365_v27  ;;  %v3374_v60 = vcombine.high %v3372_v62, %v3372_v62  ;;  %v3605_v44 = vrot.slane %v3365_v27, %v10325_v24  ;;  %v3621_v55 = vrot.slane %v3372_v62, %v10325_v24 }
 0x267   : > { %9589 = vmatpush3.bf16.msra.mxu0 %v9588_v15  ;;  %v2006_v8 = vcombine.high %v1998_v43, %v1998_v43  ;;  %v2007_v25 = vcombine.high %v11402_v34, %v11402_v34  ;;  %v11413_v49 = vrot.slane %v1998_v43, %v10325_v24  ;;  %v11417_v53 = vrot.slane %v11402_v34, %v10325_v24 }
 0x268   : > { %9615 = vmatprep.subr.bf16.mxu1 %v9614_v35  ;;  %v3606_v50 = vcombine.high %v3605_v44, %v3605_v44  ;;  %v3613_v5 = vrot.slane %v3373_v21, %v10325_v24  ;;  %v3622_v33 = vcombine.high %v3621_v55, %v3621_v55  ;;  %v3629_v39 = vrot.slane %v3374_v60, %v10325_v24 }
 0x269   : > { %v4087_v3 = vsel %vm1133_vm2, %v3605_v44, -inf  ;;  %v4115_v31 = vsel %vm1133_vm2, %v3621_v55, -inf  ;;  %v11426_v57 = vrot.slane %v2006_v8, %v10325_v24  ;;  %v14330_v34 = vcombine.high %v11413_v49, %v11413_v49 }
 0x26a   : > { %v3614_v26 = vcombine.high %v3613_v5, %v3613_v5  ;;  %v3630_v23 = vcombine.high %v3629_v39, %v3629_v39  ;;  %v4088_v10 = vrot.slane %v4087_v3, 4  ;;  %v4094_v0 = vsel %vm1133_vm2, %v3606_v50, -inf }
 0x26b   : > { %v4095_v17 = vrot.slane %v4094_v0, 4  ;;  %v4101_v41 = vsel %vm1133_vm2, %v3613_v5, -inf  ;;  %v4116_v51 = vrot.slane %v4115_v31, 4  ;;  %v4122_v13 = vsel %vm1133_vm2, %v3622_v33, -inf }
 0x26c   : > { %v4089_v38 = vmax.f32 %v4087_v3, %v4088_v10  ;;  %v4102_v20 = vrot.slane %v4101_v41, 4  ;;  %v4108_v32 = vsel %vm1133_vm2, %v3614_v26, -inf  ;;  %v4123_v14 = vrot.slane %v4122_v13, 4 }
 0x26d   : > { %v4096_v6 = vmax.f32 %v4094_v0, %v4095_v17  ;;  %v4109_v2 = vrot.slane %v4108_v32, 4  ;;  %v4117_v27 = vmax.f32 %v4115_v31, %v4116_v51  ;;  %v4129_v62 = vsel %vm1133_vm2, %v3629_v39, -inf }
 0x26e   : > { %v4090_v15 = vrot.slane %v4089_v38, 2  ;;  %v4103_v35 = vmax.f32 %v4101_v41, %v4102_v20  ;;  %v4124_v43 = vmax.f32 %v4122_v13, %v4123_v14  ;;  %v4130_v21 = vrot.slane %v4129_v62, 4 }
 0x26f   : > { %v4097_v60 = vrot.slane %v4096_v6, 2  ;;  %v4110_v44 = vmax.f32 %v4108_v32, %v4109_v2  ;;  %v4118_v55 = vrot.slane %v4117_v27, 2  ;;  %v4136_v8 = vsel %vm1133_vm2, %v3630_v23, -inf }
 0x270   : > { %v4091_v50 = vmax.f32 %v4089_v38, %v4090_v15  ;;  %v4104_v5 = vrot.slane %v4103_v35, 2  ;;  %v4125_v33 = vrot.slane %v4124_v43, 2  ;;  %v4131_v3 = vmax.f32 %v4129_v62, %v4130_v21 }
 0x271   : > { %v4098_v26 = vmax.f32 %v4096_v6, %v4097_v60  ;;  %v4111_v10 = vrot.slane %v4110_v44, 2  ;;  %v4119_v0 = vmax.f32 %v4117_v27, %v4118_v55  ;;  %v4137_v17 = vrot.slane %v4136_v8, 4  ;;  %v11434_v6 = vpop.f32.mrb[32].mxu1 }
 0x272   : > { %v4092_v31 = vrot.slane %v4091_v50, 1  ;;  %v4105_v51 = vmax.f32 %v4103_v35, %v4104_v5  ;;  %v4126_v39 = vmax.f32 %v4124_v43, %v4125_v33  ;;  %v4132_v9 = vrot.slane %v4131_v3, 2 }
 0x273   : > { %v4099_v41 = vrot.slane %v4098_v26, 1  ;;  %v4112_v13 = vmax.f32 %v4110_v44, %v4111_v10  ;;  %v4120_v20 = vrot.slane %v4119_v0, 1  ;;  %v4138_v14 = vmax.f32 %v4136_v8, %v4137_v17 }
 0x274   : > { %v4093_v32 = vmax.f32 %v4091_v50, %v4092_v31  ;;  %v4106_v2 = vrot.slane %v4105_v51, 1  ;;  %v4127_v59 = vrot.slane %v4126_v39, 1  ;;  %v4133_v23 = vmax.f32 %v4131_v3, %v4132_v9 }
 0x275   : > { %v4100_v38 = vmax.f32 %v4098_v26, %v4099_v41  ;;  %v4113_v15 = vrot.slane %v4112_v13, 1  ;;  %v4121_v47 = vmax.f32 %v4119_v0, %v4120_v20  ;;  %v4139_v62 = vrot.slane %v4138_v14, 2  ;;  %v14328_v0 = vld [vmem:[#allocation7_spill] sm:$0xff] }
 0x276   : > { %v4107_v27 = vmax.f32 %v4105_v51, %v4106_v2  ;;  %v4128_v21 = vmax.f32 %v4126_v39, %v4127_v59  ;;  %v4134_v60 = vrot.slane %v4133_v23, 1  ;;  %v4167_v35 = vmax.f32 %v11203_v52, %v4093_v32 }
 0x277   : > { %v4114_v43 = vmax.f32 %v4112_v13, %v4113_v15  ;;  %v4140_v55 = vmax.f32 %v4138_v14, %v4139_v62  ;;  %v4168_v44 = vmax.f32 %v11207_v58, %v4100_v38  ;;  %v4171_v8 = vmax.f32 %v11219_v46, %v4121_v47 }
 0x278   : > { %v4135_v50 = vmax.f32 %v4133_v23, %v4134_v60  ;;  %v4169_v9 = vmax.f32 %v11209_v22, %v4107_v27  ;;  %v4172_v5 = vmax.f32 %v11233_v16, %v4128_v21  ;;  %v4199_v33 = vmax.f32 %v4167_v35, 0.0 }
 0x279   : > { %v4141_v3 = vrot.slane %v4140_v55, 1  ;;  %v4170_v26 = vmax.f32 %v11221_v12, %v4114_v43  ;;  %v4200_v10 = vmax.f32 %v4168_v44, 0.0  ;;  %v4203_v59 = vmax.f32 %v4171_v8, 0.0 }
 0x27a   : > { %v4173_v17 = vmax.f32 %v14328_v0, %v4135_v50  ;;  %v4201_v52 = vmax.f32 %v4169_v9, 0.0  ;;  %v4204_v31 = vmax.f32 %v4172_v5, 0.0  ;;  %v4256_v58 = vsel %vm1684_vm6, %v4199_v33, %v11284_v7  ;;  %v14329_v7 = vld [vmem:[#allocation13_spill] sm:$0xff]  ;;  %v11475_v50 = vpop.f32.mrb[33].mxu1 }
 0x27b   : > { %v4142_v51 = vmax.f32 %v4140_v55, %v4141_v3  ;;  %v4202_v46 = vmax.f32 %v4170_v26, 0.0  ;;  %v4263_v22 = vsel %vm1684_vm6, %v4200_v10, %v11293_v40  ;;  %v2177_v16 = vcombine.high %v11426_v57, %v11426_v57 }
 0x27c   : > { %v4205_v47 = vmax.f32 %v4173_v17, 0.0  ;;  %v4257_v12 = vsel %vm1686_vm7, %v4201_v52, %v4256_v58  ;;  %v2185_v39 = vcombine.high %v11417_v53, %v11417_v53  ;;  %v2192_v41 = vrot.slane %v2007_v25, %v10325_v24 }
 0x27d   : > { %v4174_v13 = vmax.f32 %v14329_v7, %v4142_v51  ;;  %v4258_v20 = vsel %vm1688_vm8, %v4203_v59, %v4257_v12  ;;  %v4264_v40 = vsel %vm1686_vm7, %v4202_v46, %v4263_v22  ;;  %v2530_v14 = vsel %vm1133_vm2, %v11413_v49, -inf }
 0x27e   : > { %v4259_v32 = vsel %vm1690_vm9, %v4205_v47, %v4258_v20  ;;  %v4265_v2 = vsel %vm1688_vm8, %v4204_v31, %v4264_v40  ;;  %v2193_v23 = vcombine.high %v2192_v41, %v2192_v41  ;;  %v2531_v38 = vrot.slane %v2530_v14, 4 }
 0x27f   : > { %v4206_v15 = vmax.f32 %v4174_v13, 0.0  ;;  %4273 = vst [vmem:[#allocation2 + $0x70] sm:$0xff] %v4259_v32  ;;  %v2537_v25 = vsel %vm1133_vm2, %v14330_v34, -inf  ;;  %v2544_v62 = vsel %vm1133_vm2, %v11426_v57, -inf  ;;  %v2551_v27 = vsel %vm1133_vm2, %v2177_v16, -inf }
 0x280   : > { %v2532_v21 = vmax.f32 %v2530_v14, %v2531_v38  ;;  %v2538_v60 = vrot.slane %v2537_v25, 4  ;;  %v2545_v35 = vrot.slane %v2544_v62, 4  ;;  %v2552_v43 = vrot.slane %v2551_v27, 4 }
 0x281   : > { %v4266_v55 = vsel %vm1690_vm9, %v4206_v15, %v4265_v2  ;;  %v2558_v44 = vsel %vm1133_vm2, %v11417_v53, -inf  ;;  %v2565_v8 = vsel %vm1133_vm2, %v2185_v39, -inf  ;;  %v2572_v49 = vsel %vm1133_vm2, %v2192_v41, -inf }
 0x282   : > { %4274 = vst [vmem:[#allocation2 + $0x78] sm:$0xff] %v4266_v55  ;;  %v2533_v9 = vrot.slane %v2532_v21, 2  ;;  %v2539_v57 = vmax.f32 %v2537_v25, %v2538_v60  ;;  %v2546_v5 = vmax.f32 %v2544_v62, %v2545_v35  ;;  %v2553_v33 = vmax.f32 %v2551_v27, %v2552_v43  ;;  %v14331_v27 = vld [vmem:[#allocation16_spill] sm:$0xff] }
 0x283   : > { %v2559_v3 = vrot.slane %v2558_v44, 4  ;;  %v2566_v26 = vrot.slane %v2565_v8, 4  ;;  %v2573_v10 = vrot.slane %v2572_v49, 4  ;;  %v2579_v59 = vsel %vm1133_vm2, %v2193_v23, -inf }
 0x284   : > { %v2534_v0 = vmax.f32 %v2532_v21, %v2533_v9  ;;  %v2540_v17 = vrot.slane %v2539_v57, 2  ;;  %v2547_v52 = vrot.slane %v2546_v5, 2  ;;  %v2554_v53 = vrot.slane %v2553_v33, 2 }
 0x285   : > { %v2560_v31 = vmax.f32 %v2558_v44, %v2559_v3  ;;  %v2567_v58 = vmax.f32 %v2565_v8, %v2566_v26  ;;  %v2574_v51 = vmax.f32 %v2572_v49, %v2573_v10  ;;  %v2580_v46 = vrot.slane %v2579_v59, 4  ;;  %v14332_v44 = vld [vmem:[#allocation18_spill] sm:$0xff]  ;;  %v14333_v49 = vld [vmem:[#allocation17_spill] sm:$0xff]  ;;  %v11482_v3 = vpop.f32.mrb[34].mxu1 }
 0x286   : > { %v2535_v22 = vrot.slane %v2534_v0, 1  ;;  %v2541_v16 = vmax.f32 %v2539_v57, %v2540_v17  ;;  %v2548_v47 = vmax.f32 %v2546_v5, %v2547_v52  ;;  %v2555_v12 = vmax.f32 %v2553_v33, %v2554_v53  ;;  %v14334_v57 = vld [vmem:[#allocation21_spill] sm:$0xff]  ;;  %v11484_v17 = vpop.f32.mrb[35].mxu1 }
 0x287   : > { %v2561_v39 = vrot.slane %v2560_v31, 2  ;;  %v2568_v41 = vrot.slane %v2567_v58, 2  ;;  %v2575_v7 = vrot.slane %v2574_v51, 2  ;;  %v2581_v13 = vmax.f32 %v2579_v59, %v2580_v46 }
 0x288   : > { %v2536_v20 = vmax.f32 %v2534_v0, %v2535_v22  ;;  %v2542_v40 = vrot.slane %v2541_v16, 1  ;;  %v2549_v14 = vrot.slane %v2548_v47, 1  ;;  %v2556_v32 = vrot.slane %v2555_v12, 1  ;;  %v14336_v22 = vld [vmem:[#allocation19_spill] sm:$0xff] }
 0x289   : > { %v2562_v2 = vmax.f32 %v2560_v31, %v2561_v39  ;;  %v2569_v23 = vmax.f32 %v2567_v58, %v2568_v41  ;;  %v2576_v38 = vmax.f32 %v2574_v51, %v2575_v7  ;;  %v2582_v15 = vrot.slane %v2581_v13, 2  ;;  %v14338_v39 = vld [vmem:[#allocation14_spill] sm:$0xff] }
 0x28a   : > { %v2543_v34 = vmax.f32 %v2541_v16, %v2542_v40  ;;  %v2550_v25 = vmax.f32 %v2548_v47, %v2549_v14  ;;  %v2557_v62 = vmax.f32 %v2555_v12, %v2556_v32  ;;  %v2866_v21 = vmax.f32 %v14331_v27, %v2536_v20  ;;  %v14337_v47 = vld [vmem:[#allocation12_spill] sm:$0xff]  ;;  %v5620_v32 = vld [vmem:[%s14211_s3 + $0x50] sm:$0xff] }
 0x28b   : > { %v2563_v60 = vrot.slane %v2562_v2, 1  ;;  %v2570_v35 = vrot.slane %v2569_v23, 1  ;;  %v2577_v43 = vrot.slane %v2576_v38, 1  ;;  %v2583_v55 = vmax.f32 %v2581_v13, %v2582_v15 }
 0x28c   : > { %v2867_v8 = vmax.f32 %v14332_v44, %v2543_v34  ;;  %v2868_v9 = vmax.f32 %v14333_v49, %v2550_v25  ;;  %v2869_v5 = vmax.f32 %v14334_v57, %v2557_v62  ;;  %v2898_v33 = vmax.f32 %v2866_v21, 0.0 }
 0x28d   : > { %v2564_v26 = vmax.f32 %v2562_v2, %v2563_v60  ;;  %v2571_v10 = vmax.f32 %v2569_v23, %v2570_v35  ;;  %v2578_v59 = vmax.f32 %v2576_v38, %v2577_v43  ;;  %v2584_v0 = vrot.slane %v2583_v55, 1  ;;  %v5621_v2 = vld [vmem:[%s14211_s3 + $0x58] sm:$0xff] }
 0x28e   : > { %v2899_v52 = vmax.f32 %v2867_v8, 0.0  ;;  %v2900_v53 = vmax.f32 %v2868_v9, 0.0  ;;  %v2901_v31 = vmax.f32 %v2869_v5, 0.0  ;;  %v14335_v58 = vcombine.low %v11393_v11, %v11396_v30  ;;  %v14340_v23 = vld [vmem:[#allocation15_spill] sm:$0xff] }
 0x28f   : > { %v2585_v46 = vmax.f32 %v2583_v55, %v2584_v0  ;;  %v2870_v16 = vmax.f32 %v14336_v22, %v2564_v26  ;;  %v2871_v12 = vmax.f32 %v14337_v47, %v2571_v10  ;;  %v2872_v41 = vmax.f32 %v14338_v39, %v2578_v59 }
 0x290   : > { %v2016_v51 = vrot.slane %v14335_v58, %v10325_v24  ;;  %v2962_v7 = vsel %vm1678_vm3, %v2900_v53, %v2898_v33  ;;  %v2969_v13 = vsel %vm1678_vm3, %v2901_v31, %v2899_v52  ;;  %v14339_v20 = vcombine.high %v11393_v11, %v11396_v30 }
 0x291   : > { %v2873_v38 = vmax.f32 %v14340_v23, %v2585_v46  ;;  %v2902_v15 = vmax.f32 %v2870_v16, 0.0  ;;  %v2903_v34 = vmax.f32 %v2871_v12, 0.0  ;;  %v2904_v25 = vmax.f32 %v2872_v41, 0.0 }
 0x292   : > { %v2023_v40 = vrot.slane %v14339_v20, %v10325_v24  ;;  %v2024_v14 = vcombine.high %v2016_v51, %v2016_v51  ;;  %v2200_v27 = vrot.slane %v2016_v51, %v10325_v24  ;;  %v9616_v43 = vpack.c.bf16 %v5621_v2, %v5620_v32 }
 0x293   : > { %v2905_v21 = vmax.f32 %v2873_v38, 0.0  ;;  %v2963_v60 = vsel %vm1680_vm4, %v2902_v15, %v2962_v7  ;;  %v2970_v35 = vsel %vm1680_vm4, %v2903_v34, %v2969_v13  ;;  %v11526_v38 = vpop.f32.mrb[36].mxu1 }
 0x294   : > { %v2025_v62 = vcombine.high %v2023_v40, %v2023_v40  ;;  %v2208_v11 = vrot.slane %v2024_v14, %v10325_v24  ;;  %v2216_v30 = vrot.slane %v2023_v40, %v10325_v24  ;;  %v11512_v55 = vsel %vm1682_vm5, %v2904_v25, %v2963_v60  ;;  %9617 = vmatpush3.bf16.msra.mxu1 %v9616_v43 }
 0x295   : > { %v2201_v44 = vcombine.high %v2200_v27, %v2200_v27  ;;  %v11515_v9 = vsel %vm1682_vm5, %v2905_v21, %v2970_v35  ;;  %v2586_v5 = vsel %vm1133_vm2, %v2200_v27, -inf  ;;  %v11528_v27 = vpop.f32.mrb[37].mxu1 }
 0x296   : > { %v2209_v8 = vcombine.high %v2208_v11, %v2208_v11  ;;  %v2217_v49 = vcombine.high %v2216_v30, %v2216_v30  ;;  %v2224_v57 = vrot.slane %v2025_v62, %v10325_v24  ;;  %v2600_v33 = vsel %vm1133_vm2, %v2208_v11, -inf }
 0x297   : > { %v2587_v26 = vrot.slane %v2586_v5, 4  ;;  %v2593_v10 = vsel %vm1133_vm2, %v2201_v44, -inf  ;;  %v2601_v59 = vrot.slane %v2600_v33, 4  ;;  %v2614_v58 = vsel %vm1133_vm2, %v2216_v30, -inf }
 0x298   : > { %v2607_v0 = vsel %vm1133_vm2, %v2209_v8, -inf  ;;  %v2225_v52 = vcombine.high %v2224_v57, %v2224_v57  ;;  %v2594_v53 = vrot.slane %v2593_v10, 4  ;;  %v2615_v22 = vrot.slane %v2614_v58, 4 }
 0x299   : > { %v2608_v31 = vrot.slane %v2607_v0, 4  ;;  %v2588_v51 = vmax.f32 %v2586_v5, %v2587_v26  ;;  %v2602_v46 = vmax.f32 %v2600_v33, %v2601_v59  ;;  %v2621_v16 = vsel %vm1133_vm2, %v2217_v49, -inf }
 0x29a   : > { %v2595_v47 = vmax.f32 %v2593_v10, %v2594_v53  ;;  %v2622_v39 = vrot.slane %v2621_v16, 4  ;;  %v2628_v41 = vsel %vm1133_vm2, %v2224_v57, -inf  ;;  %v2616_v20 = vmax.f32 %v2614_v58, %v2615_v22 }
 0x29b   : > { %v2609_v12 = vmax.f32 %v2607_v0, %v2608_v31  ;;  %v2589_v7 = vrot.slane %v2588_v51, 2  ;;  %v2603_v13 = vrot.slane %v2602_v46, 2  ;;  %v2629_v40 = vrot.slane %v2628_v41, 4 }
 0x29c   : > { %v2596_v14 = vrot.slane %v2595_v47, 2  ;;  %v2623_v2 = vmax.f32 %v2621_v16, %v2622_v39  ;;  %v2635_v23 = vsel %vm1133_vm2, %v2225_v52, -inf  ;;  %v2617_v25 = vrot.slane %v2616_v20, 2 }
 0x29d   : > { %v2610_v32 = vrot.slane %v2609_v12, 2  ;;  %v2590_v15 = vmax.f32 %v2588_v51, %v2589_v7  ;;  %v2604_v34 = vmax.f32 %v2602_v46, %v2603_v13  ;;  %v2630_v62 = vmax.f32 %v2628_v41, %v2629_v40 }
 0x29e   : > { %v2597_v11 = vmax.f32 %v2595_v47, %v2596_v14  ;;  %v2624_v21 = vrot.slane %v2623_v2, 2  ;;  %v2636_v60 = vrot.slane %v2635_v23, 4  ;;  %v2618_v44 = vmax.f32 %v2616_v20, %v2617_v25  ;;  %v8707_v25 = vld [vmem:[%s14211_s3 + $0x178] sm:$0xff] }
 0x29f   : > { %v2611_v30 = vmax.f32 %v2609_v12, %v2610_v32  ;;  %v2591_v35 = vrot.slane %v2590_v15, 1  ;;  %v2605_v43 = vrot.slane %v2604_v34, 1  ;;  %v2631_v8 = vrot.slane %v2630_v62, 2 }
 0x2a0   : > { %v2598_v49 = vrot.slane %v2597_v11, 1  ;;  %v2625_v5 = vmax.f32 %v2623_v2, %v2624_v21  ;;  %v2637_v33 = vmax.f32 %v2635_v23, %v2636_v60  ;;  %v2619_v59 = vrot.slane %v2618_v44, 1  ;;  %v5639_v21 = vld [vmem:[%s14211_s3 + $0xe8] sm:$0xff]  ;;  %v5622_v60 = vld [vmem:[%s14211_s3 + $0x60] sm:$0xff] }
 0x2a1   : > { %v2612_v57 = vrot.slane %v2611_v30, 1  ;;  %v2592_v26 = vmax.f32 %v2590_v15, %v2591_v35  ;;  %v2606_v10 = vmax.f32 %v2604_v34, %v2605_v43  ;;  %v2632_v0 = vmax.f32 %v2630_v62, %v2631_v8  ;;  %v14341_v15 = vld [vmem:[#allocation20_spill] sm:$0xff] }
 0x2a2   : > { %v2599_v52 = vmax.f32 %v2597_v11, %v2598_v49  ;;  %v2626_v31 = vrot.slane %v2625_v5, 1  ;;  %v2638_v58 = vrot.slane %v2637_v33, 2  ;;  %v2620_v51 = vmax.f32 %v2618_v44, %v2619_v59  ;;  %v5638_v62 = vld [vmem:[%s14211_s3 + $0xe0] sm:$0xff]  ;;  %v5623_v35 = vld [vmem:[%s14211_s3 + $0x68] sm:$0xff]  ;;  %v5641_v59 = vld [vmem:[%s14211_s3 + $0xf8] sm:$0xff] }
 0x2a3   : > { %v2613_v53 = vmax.f32 %v2611_v30, %v2612_v57  ;;  %v2633_v46 = vrot.slane %v2632_v0, 1  ;;  %v2874_v22 = vmax.f32 %v11305_v56, %v2592_v26  ;;  %v2876_v16 = vmax.f32 %v11315_v45, %v2606_v10  ;;  %v8722_v56 = vld [vmem:[%s14211_s3 + $0x1f0] sm:$0xff] }
 0x2a4   : > { %v2627_v47 = vmax.f32 %v2625_v5, %v2626_v31  ;;  %v2639_v12 = vmax.f32 %v2637_v33, %v2638_v58  ;;  %v2875_v39 = vmax.f32 %v11307_v28, %v2599_v52  ;;  %v2878_v13 = vmax.f32 %v11337_v63, %v2620_v51  ;;  %v8723_v28 = vld [vmem:[%s14211_s3 + $0x1f8] sm:$0xff] }
 0x2a5   : > { %v2877_v41 = vmax.f32 %v11317_v18, %v2613_v53  ;;  %v2634_v7 = vmax.f32 %v2632_v0, %v2633_v46  ;;  %v2906_v20 = vmax.f32 %v2874_v22, 0.0  ;;  %v2908_v40 = vmax.f32 %v2876_v16, 0.0  ;;  %v14342_v33 = vld [vmem:[#allocation22_spill] sm:$0xff]  ;;  %v14343_v22 = vld [vmem:[#allocation11_spill] sm:$0xff] }
 0x2a6   : > { %v2640_v14 = vrot.slane %v2639_v12, 1  ;;  %v2879_v32 = vmax.f32 %v11339_v29, %v2627_v47  ;;  %v2907_v2 = vmax.f32 %v2875_v39, 0.0  ;;  %v2910_v18 = vmax.f32 %v2878_v13, 0.0  ;;  %v8706_v29 = vld [vmem:[%s14211_s3 + $0x170] sm:$0xff]  ;;  %v5625_v52 = vld [vmem:[%s14211_s3 + $0x78] sm:$0xff]  ;;  %v9960_v47 = vld [vmem:[#allocation2] sm:$0xff] }
 0x2a7   : > { %v2909_v23 = vmax.f32 %v2877_v41, 0.0  ;;  %v2880_v45 = vmax.f32 %v11367_v36, %v2634_v7  ;;  %v2965_v63 = vsel %vm1684_vm6, %v2906_v20, %v11512_v55  ;;  %v1902_v34 = vmul.f32 %v10977_v61, %v14341_v15  ;;  %v5624_v0 = vld [vmem:[%s14211_s3 + $0x70] sm:$0xff]  ;;  %v5573_v39 = vld [vmem:[#allocation2 + $0x28] sm:$0xff]  ;;  %v11592_v41 = vpop.f32.mrb[38].mxu1 }
 0x2a8   : > { %v2641_v36 = vmax.f32 %v2639_v12, %v2640_v14  ;;  %v2911_v11 = vmax.f32 %v2879_v32, 0.0  ;;  %v2966_v30 = vsel %vm1686_vm7, %v2908_v40, %v2965_v63  ;;  %v2972_v55 = vsel %vm1684_vm6, %v2907_v2, %v11515_v9  ;;  %v5640_v9 = vld [vmem:[%s14211_s3 + $0xf0] sm:$0xff]  ;;  %v5572_v14 = vld [vmem:[#allocation2 + $0x20] sm:$0xff]  ;;  %v11596_v32 = vpop.f32.mrb[39].mxu1 }
 0x2a9   : > { %v2912_v43 = vmax.f32 %v2880_v45, 0.0  ;;  %v2967_v44 = vsel %vm1688_vm8, %v2910_v18, %v2966_v30  ;;  %v2973_v8 = vsel %vm1686_vm7, %v2909_v23, %v2972_v55  ;;  %v1930_v49 = vadd.f32 %v10985_v4, %v1902_v34  ;;  %v14344_v7 = vld [vmem:[#allocation9_spill] sm:$0xff]  ;;  %14345 = vst [vmem:[#allocation7_spill] sm:$0xff] %v11596_v32  ;;  %v14346_v63 = vld [vmem:[#allocation23_spill] sm:$0xff] }
 0x2aa   : > { %v2881_v57 = vmax.f32 %v11369_v37, %v2641_v36  ;;  %v2974_v5 = vsel %vm1688_vm8, %v2911_v11, %v2973_v8  ;;  %v1903_v26 = vmul.f32 %v10992_v19, %v14342_v33  ;;  %v9590_v10 = vpack.c.bf16 %v8723_v28, %v8722_v56 }
 0x2ab   : > { %v2968_v37 = vsel %vm1690_vm9, %v2912_v43, %v2967_v44  ;;  %v9592_v53 = vpack.c.bf16 %v8707_v25, %v8706_v29  ;;  %v9618_v31 = vpack.c.bf16 %v5639_v21, %v5638_v62  ;;  %v9620_v58 = vpack.c.bf16 %v5623_v35, %v5622_v60  ;;  %v14347_v62 = vld [vmem:[#allocation24_spill] sm:$0xff] }
 0x2ac   : > { %v2913_v51 = vmax.f32 %v2881_v57, 0.0  ;;  %2994 = vst [vmem:[#allocation2 + $0x40] sm:$0xff] %v2968_v37  ;;  %v1931_v46 = vadd.f32 %v10995_v1, %v1903_v26  ;;  %9591 = vmatprep.subr.bf16.mxu0 %v9590_v10  ;;  %v1904_v16 = vmul.f32 %v10977_v61, %v14343_v22  ;;  %v5595_v12 = vmul.f32 %v9960_v47, %v11390_v42 }
 0x2ad   : > { %9593 = vmatpush3.bf16.msra.mxu0 %v9592_v53  ;;  %9619 = vmatprep.subr.bf16.mxu1 %v9618_v31  ;;  %v1905_v13 = vmul.f32 %v10992_v19, %v14344_v7  ;;  %v9622_v20 = vpack.c.bf16 %v5641_v59, %v5640_v9  ;;  %v9624_v40 = vpack.c.bf16 %v5625_v52, %v5624_v0  ;;  %v11645_v7 = vld [vmem:[#allocation2 + $0x30] sm:$0xff] }
 0x2ae   : > { %v2975_v2 = vsel %vm1690_vm9, %v2913_v51, %v2974_v5  ;;  %v2026_v23 = vcombine.low %v1930_v49, %v1931_v46  ;;  %v2027_v56 = vcombine.high %v1930_v49, %v1931_v46  ;;  %9621 = vmatpush3.bf16.msra.mxu1 %v9620_v58  ;;  %v1932_v28 = vadd.f32 %v10985_v4, %v1904_v16  ;;  %v11621_v49 = vld [vmem:[#allocation2 + $0x38] sm:$0xff] }
 0x2af   : > { %2995 = vst [vmem:[#allocation2 + $0x48] sm:$0xff] %v2975_v2  ;;  %v11600_v45 = vrot.slane %v5595_v12, 7  ;;  %v1933_v18 = vadd.f32 %v10995_v1, %v1905_v13  ;;  %9623 = vmatprep.subr.bf16.mxu1 %v9622_v20  ;;  %v1906_v15 = vmul.f32 %v10977_v61, %v14346_v63  ;;  %v11606_v34 = vmul.f32 %v11390_v42, %v5573_v39 }
 0x2b0   : > { %v2034_v29 = vrot.slane %v2026_v23, %v10325_v24  ;;  %v2041_v25 = vrot.slane %v2027_v56, %v10325_v24  ;;  %5742 = vmatmul.mubr.f32.vlgmr.msra.gmra.mrb[16].mxu0 %v9960_v47  ;;  %v1907_v36 = vmul.f32 %v10992_v19, %v14347_v62  ;;  %v11613_v11 = vmul.f32 %v11390_v42, %v5572_v14 }
 0x2b1   : > { %v2044_v30 = vcombine.low %v1932_v28, %v1933_v18  ;;  %v2045_v55 = vcombine.high %v1932_v28, %v1933_v18  ;;  %v11616_v21 = vadd.f32 %v10985_v4, %v1906_v15  ;;  %5746 = vmatprep.mubr.f32.mxu0 %v5573_v39 }
 0x2b2   : > { %v2042_v35 = vcombine.high %v2034_v29, %v2034_v29  ;;  %v2043_v43 = vcombine.high %v2041_v25, %v2041_v25  ;;  %v2232_v44 = vrot.slane %v2034_v29, %v10325_v24  ;;  %v2248_v8 = vrot.slane %v2041_v25, %v10325_v24  ;;  %9625 = vmatpush3.bf16.msra.mxu1 %v9624_v40 }
 0x2b3   : > { %v11624_v9 = vrot.slane %v2044_v30, %v10325_v24  ;;  %v11627_v57 = vrot.slane %v2045_v55, %v10325_v24  ;;  %v11630_v5 = vadd.f32 %v10995_v1, %v1907_v36 }
 0x2b4   : > { %v2233_v26 = vcombine.high %v2232_v44, %v2232_v44  ;;  %v2240_v10 = vrot.slane %v2042_v35, %v10325_v24  ;;  %v2249_v59 = vcombine.high %v2248_v8, %v2248_v8  ;;  %v2256_v0 = vrot.slane %v2043_v43, %v10325_v24  ;;  %5747 = vmatmul.mubr.f32.gmra.mrb[18].mxu0 %v5572_v14 }
 0x2b5   : > { %v2642_v52 = vsel %vm1133_vm2, %v2232_v44, -inf  ;;  %v2670_v37 = vsel %vm1133_vm2, %v2248_v8, -inf  ;;  %v2060_v53 = vcombine.high %v11624_v9, %v11624_v9  ;;  %v2061_v31 = vcombine.high %v11627_v57, %v11627_v57  ;;  %5751 = vmatprep.mubr.f32.mxu0 %v11621_v49 }
 0x2b6   : > { %v2241_v58 = vcombine.high %v2240_v10, %v2240_v10  ;;  %v2257_v51 = vcombine.high %v2256_v0, %v2256_v0  ;;  %v2643_v46 = vrot.slane %v2642_v52, 4  ;;  %v2649_v22 = vsel %vm1133_vm2, %v2233_v26, -inf }
 0x2b7   : > { %v2650_v16 = vrot.slane %v2649_v22, 4  ;;  %v2656_v47 = vsel %vm1133_vm2, %v2240_v10, -inf  ;;  %v2671_v12 = vrot.slane %v2670_v37, 4  ;;  %v2677_v39 = vsel %vm1133_vm2, %v2249_v59, -inf }
 0x2b8   : > { %v2644_v13 = vmax.f32 %v2642_v52, %v2643_v46  ;;  %v2657_v20 = vrot.slane %v2656_v47, 4  ;;  %v2663_v40 = vsel %vm1133_vm2, %v2241_v58, -inf  ;;  %v2678_v14 = vrot.slane %v2677_v39, 4  ;;  %5752 = vmatmul.mubr.f32.gmra.mrb[20].mxu0 %v11645_v7 }
 0x2b9   : > { %v2651_v2 = vmax.f32 %v2649_v22, %v2650_v16  ;;  %v2664_v23 = vrot.slane %v2663_v40, 4  ;;  %v2672_v56 = vmax.f32 %v2670_v37, %v2671_v12  ;;  %v2684_v28 = vsel %vm1133_vm2, %v2256_v0, -inf }
 0x2ba   : > { %v2645_v18 = vrot.slane %v2644_v13, 2  ;;  %v2658_v63 = vmax.f32 %v2656_v47, %v2657_v20  ;;  %v2679_v15 = vmax.f32 %v2677_v39, %v2678_v14  ;;  %v2685_v29 = vrot.slane %v2684_v28, 4 }
 0x2bb   : > { %v2652_v25 = vrot.slane %v2651_v2, 2  ;;  %v2665_v62 = vmax.f32 %v2663_v40, %v2664_v23  ;;  %v2673_v36 = vrot.slane %v2672_v56, 2  ;;  %v2691_v30 = vsel %vm1133_vm2, %v2257_v51, -inf }
 0x2bc   : > { %v2646_v55 = vmax.f32 %v2644_v13, %v2645_v18  ;;  %v2659_v35 = vrot.slane %v2658_v63, 2  ;;  %v2680_v43 = vrot.slane %v2679_v15, 2  ;;  %v2686_v44 = vmax.f32 %v2684_v28, %v2685_v29 }
 0x2bd   : > { %v2653_v8 = vmax.f32 %v2651_v2, %v2652_v25  ;;  %v2666_v26 = vrot.slane %v2665_v62, 2  ;;  %v2674_v10 = vmax.f32 %v2672_v56, %v2673_v36  ;;  %v2692_v59 = vrot.slane %v2691_v30, 4 }
 0x2be   : > { %v2647_v52 = vrot.slane %v2646_v55, 1  ;;  %v2660_v37 = vmax.f32 %v2658_v63, %v2659_v35  ;;  %v2681_v0 = vmax.f32 %v2679_v15, %v2680_v43  ;;  %v2687_v58 = vrot.slane %v2686_v44, 2 }
 0x2bf   : > { %v2654_v46 = vrot.slane %v2653_v8, 1  ;;  %v2667_v22 = vmax.f32 %v2665_v62, %v2666_v26  ;;  %v2675_v16 = vrot.slane %v2674_v10, 1  ;;  %v2693_v47 = vmax.f32 %v2691_v30, %v2692_v59 }
 0x2c0   : > { %v11651_v12 = vmax.f32 %v2646_v55, %v2647_v52  ;;  %v2661_v39 = vrot.slane %v2660_v37, 1  ;;  %v2682_v51 = vrot.slane %v2681_v0, 1  ;;  %v2688_v13 = vmax.f32 %v2686_v44, %v2687_v58 }
 0x2c1   : > { %v11653_v20 = vmax.f32 %v2653_v8, %v2654_v46  ;;  %v2668_v40 = vrot.slane %v2667_v22, 1  ;;  %v11655_v14 = vmax.f32 %v2674_v10, %v2675_v16  ;;  %v2694_v2 = vrot.slane %v2693_v47, 2 }
 0x2c2   : > { %v11657_v23 = vmax.f32 %v2660_v37, %v2661_v39  ;;  %v11659_v56 = vmax.f32 %v2681_v0, %v2682_v51  ;;  %v2689_v28 = vrot.slane %v2688_v13, 1  ;;  %v2264_v18 = vrot.slane %v11624_v9, %v10325_v24 }
 0x2c3   : > { %v11663_v63 = vmax.f32 %v2667_v22, %v2668_v40  ;;  %v2695_v15 = vmax.f32 %v2693_v47, %v2694_v2  ;;  %v2272_v29 = vrot.slane %v2060_v53, %v10325_v24  ;;  %v2280_v25 = vrot.slane %v11627_v57, %v10325_v24 }
 0x2c4   : > { %v11668_v62 = vmax.f32 %v2688_v13, %v2689_v28  ;;  %v2265_v36 = vcombine.high %v2264_v18, %v2264_v18  ;;  %v2288_v30 = vrot.slane %v2061_v31, %v10325_v24  ;;  %v2698_v55 = vsel %vm1133_vm2, %v2264_v18, -inf }
 0x2c5   : > { %v2696_v35 = vrot.slane %v2695_v15, 1  ;;  %v2273_v43 = vcombine.high %v2272_v29, %v2272_v29  ;;  %v2281_v44 = vcombine.high %v2280_v25, %v2280_v25  ;;  %v2699_v8 = vrot.slane %v2698_v55, 4 }
 0x2c6   : > { %v2289_v9 = vcombine.high %v2288_v30, %v2288_v30  ;;  %v2705_v26 = vsel %vm1133_vm2, %v2265_v36, -inf  ;;  %v2712_v10 = vsel %vm1133_vm2, %v2272_v29, -inf  ;;  %v2726_v53 = vsel %vm1133_vm2, %v2280_v25, -inf }
 0x2c7   : > { %v11675_v59 = vmax.f32 %v2695_v15, %v2696_v35  ;;  %v2700_v57 = vmax.f32 %v2698_v55, %v2699_v8  ;;  %v2706_v52 = vrot.slane %v2705_v26, 4  ;;  %v2713_v37 = vrot.slane %v2712_v10, 4 }
 0x2c8   : > { %v2719_v31 = vsel %vm1133_vm2, %v2273_v43, -inf  ;;  %v2727_v0 = vrot.slane %v2726_v53, 4  ;;  %v2733_v58 = vsel %vm1133_vm2, %v2281_v44, -inf  ;;  %v2740_v46 = vsel %vm1133_vm2, %v2288_v30, -inf }
 0x2c9   : > { %v2701_v22 = vrot.slane %v2700_v57, 2  ;;  %v2707_v16 = vmax.f32 %v2705_v26, %v2706_v52  ;;  %v2714_v47 = vmax.f32 %v2712_v10, %v2713_v37  ;;  %v2720_v39 = vrot.slane %v2719_v31, 4 }
 0x2ca   : > { %v2728_v51 = vmax.f32 %v2726_v53, %v2727_v0  ;;  %v2734_v13 = vrot.slane %v2733_v58, 4  ;;  %v2741_v40 = vrot.slane %v2740_v46, 4  ;;  %v2747_v2 = vsel %vm1133_vm2, %v2289_v9, -inf }
 0x2cb   : > { %v2702_v28 = vmax.f32 %v2700_v57, %v2701_v22  ;;  %v2708_v18 = vrot.slane %v2707_v16, 2  ;;  %v2715_v15 = vrot.slane %v2714_v47, 2  ;;  %v2721_v29 = vmax.f32 %v2719_v31, %v2720_v39 }
 0x2cc   : > { %v2729_v25 = vrot.slane %v2728_v51, 2  ;;  %v2735_v36 = vmax.f32 %v2733_v58, %v2734_v13  ;;  %v2742_v55 = vmax.f32 %v2740_v46, %v2741_v40  ;;  %v2748_v35 = vrot.slane %v2747_v2, 4  ;;  %v5569_v46 = vld [vmem:[#allocation2 + $0x8] sm:$0x80]  ;;  %v5568_v40 = vld [vmem:[#allocation2] sm:$0x80] }
 0x2cd   : > { %v2703_v43 = vrot.slane %v2702_v28, 1  ;;  %v2709_v44 = vmax.f32 %v2707_v16, %v2708_v18  ;;  %v2716_v30 = vmax.f32 %v2714_v47, %v2715_v15  ;;  %v2722_v8 = vrot.slane %v2721_v29, 2 }
 0x2ce   : > { %v2730_v26 = vmax.f32 %v2728_v51, %v2729_v25  ;;  %v2736_v10 = vrot.slane %v2735_v36, 2  ;;  %v2743_v53 = vrot.slane %v2742_v55, 2  ;;  %v2749_v52 = vmax.f32 %v2747_v2, %v2748_v35 }
 0x2cf   : > { %v11681_v37 = vmax.f32 %v2702_v28, %v2703_v43  ;;  %v2710_v9 = vrot.slane %v2709_v44, 1  ;;  %v2717_v57 = vrot.slane %v2716_v30, 1  ;;  %v2723_v0 = vmax.f32 %v2721_v29, %v2722_v8 }
 0x2d0   : > { %v2731_v22 = vrot.slane %v2730_v26, 1  ;;  %v2737_v31 = vmax.f32 %v2735_v36, %v2736_v10  ;;  %v2744_v39 = vmax.f32 %v2742_v55, %v2743_v53  ;;  %v2750_v58 = vrot.slane %v2749_v52, 2 }
 0x2d1   : > { %v11683_v13 = vmax.f32 %v2709_v44, %v2710_v9  ;;  %v11685_v16 = vmax.f32 %v2716_v30, %v2717_v57  ;;  %v2724_v47 = vrot.slane %v2723_v0, 1  ;;  %v2062_v51 = vcombine.low %v11616_v21, %v11630_v5 }
 0x2d2   : > { %v11689_v2 = vmax.f32 %v2730_v26, %v2731_v22  ;;  %v2738_v28 = vrot.slane %v2737_v31, 1  ;;  %v2745_v18 = vrot.slane %v2744_v39, 1  ;;  %v2751_v15 = vmax.f32 %v2749_v52, %v2750_v58 }
 0x2d3   : > { %v11691_v29 = vmax.f32 %v2723_v0, %v2724_v47  ;;  %v2063_v25 = vcombine.high %v11616_v21, %v11630_v5  ;;  %v2070_v36 = vrot.slane %v2062_v51, %v10325_v24  ;;  %v5593_v55 = vmul.f32 %v11390_v42, %v5569_v46 }
 0x2d4   : > { %v11697_v35 = vmax.f32 %v2737_v31, %v2738_v28  ;;  %v11699_v43 = vmax.f32 %v2744_v39, %v2745_v18  ;;  %v2752_v44 = vrot.slane %v2751_v15, 1  ;;  %v5592_v30 = vmul.f32 %v11390_v42, %v5568_v40 }
 0x2d5   : > { %v2077_v8 = vrot.slane %v2063_v25, %v10325_v24  ;;  %v2078_v26 = vcombine.high %v2070_v36, %v2070_v36  ;;  %v2296_v10 = vrot.slane %v2070_v36, %v10325_v24  ;;  %v5804_v53 = vrot.slane %v5593_v55, 7 }
 0x2d6   : > { %v11704_v52 = vmax.f32 %v2751_v15, %v2752_v44  ;;  %v5801_v21 = vrot.slane %v5592_v30, 7  ;;  %v1908_v5 = vmul.f32 %v10977_v61, %v11322_v54  ;;  %v1909_v9 = vmul.f32 %v10992_v19, %v11335_v48 }
 0x2d7   : > { %v2079_v57 = vcombine.high %v2077_v8, %v2077_v8  ;;  %v2297_v0 = vcombine.high %v2296_v10, %v2296_v10  ;;  %v2304_v22 = vrot.slane %v2078_v26, %v10325_v24  ;;  %v2312_v31 = vrot.slane %v2077_v8, %v10325_v24 }
 0x2d8   : > { %v2754_v39 = vsel %vm1133_vm2, %v2296_v10, -inf  ;;  %v5806_v58 = vsel %vm5800_vm11, %v5804_v53, %v11600_v45  ;;  %v5803_v46 = vsel %vm5800_vm11, %v5801_v21, %v11600_v45  ;;  %v11718_v47 = vadd.f32 %v10985_v4, %v1908_v5 }
 0x2d9   : > { %v2305_v61 = vcombine.high %v2304_v22, %v2304_v22  ;;  %v2313_v54 = vcombine.high %v2312_v31, %v2312_v31  ;;  %v2320_v19 = vrot.slane %v2079_v57, %v10325_v24  ;;  %v2755_v48 = vrot.slane %v2754_v39, 4  ;;  %5915 = vmatprep.mubr.f32.mxu1 %v5806_v58 }
 0x2da   : > { %v2761_v51 = vsel %vm1133_vm2, %v2297_v0, -inf  ;;  %v2768_v40 = vsel %vm1133_vm2, %v2304_v22, -inf  ;;  %v2782_v28 = vsel %vm1133_vm2, %v2312_v31, -inf  ;;  %5916 = vmatmul.mubr.f32.vlgmr.msra.gmra.mrb[48].mxu1 %v5803_v46  ;;  %v11725_v18 = vadd.f32 %v10995_v1, %v1909_v9 }
 0x2db   : > { %v2321_v15 = vcombine.high %v2320_v19, %v2320_v19  ;;  %v2756_v25 = vmax.f32 %v2754_v39, %v2755_v48  ;;  %v2762_v4 = vrot.slane %v2761_v51, 4  ;;  %v2769_v36 = vrot.slane %v2768_v40, 4 }
 0x2dc   : > { %v2775_v55 = vsel %vm1133_vm2, %v2305_v61, -inf  ;;  %v2783_v44 = vrot.slane %v2782_v28, 4  ;;  %v2789_v30 = vsel %vm1133_vm2, %v2313_v54, -inf  ;;  %v2796_v8 = vsel %vm1133_vm2, %v2320_v19, -inf  ;;  %v11731_v54 = vpop.f32.mrb[40].mxu1 }
 0x2dd   : > { %v2757_v26 = vrot.slane %v2756_v25, 2  ;;  %v2763_v10 = vmax.f32 %v2761_v51, %v2762_v4  ;;  %v2770_v53 = vmax.f32 %v2768_v40, %v2769_v36  ;;  %v2776_v21 = vrot.slane %v2775_v55, 4  ;;  %14348 = vst [vmem:[#allocation13_spill] sm:$0xff] %v11731_v54  ;;  %v11733_v4 = vpop.f32.mrb[41].mxu1 }
 0x2de   : > { %v2784_v5 = vmax.f32 %v2782_v28, %v2783_v44  ;;  %v2790_v57 = vrot.slane %v2789_v30, 4  ;;  %v2797_v0 = vrot.slane %v2796_v8, 4  ;;  %v2803_v1 = vsel %vm1133_vm2, %v2321_v15, -inf }
 0x2df   : > { %v2758_v9 = vmax.f32 %v2756_v25, %v2757_v26  ;;  %v2764_v22 = vrot.slane %v2763_v10, 2  ;;  %v2771_v31 = vrot.slane %v2770_v53, 2  ;;  %v2777_v39 = vmax.f32 %v2775_v55, %v2776_v21 }
 0x2e0   : > { %v2785_v58 = vrot.slane %v2784_v5, 2  ;;  %v2791_v46 = vmax.f32 %v2789_v30, %v2790_v57  ;;  %v2798_v61 = vmax.f32 %v2796_v8, %v2797_v0  ;;  %v2804_v48 = vrot.slane %v2803_v1, 4 }
 0x2e1   : > { %v2759_v19 = vrot.slane %v2758_v9, 1  ;;  %v2765_v33 = vmax.f32 %v2763_v10, %v2764_v22  ;;  %v2772_v51 = vmax.f32 %v2770_v53, %v2771_v31  ;;  %v2778_v40 = vrot.slane %v2777_v39, 2  ;;  %v11736_v53 = vpop.f32.mrb[42].mxu1 }
 0x2e2   : > { %v2786_v28 = vmax.f32 %v2784_v5, %v2785_v58  ;;  %v2792_v36 = vrot.slane %v2791_v46, 2  ;;  %v2799_v44 = vrot.slane %v2798_v61, 2  ;;  %v2805_v15 = vmax.f32 %v2803_v1, %v2804_v48  ;;  %v11738_v1 = vpop.f32.mrb[43].mxu1 }
 0x2e3   : > { %v2760_v25 = vmax.f32 %v2758_v9, %v2759_v19  ;;  %v2766_v26 = vrot.slane %v2765_v33, 1  ;;  %v2773_v60 = vrot.slane %v2772_v51, 1  ;;  %v2779_v55 = vmax.f32 %v2777_v39, %v2778_v40 }
 0x2e4   : > { %v2787_v21 = vrot.slane %v2786_v28, 1  ;;  %v2793_v30 = vmax.f32 %v2791_v46, %v2792_v36  ;;  %v2800_v8 = vmax.f32 %v2798_v61, %v2799_v44  ;;  %v2806_v57 = vrot.slane %v2805_v15, 2 }
 0x2e5   : > { %v2767_v0 = vmax.f32 %v2765_v33, %v2766_v26  ;;  %v2774_v54 = vmax.f32 %v2772_v51, %v2773_v60  ;;  %v2780_v32 = vrot.slane %v2779_v55, 1  ;;  %v2882_v10 = vmax.f32 %v11651_v12, %v2760_v25 }
 0x2e6   : > { %v2788_v22 = vmax.f32 %v2786_v28, %v2787_v21  ;;  %v2794_v5 = vrot.slane %v2793_v30, 1  ;;  %v2801_v31 = vrot.slane %v2800_v8, 1  ;;  %v2807_v58 = vmax.f32 %v2805_v15, %v2806_v57 }
 0x2e7   : > { %v2781_v9 = vmax.f32 %v2779_v55, %v2780_v32  ;;  %v2883_v39 = vmax.f32 %v11653_v20, %v2767_v0  ;;  %v2884_v46 = vmax.f32 %v11657_v23, %v2774_v54  ;;  %v2914_v61 = vmax.f32 %v2882_v10, 0.0 }
 0x2e8   : > { %v2795_v48 = vmax.f32 %v2793_v30, %v2794_v5  ;;  %v2802_v33 = vmax.f32 %v2800_v8, %v2801_v31  ;;  %v2808_v60 = vrot.slane %v2807_v58, 1  ;;  %v2886_v19 = vmax.f32 %v11655_v14, %v2788_v22  ;;  %v11760_v8 = vld [vmem:[%s14210_s2] ss:$2 sm:$0x3] }
 0x2e9   : > { %v2885_v12 = vmax.f32 %v11663_v63, %v2781_v9  ;;  %v2915_v51 = vmax.f32 %v2883_v39, 0.0  ;;  %v2916_v40 = vmax.f32 %v2884_v46, 0.0  ;;  %v2080_v28 = vcombine.low %v11718_v47, %v11725_v18 }
 0x2ea   : > { %v2809_v36 = vmax.f32 %v2807_v58, %v2808_v60  ;;  %v2887_v32 = vmax.f32 %v11659_v56, %v2795_v48  ;;  %v2888_v20 = vmax.f32 %v11668_v62, %v2802_v33  ;;  %v2918_v44 = vmax.f32 %v2886_v19, 0.0 }
 0x2eb   : > { %v2917_v23 = vmax.f32 %v2885_v12, 0.0  ;;  %v2976_v54 = vsel %vm1678_vm3, %v2916_v40, %v2914_v61  ;;  %v2081_v15 = vcombine.high %v11718_v47, %v11725_v18  ;;  %v2088_v14 = vrot.slane %v2080_v28, %v10325_v24  ;;  %v14351_v61 = vld [vmem:[#allocation5_spill] sm:$0xff] }
 0x2ec   : > { %v2889_v63 = vmax.f32 %v11675_v59, %v2809_v36  ;;  %v2919_v25 = vmax.f32 %v2887_v32, 0.0  ;;  %v2920_v26 = vmax.f32 %v2888_v20, 0.0  ;;  %v2977_v55 = vsel %vm1680_vm4, %v2918_v44, %v2976_v54  ;;  %v11794_v32 = vpop.f32.mrb[44].mxu1 }
 0x2ed   : > { %v2983_v21 = vsel %vm1678_vm3, %v2917_v23, %v2915_v51  ;;  %v2095_v56 = vrot.slane %v2081_v15, %v10325_v24  ;;  %v2096_v62 = vcombine.high %v2088_v14, %v2088_v14  ;;  %v2328_v30 = vrot.slane %v2088_v14, %v10325_v24  ;;  %v11785_v51 = vld [vmem:[#allocation2 + $0x48] sm:$0xff]  ;;  %v11797_v15 = vpop.f32.mrb[45].mxu1 }
 0x2ee   : > { %v2921_v47 = vmax.f32 %v2889_v63, 0.0  ;;  %v11763_v18 = vsel %vm1682_vm5, %v2920_v26, %v2977_v55  ;;  %v2984_v59 = vsel %vm1680_vm4, %v2919_v25, %v2983_v21  ;;  %v14349_v57 = vrot.slane %v11606_v34, 7  ;;  %14352 = vst [vmem:[#allocation16_spill] sm:$0xff] %v11785_v51  ;;  %5756 = vmatprep.mubr.f32.mxu0 %v11785_v51  ;;  %14353 = vst [vmem:[#allocation18_spill] sm:$0xff] %v11797_v15 }
 0x2ef   : > { %v2097_v10 = vcombine.high %v2095_v56, %v2095_v56  ;;  %v2329_v22 = vcombine.high %v2328_v30, %v2328_v30  ;;  %v2336_v5 = vrot.slane %v2096_v62, %v10325_v24  ;;  %v2344_v31 = vrot.slane %v2095_v56, %v10325_v24 }
 0x2f0   : > { %v5810_v0 = vsel %vm5800_vm11, %v11600_v45, %v14349_v57  ;;  %v11773_v58 = vsel %vm1682_vm5, %v2921_v47, %v2984_v59  ;;  %v2810_v9 = vsel %vm1133_vm2, %v2328_v30, -inf  ;;  %v14350_v39 = vrot.slane %v11613_v11, 7 }
 0x2f1   : > { %5920 = vmatprep.mubr.f32.mxu1 %v5810_v0  ;;  %v11782_v48 = vrot.slane %v11760_v8, %v14351_v61  ;;  %v2337_v33 = vcombine.high %v2336_v5, %v2336_v5  ;;  %v2345_v60 = vcombine.high %v2344_v31, %v2344_v31  ;;  %v2352_v19 = vrot.slane %v2097_v10, %v10325_v24 }
 0x2f2   : > { %v5808_v46 = vsel %vm5800_vm11, %v11600_v45, %v14350_v39  ;;  %v2811_v12 = vrot.slane %v2810_v9, 4  ;;  %v2817_v40 = vsel %vm1133_vm2, %v2329_v22, -inf  ;;  %v2824_v28 = vsel %vm1133_vm2, %v2336_v5, -inf }
 0x2f3   : > { %5921 = vmatmul.mubr.f32.gmra.mrb[50].mxu1 %v5808_v46  ;;  %v2838_v36 = vsel %vm1133_vm2, %v2344_v31, -inf  ;;  %v11792_v45 = vmul.f32 %v11782_v48, %v11434_v6  ;;  %v2353_v20 = vcombine.high %v2352_v19, %v2352_v19  ;;  %v2818_v23 = vrot.slane %v2817_v40, 4 }
 0x2f4   : > { %v2812_v44 = vmax.f32 %v2810_v9, %v2811_v12  ;;  %v2825_v54 = vrot.slane %v2824_v28, 4  ;;  %v2831_v14 = vsel %vm1133_vm2, %v2337_v33, -inf  ;;  %v2839_v63 = vrot.slane %v2838_v36, 4 }
 0x2f5   : > { %v2845_v25 = vsel %vm1133_vm2, %v2345_v60, -inf  ;;  %v2852_v26 = vsel %vm1133_vm2, %v2352_v19, -inf  ;;  %v2819_v6 = vmax.f32 %v2817_v40, %v2818_v23  ;;  %v2832_v56 = vrot.slane %v2831_v14, 4 }
 0x2f6   : > { %v2813_v55 = vrot.slane %v2812_v44, 2  ;;  %v2826_v21 = vmax.f32 %v2824_v28, %v2825_v54  ;;  %v2840_v62 = vmax.f32 %v2838_v36, %v2839_v63  ;;  %v2846_v30 = vrot.slane %v2845_v25, 4 }
 0x2f7   : > { %v2853_v47 = vrot.slane %v2852_v26, 4  ;;  %v2859_v59 = vsel %vm1133_vm2, %v2353_v20, -inf  ;;  %v2820_v0 = vrot.slane %v2819_v6, 2  ;;  %v2833_v22 = vmax.f32 %v2831_v14, %v2832_v56  ;;  %v11803_v56 = vld [vmem:[#allocation2 + $0x40] sm:$0xff] }
 0x2f8   : > { %v2814_v57 = vmax.f32 %v2812_v44, %v2813_v55  ;;  %v2827_v10 = vrot.slane %v2826_v21, 2  ;;  %v2841_v5 = vrot.slane %v2840_v62, 2  ;;  %v2847_v31 = vmax.f32 %v2845_v25, %v2846_v30  ;;  %14354 = vst [vmem:[#allocation17_spill] sm:$0xff] %v11803_v56  ;;  %5757 = vmatmul.mubr.f32.gmra.mrb[22].mxu0 %v11803_v56 }
 0x2f9   : > { %v2854_v9 = vmax.f32 %v2852_v26, %v2853_v47  ;;  %v2860_v39 = vrot.slane %v2859_v59, 4  ;;  %v2821_v33 = vmax.f32 %v2819_v6, %v2820_v0  ;;  %v2834_v19 = vrot.slane %v2833_v22, 2 }
 0x2fa   : > { %v2815_v46 = vrot.slane %v2814_v57, 1  ;;  %v2828_v60 = vmax.f32 %v2826_v21, %v2827_v10  ;;  %v2842_v12 = vmax.f32 %v2840_v62, %v2841_v5  ;;  %v2848_v40 = vrot.slane %v2847_v31, 2 }
 0x2fb   : > { %v2855_v28 = vrot.slane %v2854_v9, 2  ;;  %v2861_v36 = vmax.f32 %v2859_v59, %v2860_v39  ;;  %v2822_v54 = vrot.slane %v2821_v33, 1  ;;  %v2835_v20 = vmax.f32 %v2833_v22, %v2834_v19 }
 0x2fc   : > { %v2816_v23 = vmax.f32 %v2814_v57, %v2815_v46  ;;  %v2829_v63 = vrot.slane %v2828_v60, 1  ;;  %v2843_v44 = vrot.slane %v2842_v12, 1  ;;  %v2849_v55 = vmax.f32 %v2847_v31, %v2848_v40 }
 0x2fd   : > { %v2856_v15 = vmax.f32 %v2854_v9, %v2855_v28  ;;  %v2862_v14 = vrot.slane %v2861_v36, 2  ;;  %v2823_v25 = vmax.f32 %v2821_v33, %v2822_v54  ;;  %v2836_v30 = vrot.slane %v2835_v20, 1 }
 0x2fe   : > { %v2830_v26 = vmax.f32 %v2828_v60, %v2829_v63  ;;  %v2890_v6 = vmax.f32 %v11681_v37, %v2816_v23  ;;  %v2844_v21 = vmax.f32 %v2842_v12, %v2843_v44  ;;  %v2850_v62 = vrot.slane %v2849_v55, 1  ;;  %v8689_v37 = vld [vmem:[%s14210_s2 + $0x1] ss:$2 sm:$0x3]  ;;  %v14357_v44 = vld [vmem:[#allocation6_spill] sm:$0xff] }
 0x2ff   : > { %v2857_v47 = vrot.slane %v2856_v15, 1  ;;  %v2863_v59 = vmax.f32 %v2861_v36, %v2862_v14  ;;  %v2837_v57 = vmax.f32 %v2835_v20, %v2836_v30  ;;  %v2891_v0 = vmax.f32 %v11683_v13, %v2823_v25 }
 0x300   : > { %v2892_v10 = vmax.f32 %v11685_v16, %v2830_v26  ;;  %v2922_v22 = vmax.f32 %v2890_v6, 0.0  ;;  %v2851_v5 = vmax.f32 %v2849_v55, %v2850_v62  ;;  %v2894_v39 = vmax.f32 %v11689_v2, %v2844_v21 }
 0x301   : > { %v2858_v31 = vmax.f32 %v2856_v15, %v2857_v47  ;;  %v2864_v9 = vrot.slane %v2863_v59, 1  ;;  %v2893_v46 = vmax.f32 %v11691_v29, %v2837_v57  ;;  %v2923_v33 = vmax.f32 %v2891_v0, 0.0  ;;  %v11824_v29 = vpop.f32.mrb[46].mxu1  ;;  %v14359_v0 = vld [vmem:[#allocation7_spill] sm:$0xff] }
 0x302   : > { %v2924_v60 = vmax.f32 %v2892_v10, 0.0  ;;  %v2979_v19 = vsel %vm1684_vm6, %v2922_v22, %v11763_v18  ;;  %v2895_v16 = vmax.f32 %v11697_v35, %v2851_v5  ;;  %v2926_v15 = vmax.f32 %v2894_v39, 0.0  ;;  %14355 = vst [vmem:[#allocation21_spill] sm:$0xff] %v11824_v29  ;;  %v11828_v63 = vpop.f32.mrb[47].mxu1 }
 0x303   : > { %v2865_v13 = vmax.f32 %v2863_v59, %v2864_v9  ;;  %v2896_v12 = vmax.f32 %v11699_v43, %v2858_v31  ;;  %v2925_v40 = vmax.f32 %v2893_v46, 0.0  ;;  %v2986_v28 = vsel %vm1684_vm6, %v2923_v33, %v11773_v58  ;;  %14356 = vst [vmem:[#allocation19_spill] sm:$0xff] %v11828_v63 }
 0x304   : > { %v2980_v2 = vsel %vm1686_vm7, %v2924_v60, %v2979_v19  ;;  %v11822_v36 = vrot.slane %v8689_v37, %v14351_v61  ;;  %v2927_v18 = vmax.f32 %v2895_v16, 0.0  ;;  %v11835_v58 = vrot.slane %v11760_v8, %v14357_v44 }
 0x305   : > { %v2897_v23 = vmax.f32 %v11704_v52, %v2865_v13  ;;  %v2928_v54 = vmax.f32 %v2896_v12, 0.0  ;;  %v2981_v35 = vsel %vm1688_vm8, %v2926_v15, %v2980_v2  ;;  %v2987_v43 = vsel %vm1686_vm7, %v2925_v40, %v2986_v28 }
 0x306   : > { %v4476_v20 = vadd.f32 %v11822_v36, %v11792_v45  ;;  %v11838_v55 = vrot.slane %v8689_v37, %v14357_v44  ;;  %v2988_v25 = vsel %vm1688_vm8, %v2927_v18, %v2987_v43  ;;  %v4450_v26 = vmul.f32 %v11782_v48, %v11482_v3 }
 0x307   : > { %v2929_v14 = vmax.f32 %v2897_v23, 0.0  ;;  %v2982_v52 = vsel %vm1690_vm9, %v2928_v54, %v2981_v35  ;;  %v4449_v30 = vmul.f32 %v11835_v58, %v11475_v50  ;;  %v4451_v45 = vmul.f32 %v11835_v58, %v11484_v17 }
 0x308   : > { %14358 = vst [vmem:[#allocation12_spill] sm:$0xff] %v11838_v55  ;;  %2996 = vst [vmem:[#allocation2 + $0x50] sm:$0xff] %v2982_v52  ;;  %v4452_v8 = vmul.f32 %v11782_v48, %v11526_v38  ;;  %v11852_v6 = vmul.f32 %v11390_v42, %v11621_v49  ;;  %v4478_v62 = vadd.f32 %v11822_v36, %v4450_v26 }
 0x309   : > { %v2989_v21 = vsel %vm1690_vm9, %v2929_v14, %v2988_v25  ;;  %v4453_v3 = vmul.f32 %v11835_v58, %v11528_v27  ;;  %v11860_v50 = vmul.f32 %v11390_v42, %v11645_v7  ;;  %v4477_v17 = vadd.f32 %v11838_v55, %v4449_v30 }
 0x30a   : > { %2997 = vst [vmem:[#allocation2 + $0x58] sm:$0xff] %v2989_v21  ;;  %v4479_v38 = vadd.f32 %v11838_v55, %v4451_v45  ;;  %v4480_v47 = vadd.f32 %v11822_v36, %v4452_v8  ;;  %v4454_v27 = vmul.f32 %v11782_v48, %v11592_v41  ;;  %v4455_v7 = vmul.f32 %v11835_v58, %v14359_v0 }
 0x30b   : > { %v4481_v59 = vadd.f32 %v11838_v55, %v4453_v3  ;;  %v4508_v10 = vcombine.low %v4476_v20, %v4477_v17  ;;  %v4509_v22 = vcombine.high %v4476_v20, %v4477_v17 }
 0x30c   : > { %v4526_v5 = vcombine.low %v4478_v62, %v4479_v38  ;;  %v4527_v31 = vcombine.high %v4478_v62, %v4479_v38  ;;  %v11873_v37 = vadd.f32 %v11822_v36, %v4454_v27  ;;  %v11876_v46 = vadd.f32 %v11838_v55, %v4455_v7 }
 0x30d   : > { %v4544_v9 = vcombine.low %v4480_v47, %v4481_v59  ;;  %v4545_v39 = vcombine.high %v4480_v47, %v4481_v59  ;;  %v4516_v33 = vrot.slane %v4508_v10, %v10325_v24  ;;  %v4523_v60 = vrot.slane %v4509_v22, %v10325_v24 }
 0x30e   : > { %v4534_v41 = vrot.slane %v4526_v5, %v10325_v24  ;;  %v11882_v19 = vrot.slane %v4527_v31, %v10325_v24 }
 0x30f   : > { %v11885_v13 = vrot.slane %v4544_v9, %v10325_v24  ;;  %v11888_v16 = vrot.slane %v4545_v39, %v10325_v24  ;;  %v4524_v40 = vcombine.high %v4516_v33, %v4516_v33  ;;  %v4525_v2 = vcombine.high %v4523_v60, %v4523_v60 }
 0x310   : > { %v4658_v28 = vrot.slane %v4516_v33, %v10325_v24  ;;  %v4674_v23 = vrot.slane %v4523_v60, %v10325_v24  ;;  %v4542_v18 = vcombine.high %v4534_v41, %v4534_v41  ;;  %v4543_v54 = vcombine.high %v11882_v19, %v11882_v19 }
 0x311   : > { %v11899_v35 = vrot.slane %v4534_v41, %v10325_v24  ;;  %v11903_v43 = vrot.slane %v11882_v19, %v10325_v24  ;;  %v4666_v14 = vrot.slane %v4524_v40, %v10325_v24  ;;  %v4682_v25 = vrot.slane %v4525_v2, %v10325_v24 }
 0x312   : > { %v4659_v20 = vcombine.high %v4658_v28, %v4658_v28  ;;  %v4675_v52 = vcombine.high %v4674_v23, %v4674_v23  ;;  %v4972_v26 = vsel %vm1133_vm2, %v4658_v28, -inf  ;;  %v5000_v30 = vsel %vm1133_vm2, %v4674_v23, -inf }
 0x313   : > { %v4691_v45 = vcombine.high %v11899_v35, %v11899_v35  ;;  %v11912_v8 = vrot.slane %v4542_v18, %v10325_v24  ;;  %v4667_v21 = vcombine.high %v4666_v14, %v4666_v14  ;;  %v4683_v62 = vcombine.high %v4682_v25, %v4682_v25 }
 0x314   : > { %v4973_v3 = vrot.slane %v4972_v26, 4  ;;  %v4979_v17 = vsel %vm1133_vm2, %v4659_v20, -inf  ;;  %v4986_v47 = vsel %vm1133_vm2, %v4666_v14, -inf  ;;  %v5001_v59 = vrot.slane %v5000_v30, 4 }
 0x315   : > { %v4980_v38 = vrot.slane %v4979_v17, 4  ;;  %v5007_v27 = vsel %vm1133_vm2, %v4675_v52, -inf  ;;  %v4987_v7 = vrot.slane %v4986_v47, 4  ;;  %v4993_v10 = vsel %vm1133_vm2, %v4667_v21, -inf }
 0x316   : > { %v4974_v0 = vmax.f32 %v4972_v26, %v4973_v3  ;;  %v5008_v22 = vrot.slane %v5007_v27, 4  ;;  %v4994_v31 = vrot.slane %v4993_v10, 4  ;;  %v5002_v9 = vmax.f32 %v5000_v30, %v5001_v59 }
 0x317   : > { %v4981_v5 = vmax.f32 %v4979_v17, %v4980_v38  ;;  %v5014_v39 = vsel %vm1133_vm2, %v4682_v25, -inf  ;;  %v4988_v60 = vmax.f32 %v4986_v47, %v4987_v7  ;;  %v5021_v18 = vsel %vm1133_vm2, %v4683_v62, -inf }
 0x318   : > { %v4975_v33 = vrot.slane %v4974_v0, 2  ;;  %v5009_v41 = vmax.f32 %v5007_v27, %v5008_v22  ;;  %v5015_v40 = vrot.slane %v5014_v39, 4  ;;  %v4995_v28 = vmax.f32 %v4993_v10, %v4994_v31 }
 0x319   : > { %v4982_v2 = vrot.slane %v4981_v5, 2  ;;  %v5003_v23 = vrot.slane %v5002_v9, 2  ;;  %v4989_v14 = vrot.slane %v4988_v60, 2  ;;  %v5022_v38 = vrot.slane %v5021_v18, 4 }
 0x31a   : > { %v4976_v20 = vmax.f32 %v4974_v0, %v4975_v33  ;;  %v5010_v52 = vrot.slane %v5009_v41, 2  ;;  %v5016_v26 = vmax.f32 %v5014_v39, %v5015_v40  ;;  %v4996_v3 = vrot.slane %v4995_v28, 2 }
 0x31b   : > { %v4983_v21 = vmax.f32 %v4981_v5, %v4982_v2  ;;  %v5004_v17 = vmax.f32 %v5002_v9, %v5003_v23  ;;  %v4990_v59 = vmax.f32 %v4988_v60, %v4989_v14  ;;  %v5023_v22 = vmax.f32 %v5021_v18, %v5022_v38 }
 0x31c   : > { %v4977_v30 = vrot.slane %v4976_v20, 1  ;;  %v5011_v25 = vmax.f32 %v5009_v41, %v5010_v52  ;;  %v5017_v57 = vrot.slane %v5016_v26, 2  ;;  %v4997_v27 = vmax.f32 %v4995_v28, %v4996_v3 }
 0x31d   : > { %v4984_v47 = vrot.slane %v4983_v21, 1  ;;  %v5005_v7 = vrot.slane %v5004_v17, 1  ;;  %v4991_v31 = vrot.slane %v4990_v59, 1  ;;  %v5024_v9 = vrot.slane %v5023_v22, 2 }
 0x31e   : > { %v11920_v10 = vmax.f32 %v4976_v20, %v4977_v30  ;;  %v5012_v62 = vrot.slane %v5011_v25, 1  ;;  %v5018_v0 = vmax.f32 %v5016_v26, %v5017_v57  ;;  %v4998_v39 = vrot.slane %v4997_v27, 1 }
 0x31f   : > { %v11922_v33 = vmax.f32 %v4983_v21, %v4984_v47  ;;  %v11924_v5 = vmax.f32 %v5004_v17, %v5005_v7  ;;  %v11926_v40 = vmax.f32 %v4990_v59, %v4991_v31  ;;  %v4699_v2 = vcombine.high %v11912_v8, %v11912_v8 }
 0x320   : > { %v11928_v60 = vmax.f32 %v5011_v25, %v5012_v62  ;;  %v5019_v41 = vrot.slane %v5018_v0, 1  ;;  %v11932_v28 = vmax.f32 %v4997_v27, %v4998_v39  ;;  %v5025_v23 = vmax.f32 %v5023_v22, %v5024_v9 }
 0x321   : > { %v4707_v57 = vcombine.high %v11903_v43, %v11903_v43  ;;  %v4714_v18 = vrot.slane %v4543_v54, %v10325_v24  ;;  %v5028_v14 = vsel %vm1133_vm2, %v11899_v35, -inf  ;;  %v5035_v52 = vsel %vm1133_vm2, %v4691_v45, -inf }
 0x322   : > { %v11940_v20 = vmax.f32 %v5018_v0, %v5019_v41  ;;  %v5042_v26 = vsel %vm1133_vm2, %v11912_v8, -inf  ;;  %v5026_v21 = vrot.slane %v5025_v23, 1  ;;  %v5029_v17 = vrot.slane %v5028_v14, 4 }
 0x323   : > { %v4715_v3 = vcombine.high %v4714_v18, %v4714_v18  ;;  %v5036_v38 = vrot.slane %v5035_v52, 4  ;;  %v5043_v30 = vrot.slane %v5042_v26, 4  ;;  %v5049_v59 = vsel %vm1133_vm2, %v4699_v2, -inf }
 0x324   : > { %v5056_v19 = vsel %vm1133_vm2, %v11903_v43, -inf  ;;  %v5063_v54 = vsel %vm1133_vm2, %v4707_v57, -inf  ;;  %v11951_v25 = vmax.f32 %v5025_v23, %v5026_v21  ;;  %v5030_v35 = vmax.f32 %v5028_v14, %v5029_v17 }
 0x325   : > { %v5037_v47 = vmax.f32 %v5035_v52, %v5036_v38  ;;  %v5050_v45 = vrot.slane %v5049_v59, 4  ;;  %v5044_v27 = vmax.f32 %v5042_v26, %v5043_v30  ;;  %v5057_v7 = vrot.slane %v5056_v19, 4 }
 0x326   : > { %v5064_v8 = vrot.slane %v5063_v54, 4  ;;  %v5070_v22 = vsel %vm1133_vm2, %v4714_v18, -inf  ;;  %v5031_v31 = vrot.slane %v5030_v35, 2  ;;  %v5077_v43 = vsel %vm1133_vm2, %v4715_v3, -inf }
 0x327   : > { %v5038_v62 = vrot.slane %v5037_v47, 2  ;;  %v5051_v0 = vmax.f32 %v5049_v59, %v5050_v45  ;;  %v5071_v39 = vrot.slane %v5070_v22, 4  ;;  %v5045_v9 = vrot.slane %v5044_v27, 2 }
 0x328   : > { %v5058_v41 = vmax.f32 %v5056_v19, %v5057_v7  ;;  %v5065_v2 = vmax.f32 %v5063_v54, %v5064_v8  ;;  %v5032_v57 = vmax.f32 %v5030_v35, %v5031_v31  ;;  %v5078_v38 = vrot.slane %v5077_v43, 4 }
 0x329   : > { %v5039_v23 = vmax.f32 %v5037_v47, %v5038_v62  ;;  %v5052_v21 = vrot.slane %v5051_v0, 2  ;;  %v5072_v14 = vmax.f32 %v5070_v22, %v5071_v39  ;;  %v5046_v52 = vmax.f32 %v5044_v27, %v5045_v9 }
 0x32a   : > { %v5059_v17 = vrot.slane %v5058_v41, 2  ;;  %v5066_v26 = vrot.slane %v5065_v2, 2  ;;  %v5033_v30 = vrot.slane %v5032_v57, 1  ;;  %v5079_v44 = vmax.f32 %v5077_v43, %v5078_v38 }
 0x32b   : > { %v5040_v49 = vrot.slane %v5039_v23, 1  ;;  %v5053_v18 = vmax.f32 %v5051_v0, %v5052_v21  ;;  %v5073_v15 = vrot.slane %v5072_v14, 2  ;;  %v5047_v12 = vrot.slane %v5046_v52, 1 }
 0x32c   : > { %v5060_v59 = vmax.f32 %v5058_v41, %v5059_v17  ;;  %v5067_v45 = vmax.f32 %v5065_v2, %v5066_v26  ;;  %v11955_v19 = vmax.f32 %v5032_v57, %v5033_v30  ;;  %v5080_v8 = vrot.slane %v5079_v44, 2 }
 0x32d   : > { %v11957_v54 = vmax.f32 %v5039_v23, %v5040_v49  ;;  %v5054_v3 = vrot.slane %v5053_v18, 1  ;;  %v5074_v35 = vmax.f32 %v5072_v14, %v5073_v15  ;;  %v11959_v47 = vmax.f32 %v5046_v52, %v5047_v12 }
 0x32e   : > { %v5061_v27 = vrot.slane %v5060_v59, 1  ;;  %v5068_v7 = vrot.slane %v5067_v45, 1  ;;  %v4560_v62 = vcombine.high %v11885_v13, %v11885_v13  ;;  %v4561_v0 = vcombine.high %v11888_v16, %v11888_v16 }
 0x32f   : > { %v11961_v22 = vmax.f32 %v5053_v18, %v5054_v3  ;;  %v5075_v31 = vrot.slane %v5074_v35, 1  ;;  %v5081_v9 = vmax.f32 %v5079_v44, %v5080_v8  ;;  %v4722_v12 = vrot.slane %v11885_v13, %v10325_v24 }
 0x330   : > { %v11967_v39 = vmax.f32 %v5060_v59, %v5061_v27  ;;  %v11969_v49 = vmax.f32 %v5067_v45, %v5068_v7  ;;  %v4730_v41 = vrot.slane %v4560_v62, %v10325_v24  ;;  %v4738_v2 = vrot.slane %v11888_v16, %v10325_v24 }
 0x331   : > { %v11973_v15 = vmax.f32 %v5074_v35, %v5075_v31  ;;  %v4746_v43 = vrot.slane %v4561_v0, %v10325_v24  ;;  %v5082_v57 = vrot.slane %v5081_v9, 1  ;;  %v4723_v23 = vcombine.high %v4722_v12, %v4722_v12 }
 0x332   : > { %v5084_v21 = vsel %vm1133_vm2, %v4722_v12, -inf  ;;  %v14360_v44 = vcombine.low %v11873_v37, %v11876_v46  ;;  %v4731_v13 = vcombine.high %v4730_v41, %v4730_v41  ;;  %v4739_v52 = vcombine.high %v4738_v2, %v4738_v2 }
 0x333   : > { %v4747_v17 = vcombine.high %v4746_v43, %v4746_v43  ;;  %v5085_v26 = vrot.slane %v5084_v21, 4  ;;  %v11986_v38 = vmax.f32 %v5081_v9, %v5082_v57  ;;  %v5091_v16 = vsel %vm1133_vm2, %v4723_v23, -inf }
 0x334   : > { %v11984_v14 = vrot.slane %v14360_v44, %v10325_v24  ;;  %v5098_v30 = vsel %vm1133_vm2, %v4730_v41, -inf  ;;  %v5112_v18 = vsel %vm1133_vm2, %v4738_v2, -inf  ;;  %v5092_v45 = vrot.slane %v5091_v16, 4 }
 0x335   : > { %v5086_v59 = vmax.f32 %v5084_v21, %v5085_v26  ;;  %v5099_v3 = vrot.slane %v5098_v30, 4  ;;  %v5105_v35 = vsel %vm1133_vm2, %v4731_v13, -inf  ;;  %v5113_v7 = vrot.slane %v5112_v18, 4 }
 0x336   : > { %v5106_v27 = vrot.slane %v5105_v35, 4  ;;  %v5119_v8 = vsel %vm1133_vm2, %v4739_v52, -inf  ;;  %v5126_v31 = vsel %vm1133_vm2, %v4746_v43, -inf  ;;  %v5093_v0 = vmax.f32 %v5091_v16, %v5092_v45 }
 0x337   : > { %v5087_v62 = vrot.slane %v5086_v59, 2  ;;  %v5100_v9 = vmax.f32 %v5098_v30, %v5099_v3  ;;  %v5120_v12 = vrot.slane %v5119_v8, 4  ;;  %v5114_v23 = vmax.f32 %v5112_v18, %v5113_v7 }
 0x338   : > { %v5107_v57 = vmax.f32 %v5105_v35, %v5106_v27  ;;  %v5127_v41 = vrot.slane %v5126_v31, 4  ;;  %v5133_v2 = vsel %vm1133_vm2, %v4747_v17, -inf  ;;  %v5094_v44 = vrot.slane %v5093_v0, 2 }
 0x339   : > { %v5088_v21 = vmax.f32 %v5086_v59, %v5087_v62  ;;  %v5101_v26 = vrot.slane %v5100_v9, 2  ;;  %v5121_v61 = vmax.f32 %v5119_v8, %v5120_v12  ;;  %v5115_v63 = vrot.slane %v5114_v23, 2 }
 0x33a   : > { %v5108_v13 = vrot.slane %v5107_v57, 2  ;;  %v5128_v29 = vmax.f32 %v5126_v31, %v5127_v41  ;;  %v5134_v56 = vrot.slane %v5133_v2, 4  ;;  %v5095_v55 = vmax.f32 %v5093_v0, %v5094_v44 }
 0x33b   : > { %v5089_v52 = vrot.slane %v5088_v21, 1  ;;  %v5102_v43 = vmax.f32 %v5100_v9, %v5101_v26  ;;  %v5122_v42 = vrot.slane %v5121_v61, 2  ;;  %v5116_v30 = vmax.f32 %v5114_v23, %v5115_v63  ;;  %v5579_v63 = vld [vmem:[#allocation2 + $0x58] sm:$0xff] }
 0x33c   : > { %v5109_v16 = vmax.f32 %v5107_v57, %v5108_v13  ;;  %v5129_v45 = vrot.slane %v5128_v29, 2  ;;  %v5135_v3 = vmax.f32 %v5133_v2, %v5134_v56  ;;  %v5096_v35 = vrot.slane %v5095_v55, 1  ;;  %5761 = vmatprep.mubr.f32.mxu0 %v5579_v63  ;;  %v12030_v63 = vld [vmem:[#allocation2 + $0x70] sm:$0xff] }
 0x33d   : > { %v5090_v18 = vmax.f32 %v5088_v21, %v5089_v52  ;;  %v5103_v27 = vrot.slane %v5102_v43, 1  ;;  %v5123_v17 = vmax.f32 %v5121_v61, %v5122_v42  ;;  %v5117_v7 = vrot.slane %v5116_v30, 1  ;;  %v5578_v61 = vld [vmem:[#allocation2 + $0x50] sm:$0xff] }
 0x33e   : > { %v5110_v59 = vrot.slane %v5109_v16, 1  ;;  %v5130_v62 = vmax.f32 %v5128_v29, %v5129_v45  ;;  %v5136_v8 = vrot.slane %v5135_v3, 2  ;;  %v5097_v12 = vmax.f32 %v5095_v55, %v5096_v35  ;;  %5762 = vmatmul.mubr.f32.gmra.mrb[24].mxu0 %v5578_v61 }
 0x33f   : > { %v5104_v51 = vmax.f32 %v5102_v43, %v5103_v27  ;;  %v5124_v31 = vrot.slane %v5123_v17, 1  ;;  %v5420_v41 = vmax.f32 %v11920_v10, %v5090_v18  ;;  %v5118_v9 = vmax.f32 %v5116_v30, %v5117_v7  ;;  %v5581_v10 = vld [vmem:[#allocation2 + $0x68] sm:$0xff]  ;;  %v5580_v18 = vld [vmem:[#allocation2 + $0x60] sm:$0xff] }
 0x340   : > { %v5111_v0 = vmax.f32 %v5109_v16, %v5110_v59  ;;  %v5131_v44 = vrot.slane %v5130_v62, 1  ;;  %v5137_v57 = vmax.f32 %v5135_v3, %v5136_v8  ;;  %v5421_v56 = vmax.f32 %v11922_v33, %v5097_v12  ;;  %5766 = vmatprep.mubr.f32.mxu0 %v5581_v10 }
 0x341   : > { %v5125_v23 = vmax.f32 %v5123_v17, %v5124_v31  ;;  %v5422_v2 = vmax.f32 %v11926_v40, %v5104_v51  ;;  %v5452_v42 = vmax.f32 %v5420_v41, 0.0  ;;  %v5424_v26 = vmax.f32 %v11924_v5, %v5118_v9  ;;  %v12012_v17 = vld [vmem:[#allocation2 + $0x78] sm:$0xff] }
 0x342   : > { %v5132_v29 = vmax.f32 %v5130_v62, %v5131_v44  ;;  %v5138_v21 = vrot.slane %v5137_v57, 1  ;;  %v5423_v55 = vmax.f32 %v11932_v28, %v5111_v0  ;;  %v5453_v52 = vmax.f32 %v5421_v56, 0.0  ;;  %5767 = vmatmul.mubr.f32.gmra.mrb[26].mxu0 %v5580_v18 }
 0x343   : > { %v5425_v13 = vmax.f32 %v11928_v60, %v5125_v23  ;;  %v5454_v43 = vmax.f32 %v5422_v2, 0.0  ;;  %v14361_v33 = vcombine.high %v11873_v37, %v11876_v46  ;;  %v5456_v45 = vmax.f32 %v5424_v26, 0.0  ;;  %5771 = vmatprep.mubr.f32.mxu0 %v12012_v17 }
 0x344   : > { %v5139_v40 = vmax.f32 %v5137_v57, %v5138_v21  ;;  %v5426_v16 = vmax.f32 %v11940_v20, %v5132_v29  ;;  %v5455_v30 = vmax.f32 %v5423_v55, 0.0  ;;  %v4578_v3 = vcombine.high %v11984_v14, %v11984_v14 }
 0x345   : > { %v4577_v51 = vrot.slane %v14361_v33, %v10325_v24  ;;  %v5457_v28 = vmax.f32 %v5425_v13, 0.0  ;;  %v5516_v5 = vsel %vm1678_vm3, %v5454_v43, %v5452_v42  ;;  %v4754_v59 = vrot.slane %v11984_v14, %v10325_v24 }
 0x346   : > { %v5427_v35 = vmax.f32 %v11951_v25, %v5139_v40  ;;  %v5458_v27 = vmax.f32 %v5426_v16, 0.0  ;;  %v5517_v37 = vsel %vm1680_vm4, %v5456_v45, %v5516_v5  ;;  %v5523_v46 = vsel %vm1678_vm3, %v5455_v30, %v5453_v52  ;;  %5772 = vmatmul.mubr.f32.gmra.mrb[28].mxu0 %v12030_v63 }
 0x347   : > { %v4579_v60 = vcombine.high %v4577_v51, %v4577_v51  ;;  %v5524_v20 = vsel %vm1680_vm4, %v5457_v28, %v5523_v46  ;;  %v4762_v7 = vrot.slane %v4578_v3, %v10325_v24  ;;  %v4770_v62 = vrot.slane %v4577_v51, %v10325_v24 }
 0x348   : > { %v5459_v25 = vmax.f32 %v5427_v35, 0.0  ;;  %v12021_v8 = vsel %vm1682_vm5, %v5458_v27, %v5517_v37  ;;  %v14362_v31 = vrot.slane %v11852_v6, 7  ;;  %v14363_v41 = vrot.slane %v11606_v34, 7 }
 0x349   : > { %v4778_v12 = vrot.slane %v4579_v60, %v10325_v24  ;;  %v4755_v9 = vcombine.high %v4754_v59, %v4754_v59  ;;  %v4763_v14 = vcombine.high %v4762_v7, %v4762_v7  ;;  %v4771_v44 = vcombine.high %v4770_v62, %v4770_v62 }
 0x34a   : > { %v5814_v0 = vsel %vm5800_vm11, %v14363_v41, %v14362_v31  ;;  %v5140_v57 = vsel %vm1133_vm2, %v4754_v59, -inf  ;;  %v12033_v23 = vsel %vm1682_vm5, %v5459_v25, %v5524_v20  ;;  %v5154_v42 = vsel %vm1133_vm2, %v4762_v7, -inf }
 0x34b   : > { %5925 = vmatprep.mubr.f32.mxu1 %v5814_v0  ;;  %v4779_v56 = vcombine.high %v4778_v12, %v4778_v12  ;;  %v5141_v2 = vrot.slane %v5140_v57, 4  ;;  %v5147_v34 = vsel %vm1133_vm2, %v4755_v9, -inf  ;;  %v5155_v61 = vrot.slane %v5154_v42, 4 }
 0x34c   : > { %v5161_v29 = vsel %vm1133_vm2, %v4763_v14, -inf  ;;  %v5168_v21 = vsel %vm1133_vm2, %v4770_v62, -inf  ;;  %v5148_v26 = vrot.slane %v5147_v34, 4  ;;  %v5175_v43 = vsel %vm1133_vm2, %v4771_v44, -inf }
 0x34d   : > { %v5142_v55 = vmax.f32 %v5140_v57, %v5141_v2  ;;  %v5162_v10 = vrot.slane %v5161_v29, 4  ;;  %v5169_v13 = vrot.slane %v5168_v21, 4  ;;  %v5156_v52 = vmax.f32 %v5154_v42, %v5155_v61 }
 0x34e   : > { %v5182_v33 = vsel %vm1133_vm2, %v4778_v12, -inf  ;;  %v5189_v51 = vsel %vm1133_vm2, %v4779_v56, -inf  ;;  %v5149_v16 = vmax.f32 %v5147_v34, %v5148_v26  ;;  %v5176_v5 = vrot.slane %v5175_v43, 4 }
 0x34f   : > { %v5143_v40 = vrot.slane %v5142_v55, 2  ;;  %v5163_v30 = vmax.f32 %v5161_v29, %v5162_v10  ;;  %v5170_v45 = vmax.f32 %v5168_v21, %v5169_v13  ;;  %v5157_v28 = vrot.slane %v5156_v52, 2 }
 0x350   : > { %v5183_v3 = vrot.slane %v5182_v33, 4  ;;  %v5190_v60 = vrot.slane %v5189_v51, 4  ;;  %v5150_v35 = vrot.slane %v5149_v16, 2  ;;  %v5177_v20 = vmax.f32 %v5175_v43, %v5176_v5 }
 0x351   : > { %v5144_v18 = vmax.f32 %v5142_v55, %v5143_v40  ;;  %v5164_v27 = vrot.slane %v5163_v30, 2  ;;  %v5171_v37 = vrot.slane %v5170_v45, 2  ;;  %v5158_v46 = vmax.f32 %v5156_v52, %v5157_v28 }
 0x352   : > { %v5184_v59 = vmax.f32 %v5182_v33, %v5183_v3  ;;  %v5191_v7 = vmax.f32 %v5189_v51, %v5190_v60  ;;  %v5151_v25 = vmax.f32 %v5149_v16, %v5150_v35  ;;  %v5178_v0 = vrot.slane %v5177_v20, 2 }
 0x353   : > { %v5145_v62 = vrot.slane %v5144_v18, 1  ;;  %v5165_v12 = vmax.f32 %v5163_v30, %v5164_v27  ;;  %v5172_v31 = vmax.f32 %v5170_v45, %v5171_v37  ;;  %v5159_v41 = vrot.slane %v5158_v46, 1 }
 0x354   : > { %v5185_v9 = vrot.slane %v5184_v59, 2  ;;  %v5192_v14 = vrot.slane %v5191_v7, 2  ;;  %v5152_v57 = vrot.slane %v5151_v25, 1  ;;  %v5179_v34 = vmax.f32 %v5177_v20, %v5178_v0 }
 0x355   : > { %v5146_v44 = vmax.f32 %v5144_v18, %v5145_v62  ;;  %v5166_v56 = vrot.slane %v5165_v12, 1  ;;  %v5173_v2 = vrot.slane %v5172_v31, 1  ;;  %v5160_v42 = vmax.f32 %v5158_v46, %v5159_v41 }
 0x356   : > { %v5186_v61 = vmax.f32 %v5184_v59, %v5185_v9  ;;  %v5193_v29 = vmax.f32 %v5191_v7, %v5192_v14  ;;  %v5153_v21 = vmax.f32 %v5151_v25, %v5152_v57  ;;  %v5180_v13 = vrot.slane %v5179_v34, 1  ;;  %v14367_v9 = vld [vmem:[#allocation16_spill] sm:$0xff] }
 0x357   : > { %v5167_v55 = vmax.f32 %v5165_v12, %v5166_v56  ;;  %v5174_v26 = vmax.f32 %v5172_v31, %v5173_v2  ;;  %v5428_v10 = vmax.f32 %v11955_v19, %v5146_v44  ;;  %v5430_v33 = vmax.f32 %v11959_v47, %v5160_v42  ;;  %v14368_v14 = vld [vmem:[#allocation8_spill] sm:$0xff] }
 0x358   : > { %v5187_v52 = vrot.slane %v5186_v61, 1  ;;  %v5194_v43 = vrot.slane %v5193_v29, 1  ;;  %v5429_v51 = vmax.f32 %v11957_v54, %v5153_v21  ;;  %v5181_v45 = vmax.f32 %v5179_v34, %v5180_v13 }
 0x359   : > { %v5431_v40 = vmax.f32 %v11961_v22, %v5167_v55  ;;  %v5432_v16 = vmax.f32 %v11967_v39, %v5174_v26  ;;  %v5460_v30 = vmax.f32 %v5428_v10, 0.0  ;;  %v5462_v3 = vmax.f32 %v5430_v33, 0.0 }
 0x35a   : > { %v5188_v28 = vmax.f32 %v5186_v61, %v5187_v52  ;;  %v5195_v5 = vmax.f32 %v5193_v29, %v5194_v43  ;;  %v5461_v60 = vmax.f32 %v5429_v51, 0.0  ;;  %v5433_v27 = vmax.f32 %v11969_v49, %v5181_v45  ;;  %v14371_v61 = vld [vmem:[#allocation17_spill] sm:$0xff]  ;;  %v14373_v51 = vld [vmem:[#allocation19_spill] sm:$0xff] }
 0x35b   : > { %v5463_v18 = vmax.f32 %v5431_v40, 0.0  ;;  %v5464_v35 = vmax.f32 %v5432_v16, 0.0  ;;  %v5519_v19 = vsel %vm1684_vm6, %v5460_v30, %v12021_v8  ;;  %v14364_v46 = vrot.slane %v11860_v50, 7  ;;  %v14366_v8 = vld [vmem:[#allocation13_spill] sm:$0xff] }
 0x35c   : > { %v5434_v47 = vmax.f32 %v11973_v15, %v5188_v28  ;;  %v5435_v54 = vmax.f32 %v11986_v38, %v5195_v5  ;;  %v5520_v22 = vsel %vm1686_vm7, %v5462_v3, %v5519_v19  ;;  %v5526_v37 = vsel %vm1684_vm6, %v5461_v60, %v12033_v23  ;;  %v14372_v43 = vld [vmem:[#allocation21_spill] sm:$0xff] }
 0x35d   : > { %v5521_v39 = vsel %vm1688_vm8, %v5464_v35, %v5520_v22  ;;  %v14365_v20 = vrot.slane %v11613_v11, 7  ;;  %v4456_v49 = vmul.f32 %v11782_v48, %v14366_v8  ;;  %v5465_v7 = vmax.f32 %v5433_v27, 0.0 }
 0x35e   : > { %v5466_v15 = vmax.f32 %v5434_v47, 0.0  ;;  %v5467_v62 = vmax.f32 %v5435_v54, 0.0  ;;  %v5527_v38 = vsel %vm1686_vm7, %v5463_v18, %v5526_v37  ;;  %v4457_v23 = vmul.f32 %v11835_v58, %v11733_v4  ;;  %v14369_v4 = vld [vmem:[#allocation12_spill] sm:$0xff] }
 0x35f   : > { %v5812_v59 = vsel %vm5800_vm11, %v14365_v20, %v14364_v46  ;;  %v4484_v25 = vadd.f32 %v11822_v36, %v4456_v49  ;;  %v4458_v12 = vmul.f32 %v11782_v48, %v11736_v53  ;;  %v4459_v11 = vmul.f32 %v11835_v58, %v11738_v1 }
 0x360   : > { %5926 = vmatmul.mubr.f32.gmra.mrb[52].mxu1 %v5812_v59  ;;  %v5522_v31 = vsel %vm1690_vm9, %v5466_v15, %v5521_v39  ;;  %v5528_v41 = vsel %vm1688_vm8, %v5465_v7, %v5527_v38  ;;  %v4460_v0 = vmul.f32 %v11782_v48, %v11794_v32  ;;  %v12078_v44 = vmul.f32 %v14368_v14, %v14367_v9  ;;  %v14370_v32 = vld [vmem:[#allocation18_spill] sm:$0xff] }
 0x361   : > { %v5529_v57 = vsel %vm1690_vm9, %v5467_v62, %v5528_v41  ;;  %5548 = vst [vmem:[#allocation2 + $0x80] sm:$0xff] %v5522_v31  ;;  %v4485_v56 = vadd.f32 %v14369_v4, %v4457_v23  ;;  %v4486_v53 = vadd.f32 %v11822_v36, %v4458_v12  ;;  %v4487_v1 = vadd.f32 %v14369_v4, %v4459_v11 }
 0x362   : > { %5549 = vst [vmem:[#allocation2 + $0x88] sm:$0xff] %v5529_v57  ;;  %v12085_v2 = vadd.f32 %v11822_v36, %v4460_v0  ;;  %v5817_v42 = vrot.slane %v12078_v44, 7  ;;  %v4461_v34 = vmul.f32 %v11835_v58, %v14370_v32  ;;  %v12092_v29 = vmul.f32 %v14368_v14, %v14371_v61  ;;  %5776 = vmatprep.mubr.f32.mxu0 %v5529_v57 }
 0x363   : > { %v4580_v21 = vcombine.low %v4484_v25, %v4485_v56  ;;  %v4581_v55 = vcombine.high %v4484_v25, %v4485_v56  ;;  %v4598_v26 = vcombine.low %v4486_v53, %v4487_v1  ;;  %v4599_v10 = vcombine.high %v4486_v53, %v4487_v1  ;;  %5777 = vmatmul.mubr.f32.gmra.mrb[30].mxu0 %v5522_v31 }
 0x364   : > { %v12095_v13 = vadd.f32 %v14369_v4, %v4461_v34  ;;  %v5815_v52 = vrot.slane %v12092_v29, 7  ;;  %v4462_v33 = vmul.f32 %v11782_v48, %v14372_v43  ;;  %v4463_v40 = vmul.f32 %v11835_v58, %v14373_v51  ;;  %v8762_v29 = vld [vmem:[%s14211_s3 + $0x330] sm:$0xff] }
 0x365   : > { %v4588_v16 = vrot.slane %v4580_v21, %v10325_v24  ;;  %v4595_v30 = vrot.slane %v4581_v55, %v10325_v24  ;;  %v4606_v45 = vrot.slane %v4598_v26, %v10325_v24  ;;  %v12106_v28 = vrot.slane %v4599_v10, %v10325_v24 }
 0x366   : > { %v4616_v5 = vcombine.low %v12085_v2, %v12095_v13  ;;  %v4617_v3 = vcombine.high %v12085_v2, %v12095_v13  ;;  %v12113_v48 = vadd.f32 %v11822_v36, %v4462_v33  ;;  %v12116_v58 = vadd.f32 %v14369_v4, %v4463_v40 }
 0x367   : > { %v4596_v60 = vcombine.high %v4588_v16, %v4588_v16  ;;  %v4597_v18 = vcombine.high %v4595_v30, %v4595_v30  ;;  %v4786_v35 = vrot.slane %v4588_v16, %v10325_v24  ;;  %v4802_v19 = vrot.slane %v4595_v30, %v10325_v24 }
 0x368   : > { %v4614_v27 = vcombine.high %v4606_v45, %v4606_v45  ;;  %v4615_v47 = vcombine.high %v12106_v28, %v12106_v28  ;;  %v12123_v54 = vrot.slane %v4606_v45, %v10325_v24  ;;  %v12127_v36 = vrot.slane %v12106_v28, %v10325_v24 }
 0x369   : > { %v4787_v22 = vcombine.high %v4786_v35, %v4786_v35  ;;  %v4794_v39 = vrot.slane %v4596_v60, %v10325_v24  ;;  %v4803_v37 = vcombine.high %v4802_v19, %v4802_v19  ;;  %v4810_v46 = vrot.slane %v4597_v18, %v10325_v24 }
 0x36a   : > { %v5196_v20 = vsel %vm1133_vm2, %v4786_v35, -inf  ;;  %v5224_v59 = vsel %vm1133_vm2, %v4802_v19, -inf  ;;  %v4819_v8 = vcombine.high %v12123_v54, %v12123_v54  ;;  %v12136_v49 = vrot.slane %v4614_v27, %v10325_v24 }
 0x36b   : > { %v4795_v7 = vcombine.high %v4794_v39, %v4794_v39  ;;  %v4811_v15 = vcombine.high %v4810_v46, %v4810_v46  ;;  %v5197_v62 = vrot.slane %v5196_v20, 4  ;;  %v5203_v38 = vsel %vm1133_vm2, %v4787_v22, -inf }
 0x36c   : > { %v5204_v25 = vrot.slane %v5203_v38, 4  ;;  %v5210_v23 = vsel %vm1133_vm2, %v4794_v39, -inf  ;;  %v5225_v12 = vrot.slane %v5224_v59, 4  ;;  %v5231_v11 = vsel %vm1133_vm2, %v4803_v37, -inf }
 0x36d   : > { %v5198_v31 = vmax.f32 %v5196_v20, %v5197_v62  ;;  %v5211_v41 = vrot.slane %v5210_v23, 4  ;;  %v5217_v0 = vsel %vm1133_vm2, %v4795_v7, -inf  ;;  %v5232_v9 = vrot.slane %v5231_v11, 4 }
 0x36e   : > { %v5205_v57 = vmax.f32 %v5203_v38, %v5204_v25  ;;  %v5218_v4 = vrot.slane %v5217_v0, 4  ;;  %v5226_v56 = vmax.f32 %v5224_v59, %v5225_v12  ;;  %v5238_v53 = vsel %vm1133_vm2, %v4810_v46, -inf }
 0x36f   : > { %v5199_v1 = vrot.slane %v5198_v31, 2  ;;  %v5212_v32 = vmax.f32 %v5210_v23, %v5211_v41  ;;  %v5233_v34 = vmax.f32 %v5231_v11, %v5232_v9  ;;  %v5239_v61 = vrot.slane %v5238_v53, 4 }
 0x370   : > { %v5206_v21 = vrot.slane %v5205_v57, 2  ;;  %v5219_v55 = vmax.f32 %v5217_v0, %v5218_v4  ;;  %v5227_v26 = vrot.slane %v5226_v56, 2  ;;  %v5245_v10 = vsel %vm1133_vm2, %v4811_v15, -inf }
 0x371   : > { %v5200_v43 = vmax.f32 %v5198_v31, %v5199_v1  ;;  %v5213_v33 = vrot.slane %v5212_v32, 2  ;;  %v5234_v51 = vrot.slane %v5233_v34, 2  ;;  %v5240_v40 = vmax.f32 %v5238_v53, %v5239_v61 }
 0x372   : > { %v5207_v16 = vmax.f32 %v5205_v57, %v5206_v21  ;;  %v5220_v30 = vrot.slane %v5219_v55, 2  ;;  %v5228_v45 = vmax.f32 %v5226_v56, %v5227_v26  ;;  %v5246_v60 = vrot.slane %v5245_v10, 4 }
 0x373   : > { %v5201_v18 = vrot.slane %v5200_v43, 1  ;;  %v5214_v35 = vmax.f32 %v5212_v32, %v5213_v33  ;;  %v5235_v19 = vmax.f32 %v5233_v34, %v5234_v51  ;;  %v5241_v27 = vrot.slane %v5240_v40, 2 }
 0x374   : > { %v5208_v22 = vrot.slane %v5207_v16, 1  ;;  %v5221_v39 = vmax.f32 %v5219_v55, %v5220_v30  ;;  %v5229_v37 = vrot.slane %v5228_v45, 1  ;;  %v5247_v46 = vmax.f32 %v5245_v10, %v5246_v60 }
 0x375   : > { %v12144_v20 = vmax.f32 %v5200_v43, %v5201_v18  ;;  %v5215_v59 = vrot.slane %v5214_v35, 1  ;;  %v5236_v7 = vrot.slane %v5235_v19, 1  ;;  %v5242_v15 = vmax.f32 %v5240_v40, %v5241_v27 }
 0x376   : > { %v12146_v62 = vmax.f32 %v5207_v16, %v5208_v22  ;;  %v5222_v38 = vrot.slane %v5221_v39, 1  ;;  %v12148_v25 = vmax.f32 %v5228_v45, %v5229_v37  ;;  %v5248_v23 = vrot.slane %v5247_v46, 2 }
 0x377   : > { %v12150_v12 = vmax.f32 %v5214_v35, %v5215_v59  ;;  %v12152_v11 = vmax.f32 %v5235_v19, %v5236_v7  ;;  %v5243_v31 = vrot.slane %v5242_v15, 1  ;;  %v4827_v41 = vcombine.high %v12136_v49, %v12136_v49 }
 0x378   : > { %v12156_v0 = vmax.f32 %v5221_v39, %v5222_v38  ;;  %v5249_v9 = vmax.f32 %v5247_v46, %v5248_v23  ;;  %v4835_v57 = vcombine.high %v12127_v36, %v12127_v36  ;;  %v4842_v4 = vrot.slane %v4615_v47, %v10325_v24 }
 0x379   : > { %v12164_v56 = vmax.f32 %v5242_v15, %v5243_v31  ;;  %v5252_v53 = vsel %vm1133_vm2, %v12123_v54, -inf  ;;  %v5259_v1 = vsel %vm1133_vm2, %v4819_v8, -inf  ;;  %v5266_v32 = vsel %vm1133_vm2, %v12136_v49, -inf }
 0x37a   : > { %v5250_v34 = vrot.slane %v5249_v9, 1  ;;  %v4843_v61 = vcombine.high %v4842_v4, %v4842_v4  ;;  %v5253_v21 = vrot.slane %v5252_v53, 4  ;;  %v5260_v55 = vrot.slane %v5259_v1, 4 }
 0x37b   : > { %v5267_v26 = vrot.slane %v5266_v32, 4  ;;  %v5273_v10 = vsel %vm1133_vm2, %v4827_v41, -inf  ;;  %v5280_v28 = vsel %vm1133_vm2, %v12127_v36, -inf  ;;  %v5287_v47 = vsel %vm1133_vm2, %v4835_v57, -inf }
 0x37c   : > { %v12175_v43 = vmax.f32 %v5249_v9, %v5250_v34  ;;  %v5254_v54 = vmax.f32 %v5252_v53, %v5253_v21  ;;  %v5261_v33 = vmax.f32 %v5259_v1, %v5260_v55  ;;  %v5274_v8 = vrot.slane %v5273_v10, 4 }
 0x37d   : > { %v5268_v51 = vmax.f32 %v5266_v32, %v5267_v26  ;;  %v5281_v40 = vrot.slane %v5280_v28, 4  ;;  %v5288_v49 = vrot.slane %v5287_v47, 4  ;;  %v5294_v16 = vsel %vm1133_vm2, %v4842_v4, -inf }
 0x37e   : > { %v5255_v30 = vrot.slane %v5254_v54, 2  ;;  %v5262_v45 = vrot.slane %v5261_v33, 2  ;;  %v5275_v60 = vmax.f32 %v5273_v10, %v5274_v8  ;;  %v5295_v18 = vrot.slane %v5294_v16, 4 }
 0x37f   : > { %v5269_v35 = vrot.slane %v5268_v51, 2  ;;  %v5282_v19 = vmax.f32 %v5280_v28, %v5281_v40  ;;  %v5289_v27 = vmax.f32 %v5287_v47, %v5288_v49  ;;  %v5301_v36 = vsel %vm1133_vm2, %v4843_v61, -inf }
 0x380   : > { %v5256_v22 = vmax.f32 %v5254_v54, %v5255_v30  ;;  %v5263_v39 = vmax.f32 %v5261_v33, %v5262_v45  ;;  %v5276_v37 = vrot.slane %v5275_v60, 2  ;;  %v5296_v46 = vmax.f32 %v5294_v16, %v5295_v18 }
 0x381   : > { %v5270_v59 = vmax.f32 %v5268_v51, %v5269_v35  ;;  %v5283_v7 = vrot.slane %v5282_v19, 2  ;;  %v5290_v15 = vrot.slane %v5289_v27, 2  ;;  %v5302_v38 = vrot.slane %v5301_v36, 4 }
 0x382   : > { %v5257_v23 = vrot.slane %v5256_v22, 1  ;;  %v5264_v31 = vrot.slane %v5263_v39, 1  ;;  %v5277_v41 = vmax.f32 %v5275_v60, %v5276_v37  ;;  %v5297_v9 = vrot.slane %v5296_v46, 2 }
 0x383   : > { %v5271_v57 = vrot.slane %v5270_v59, 1  ;;  %v5284_v4 = vmax.f32 %v5282_v19, %v5283_v7  ;;  %v5291_v53 = vmax.f32 %v5289_v27, %v5290_v15  ;;  %v5303_v1 = vmax.f32 %v5301_v36, %v5302_v38 }
 0x384   : > { %v12179_v32 = vmax.f32 %v5256_v22, %v5257_v23  ;;  %v12181_v34 = vmax.f32 %v5263_v39, %v5264_v31  ;;  %v5278_v61 = vrot.slane %v5277_v41, 1  ;;  %v5298_v21 = vmax.f32 %v5296_v46, %v5297_v9 }
 0x385   : > { %v12183_v55 = vmax.f32 %v5270_v59, %v5271_v57  ;;  %v5285_v26 = vrot.slane %v5284_v4, 1  ;;  %v5292_v10 = vrot.slane %v5291_v53, 1  ;;  %v5304_v28 = vrot.slane %v5303_v1, 2 }
 0x386   : > { %v12185_v47 = vmax.f32 %v5277_v41, %v5278_v61  ;;  %v5299_v54 = vrot.slane %v5298_v21, 1  ;;  %v4624_v33 = vrot.slane %v4616_v5, %v10325_v24  ;;  %v4631_v8 = vrot.slane %v4617_v3, %v10325_v24 }
 0x387   : > { %v12195_v51 = vmax.f32 %v5284_v4, %v5285_v26  ;;  %v12197_v40 = vmax.f32 %v5291_v53, %v5292_v10  ;;  %v5305_v49 = vmax.f32 %v5303_v1, %v5304_v28  ;;  %v4634_v16 = vcombine.low %v12113_v48, %v12116_v58 }
 0x388   : > { %v12201_v30 = vmax.f32 %v5298_v21, %v5299_v54  ;;  %v4632_v45 = vcombine.high %v4624_v33, %v4624_v33  ;;  %v4633_v60 = vcombine.high %v4631_v8, %v4631_v8  ;;  %v4850_v18 = vrot.slane %v4624_v33, %v10325_v24 }
 0x389   : > { %v5306_v5 = vrot.slane %v5305_v49, 1  ;;  %v4866_v35 = vrot.slane %v4631_v8, %v10325_v24  ;;  %v4635_v2 = vcombine.high %v12113_v48, %v12116_v58  ;;  %v12208_v13 = vrot.slane %v4634_v16, %v10325_v24 }
 0x38a   : > { %v4851_v3 = vcombine.high %v4850_v18, %v4850_v18  ;;  %v4858_v19 = vrot.slane %v4632_v45, %v10325_v24  ;;  %v4874_v27 = vrot.slane %v4633_v60, %v10325_v24  ;;  %v5308_v36 = vsel %vm1133_vm2, %v4850_v18, -inf }
 0x38b   : > { %v12213_v22 = vmax.f32 %v5305_v49, %v5306_v5  ;;  %v4867_v39 = vcombine.high %v4866_v35, %v4866_v35  ;;  %v5309_v37 = vrot.slane %v5308_v36, 4  ;;  %v5336_v46 = vsel %vm1133_vm2, %v4866_v35, -inf }
 0x38c   : > { %v4859_v59 = vcombine.high %v4858_v19, %v4858_v19  ;;  %v4875_v7 = vcombine.high %v4874_v27, %v4874_v27  ;;  %v5315_v15 = vsel %vm1133_vm2, %v4851_v3, -inf  ;;  %v5322_v38 = vsel %vm1133_vm2, %v4858_v19, -inf }
 0x38d   : > { %v5310_v23 = vmax.f32 %v5308_v36, %v5309_v37  ;;  %v5316_v31 = vrot.slane %v5315_v15, 4  ;;  %v5323_v41 = vrot.slane %v5322_v38, 4  ;;  %v5337_v9 = vrot.slane %v5336_v46, 4 }
 0x38e   : > { %v5329_v57 = vsel %vm1133_vm2, %v4859_v59, -inf  ;;  %v5343_v4 = vsel %vm1133_vm2, %v4867_v39, -inf  ;;  %v5350_v53 = vsel %vm1133_vm2, %v4874_v27, -inf  ;;  %v5357_v1 = vsel %vm1133_vm2, %v4875_v7, -inf }
 0x38f   : > { %v5311_v61 = vrot.slane %v5310_v23, 2  ;;  %v5317_v21 = vmax.f32 %v5315_v15, %v5316_v31  ;;  %v5324_v26 = vmax.f32 %v5322_v38, %v5323_v41  ;;  %v5330_v10 = vrot.slane %v5329_v57, 4 }
 0x390   : > { %v5338_v28 = vmax.f32 %v5336_v46, %v5337_v9  ;;  %v5344_v54 = vrot.slane %v5343_v4, 4  ;;  %v5351_v33 = vrot.slane %v5350_v53, 4  ;;  %v5358_v8 = vrot.slane %v5357_v1, 4 }
 0x391   : > { %v5312_v49 = vmax.f32 %v5310_v23, %v5311_v61  ;;  %v5318_v16 = vrot.slane %v5317_v21, 2  ;;  %v5325_v45 = vrot.slane %v5324_v26, 2  ;;  %v5331_v60 = vmax.f32 %v5329_v57, %v5330_v10 }
 0x392   : > { %v5339_v18 = vrot.slane %v5338_v28, 2  ;;  %v5345_v5 = vmax.f32 %v5343_v4, %v5344_v54  ;;  %v5352_v35 = vmax.f32 %v5350_v53, %v5351_v33  ;;  %v5359_v3 = vmax.f32 %v5357_v1, %v5358_v8 }
 0x393   : > { %v5313_v19 = vrot.slane %v5312_v49, 1  ;;  %v5319_v27 = vmax.f32 %v5317_v21, %v5318_v16  ;;  %v5326_v36 = vmax.f32 %v5324_v26, %v5325_v45  ;;  %v5332_v39 = vrot.slane %v5331_v60, 2 }
 0x394   : > { %v5340_v37 = vmax.f32 %v5338_v28, %v5339_v18  ;;  %v5346_v59 = vrot.slane %v5345_v5, 2  ;;  %v5353_v7 = vrot.slane %v5352_v35, 2  ;;  %v5360_v15 = vrot.slane %v5359_v3, 2 }
 0x395   : > { %v5314_v46 = vmax.f32 %v5312_v49, %v5313_v19  ;;  %v5320_v38 = vrot.slane %v5319_v27, 1  ;;  %v5327_v31 = vrot.slane %v5326_v36, 1  ;;  %v5333_v41 = vmax.f32 %v5331_v60, %v5332_v39 }
 0x396   : > { %v5341_v23 = vrot.slane %v5340_v37, 1  ;;  %v5347_v9 = vmax.f32 %v5345_v5, %v5346_v59  ;;  %v5354_v61 = vmax.f32 %v5352_v35, %v5353_v7  ;;  %v5361_v57 = vmax.f32 %v5359_v3, %v5360_v15 }
 0x397   : > { %v5321_v10 = vmax.f32 %v5319_v27, %v5320_v38  ;;  %v5328_v4 = vmax.f32 %v5326_v36, %v5327_v31  ;;  %v5334_v53 = vrot.slane %v5333_v41, 1  ;;  %v5436_v1 = vmax.f32 %v12144_v20, %v5314_v46 }
 0x398   : > { %v5342_v21 = vmax.f32 %v5340_v37, %v5341_v23  ;;  %v5348_v26 = vrot.slane %v5347_v9, 1  ;;  %v5355_v54 = vrot.slane %v5354_v61, 1  ;;  %v5362_v28 = vrot.slane %v5361_v57, 1 }
 0x399   : > { %v5335_v33 = vmax.f32 %v5333_v41, %v5334_v53  ;;  %v5437_v8 = vmax.f32 %v12146_v62, %v5321_v10  ;;  %v5438_v49 = vmax.f32 %v12150_v12, %v5328_v4  ;;  %v5468_v16 = vmax.f32 %v5436_v1, 0.0 }
 0x39a   : > { %v5349_v45 = vmax.f32 %v5347_v9, %v5348_v26  ;;  %v5356_v60 = vmax.f32 %v5354_v61, %v5355_v54  ;;  %v5363_v18 = vmax.f32 %v5361_v57, %v5362_v28  ;;  %v5440_v5 = vmax.f32 %v12148_v25, %v5342_v21 }
 0x39b   : > { %v5439_v35 = vmax.f32 %v12156_v0, %v5335_v33  ;;  %v5469_v3 = vmax.f32 %v5437_v8, 0.0  ;;  %v5470_v19 = vmax.f32 %v5438_v49, 0.0  ;;  %v4649_v20 = vrot.slane %v4635_v2, %v10325_v24 }
 0x39c   : > { %v5441_v27 = vmax.f32 %v12152_v11, %v5349_v45  ;;  %v5442_v62 = vmax.f32 %v12164_v56, %v5356_v60  ;;  %v5443_v12 = vmax.f32 %v12175_v43, %v5363_v18  ;;  %v5472_v36 = vmax.f32 %v5440_v5, 0.0 }
 0x39d   : > { %v5471_v39 = vmax.f32 %v5439_v35, 0.0  ;;  %v5530_v37 = vsel %vm1678_vm3, %v5470_v19, %v5468_v16  ;;  %v4650_v25 = vcombine.high %v12208_v13, %v12208_v13  ;;  %v4651_v0 = vcombine.high %v4649_v20, %v4649_v20 }
 0x39e   : > { %v5473_v59 = vmax.f32 %v5441_v27, 0.0  ;;  %v5474_v7 = vmax.f32 %v5442_v62, 0.0  ;;  %v5475_v15 = vmax.f32 %v5443_v12, 0.0  ;;  %v5531_v48 = vsel %vm1680_vm4, %v5472_v36, %v5530_v37 }
 0x39f   : > { %v5537_v58 = vsel %vm1678_vm3, %v5471_v39, %v5469_v3  ;;  %v4882_v11 = vrot.slane %v12208_v13, %v10325_v24  ;;  %v4890_v56 = vrot.slane %v4650_v25, %v10325_v24  ;;  %v4898_v43 = vrot.slane %v4649_v20, %v10325_v24 }
 0x3a0   : > { %v12244_v2 = vsel %vm1682_vm5, %v5474_v7, %v5531_v48  ;;  %v5538_v46 = vsel %vm1680_vm4, %v5473_v59, %v5537_v58  ;;  %v4906_v38 = vrot.slane %v4651_v0, %v10325_v24  ;;  %v14374_v31 = vrot.slane %v11852_v6, 7 }
 0x3a1   : > { %v12254_v23 = vsel %vm1682_vm5, %v5475_v15, %v5538_v46  ;;  %v4883_v13 = vcombine.high %v4882_v11, %v4882_v11  ;;  %v4891_v9 = vcombine.high %v4890_v56, %v4890_v56  ;;  %v4899_v61 = vcombine.high %v4898_v43, %v4898_v43 }
 0x3a2   : > { %v5818_v41 = vsel %vm5800_vm11, %v14374_v31, %v5817_v42  ;;  %v4907_v57 = vcombine.high %v4906_v38, %v4906_v38  ;;  %v5364_v10 = vsel %vm1133_vm2, %v4882_v11, -inf  ;;  %v5378_v4 = vsel %vm1133_vm2, %v4890_v56, -inf }
 0x3a3   : > { %5930 = vmatprep.mubr.f32.mxu1 %v5818_v41  ;;  %v5392_v53 = vsel %vm1133_vm2, %v4898_v43, -inf  ;;  %v5365_v1 = vrot.slane %v5364_v10, 4  ;;  %v5371_v21 = vsel %vm1133_vm2, %v4883_v13, -inf  ;;  %v5379_v6 = vrot.slane %v5378_v4, 4 }
 0x3a4   : > { %v5385_v26 = vsel %vm1133_vm2, %v4891_v9, -inf  ;;  %v5372_v54 = vrot.slane %v5371_v21, 4  ;;  %v5393_v33 = vrot.slane %v5392_v53, 4  ;;  %v5399_v8 = vsel %vm1133_vm2, %v4899_v61, -inf }
 0x3a5   : > { %v5386_v28 = vrot.slane %v5385_v26, 4  ;;  %v5366_v49 = vmax.f32 %v5364_v10, %v5365_v1  ;;  %v5380_v16 = vmax.f32 %v5378_v4, %v5379_v6  ;;  %v5400_v45 = vrot.slane %v5399_v8, 4 }
 0x3a6   : > { %v5406_v60 = vsel %vm1133_vm2, %v4906_v38, -inf  ;;  %v5373_v18 = vmax.f32 %v5371_v21, %v5372_v54  ;;  %v5394_v35 = vmax.f32 %v5392_v53, %v5393_v33  ;;  %v5413_v62 = vsel %vm1133_vm2, %v4907_v57, -inf }
 0x3a7   : > { %v5387_v5 = vmax.f32 %v5385_v26, %v5386_v28  ;;  %v5407_v3 = vrot.slane %v5406_v60, 4  ;;  %v5367_v19 = vrot.slane %v5366_v49, 2  ;;  %v5381_v20 = vrot.slane %v5380_v16, 2 }
 0x3a8   : > { %v5401_v27 = vmax.f32 %v5399_v8, %v5400_v45  ;;  %v5374_v12 = vrot.slane %v5373_v18, 2  ;;  %v5395_v39 = vrot.slane %v5394_v35, 2  ;;  %v5414_v7 = vrot.slane %v5413_v62, 4 }
 0x3a9   : > { %v5388_v36 = vrot.slane %v5387_v5, 2  ;;  %v5408_v37 = vmax.f32 %v5406_v60, %v5407_v3  ;;  %v5368_v25 = vmax.f32 %v5366_v49, %v5367_v19  ;;  %v5382_v0 = vmax.f32 %v5380_v16, %v5381_v20  ;;  %v8740_v60 = vld [vmem:[%s14211_s3 + $0x280] sm:$0xff]  ;;  %v8725_v20 = vld [vmem:[%s14211_s3 + $0x208] sm:$0xff] }
 0x3aa   : > { %v5402_v59 = vrot.slane %v5401_v27, 2  ;;  %v5375_v15 = vmax.f32 %v5373_v18, %v5374_v12  ;;  %v5396_v58 = vmax.f32 %v5394_v35, %v5395_v39  ;;  %v5415_v38 = vmax.f32 %v5413_v62, %v5414_v7  ;;  %v8741_v18 = vld [vmem:[%s14211_s3 + $0x288] sm:$0xff]  ;;  %v8726_v39 = vld [vmem:[%s14211_s3 + $0x210] sm:$0xff] }
 0x3ab   : > { %v5389_v48 = vmax.f32 %v5387_v5, %v5388_v36  ;;  %v5409_v11 = vrot.slane %v5408_v37, 2  ;;  %v5369_v56 = vrot.slane %v5368_v25, 1  ;;  %v5383_v43 = vrot.slane %v5382_v0, 1 }
 0x3ac   : > { %v5403_v46 = vmax.f32 %v5401_v27, %v5402_v59  ;;  %v5376_v31 = vrot.slane %v5375_v15, 1  ;;  %v5397_v13 = vrot.slane %v5396_v58, 1  ;;  %v5416_v4 = vrot.slane %v5415_v38, 2  ;;  %v8742_v27 = vld [vmem:[%s14211_s3 + $0x290] sm:$0xff] }
 0x3ad   : > { %v5390_v41 = vrot.slane %v5389_v48, 1  ;;  %v5410_v9 = vmax.f32 %v5408_v37, %v5409_v11  ;;  %v5370_v61 = vmax.f32 %v5368_v25, %v5369_v56  ;;  %v5384_v57 = vmax.f32 %v5382_v0, %v5383_v43  ;;  %v8727_v37 = vld [vmem:[%s14211_s3 + $0x218] sm:$0xff]  ;;  %v8772_v25 = vld [vmem:[%s14211_s3 + $0x380] sm:$0xff]  ;;  %v8773_v0 = vld [vmem:[%s14211_s3 + $0x388] sm:$0xff] }
 0x3ae   : > { %v5404_v10 = vrot.slane %v5403_v46, 1  ;;  %v5377_v53 = vmax.f32 %v5375_v15, %v5376_v31  ;;  %v5398_v21 = vmax.f32 %v5396_v58, %v5397_v13  ;;  %v5417_v54 = vmax.f32 %v5415_v38, %v5416_v4  ;;  %v8756_v58 = vld [vmem:[%s14211_s3 + $0x300] sm:$0xff]  ;;  %v8757_v11 = vld [vmem:[%s14211_s3 + $0x308] sm:$0xff]  ;;  %v8774_v38 = vld [vmem:[%s14211_s3 + $0x390] sm:$0xff] }
 0x3af   : > { %v5391_v1 = vmax.f32 %v5389_v48, %v5390_v41  ;;  %v5411_v6 = vrot.slane %v5410_v9, 1  ;;  %v5444_v28 = vmax.f32 %v12179_v32, %v5370_v61  ;;  %v5446_v33 = vmax.f32 %v12183_v55, %v5384_v57  ;;  %v8744_v56 = vld [vmem:[%s14211_s3 + $0x2a0] sm:$0xff]  ;;  %v8775_v31 = vld [vmem:[%s14211_s3 + $0x398] sm:$0xff]  ;;  %v8758_v4 = vld [vmem:[%s14211_s3 + $0x310] sm:$0xff] }
 0x3b0   : > { %v5405_v26 = vmax.f32 %v5403_v46, %v5404_v10  ;;  %v5445_v49 = vmax.f32 %v12181_v34, %v5377_v53  ;;  %v5448_v45 = vmax.f32 %v12195_v51, %v5398_v21  ;;  %v5418_v5 = vrot.slane %v5417_v54, 1  ;;  %v8724_v34 = vld [vmem:[%s14211_s3 + $0x200] sm:$0xff]  ;;  %v8745_v46 = vld [vmem:[%s14211_s3 + $0x2a8] sm:$0xff]  ;;  %v8759_v53 = vld [vmem:[%s14211_s3 + $0x318] sm:$0xff] }
 0x3b1   : > { %v5412_v8 = vmax.f32 %v5410_v9, %v5411_v6  ;;  %v5447_v16 = vmax.f32 %v12185_v47, %v5391_v1  ;;  %v5476_v35 = vmax.f32 %v5444_v28, 0.0  ;;  %v5478_v55 = vmax.f32 %v5446_v33, 0.0  ;;  %v8728_v33 = vld [vmem:[%s14211_s3 + $0x220] sm:$0xff] }
 0x3b2   : > { %v5449_v32 = vmax.f32 %v12197_v40, %v5405_v26  ;;  %v5477_v51 = vmax.f32 %v5445_v49, 0.0  ;;  %v5480_v19 = vmax.f32 %v5448_v45, 0.0  ;;  %v8743_v40 = vld [vmem:[%s14211_s3 + $0x298] sm:$0xff]  ;;  %v5419_v62 = vmax.f32 %v5417_v54, %v5418_v5  ;;  %v8776_v26 = vld [vmem:[%s14211_s3 + $0x3a0] sm:$0xff]  ;;  %v8777_v54 = vld [vmem:[%s14211_s3 + $0x3a8] sm:$0xff] }
 0x3b3   : > { %v5450_v47 = vmax.f32 %v12201_v30, %v5412_v8  ;;  %v5479_v3 = vmax.f32 %v5447_v16, 0.0  ;;  %v5533_v30 = vsel %vm1684_vm6, %v5476_v35, %v12244_v2  ;;  %v9626_v36 = vpack.c.bf16 %v8741_v18, %v8740_v60  ;;  %v8729_v8 = vld [vmem:[%s14211_s3 + $0x228] sm:$0xff]  ;;  %v12353_v49 = vld [vmem:[#allocation2 + $0x58] sm:$0xff]  ;;  %v12357_v45 = vld [vmem:[#allocation2 + $0x50] sm:$0xff] }
 0x3b4   : > { %v5481_v12 = vmax.f32 %v5449_v32, 0.0  ;;  %v5534_v2 = vsel %vm1686_vm7, %v5478_v55, %v5533_v30  ;;  %v5540_v7 = vsel %vm1684_vm6, %v5477_v51, %v12254_v23  ;;  %v14375_v15 = vrot.slane %v11860_v50, 7  ;;  %v14376_v18 = vld [vmem:[#allocation4_spill] sm:$0xff]  ;;  %v8746_v32 = vld [vmem:[%s14211_s3 + $0x2b0] sm:$0xff]  ;;  %v8747_v35 = vld [vmem:[%s14211_s3 + $0x2b8] sm:$0xff] }
 0x3b5   : > { %v5482_v59 = vmax.f32 %v5450_v47, 0.0  ;;  %v5451_v23 = vmax.f32 %v12213_v22, %v5419_v62  ;;  %v5535_v43 = vsel %vm1688_vm8, %v5480_v19, %v5534_v2  ;;  %v5541_v50 = vsel %vm1686_vm7, %v5479_v3, %v5540_v7  ;;  %9627 = vmatprep.subr.bf16.mxu0 %v9626_v36  ;;  %v12368_v55 = vld [vmem:[#allocation2 + $0x68] sm:$0xff]  ;;  %v8760_v19 = vld [vmem:[%s14211_s3 + $0x320] sm:$0xff]  ;;  %v8778_v30 = vld [vmem:[%s14211_s3 + $0x3b0] sm:$0xff] }
 0x3b6   : > { %v5816_v48 = vsel %vm5800_vm11, %v14375_v15, %v5815_v52  ;;  %v5542_v41 = vsel %vm1688_vm8, %v5481_v12, %v5541_v50  ;;  %v9628_v13 = vpack.c.bf16 %v8725_v20, %v8724_v34  ;;  %v9630_v9 = vpack.c.bf16 %v8743_v40, %v8742_v27  ;;  %v8761_v20 = vld [vmem:[%s14211_s3 + $0x328] sm:$0xff]  ;;  %v12382_v40 = vld [vmem:[#allocation2 + $0x60] sm:$0xff]  ;;  %v8779_v36 = vld [vmem:[%s14211_s3 + $0x3b8] sm:$0xff] }
 0x3b7   : > { %5931 = vmatmul.mubr.f32.gmra.mrb[54].mxu1 %v5816_v48  ;;  %v5536_v22 = vsel %vm1690_vm9, %v5482_v59, %v5535_v43  ;;  %v5483_v61 = vmax.f32 %v5451_v23, 0.0  ;;  %v9658_v57 = vpack.c.bf16 %v8773_v0, %v8772_v25  ;;  %v9660_v10 = vpack.c.bf16 %v8757_v11, %v8756_v58  ;;  %v8731_v59 = vld [vmem:[%s14211_s3 + $0x238] sm:$0xff]  ;;  %v8748_v15 = vld [vmem:[%s14211_s3 + $0x2c0] sm:$0xff]  ;;  %v8749_v48 = vld [vmem:[%s14211_s3 + $0x2c8] sm:$0xff] }
 0x3b8   : > { %5550 = vst [vmem:[#allocation2 + $0x90] sm:$0xff] %v5536_v22  ;;  %9629 = vmatpush3.bf16.msra.mxu0 %v9628_v13  ;;  %v9632_v1 = vpack.c.bf16 %v8727_v37, %v8726_v39  ;;  %v9634_v21 = vpack.c.bf16 %v8745_v46, %v8744_v56  ;;  %v9662_v6 = vpack.c.bf16 %v8775_v31, %v8774_v38  ;;  %vm5565_vm12 = vcmp.lt.s32.totalorder %v14376_v18, 7  ;;  %v9965_v39 = vld [vmem:[#allocation2] sm:$0xff]  ;;  %v8781_v38 = vld [vmem:[%s14211_s3 + $0x3c8] sm:$0xff] }
 0x3b9   : > { %v5543_v28 = vsel %vm1690_vm9, %v5483_v61, %v5542_v41  ;;  %9631 = vmatprep.subr.bf16.mxu0 %v9630_v9  ;;  %9659 = vmatprep.subr.bf16.mxu1 %v9658_v57  ;;  %v5603_v16 = vmul.f32 %v12353_v49, %v14368_v14  ;;  %v5602_v60 = vmul.f32 %v12357_v45, %v14368_v14  ;;  %v8691_v37 = vsel %vm5565_vm12, 1.0, %v9965_v39  ;;  %v8780_v46 = vld [vmem:[%s14211_s3 + $0x3c0] sm:$0xff]  ;;  %v12447_v31 = vld [vmem:[#allocation2 + $0x28] sm:$0xff]  ;;  %v6212_v39 = vld [vmem:[#allocation2 + $0x18] sm:$0x80] }
 0x3ba   : > { %5551 = vst [vmem:[#allocation2 + $0x98] sm:$0xff] %v5543_v28  ;;  %9661 = vmatpush3.bf16.msra.mxu1 %v9660_v10  ;;  %v9664_v5 = vpack.c.bf16 %v8759_v53, %v8758_v4  ;;  %v5605_v34 = vmul.f32 %v12368_v55, %v14368_v14  ;;  %v9666_v3 = vpack.c.bf16 %v8777_v54, %v8776_v26  ;;  %v12436_v23 = vrot.slane %v8691_v37, 7  ;;  %v8732_v41 = vld [vmem:[%s14211_s3 + $0x240] sm:$0xff]  ;;  %v8733_v13 = vld [vmem:[%s14211_s3 + $0x248] sm:$0xff]  ;;  %v8750_v10 = vld [vmem:[%s14211_s3 + $0x2d0] sm:$0xff] }
 0x3bb   : > { %9663 = vmatprep.subr.bf16.mxu1 %v9662_v6  ;;  %v12372_v47 = vrot.slane %v5603_v16, 7  ;;  %v12374_v51 = vrot.slane %v5602_v60, 7  ;;  %v9636_v27 = vpack.c.bf16 %v8729_v8, %v8728_v33  ;;  %v5604_v62 = vmul.f32 %v12382_v40, %v14368_v14  ;;  %v5585_v9 = vld [vmem:[#allocation2 + $0x88] sm:$0x7f]  ;;  %v8751_v4 = vld [vmem:[%s14211_s3 + $0x2d8] sm:$0xff]  ;;  %v8764_v54 = vld [vmem:[%s14211_s3 + $0x340] sm:$0xff] }
 0x3bc   : > { %9633 = vmatpush3.bf16.msra.mxu0 %v9632_v1  ;;  %v12388_v12 = vmul.f32 %v14368_v14, %v12012_v17  ;;  %v9638_v25 = vpack.c.bf16 %v8747_v35, %v8746_v32  ;;  %v12398_v0 = vrot.slane %v5605_v34, 7  ;;  %v8730_v17 = vld [vmem:[%s14211_s3 + $0x230] sm:$0xff]  ;;  %v9668_v7 = vpack.c.bf16 %v8761_v20, %v8760_v19  ;;  %v8765_v28 = vld [vmem:[%s14211_s3 + $0x348] sm:$0xff]  ;;  %v8783_v60 = vld [vmem:[%s14211_s3 + $0x3d8] sm:$0xff] }
 0x3bd   : > { %14377 = vst [vmem:[#allocation14_spill] sm:$0xff] %v12372_v47  ;;  %14378 = vst [vmem:[#allocation15_spill] sm:$0xff] %v12374_v51  ;;  %9635 = vmatprep.subr.bf16.mxu0 %v9634_v21  ;;  %v5822_v2 = vsel %vm5800_vm11, %v5817_v42, %v12372_v47  ;;  %v5820_v58 = vsel %vm5800_vm11, %v5815_v52, %v12374_v51  ;;  %v12422_v44 = vmul.f32 %v14368_v14, %v12030_v63  ;;  %v8763_v52 = vld [vmem:[%s14211_s3 + $0x338] sm:$0xff]  ;;  %v5584_v21 = vld [vmem:[#allocation2 + $0x80] sm:$0x7f] }
 0x3be   : > { %9665 = vmatpush3.bf16.msra.mxu1 %v9664_v5  ;;  %5935 = vmatprep.mubr.f32.mxu1 %v5822_v2  ;;  %v5829_v42 = vrot.slane %v12388_v12, 7  ;;  %v9670_v11 = vpack.c.bf16 %v8779_v36, %v8778_v30  ;;  %v12428_v56 = vsel %vm5800_vm11, %v12372_v47, %v12398_v0  ;;  %v5957_v63 = vld [vmem:[#allocation2 + $0x18] sm:$0xfe]  ;;  %v9640_v43 = vpack.c.bf16 %v8731_v59, %v8730_v17  ;;  %v8782_v16 = vld [vmem:[%s14211_s3 + $0x3d0] sm:$0xff] }
 0x3bf   : > { %9667 = vmatprep.subr.bf16.mxu1 %v9666_v3  ;;  %5936 = vmatmul.mubr.f32.gmra.mrb[56].mxu1 %v5820_v58  ;;  %14379 = vst [vmem:[#allocation20_spill] sm:$0xff] %v12428_v56  ;;  %v12438_v50 = vrot.slane %v5604_v62, 7  ;;  %v9642_v22 = vpack.c.bf16 %v8749_v48, %v8748_v15  ;;  %v9672_v61 = vpack.c.bf16 %v8763_v52, %v8762_v29  ;;  %v5827_v57 = vrot.slane %v12422_v44, 7  ;;  %v8734_v35 = vld [vmem:[%s14211_s3 + $0x250] sm:$0xff]  ;;  %v8735_v34 = vld [vmem:[%s14211_s3 + $0x258] sm:$0xff]  ;;  %v8753_v62 = vld [vmem:[%s14211_s3 + $0x2e8] sm:$0xff] }
 0x3c0   : > { %9637 = vmatpush3.bf16.msra.mxu0 %v9636_v27  ;;  %5940 = vmatprep.mubr.f32.mxu1 %v12428_v56  ;;  %v5980_v1 = vmul.f32 %v12436_v23, %v5957_v63  ;;  %v9674_v6 = vpack.c.bf16 %v8781_v38, %v8780_v46  ;;  %v5830_v26 = vsel %vm5800_vm11, %v12398_v0, %v5829_v42  ;;  %v8752_v27 = vld [vmem:[%s14211_s3 + $0x2e0] sm:$0xff]  ;;  %v8767_v17 = vld [vmem:[%s14211_s3 + $0x358] sm:$0xff]  ;;  %v5956_v2 = vld [vmem:[#allocation2 + $0x10] sm:$0xfe] }
 0x3c1   : > { %9639 = vmatprep.subr.bf16.mxu0 %v9638_v25  ;;  %v12465_v53 = vsel %vm5800_vm11, %v12374_v51, %v12438_v50  ;;  %v12481_v33 = vmul.f32 %v12436_v23, %v12447_v31  ;;  %v9644_v8 = vpack.c.bf16 %v8733_v13, %v8732_v41  ;;  %v5609_v5 = vmul.f32 %v14368_v14, %v5585_v9  ;;  %v8766_v25 = vld [vmem:[%s14211_s3 + $0x350] sm:$0xff]  ;;  %v8784_v48 = vld [vmem:[%s14211_s3 + $0x3e0] sm:$0xff]  ;;  %v8785_v58 = vld [vmem:[%s14211_s3 + $0x3e8] sm:$0xff] }
 0x3c2   : > { %9669 = vmatpush3.bf16.msra.mxu1 %v9668_v7  ;;  %14380 = vst [vmem:[#allocation22_spill] sm:$0xff] %v12465_v53  ;;  %v6051_v18 = vrot.slane %v5980_v1, 1  ;;  %v9646_v32 = vpack.c.bf16 %v8751_v4, %v8750_v10  ;;  %v5608_v19 = vmul.f32 %v14368_v14, %v5584_v21  ;;  %v9676_v20 = vpack.c.bf16 %v8765_v28, %v8764_v54  ;;  %v8736_v52 = vld [vmem:[%s14211_s3 + $0x260] sm:$0xff]  ;;  %v8737_v63 = vld [vmem:[%s14211_s3 + $0x268] sm:$0xff]  ;;  %v8755_v46 = vld [vmem:[%s14211_s3 + $0x2f8] sm:$0xff] }
 0x3c3   : > { %9671 = vmatprep.subr.bf16.mxu1 %v9670_v11  ;;  %5941 = vmatmul.mubr.f32.gmra.mrb[58].mxu1 %v12465_v53  ;;  %v6052_v3 = vrot.slane %v12481_v33, 1  ;;  %v5828_v30 = vsel %vm5800_vm11, %v12438_v50, %v5827_v57  ;;  %v5833_v36 = vrot.slane %v5609_v5, 7  ;;  %v9678_v37 = vpack.c.bf16 %v8783_v60, %v8782_v16  ;;  %v12524_v11 = vld [vmem:[#allocation2 + $0x20] sm:$0xff]  ;;  %v12542_v38 = vld [vmem:[%s14211_s3 + $0x270] sm:$0xff]  ;;  %v8769_v10 = vld [vmem:[%s14211_s3 + $0x368] sm:$0xff] }
 0x3c4   : > { %9641 = vmatpush3.bf16.msra.mxu0 %v9640_v43  ;;  %5945 = vmatprep.mubr.f32.mxu1 %v5830_v26  ;;  %v5831_v7 = vrot.slane %v5608_v19, 7  ;;  %v9648_v15 = vpack.c.bf16 %v8735_v34, %v8734_v35  ;;  %v9650_v29 = vpack.c.bf16 %v8753_v62, %v8752_v27  ;;  %v8754_v43 = vld [vmem:[%s14211_s3 + $0x2f0] sm:$0xff]  ;;  %v6216_v12 = vmul.f32 %v6212_v39, %v14368_v14  ;;  %v12560_v4 = vld [vmem:[#allocation2 + $0x38] sm:$0xff]  ;;  %v8804_v5 = vld [vmem:[%s14211_s3 + $0x480] sm:$0xff] }
 0x3c5   : > { %9643 = vmatprep.subr.bf16.mxu0 %v9642_v22  ;;  %v6053_v59 = vsel %vm5587_vm13, %v6051_v18, %v6052_v3  ;;  %v5834_v44 = vsel %vm5800_vm11, %v5829_v42, %v5833_v36  ;;  %v9680_v42 = vpack.c.bf16 %v8767_v17, %v8766_v25  ;;  %v12547_v22 = vld [vmem:[%s14211_s3 + $0x278] sm:$0xff]  ;;  %v12552_v13 = vmul.f32 %v12447_v31, %v14368_v14  ;;  %v8786_v26 = vld [vmem:[%s14211_s3 + $0x3f0] sm:$0xff]  ;;  %v12592_v27 = vld [vmem:[%s14211_s3 + $0x400] sm:$0xff] }
 0x3c6   : > { %9673 = vmatpush3.bf16.msra.mxu1 %v9672_v61  ;;  %6162 = vmatprep.mubr.f32.mxu0 %v6053_v59  ;;  %v5832_v41 = vsel %vm5800_vm11, %v5827_v57, %v5831_v7  ;;  %v9682_v9 = vpack.c.bf16 %v8785_v58, %v8784_v48  ;;  %v8768_v61 = vld [vmem:[%s14211_s3 + $0x360] sm:$0xff]  ;;  %v6287_v1 = vrot.slane %v6216_v12, 7  ;;  %v9652_v57 = vpack.c.bf16 %v8737_v63, %v8736_v52  ;;  %v8787_v54 = vld [vmem:[%s14211_s3 + $0x3f8] sm:$0xff]  ;;  %v6211_v60 = vld [vmem:[#allocation2 + $0x10] sm:$0x80] }
 0x3c7   : > { %9675 = vmatprep.subr.bf16.mxu1 %v9674_v6  ;;  %5946 = vmatmul.mubr.f32.gmra.mrb[60].mxu1 %v5828_v30  ;;  %v5979_v21 = vmul.f32 %v12436_v23, %v5956_v2  ;;  %v12565_v6 = vmul.f32 %v12436_v23, %v12524_v11  ;;  %v6288_v28 = vrot.slane %v12552_v13, 7  ;;  %v9654_v16 = vpack.c.bf16 %v8755_v46, %v8754_v43  ;;  %v8770_v62 = vld [vmem:[%s14211_s3 + $0x370] sm:$0xff]  ;;  %v8771_v30 = vld [vmem:[%s14211_s3 + $0x378] sm:$0xff]  ;;  %v12606_v25 = vld [vmem:[%s14211_s3 + $0x408] sm:$0xff] }
 0x3c8   : > { %9645 = vmatpush3.bf16.msra.mxu0 %v9644_v8  ;;  %5950 = vmatprep.mubr.f32.mxu1 %v5834_v44  ;;  %v12574_v8 = vld [vmem:[#allocation2 + $0x30] sm:$0xff]  ;;  %v9684_v18 = vpack.c.bf16 %v8769_v10, %v8768_v61  ;;  %v5984_v35 = vmul.f32 %v12436_v23, %v12560_v4  ;;  %v9656_v19 = vpack.c.bf16 %v12547_v22, %v12542_v38  ;;  %v8836_v2 = vld [vmem:[%s14211_s3 + $0x580] sm:$0xff]  ;;  %v8837_v7 = vld [vmem:[%s14211_s3 + $0x588] sm:$0xff] }
 0x3c9   : > { %9647 = vmatprep.subr.bf16.mxu0 %v9646_v32  ;;  %v8805_v32 = vld [vmem:[%s14211_s3 + $0x488] sm:$0xff]  ;;  %v6289_v34 = vsel %vm5800_vm11, %v6287_v1, %v6288_v28  ;;  %v5983_v36 = vmul.f32 %v12436_v23, %v12574_v8  ;;  %v6048_v39 = vrot.slane %v5979_v21, 1  ;;  %v12609_v17 = vmul.f32 %v6211_v60, %v14368_v14  ;;  %v8807_v52 = vld [vmem:[%s14211_s3 + $0x498] sm:$0xff]  ;;  %v12640_v12 = vld [vmem:[%s14211_s3 + $0x410] sm:$0xff]  ;;  %v12663_v1 = vpop.f32.mrb[16].mxu0 }
 0x3ca   : > { %9677 = vmatpush3.bf16.msra.mxu1 %v9676_v20  ;;  %v9686_v20 = vpack.c.bf16 %v8787_v54, %v8786_v26  ;;  %v12613_v59 = vmul.f32 %v12524_v11, %v14368_v14  ;;  %v6220_v48 = vmul.f32 %v12560_v4, %v14368_v14  ;;  %v12623_v58 = vrot.slane %v5984_v35, 1  ;;  %v12631_v63 = vld [vmem:[#allocation2 + $0x48] sm:$0xff]  ;;  %v12649_v38 = vld [vmem:[%s14211_s3 + $0x418] sm:$0xff]  ;;  %v12657_v61 = vld [vmem:[#allocation2 + $0x40] sm:$0xff] }
 0x3cb   : > { %9679 = vmatprep.subr.bf16.mxu1 %v9678_v37  ;;  %5951 = vmatmul.mubr.f32.gmra.mrb[62].mxu1 %v5832_v41  ;;  %v6049_v37 = vrot.slane %v12565_v6, 1  ;;  %v9688_v44 = vpack.c.bf16 %v8771_v30, %v8770_v62  ;;  %v12635_v43 = vmul.f32 %v12631_v63, %v12436_v23  ;;  %v12644_v46 = vrot.slane %v5983_v36, 1  ;;  %v8820_v41 = vld [vmem:[%s14211_s3 + $0x500] sm:$0xff]  ;;  %v8839_v60 = vld [vmem:[%s14211_s3 + $0x598] sm:$0xff] }
 0x3cc   : > { %9649 = vmatpush3.bf16.msra.mxu0 %v9648_v15  ;;  %6398 = vmatprep.mubr.f32.mxu1 %v6289_v34  ;;  %v9690_v15 = vpack.c.bf16 %v8805_v32, %v8804_v5  ;;  %v9722_v22 = vpack.c.bf16 %v8837_v7, %v8836_v2  ;;  %v12661_v10 = vmul.f32 %v12657_v61, %v12436_v23  ;;  %v6284_v6 = vrot.slane %v12609_v17, 7  ;;  %v12687_v34 = vld [vmem:[%s14211_s3 + $0x4a0] sm:$0xff] }
 0x3cd   : > { %9651 = vmatprep.subr.bf16.mxu0 %v9650_v29  ;;  %v8806_v29 = vld [vmem:[%s14211_s3 + $0x490] sm:$0xff]  ;;  %v6050_v21 = vsel %vm5587_vm13, %v6048_v39, %v6049_v37  ;;  %v6285_v26 = vrot.slane %v12613_v59, 7  ;;  %v6219_v54 = vmul.f32 %v12574_v8, %v14368_v14  ;;  %v12682_v35 = vrot.slane %v6220_v48, 7 }
 0x3ce   : > { %9681 = vmatpush3.bf16.msra.mxu1 %v9680_v42  ;;  %v9692_v42 = vpack.c.bf16 %v12606_v25, %v12592_v27  ;;  %v9694_v32 = vpack.c.bf16 %v8807_v52, %v8806_v29  ;;  %v12698_v27 = vmul.f32 %v12631_v63, %v14368_v14  ;;  %v6057_v36 = vsel %vm5587_vm13, %v6052_v3, %v12623_v58  ;;  %v8822_v48 = vld [vmem:[%s14211_s3 + $0x510] sm:$0xff] }
 0x3cf   : > { %9683 = vmatprep.subr.bf16.mxu1 %v9682_v9  ;;  %v8821_v9 = vld [vmem:[%s14211_s3 + $0x508] sm:$0xff]  ;;  %v6060_v39 = vrot.slane %v12635_v43, 1  ;;  %v6055_v7 = vsel %vm5587_vm13, %v6049_v37, %v12644_v46  ;;  %v9696_v33 = vpack.c.bf16 %v12649_v38, %v12640_v12  ;;  %v6058_v3 = vrot.slane %v12661_v10, 1  ;;  %v8823_v37 = vld [vmem:[%s14211_s3 + $0x518] sm:$0xff] }
 0x3d0   : > { %9653 = vmatpush3.bf16.msra.mxu0 %v9652_v57  ;;  %v12665_v57 = vpop.f32.mrb[48].mxu1  ;;  %v9724_v25 = vpack.c.bf16 %v8821_v9, %v8820_v41  ;;  %v6286_v29 = vsel %vm5800_vm11, %v6284_v6, %v6285_v26  ;;  %v12738_v43 = vrot.slane %v6219_v54, 7  ;;  %v8793_v12 = vld [vmem:[%s14211_s3 + $0x428] sm:$0xff]  ;;  %v12745_v38 = vmul.f32 %v12657_v61, %v14368_v14  ;;  %v8810_v6 = vld [vmem:[%s14211_s3 + $0x4b0] sm:$0xff]  ;;  %v8811_v54 = vld [vmem:[%s14211_s3 + $0x4b8] sm:$0xff] }
 0x3d1   : > { %9655 = vmatprep.subr.bf16.mxu0 %v9654_v16  ;;  %v8838_v16 = vld [vmem:[%s14211_s3 + $0x590] sm:$0xff]  ;;  %v12680_v5 = vpop.f32.mrb[49].mxu1  ;;  %v6293_v9 = vsel %vm5800_vm11, %v6288_v28, %v12682_v35  ;;  %v9728_v13 = vpack.c.bf16 %v8823_v37, %v8822_v48  ;;  %v9702_v48 = vpack.c.bf16 %v8811_v54, %v8810_v6  ;;  %v8843_v37 = vld [vmem:[%s14211_s3 + $0x5b8] sm:$0xff] }
 0x3d2   : > { %9685 = vmatpush3.bf16.msra.mxu1 %v9684_v18  ;;  %v12678_v18 = vpop.f32.mrb[17].mxu0  ;;  %v12702_v30 = vpop.f32.mrb[50].mxu1  ;;  %v8826_v54 = vld [vmem:[%s14211_s3 + $0x530] sm:$0xff] }
 0x3d3   : > { %9687 = vmatprep.subr.bf16.mxu1 %v9686_v20  ;;  %v5988_v20 = vmul.f32 %v12353_v49, %v12436_v23  ;;  %v12700_v62 = vpop.f32.mrb[18].mxu0  ;;  %v5987_v49 = vmul.f32 %v12357_v45, %v12436_v23  ;;  %v12713_v2 = vpop.f32.mrb[51].mxu1  ;;  %v9726_v45 = vpack.c.bf16 %v8839_v60, %v8838_v16  ;;  %v6061_v60 = vsel %vm5587_vm13, %v12623_v58, %v6060_v39 }
 0x3d4   : > { %9657 = vmatpush3.bf16.msra.mxu0 %v9656_v19  ;;  %v12692_v19 = vld [vmem:[%s14211_s3 + $0x4a8] sm:$0xff]  ;;  %v12711_v17 = vpop.f32.mrb[19].mxu0 }
 0x3d5   : > { %9691 = vmatprep.subr.bf16.mxu0 %v9690_v15  ;;  %v12723_v15 = vld [vmem:[%s14211_s3 + $0x420] sm:$0xff]  ;;  %v9698_v52 = vpack.c.bf16 %v12692_v19, %v12687_v34  ;;  %v12759_v10 = vrot.slane %v5988_v20, 1  ;;  %v12772_v28 = vrot.slane %v5987_v49, 1  ;;  %v12781_v34 = vld [vmem:[%s14211_s3 + $0x430] sm:$0xff]  ;;  %v12786_v19 = vld [vmem:[%s14211_s3 + $0x438] sm:$0xff] }
 0x3d6   : > { %9689 = vmatpush3.bf16.msra.mxu1 %v9688_v44  ;;  %v12731_v44 = vpop.f32.mrb[20].mxu0  ;;  %v8825_v49 = vld [vmem:[%s14211_s3 + $0x528] sm:$0xff] }
 0x3d7   : > { %6163 = vmatmul.mubr.f32.vlgmr.msra.gmra.mrb[32].mxu0 %v6050_v21  ;;  %9723 = vmatprep.subr.bf16.mxu1 %v9722_v22  ;;  %v8841_v22 = vld [vmem:[%s14211_s3 + $0x5a8] sm:$0xff]  ;;  %v12753_v41 = vpop.f32.mrb[21].mxu0  ;;  %v6296_v21 = vrot.slane %v12698_v27, 7  ;;  %v6059_v27 = vsel %vm5587_vm13, %v12644_v46, %v6058_v3 }
 0x3d8   : > { %6167 = vmatprep.mubr.f32.mxu0 %v6057_v36  ;;  %9693 = vmatpush3.bf16.msra.mxu0 %v9692_v42  ;;  %v8840_v42 = vld [vmem:[%s14211_s3 + $0x5a0] sm:$0xff]  ;;  %v12768_v16 = vpop.f32.mrb[22].mxu0  ;;  %v9700_v36 = vpack.c.bf16 %v8793_v12, %v12723_v15  ;;  %v6294_v15 = vrot.slane %v12745_v38, 7  ;;  %v8813_v12 = vld [vmem:[%s14211_s3 + $0x4c8] sm:$0xff] }
 0x3d9   : > { %9695 = vmatprep.subr.bf16.mxu0 %v9694_v32  ;;  %6399 = vmatmul.mubr.f32.vlgmr.msra.gmra.mrb[64].mxu1 %v6286_v29  ;;  %14381 = vst [vmem:[#allocation11_spill] sm:$0xff] %v12768_v16  ;;  %v12776_v32 = vmul.f32 %v12368_v55, %v12436_v23  ;;  %v12788_v20 = vpop.f32.mrb[23].mxu0  ;;  %v9730_v55 = vpack.c.bf16 %v8841_v22, %v8840_v42  ;;  %v8812_v29 = vld [vmem:[%s14211_s3 + $0x4c0] sm:$0xff] }
 0x3da   : > { %6403 = vmatprep.mubr.f32.mxu1 %v6293_v9  ;;  %9725 = vmatpush3.bf16.msra.mxu1 %v9724_v25  ;;  %14382 = vst [vmem:[#allocation9_spill] sm:$0xff] %v12788_v20  ;;  %v8824_v25 = vld [vmem:[%s14211_s3 + $0x520] sm:$0xff]  ;;  %v6297_v59 = vsel %vm5800_vm11, %v12682_v35, %v6296_v21  ;;  %v12827_v42 = vmul.f32 %v12382_v40, %v12436_v23  ;;  %v12837_v9 = vld [vmem:[%s14211_s3 + $0x448] sm:$0xff]  ;;  %v5972_v20 = vld [vmem:[#allocation2 + $0x90] sm:$0x1] }
 0x3db   : > { %6168 = vmatmul.mubr.f32.gmra.mrb[34].mxu0 %v6055_v7  ;;  %9727 = vmatprep.subr.bf16.mxu1 %v9726_v45  ;;  %v6291_v7 = vsel %vm5800_vm11, %v6285_v26, %v12738_v43  ;;  %v8842_v45 = vld [vmem:[%s14211_s3 + $0x5b0] sm:$0xff]  ;;  %v9704_v26 = vpack.c.bf16 %v12786_v19, %v12781_v34  ;;  %v9732_v38 = vpack.c.bf16 %v8825_v49, %v8824_v25  ;;  %v12832_v22 = vld [vmem:[%s14211_s3 + $0x440] sm:$0xff] }
 0x3dc   : > { %6172 = vmatprep.mubr.f32.mxu0 %v6061_v60  ;;  %9697 = vmatpush3.bf16.msra.mxu0 %v9696_v33  ;;  %v6065_v33 = vsel %vm5587_vm13, %v6060_v39, %v12759_v10  ;;  %v6063_v39 = vsel %vm5587_vm13, %v6058_v3, %v12772_v28  ;;  %v12839_v3 = vld [vmem:[#allocation2 + $0x78] sm:$0xff]  ;;  %v9734_v40 = vpack.c.bf16 %v8843_v37, %v8842_v45  ;;  %v14244_v45 = vrot.slane %v12827_v42, 1 }
 0x3dd   : > { %9699 = vmatprep.subr.bf16.mxu0 %v9698_v52  ;;  %6404 = vmatmul.mubr.f32.gmra.mrb[66].mxu1 %v6291_v7  ;;  %v14245_v52 = vrot.slane %v12776_v32, 1  ;;  %v12843_v6 = vmul.f32 %v12839_v3, %v12436_v23  ;;  %v8827_v60 = vld [vmem:[%s14211_s3 + $0x538] sm:$0xff]  ;;  %v6295_v34 = vsel %vm5800_vm11, %v12738_v43, %v6294_v15  ;;  %v9706_v19 = vpack.c.bf16 %v8813_v12, %v8812_v29 }
 0x3de   : > { %6408 = vmatprep.mubr.f32.mxu1 %v6297_v59  ;;  %9729 = vmatpush3.bf16.msra.mxu1 %v9728_v13  ;;  %v6301_v25 = vsel %vm5800_vm11, %v6296_v21, %v12372_v47  ;;  %v9708_v49 = vpack.c.bf16 %v12837_v9, %v12832_v22  ;;  %v12873_v7 = vmul.f32 %v12839_v3, %v14368_v14  ;;  %v8814_v21 = vld [vmem:[%s14211_s3 + $0x4d0] sm:$0xff]  ;;  %v8815_v59 = vld [vmem:[%s14211_s3 + $0x4d8] sm:$0xff]  ;;  %v8828_v22 = vld [vmem:[%s14211_s3 + $0x540] sm:$0xff] }
 0x3df   : > { %6173 = vmatmul.mubr.f32.gmra.mrb[36].mxu0 %v6059_v27  ;;  %9731 = vmatprep.subr.bf16.mxu1 %v9730_v55  ;;  %v12855_v13 = vsel %vm5587_vm13, %v12759_v10, %v14245_v52  ;;  %v12859_v27 = vld [vmem:[#allocation2 + $0x88] sm:$0xff]  ;;  %v8844_v55 = vld [vmem:[%s14211_s3 + $0x5c0] sm:$0xff]  ;;  %v9736_v37 = vpack.c.bf16 %v8827_v60, %v8826_v54  ;;  %v5973_v60 = vld [vmem:[#allocation2 + $0x98] sm:$0x1]  ;;  %v14383_v24 = vrot.slane %v12843_v6, 1  ;;  %v5995_v16 = vmul.f32 %v12436_v23, %v5972_v20 }
 0x3e0   : > { %6177 = vmatprep.mubr.f32.mxu0 %v6065_v33  ;;  %9701 = vmatpush3.bf16.msra.mxu0 %v9700_v36  ;;  %v8845_v36 = vld [vmem:[%s14211_s3 + $0x5c8] sm:$0xff]  ;;  %v12876_v33 = vld [vmem:[#allocation2 + $0x70] sm:$0xff]  ;;  %v5994_v12 = vmul.f32 %v12436_v23, %v12859_v27  ;;  %v12897_v54 = vld [vmem:[#allocation2 + $0x80] sm:$0xff]  ;;  %v6230_v52 = vmul.f32 %v12859_v27, %v14368_v14 }
 0x3e1   : > { %9703 = vmatprep.subr.bf16.mxu0 %v9702_v48  ;;  %6409 = vmatmul.mubr.f32.gmra.mrb[68].mxu1 %v6295_v34  ;;  %v12880_v48 = vmul.f32 %v12876_v33, %v12436_v23  ;;  %v8829_v9 = vld [vmem:[%s14211_s3 + $0x548] sm:$0xff]  ;;  %v12910_v34 = vmul.f32 %v12876_v33, %v14368_v14  ;;  %v6214_v29 = vld [vmem:[#allocation2 + $0x98] sm:$0x7f]  ;;  %v8832_v20 = vld [vmem:[%s14211_s3 + $0x560] sm:$0xff] }
 0x3e2   : > { %6413 = vmatprep.mubr.f32.mxu1 %v6301_v25  ;;  %9733 = vmatpush3.bf16.msra.mxu1 %v9732_v38  ;;  %v9738_v38 = vpack.c.bf16 %v8845_v36, %v8844_v55  ;;  %v8846_v55 = vld [vmem:[%s14211_s3 + $0x5d0] sm:$0xff]  ;;  %v9710_v36 = vpack.c.bf16 %v8815_v59, %v8814_v21  ;;  %v8799_v25 = vld [vmem:[%s14211_s3 + $0x458] sm:$0xff]  ;;  %v5993_v21 = vmul.f32 %v12436_v23, %v12897_v54  ;;  %v8816_v59 = vld [vmem:[%s14211_s3 + $0x4e0] sm:$0xff] }
 0x3e3   : > { %6178 = vmatmul.mubr.f32.gmra.mrb[38].mxu0 %v6063_v39  ;;  %9735 = vmatprep.subr.bf16.mxu1 %v9734_v40  ;;  %v12904_v39 = vsel %vm5587_vm13, %v12772_v28, %v14244_v45  ;;  %v6299_v40 = vsel %vm5800_vm11, %v6294_v15, %v12374_v51  ;;  %v8798_v15 = vld [vmem:[%s14211_s3 + $0x450] sm:$0xff]  ;;  %v6308_v45 = vrot.slane %v12873_v7, 7  ;;  %v8817_v7 = vld [vmem:[%s14211_s3 + $0x4e8] sm:$0xff]  ;;  %v8831_v47 = vld [vmem:[%s14211_s3 + $0x558] sm:$0xff] }
 0x3e4   : > { %6182 = vmatprep.mubr.f32.mxu0 %v12855_v13  ;;  %9705 = vmatpush3.bf16.msra.mxu0 %v9704_v26  ;;  %v8847_v26 = vld [vmem:[%s14211_s3 + $0x5d8] sm:$0xff]  ;;  %v8830_v51 = vld [vmem:[%s14211_s3 + $0x550] sm:$0xff] }
 0x3e5   : > { %9707 = vmatprep.subr.bf16.mxu0 %v9706_v19  ;;  %6414 = vmatmul.mubr.f32.gmra.mrb[70].mxu1 %v6299_v40  ;;  %v9740_v40 = vpack.c.bf16 %v8829_v9, %v8828_v22  ;;  %v12945_v9 = vrot.slane %v5994_v12, 1  ;;  %v12948_v19 = vmul.f32 %v12436_v23, %v5973_v60  ;;  %v6229_v12 = vmul.f32 %v12897_v54, %v14368_v14  ;;  %v8849_v60 = vld [vmem:[%s14211_s3 + $0x5e8] sm:$0xff] }
 0x3e6   : > { %6418 = vmatprep.mubr.f32.mxu1 %v12428_v56  ;;  %9737 = vmatpush3.bf16.msra.mxu1 %v9736_v37  ;;  %v14384_v37 = vrot.slane %v12776_v32, 1  ;;  %v9742_v56 = vpack.c.bf16 %v8847_v26, %v8846_v55  ;;  %v9714_v55 = vpack.c.bf16 %v8817_v7, %v8816_v59  ;;  %v8800_v26 = vld [vmem:[%s14211_s3 + $0x460] sm:$0xff]  ;;  %v14386_v32 = vrot.slane %v12880_v48, 1 }
 0x3e7   : > { %6183 = vmatmul.mubr.f32.gmra.mrb[40].mxu0 %v12904_v39  ;;  %9739 = vmatprep.subr.bf16.mxu1 %v9738_v38  ;;  %v8848_v38 = vld [vmem:[%s14211_s3 + $0x5e0] sm:$0xff]  ;;  %v12988_v59 = vrot.slane %v5993_v21, 1  ;;  %v9744_v7 = vpack.c.bf16 %v8831_v47, %v8830_v51  ;;  %v6080_v47 = vrot.slane %v12948_v19, 1 }
 0x3e8   : > { %v12943_v22 = vsel %vm5587_vm13, %v14384_v37, %v14383_v24  ;;  %9709 = vmatpush3.bf16.msra.mxu0 %v9708_v49  ;;  %v9712_v24 = vpack.c.bf16 %v8799_v25, %v8798_v15  ;;  %v12969_v49 = vsel %vm5800_vm11, %v12398_v0, %v6308_v45  ;;  %v8801_v15 = vld [vmem:[%s14211_s3 + $0x468] sm:$0xff]  ;;  %v12977_v25 = vrot.slane %v6230_v52, 7  ;;  %v8818_v52 = vld [vmem:[%s14211_s3 + $0x4f0] sm:$0xff] }
 0x3e9   : > { %6187 = vmatprep.mubr.f32.mxu0 %v12943_v22  ;;  %9711 = vmatprep.subr.bf16.mxu0 %v9710_v36  ;;  %v6232_v37 = vmul.f32 %v6214_v29, %v14368_v14  ;;  %v6213_v36 = vld [vmem:[#allocation2 + $0x90] sm:$0x7f]  ;;  %v8819_v29 = vld [vmem:[%s14211_s3 + $0x4f8] sm:$0xff]  ;;  %v9746_v51 = vpack.c.bf16 %v8849_v60, %v8848_v38  ;;  %v9716_v19 = vpack.c.bf16 %v8801_v15, %v8800_v26 }
 0x3ea   : > { %6419 = vmatmul.mubr.f32.gmra.mrb[72].mxu1 %v12465_v53  ;;  %14385 = vst [vmem:[#allocation23_spill] sm:$0xff] %v12977_v25  ;;  %v14387_v53 = vrot.slane %v12827_v42, 1  ;;  %v8850_v38 = vld [vmem:[%s14211_s3 + $0x5f0] sm:$0xff]  ;;  %v8851_v60 = vld [vmem:[%s14211_s3 + $0x5f8] sm:$0xff] }
 0x3eb   : > { %6423 = vmatprep.mubr.f32.mxu1 %v12969_v49  ;;  %9741 = vmatpush3.bf16.msra.mxu1 %v9740_v40  ;;  %v8833_v40 = vld [vmem:[%s14211_s3 + $0x568] sm:$0xff]  ;;  %v8802_v26 = vld [vmem:[%s14211_s3 + $0x470] sm:$0xff]  ;;  %v8803_v15 = vld [vmem:[%s14211_s3 + $0x478] sm:$0xff] }
 0x3ec   : > { %v12985_v0 = vsel %vm5587_vm13, %v14387_v53, %v14386_v32  ;;  %v14388_v53 = vrot.slane %v12843_v6, 1  ;;  %9743 = vmatprep.subr.bf16.mxu1 %v9742_v56  ;;  %9713 = vmatpush3.bf16.msra.mxu0 %v9712_v24  ;;  %v14389_v6 = vrot.slane %v12910_v34, 7  ;;  %v13018_v56 = vrot.slane %v6229_v12, 7  ;;  %v6596_v24 = vld [vmem:[#allocation2 + $0x28] sm:$0xfe] }
 0x3ed   : > { %6188 = vmatmul.mubr.f32.gmra.mrb[42].mxu0 %v12985_v0  ;;  %v6231_v32 = vmul.f32 %v6213_v36, %v14368_v14  ;;  %9715 = vmatprep.subr.bf16.mxu0 %v9714_v55  ;;  %v9718_v12 = vpack.c.bf16 %v8819_v29, %v8818_v52  ;;  %v6316_v36 = vrot.slane %v6232_v37, 7  ;;  %v9748_v52 = vpack.c.bf16 %v8833_v40, %v8832_v20  ;;  %v8868_v29 = vld [vmem:[%s14211_s3 + $0x680] sm:$0xff]  ;;  %v13051_v37 = vld [vmem:[#allocation2 + $0x48] sm:$0xff] }
 0x3ee   : > { %v13002_v42 = vsel %vm5587_vm13, %v14388_v53, %v12945_v9  ;;  %v13016_v21 = vsel %vm5800_vm11, %v12438_v50, %v14389_v6  ;;  %v13030_v50 = vsel %vm5800_vm11, %v6308_v45, %v12977_v25  ;;  %v14392_v53 = vrot.slane %v12880_v48, 1  ;;  %v8869_v6 = vld [vmem:[%s14211_s3 + $0x688] sm:$0xff]  ;;  %v6595_v40 = vld [vmem:[#allocation2 + $0x20] sm:$0xfe] }
 0x3ef   : > { %6192 = vmatprep.mubr.f32.mxu0 %v13002_v42  ;;  %14390 = vst [vmem:[#allocation24_spill] sm:$0xff] %v13016_v21  ;;  %6424 = vmatmul.mubr.f32.gmra.mrb[74].mxu1 %v13016_v21  ;;  %14391 = vst [vmem:[#allocation7_spill] sm:$0xff] %v13030_v50  ;;  %v6078_v45 = vrot.slane %v5995_v16, 1  ;;  %v6081_v48 = vsel %vm5587_vm13, %v12945_v9, %v6080_v47  ;;  %v8834_v16 = vld [vmem:[%s14211_s3 + $0x570] sm:$0xff]  ;;  %v6614_v20 = vmul.f32 %v6596_v24, %v12436_v23  ;;  %v8901_v21 = vld [vmem:[%s14211_s3 + $0x788] sm:$0xff] }
 0x3f0   : > { %v13042_v55 = vsel %vm5587_vm13, %v14392_v53, %v12988_v59  ;;  %6428 = vmatprep.mubr.f32.mxu1 %v13030_v50  ;;  %9745 = vmatpush3.bf16.msra.mxu1 %v9744_v7  ;;  %v9750_v53 = vpack.c.bf16 %v8851_v60, %v8850_v38  ;;  %v8835_v7 = vld [vmem:[%s14211_s3 + $0x578] sm:$0xff]  ;;  %v14393_v50 = vrot.slane %v12910_v34, 7  ;;  %v6314_v38 = vrot.slane %v6231_v32, 7  ;;  %v8900_v60 = vld [vmem:[%s14211_s3 + $0x780] sm:$0xff]  ;;  %v8853_v32 = vld [vmem:[%s14211_s3 + $0x608] sm:$0xff] }
 0x3f1   : > { %6193 = vmatmul.mubr.f32.gmra.mrb[44].mxu0 %v13042_v55  ;;  %9747 = vmatprep.subr.bf16.mxu1 %v9746_v51  ;;  %v9720_v51 = vpack.c.bf16 %v8803_v15, %v8802_v26  ;;  %v9754_v34 = vpack.c.bf16 %v8869_v6, %v8868_v29  ;;  %v8852_v24 = vld [vmem:[%s14211_s3 + $0x600] sm:$0xff]  ;;  %v9752_v15 = vpack.c.bf16 %v8835_v7, %v8834_v16  ;;  %v8871_v29 = vld [vmem:[%s14211_s3 + $0x698] sm:$0xff] }
 0x3f2   : > { %6197 = vmatprep.mubr.f32.mxu0 %v6081_v48  ;;  %9717 = vmatpush3.bf16.msra.mxu0 %v9716_v19  ;;  %v13067_v47 = vsel %vm5800_vm11, %v14393_v50, %v13018_v56  ;;  %v6317_v19 = vsel %vm5800_vm11, %v12977_v25, %v6316_v36  ;;  %v6618_v50 = vmul.f32 %v13051_v37, %v12436_v23  ;;  %v13086_v26 = vld [vmem:[#allocation2 + $0x40] sm:$0xff]  ;;  %v8870_v36 = vld [vmem:[%s14211_s3 + $0x690] sm:$0xff]  ;;  %v6685_v48 = vrot.slane %v6614_v20, 1  ;;  %v8903_v20 = vld [vmem:[%s14211_s3 + $0x798] sm:$0xff] }
 0x3f3   : > { %9719 = vmatprep.subr.bf16.mxu0 %v9718_v12  ;;  %6429 = vmatmul.mubr.f32.gmra.mrb[76].mxu1 %v13067_v47  ;;  %v6079_v12 = vsel %vm5587_vm13, %v12988_v59, %v6078_v45  ;;  %v6613_v6 = vmul.f32 %v6595_v40, %v12436_v23  ;;  %v9786_v25 = vpack.c.bf16 %v8901_v21, %v8900_v60  ;;  %v8884_v45 = vld [vmem:[%s14211_s3 + $0x700] sm:$0xff]  ;;  %v8902_v21 = vld [vmem:[%s14211_s3 + $0x790] sm:$0xff] }
 0x3f4   : > { %6433 = vmatprep.mubr.f32.mxu1 %v6317_v19  ;;  %9749 = vmatpush3.bf16.msra.mxu1 %v9748_v52  ;;  %v8885_v52 = vld [vmem:[%s14211_s3 + $0x708] sm:$0xff]  ;;  %v6315_v16 = vsel %vm5800_vm11, %v13018_v56, %v6314_v38  ;;  %v9756_v7 = vpack.c.bf16 %v8853_v32, %v8852_v24  ;;  %v9758_v40 = vpack.c.bf16 %v8871_v29, %v8870_v36  ;;  %v8855_v38 = vld [vmem:[%s14211_s3 + $0x618] sm:$0xff]  ;;  %v13122_v60 = vrot.slane %v6618_v50, 1  ;;  %v8886_v50 = vld [vmem:[%s14211_s3 + $0x710] sm:$0xff] }
 0x3f5   : > { %6198 = vmatmul.mubr.f32.gmra.mrb[46].mxu0 %v6079_v12  ;;  %9751 = vmatprep.subr.bf16.mxu1 %v9750_v53  ;;  %v6617_v53 = vmul.f32 %v13086_v26, %v12436_v23  ;;  %v6682_v19 = vrot.slane %v6613_v6, 1  ;;  %v9788_v24 = vpack.c.bf16 %v8885_v52, %v8884_v45  ;;  %v8873_v32 = vld [vmem:[%s14211_s3 + $0x6a8] sm:$0xff]  ;;  %v9790_v12 = vpack.c.bf16 %v8903_v20, %v8902_v21  ;;  %v8856_v45 = vld [vmem:[%s14211_s3 + $0x620] sm:$0xff] }
 0x3f6   : > { %9721 = vmatpush3.bf16.msra.mxu0 %v9720_v51  ;;  %6546 = vmatprep.mubr.f32.mxu0 %v12447_v31  ;;  %v6687_v31 = vsel %vm5587_vm13, %v6685_v48, %v12623_v58  ;;  %v8854_v51 = vld [vmem:[%s14211_s3 + $0x610] sm:$0xff]  ;;  %v8857_v52 = vld [vmem:[%s14211_s3 + $0x628] sm:$0xff]  ;;  %v8888_v21 = vld [vmem:[%s14211_s3 + $0x720] sm:$0xff] }
 0x3f7   : > { %9755 = vmatprep.subr.bf16.mxu0 %v9754_v34  ;;  %6434 = vmatmul.mubr.f32.gmra.mrb[78].mxu1 %v6315_v16  ;;  %v8872_v34 = vld [vmem:[%s14211_s3 + $0x6a0] sm:$0xff]  ;;  %v6684_v36 = vsel %vm5587_vm13, %v6682_v19, %v12644_v46  ;;  %v9760_v29 = vpack.c.bf16 %v8855_v38, %v8854_v51  ;;  %v13140_v6 = vrot.slane %v6617_v53, 1  ;;  %v8889_v20 = vld [vmem:[%s14211_s3 + $0x728] sm:$0xff]  ;;  %v8907_v51 = vld [vmem:[%s14211_s3 + $0x7b8] sm:$0xff] }
 0x3f8   : > { %9753 = vmatpush3.bf16.msra.mxu1 %v9752_v15  ;;  %6796 = vmatprep.mubr.f32.mxu1 %v6687_v31  ;;  %v8887_v15 = vld [vmem:[%s14211_s3 + $0x718] sm:$0xff]  ;;  %v9762_v48 = vpack.c.bf16 %v8873_v32, %v8872_v34  ;;  %v8876_v34 = vld [vmem:[%s14211_s3 + $0x6c0] sm:$0xff] }
 0x3f9   : > { %6547 = vmatmul.mubr.f32.vlgmr.msra.gmra.mrb[48].mxu0 %v12524_v11  ;;  %9787 = vmatprep.subr.bf16.mxu1 %v9786_v25  ;;  %v8904_v11 = vld [vmem:[%s14211_s3 + $0x7a0] sm:$0xff]  ;;  %v8905_v25 = vld [vmem:[%s14211_s3 + $0x7a8] sm:$0xff]  ;;  %v9792_v16 = vpack.c.bf16 %v8887_v15, %v8886_v50  ;;  %v6689_v31 = vsel %vm5587_vm13, %v12644_v46, %v13140_v6  ;;  %v8858_v46 = vld [vmem:[%s14211_s3 + $0x630] sm:$0xff] }
 0x3fa   : > { %6551 = vmatprep.mubr.f32.mxu0 %v12560_v4  ;;  %9757 = vmatpush3.bf16.msra.mxu0 %v9756_v7  ;;  %v6691_v4 = vsel %vm5587_vm13, %v12623_v58, %v13122_v60  ;;  %v8874_v7 = vld [vmem:[%s14211_s3 + $0x6b0] sm:$0xff]  ;;  %v8875_v58 = vld [vmem:[%s14211_s3 + $0x6b8] sm:$0xff]  ;;  %v9794_v53 = vpack.c.bf16 %v8905_v25, %v8904_v11  ;;  %v8909_v11 = vld [vmem:[%s14211_s3 + $0x7c8] sm:$0xff] }
 0x3fb   : > { %9759 = vmatprep.subr.bf16.mxu0 %v9758_v40  ;;  %6797 = vmatmul.mubr.f32.vlgmr.msra.gmra.mrb[80].mxu1 %v6684_v36  ;;  %v9764_v40 = vpack.c.bf16 %v8857_v52, %v8856_v45  ;;  %v9766_v38 = vpack.c.bf16 %v8875_v58, %v8874_v7  ;;  %v8859_v19 = vld [vmem:[%s14211_s3 + $0x638] sm:$0xff]  ;;  %v6693_v36 = vsel %vm5587_vm13, %v13140_v6, %v12772_v28  ;;  %v8861_v28 = vld [vmem:[%s14211_s3 + $0x648] sm:$0xff]  ;;  %v8878_v45 = vld [vmem:[%s14211_s3 + $0x6d0] sm:$0xff] }
 0x3fc   : > { %6801 = vmatprep.mubr.f32.mxu1 %v6691_v4  ;;  %9789 = vmatpush3.bf16.msra.mxu1 %v9788_v24  ;;  %v9796_v24 = vpack.c.bf16 %v8889_v20, %v8888_v21  ;;  %v8891_v50 = vld [vmem:[%s14211_s3 + $0x738] sm:$0xff]  ;;  %v8860_v4 = vld [vmem:[%s14211_s3 + $0x640] sm:$0xff]  ;;  %v13229_v7 = vld [vmem:[#allocation2 + $0x50] sm:$0xff] }
 0x3fd   : > { %6552 = vmatmul.mubr.f32.gmra.mrb[50].mxu0 %v12574_v8  ;;  %9791 = vmatprep.subr.bf16.mxu1 %v9790_v12  ;;  %v8906_v8 = vld [vmem:[%s14211_s3 + $0x7b0] sm:$0xff]  ;;  %v13202_v15 = vld [vmem:[#allocation2 + $0x58] sm:$0xff]  ;;  %v13238_v21 = vld [vmem:[#allocation2 + $0x68] sm:$0xff]  ;;  %v9772_v20 = vpack.c.bf16 %v8861_v28, %v8860_v4 }
 0x3fe   : > { %6556 = vmatprep.mubr.f32.mxu0 %v12631_v63  ;;  %9761 = vmatpush3.bf16.msra.mxu0 %v9760_v29  ;;  %v6695_v63 = vsel %vm5587_vm13, %v13122_v60, %v12759_v10  ;;  %v8877_v10 = vld [vmem:[%s14211_s3 + $0x6c8] sm:$0xff]  ;;  %v9798_v32 = vpack.c.bf16 %v8907_v51, %v8906_v8  ;;  %v8890_v12 = vld [vmem:[%s14211_s3 + $0x730] sm:$0xff]  ;;  %v8908_v29 = vld [vmem:[%s14211_s3 + $0x7c0] sm:$0xff] }
 0x3ff   : > { %9763 = vmatprep.subr.bf16.mxu0 %v9762_v48  ;;  %6802 = vmatmul.mubr.f32.gmra.mrb[82].mxu1 %v6689_v31  ;;  %v9770_v25 = vpack.c.bf16 %v8877_v10, %v8876_v34  ;;  %v9800_v48 = vpack.c.bf16 %v8891_v50, %v8890_v12  ;;  %v8879_v52 = vld [vmem:[%s14211_s3 + $0x6d8] sm:$0xff]  ;;  %v9802_v58 = vpack.c.bf16 %v8909_v11, %v8908_v29  ;;  %v8910_v31 = vld [vmem:[%s14211_s3 + $0x7d0] sm:$0xff]  ;;  %v6612_v34 = vld [vmem:[#allocation2 + $0xa8] sm:$0x1] }
 0x400   : > { %6806 = vmatprep.mubr.f32.mxu1 %v6695_v63  ;;  %9793 = vmatpush3.bf16.msra.mxu1 %v9792_v16  ;;  %v13227_v16 = vld [vmem:[#allocation2 + $0x98] sm:$0xff]  ;;  %v9774_v8 = vpack.c.bf16 %v8879_v52, %v8878_v45  ;;  %v8862_v51 = vld [vmem:[%s14211_s3 + $0x650] sm:$0xff]  ;;  %v13265_v10 = vld [vmem:[#allocation2 + $0x60] sm:$0xff] }
 0x401   : > { %6557 = vmatmul.mubr.f32.gmra.mrb[52].mxu0 %v12657_v61  ;;  %9795 = vmatprep.subr.bf16.mxu1 %v9794_v53  ;;  %v9768_v61 = vpack.c.bf16 %v8859_v19, %v8858_v46  ;;  %v8893_v53 = vld [vmem:[%s14211_s3 + $0x748] sm:$0xff]  ;;  %v8863_v63 = vld [vmem:[%s14211_s3 + $0x658] sm:$0xff]  ;;  %v13256_v46 = vld [vmem:[#allocation2 + $0x90] sm:$0xff] }
 0x402   : > { %6561 = vmatprep.mubr.f32.mxu0 %v13202_v15  ;;  %9765 = vmatpush3.bf16.msra.mxu0 %v9764_v40  ;;  %v8911_v40 = vld [vmem:[%s14211_s3 + $0x7d8] sm:$0xff]  ;;  %v9776_v50 = vpack.c.bf16 %v8863_v63, %v8862_v51  ;;  %v8913_v29 = vld [vmem:[%s14211_s3 + $0x7e8] sm:$0xff]  ;;  %v6611_v45 = vld [vmem:[#allocation2 + $0xa0] sm:$0x1] }
 0x403   : > { %9767 = vmatprep.subr.bf16.mxu0 %v9766_v38  ;;  %6807 = vmatmul.mubr.f32.gmra.mrb[84].mxu1 %v6693_v36  ;;  %v6628_v38 = vmul.f32 %v13227_v16, %v12436_v23  ;;  %v8895_v12 = vld [vmem:[%s14211_s3 + $0x758] sm:$0xff]  ;;  %v6627_v36 = vmul.f32 %v13256_v46, %v12436_v23  ;;  %v8865_v4 = vld [vmem:[%s14211_s3 + $0x668] sm:$0xff]  ;;  %v8914_v51 = vld [vmem:[%s14211_s3 + $0x7f0] sm:$0xff] }
 0x404   : > { %6811 = vmatprep.mubr.f32.mxu1 %v12855_v13  ;;  %9797 = vmatpush3.bf16.msra.mxu1 %v9796_v24  ;;  %v8892_v13 = vld [vmem:[%s14211_s3 + $0x740] sm:$0xff]  ;;  %v8881_v24 = vld [vmem:[%s14211_s3 + $0x6e8] sm:$0xff]  ;;  %v8915_v63 = vld [vmem:[%s14211_s3 + $0x7f8] sm:$0xff] }
 0x405   : > { %6562 = vmatmul.mubr.f32.gmra.mrb[54].mxu0 %v13229_v7  ;;  %9799 = vmatprep.subr.bf16.mxu1 %v9798_v32  ;;  %v9804_v19 = vpack.c.bf16 %v8893_v53, %v8892_v13  ;;  %v9806_v32 = vpack.c.bf16 %v8911_v40, %v8910_v31  ;;  %v13290_v28 = vrot.slane %v6628_v38, 1  ;;  %v6846_v13 = vld [vmem:[#allocation2 + $0x28] sm:$0x80]  ;;  %v13308_v40 = vrot.slane %v6627_v36, 1 }
 0x406   : > { %6566 = vmatprep.mubr.f32.mxu0 %v13238_v21  ;;  %9769 = vmatpush3.bf16.msra.mxu0 %v9768_v61  ;;  %v8912_v61 = vld [vmem:[%s14211_s3 + $0x7e0] sm:$0xff]  ;;  %v9814_v36 = vpack.c.bf16 %v8915_v63, %v8914_v51  ;;  %v8992_v51 = vadd.f32 %v12678_v18, %v12663_v1  ;;  %v9974_v18 = vld [vmem:[#allocation2 + $0x38] sm:$0xff] }
 0x407   : > { %9771 = vmatprep.subr.bf16.mxu0 %v9770_v25  ;;  %6812 = vmatmul.mubr.f32.gmra.mrb[86].mxu1 %v12904_v39  ;;  %v8880_v39 = vld [vmem:[%s14211_s3 + $0x6e0] sm:$0xff]  ;;  %v9810_v53 = vpack.c.bf16 %v8913_v29, %v8912_v61  ;;  %v6711_v38 = vsel %vm5587_vm13, %v12945_v9, %v13290_v28  ;;  %v8898_v61 = vld [vmem:[%s14211_s3 + $0x770] sm:$0xff]  ;;  %v8899_v29 = vld [vmem:[%s14211_s3 + $0x778] sm:$0xff] }
 0x408   : > { %6816 = vmatprep.mubr.f32.mxu1 %v12943_v22  ;;  %9801 = vmatpush3.bf16.msra.mxu1 %v9800_v48  ;;  %v8894_v22 = vld [vmem:[%s14211_s3 + $0x750] sm:$0xff]  ;;  %v9778_v11 = vpack.c.bf16 %v8881_v24, %v8880_v39  ;;  %v8864_v25 = vld [vmem:[%s14211_s3 + $0x660] sm:$0xff]  ;;  %v6630_v48 = vmul.f32 %v6612_v34, %v12436_v23  ;;  %v8867_v24 = vld [vmem:[%s14211_s3 + $0x678] sm:$0xff]  ;;  %v6850_v34 = vmul.f32 %v6846_v13, %v14368_v14 }
 0x409   : > { %6567 = vmatmul.mubr.f32.gmra.mrb[56].mxu0 %v13265_v10  ;;  %9803 = vmatprep.subr.bf16.mxu1 %v9802_v58  ;;  %v9808_v52 = vpack.c.bf16 %v8895_v12, %v8894_v22  ;;  %v8883_v58 = vld [vmem:[%s14211_s3 + $0x6f8] sm:$0xff]  ;;  %v9780_v31 = vpack.c.bf16 %v8865_v4, %v8864_v25  ;;  %v8866_v39 = vld [vmem:[%s14211_s3 + $0x670] sm:$0xff]  ;;  %v6845_v22 = vld [vmem:[#allocation2 + $0x20] sm:$0x80] }
 0x40a   : > { %6571 = vmatprep.mubr.f32.mxu0 %v12839_v3  ;;  %9773 = vmatpush3.bf16.msra.mxu0 %v9772_v20  ;;  %v8896_v20 = vld [vmem:[%s14211_s3 + $0x760] sm:$0xff]  ;;  %v8933_v12 = vld [vmem:[%s14211_s3 + $0x888] sm:$0xff]  ;;  %v9784_v25 = vpack.c.bf16 %v8867_v24, %v8866_v39  ;;  %v6849_v4 = vmul.f32 %v6845_v22, %v14368_v14  ;;  %v8918_v24 = vld [vmem:[%s14211_s3 + $0x810] sm:$0xff] }
 0x40b   : > { %9775 = vmatprep.subr.bf16.mxu0 %v9774_v8  ;;  %6817 = vmatmul.mubr.f32.gmra.mrb[88].mxu1 %v12985_v0  ;;  %v8882_v0 = vld [vmem:[%s14211_s3 + $0x6f0] sm:$0xff]  ;;  %v6629_v8 = vmul.f32 %v6611_v45, %v12436_v23  ;;  %v8932_v9 = vld [vmem:[%s14211_s3 + $0x880] sm:$0xff]  ;;  %v6921_v45 = vrot.slane %v6850_v34, 7  ;;  %v8917_v13 = vld [vmem:[%s14211_s3 + $0x808] sm:$0xff] }
 0x40c   : > { %6821 = vmatprep.mubr.f32.mxu1 %v13002_v42  ;;  %9805 = vmatpush3.bf16.msra.mxu1 %v9804_v19  ;;  %v8897_v42 = vld [vmem:[%s14211_s3 + $0x768] sm:$0xff]  ;;  %v9782_v19 = vpack.c.bf16 %v8883_v58, %v8882_v0  ;;  %v9818_v0 = vpack.c.bf16 %v8933_v12, %v8932_v9  ;;  %v8916_v58 = vld [vmem:[%s14211_s3 + $0x800] sm:$0xff]  ;;  %v6918_v63 = vrot.slane %v6849_v4, 7  ;;  %v8919_v34 = vld [vmem:[%s14211_s3 + $0x818] sm:$0xff]  ;;  %v8995_v9 = vadd.f32 %v12711_v17, %v12700_v62 }
 0x40d   : > { %6572 = vmatmul.mubr.f32.gmra.mrb[58].mxu0 %v12876_v33  ;;  %9807 = vmatprep.subr.bf16.mxu1 %v9806_v32  ;;  %v6714_v32 = vrot.slane %v6630_v48, 1  ;;  %v6712_v48 = vrot.slane %v6629_v8, 1  ;;  %v8936_v22 = vld [vmem:[%s14211_s3 + $0x8a0] sm:$0xff]  ;;  %v9048_v12 = vadd.f32 %v12680_v5, %v12665_v57  ;;  %v9824_v57 = vpack.c.bf16 %v8919_v34, %v8918_v24 }
 0x40e   : > { %6576 = vmatprep.mubr.f32.mxu0 %v12859_v27  ;;  %9777 = vmatpush3.bf16.msra.mxu0 %v9776_v50  ;;  %v13337_v50 = vmul.f32 %v13051_v37, %v14368_v14  ;;  %v6920_v1 = vsel %vm5800_vm11, %v6918_v63, %v12738_v43  ;;  %v8924_v34 = vld [vmem:[%s14211_s3 + $0x840] sm:$0xff] }
 0x40f   : > { %9779 = vmatprep.subr.bf16.mxu0 %v9778_v11  ;;  %6822 = vmatmul.mubr.f32.gmra.mrb[90].mxu1 %v13042_v55  ;;  %v9812_v55 = vpack.c.bf16 %v8897_v42, %v8896_v20  ;;  %v6709_v11 = vsel %vm5587_vm13, %v12988_v59, %v13308_v40  ;;  %v9816_v59 = vpack.c.bf16 %v8899_v29, %v8898_v61  ;;  %v8934_v20 = vld [vmem:[%s14211_s3 + $0x890] sm:$0xff]  ;;  %v8935_v42 = vld [vmem:[%s14211_s3 + $0x898] sm:$0xff] }
 0x410   : > { %6826 = vmatprep.mubr.f32.mxu1 %v6711_v38  ;;  %9809 = vmatpush3.bf16.msra.mxu1 %v9808_v52  ;;  %v6715_v52 = vsel %vm5587_vm13, %v13290_v28, %v6714_v32  ;;  %v6926_v8 = vrot.slane %v13337_v50, 7  ;;  %v6713_v38 = vsel %vm5587_vm13, %v13308_v40, %v6712_v48  ;;  %v9822_v39 = vpack.c.bf16 %v8935_v42, %v8934_v20  ;;  %v8922_v20 = vld [vmem:[%s14211_s3 + $0x830] sm:$0xff]  ;;  %v8923_v42 = vld [vmem:[%s14211_s3 + $0x838] sm:$0xff] }
 0x411   : > { %6577 = vmatmul.mubr.f32.gmra.mrb[60].mxu0 %v12897_v54  ;;  %9811 = vmatprep.subr.bf16.mxu1 %v9810_v53  ;;  %v13360_v53 = vmul.f32 %v13086_v26, %v14368_v14  ;;  %v9002_v50 = vpop.f32.mrb[24].mxu0  ;;  %v9051_v61 = vadd.f32 %v12713_v2, %v12702_v30  ;;  %v13401_v29 = vadd.f32 %v12753_v41, %v12731_v44  ;;  %v8920_v2 = vld [vmem:[%s14211_s3 + $0x820] sm:$0xff]  ;;  %v8921_v44 = vld [vmem:[%s14211_s3 + $0x828] sm:$0xff] }
 0x412   : > { %6581 = vmatprep.mubr.f32.mxu0 %v13227_v16  ;;  %9781 = vmatpush3.bf16.msra.mxu0 %v9780_v31  ;;  %v6923_v31 = vsel %vm5800_vm11, %v6921_v45, %v12682_v35  ;;  %v9003_v62 = vpop.f32.mrb[25].mxu0  ;;  %v13407_v5 = vadd.f32 %v9048_v12, %v8992_v51  ;;  %v8938_v45 = vld [vmem:[%s14211_s3 + $0x8b0] sm:$0xff]  ;;  %v8940_v51 = vld [vmem:[%s14211_s3 + $0x8c0] sm:$0xff] }
 0x413   : > { %9783 = vmatprep.subr.bf16.mxu0 %v9782_v19  ;;  %6827 = vmatmul.mubr.f32.gmra.mrb[92].mxu1 %v6709_v11  ;;  %v9820_v19 = vpack.c.bf16 %v8917_v13, %v8916_v58  ;;  %v6924_v32 = vrot.slane %v13360_v53, 7  ;;  %v14394_v11 = vld [vmem:[#allocation11_spill] sm:$0xff]  ;;  %v13409_v17 = vadd.f32 %v9003_v62, %v9002_v50  ;;  %v13417_v41 = vadd.f32 %v9051_v61, %v8995_v9  ;;  %v14396_v58 = vld [vmem:[#allocation14_spill] sm:$0xff]  ;;  %v6848_v9 = vld [vmem:[#allocation2 + $0xa8] sm:$0x7f] }
 0x414   : > { %6831 = vmatprep.mubr.f32.mxu1 %v6715_v52  ;;  %9813 = vmatpush3.bf16.msra.mxu1 %v9812_v55  ;;  %v8937_v55 = vld [vmem:[%s14211_s3 + $0x8a8] sm:$0xff]  ;;  %v8939_v52 = vld [vmem:[%s14211_s3 + $0x8b8] sm:$0xff]  ;;  %v6931_v13 = vsel %vm5800_vm11, %v6926_v8, %v14396_v58  ;;  %v9828_v53 = vpack.c.bf16 %v8921_v44, %v8920_v2  ;;  %v8926_v12 = vld [vmem:[%s14211_s3 + $0x850] sm:$0xff] }
 0x415   : > { %6582 = vmatmul.mubr.f32.gmra.mrb[62].mxu0 %v13256_v46  ;;  %9815 = vmatprep.subr.bf16.mxu1 %v9814_v36  ;;  %v6927_v36 = vsel %vm5800_vm11, %v12682_v35, %v6926_v8  ;;  %v9975_v35 = vld [vmem:[#allocation2 + $0x30] sm:$0xff]  ;;  %v9826_v30 = vpack.c.bf16 %v8937_v55, %v8936_v22  ;;  %v6925_v48 = vsel %vm5800_vm11, %v12738_v43, %v6924_v32  ;;  %v8927_v50 = vld [vmem:[%s14211_s3 + $0x858] sm:$0xff]  ;;  %v14400_v61 = vld [vmem:[#allocation24_spill] sm:$0xff] }
 0x416   : > { %9785 = vmatpush3.bf16.msra.mxu0 %v9784_v25  ;;  %7032 = vmatprep.mubr.f32.mxu0 %v6923_v31  ;;  %v14395_v25 = vld [vmem:[#allocation9_spill] sm:$0xff]  ;;  %v14397_v31 = vld [vmem:[#allocation15_spill] sm:$0xff]  ;;  %v6864_v22 = vmul.f32 %v13227_v16, %v14368_v14 }
 0x417   : > { %9819 = vmatprep.subr.bf16.mxu0 %v9818_v0  ;;  %6832 = vmatmul.mubr.f32.gmra.mrb[94].mxu1 %v6713_v38  ;;  %v13405_v4 = vadd.f32 %v14395_v25, %v14394_v11  ;;  %v9005_v0 = vpop.f32.mrb[26].mxu0  ;;  %v6929_v8 = vsel %vm5800_vm11, %v6924_v32, %v14397_v31  ;;  %v8943_v32 = vld [vmem:[%s14211_s3 + $0x8d8] sm:$0xff]  ;;  %v6866_v25 = vmul.f32 %v6848_v9, %v14368_v14  ;;  %v6847_v62 = vld [vmem:[#allocation2 + $0xa0] sm:$0x7f]  ;;  %v8929_v2 = vld [vmem:[%s14211_s3 + $0x868] sm:$0xff] }
 0x418   : > { %9817 = vmatpush3.bf16.msra.mxu1 %v9816_v59  ;;  %7180 = vmatprep.mubr.f32.mxu1 %v9974_v18  ;;  %v9006_v59 = vpop.f32.mrb[27].mxu0  ;;  %v8942_v18 = vld [vmem:[%s14211_s3 + $0x8d0] sm:$0xff]  ;;  %v6946_v11 = vrot.slane %v6864_v22, 7 }
 0x419   : > { %7033 = vmatmul.mubr.f32.vlgmr.msra.gmra.mrb[64].mxu0 %v6920_v1  ;;  %v13430_v43 = vadd.f32 %v9006_v59, %v9005_v0  ;;  %v9008_v63 = vpop.f32.mrb[28].mxu0  ;;  %v8925_v1 = vld [vmem:[%s14211_s3 + $0x848] sm:$0xff]  ;;  %v14402_v0 = vld [vmem:[#allocation23_spill] sm:$0xff] }
 0x41a   : > { %7037 = vmatprep.mubr.f32.mxu0 %v6927_v36  ;;  %9821 = vmatpush3.bf16.msra.mxu0 %v9820_v19  ;;  %v9009_v38 = vpop.f32.mrb[29].mxu0  ;;  %v14398_v19 = vld [vmem:[#allocation20_spill] sm:$0xff]  ;;  %v9836_v55 = vpack.c.bf16 %v8925_v1, %v8924_v34  ;;  %v6947_v58 = vsel %vm5800_vm11, %v14402_v0, %v6946_v11  ;;  %v7234_v59 = vld [vmem:[#allocation2 + $0x58] sm:$0xff] }
 0x41b   : > { %9823 = vmatprep.subr.bf16.mxu0 %v9822_v39  ;;  %7181 = vmatmul.mubr.f32.vlgmr.msra.gmra.mrb[96].mxu1 %v9975_v35  ;;  %v9832_v39 = vpack.c.bf16 %v8923_v42, %v8922_v20  ;;  %v13449_v24 = vadd.f32 %v9009_v38, %v9008_v63  ;;  %v8944_v36 = vld [vmem:[%s14211_s3 + $0x8e0] sm:$0xff]  ;;  %v7229_v20 = vld [vmem:[#allocation2 + $0x30] sm:$0xfe] }
 0x41c   : > { %7185 = vmatprep.mubr.f32.mxu1 %v13051_v37  ;;  %v9830_v37 = vpack.c.bf16 %v8939_v52, %v8938_v45  ;;  %v8946_v45 = vld [vmem:[%s14211_s3 + $0x8f0] sm:$0xff]  ;;  %v7230_v52 = vld [vmem:[#allocation2 + $0x38] sm:$0xfe]  ;;  %v7247_v63 = vmul.f32 %v7229_v20, %v12436_v23 }
 0x41d   : > { %7038 = vmatmul.mubr.f32.gmra.mrb[66].mxu0 %v6925_v48  ;;  %v6865_v48 = vmul.f32 %v6847_v62, %v14368_v14 }
 0x41e   : > { %7042 = vmatprep.mubr.f32.mxu0 %v6931_v13  ;;  %9825 = vmatpush3.bf16.msra.mxu0 %v9824_v57  ;;  %v14401_v57 = vld [vmem:[#allocation7_spill] sm:$0xff]  ;;  %v6950_v13 = vrot.slane %v6866_v25, 7  ;;  %v7240_v25 = vld [vmem:[#allocation2 + $0x88] sm:$0xff] }
 0x41f   : > { %9827 = vmatprep.subr.bf16.mxu0 %v9826_v30  ;;  %7186 = vmatmul.mubr.f32.gmra.mrb[98].mxu1 %v13086_v26  ;;  %v8941_v26 = vld [vmem:[%s14211_s3 + $0x8c8] sm:$0xff]  ;;  %v8928_v30 = vld [vmem:[%s14211_s3 + $0x860] sm:$0xff]  ;;  %v6948_v31 = vrot.slane %v6865_v48, 7 }
 0x420   : > { %7190 = vmatprep.mubr.f32.mxu1 %v13202_v15  ;;  %v9834_v15 = vpack.c.bf16 %v8941_v26, %v8940_v51  ;;  %v7233_v51 = vld [vmem:[#allocation2 + $0x50] sm:$0xff] }
 0x421   : > { %7043 = vmatmul.mubr.f32.gmra.mrb[68].mxu0 %v6929_v8  ;;  %v7252_v8 = vmul.f32 %v7234_v59, %v12436_v23 }
 0x422   : > { %7047 = vmatprep.mubr.f32.mxu0 %v14398_v19  ;;  %9829 = vmatpush3.bf16.msra.mxu0 %v9828_v53  ;;  %v8930_v53 = vld [vmem:[%s14211_s3 + $0x870] sm:$0xff] }
 0x423   : > { %9831 = vmatprep.subr.bf16.mxu0 %v9830_v37  ;;  %7191 = vmatmul.mubr.f32.gmra.mrb[100].mxu1 %v13229_v7  ;;  %v14399_v7 = vld [vmem:[#allocation22_spill] sm:$0xff]  ;;  %v7248_v37 = vmul.f32 %v7230_v52, %v12436_v23 }
 0x424   : > { %7195 = vmatprep.mubr.f32.mxu1 %v13238_v21  ;;  %v9838_v21 = vpack.c.bf16 %v8943_v32, %v8942_v18  ;;  %v7324_v18 = vrot.slane %v7252_v8, 1 }
 0x425   : > { %7048 = vmatmul.mubr.f32.gmra.mrb[70].mxu0 %v14399_v7  ;;  %v7319_v38 = vrot.slane %v7248_v37, 1  ;;  %v7316_v7 = vrot.slane %v7247_v63, 1 }
 0x426   : > { %7052 = vmatprep.mubr.f32.mxu0 %v12969_v49  ;;  %9833 = vmatpush3.bf16.msra.mxu0 %v9832_v39  ;;  %v6863_v49 = vmul.f32 %v13256_v46, %v14368_v14  ;;  %v7251_v39 = vmul.f32 %v7233_v51, %v12436_v23 }
 0x427   : > { %9835 = vmatprep.subr.bf16.mxu0 %v9834_v15  ;;  %7196 = vmatmul.mubr.f32.gmra.mrb[102].mxu1 %v13265_v10  ;;  %v8945_v10 = vld [vmem:[%s14211_s3 + $0x8e8] sm:$0xff]  ;;  %v7321_v1 = vsel %vm5587_vm13, %v7319_v38, %v13122_v60 }
 0x428   : > { %7200 = vmatprep.mubr.f32.mxu1 %v12839_v3  ;;  %v9840_v3 = vpack.c.bf16 %v8927_v50, %v8926_v12  ;;  %v9842_v35 = vpack.c.bf16 %v8945_v10, %v8944_v36  ;;  %v6944_v44 = vrot.slane %v6863_v49, 7  ;;  %v7236_v15 = vld [vmem:[#allocation2 + $0x68] sm:$0xff]  ;;  %v7322_v12 = vrot.slane %v7251_v39, 1  ;;  %v7237_v10 = vld [vmem:[#allocation2 + $0x70] sm:$0xff] }
 0x429   : > { %7053 = vmatmul.mubr.f32.gmra.mrb[72].mxu0 %v14400_v61  ;;  %v7254_v22 = vmul.f32 %v7236_v15, %v12436_v23  ;;  %v7325_v49 = vsel %vm5587_vm13, %v13122_v60, %v7324_v18 }
 0x42a   : > { %7057 = vmatprep.mubr.f32.mxu0 %v14401_v57  ;;  %9837 = vmatpush3.bf16.msra.mxu0 %v9836_v55  ;;  %v6945_v42 = vsel %vm5800_vm11, %v13018_v56, %v6944_v44  ;;  %v6949_v56 = vsel %vm5800_vm11, %v6944_v44, %v6948_v31  ;;  %v7235_v55 = vld [vmem:[#allocation2 + $0x60] sm:$0xff]  ;;  %v7323_v57 = vsel %vm5587_vm13, %v13140_v6, %v7322_v12 }
 0x42b   : > { %9839 = vmatprep.subr.bf16.mxu0 %v9838_v21  ;;  %7201 = vmatmul.mubr.f32.gmra.mrb[104].mxu1 %v12876_v33  ;;  %v8947_v33 = vld [vmem:[%s14211_s3 + $0x8f8] sm:$0xff]  ;;  %v7318_v21 = vsel %vm5587_vm13, %v7316_v7, %v13140_v6  ;;  %v7328_v62 = vrot.slane %v7254_v22, 1 }
 0x42c   : > { %7205 = vmatprep.mubr.f32.mxu1 %v12859_v27  ;;  %v9844_v27 = vpack.c.bf16 %v8929_v2, %v8928_v30  ;;  %v9846_v14 = vpack.c.bf16 %v8947_v33, %v8946_v45  ;;  %v7258_v30 = vmul.f32 %v7240_v25, %v12436_v23  ;;  %v7239_v2 = vld [vmem:[#allocation2 + $0x80] sm:$0xff] }
 0x42d   : > { %7058 = vmatmul.mubr.f32.gmra.mrb[74].mxu0 %v13067_v47  ;;  %v8931_v47 = vld [vmem:[%s14211_s3 + $0x878] sm:$0xff]  ;;  %v7257_v33 = vmul.f32 %v7239_v2, %v12436_v23 }
 0x42e   : > { %7062 = vmatprep.mubr.f32.mxu0 %v6947_v58  ;;  %9841 = vmatpush3.bf16.msra.mxu0 %v9840_v3  ;;  %v9848_v26 = vpack.c.bf16 %v8931_v47, %v8930_v53  ;;  %v7255_v3 = vmul.f32 %v7237_v10, %v12436_v23  ;;  %v7336_v6 = vrot.slane %v7258_v30, 1  ;;  %v7245_v53 = vld [vmem:[#allocation2 + $0xb0] sm:$0x1] }
 0x42f   : > { %9843 = vmatprep.subr.bf16.mxu0 %v9842_v35  ;;  %7206 = vmatmul.mubr.f32.gmra.mrb[106].mxu1 %v12897_v54  ;;  %v6951_v54 = vsel %vm5800_vm11, %v6946_v11, %v6950_v13  ;;  %v7253_v11 = vmul.f32 %v7235_v55, %v12436_v23  ;;  %v7329_v35 = vsel %vm5587_vm13, %v7324_v18, %v7328_v62  ;;  %v7334_v58 = vrot.slane %v7257_v33, 1  ;;  %v7246_v13 = vld [vmem:[#allocation2 + $0xb8] sm:$0x1] }
 0x430   : > { %7210 = vmatprep.mubr.f32.mxu1 %v13227_v16  ;;  %v9976_v16 = vld [vmem:[#allocation2] sm:$0xff]  ;;  %v7330_v45 = vrot.slane %v7255_v3, 1  ;;  %v7341_v37 = vsel %vm5587_vm13, %v7336_v6, %v13290_v28  ;;  %v7263_v20 = vmul.f32 %v7245_v53, %v12436_v23 }
 0x431   : > { %7063 = vmatmul.mubr.f32.gmra.mrb[76].mxu0 %v6945_v42  ;;  %v7326_v44 = vrot.slane %v7253_v11, 1  ;;  %v7262_v59 = vmul.f32 %v9976_v16, %v12436_v23 }
 0x432   : > { %7067 = vmatprep.mubr.f32.mxu0 %v6951_v54  ;;  %9845 = vmatpush3.bf16.msra.mxu0 %v9844_v27  ;;  %v7335_v47 = vsel %vm5587_vm13, %v7330_v45, %v7334_v58  ;;  %v7339_v54 = vsel %vm5587_vm13, %v7334_v58, %v13308_v40  ;;  %v7346_v51 = vrot.slane %v7263_v20, 1 }
 0x433   : > { %9847 = vmatprep.subr.bf16.mxu0 %v9846_v14  ;;  %7211 = vmatmul.mubr.f32.gmra.mrb[108].mxu1 %v13256_v46  ;;  %v9052_v19 = vpop.f32.mrb[52].mxu1  ;;  %v7238_v46 = vld [vmem:[#allocation2 + $0x78] sm:$0xff]  ;;  %v7327_v48 = vsel %vm5587_vm13, %v7322_v12, %v7326_v44  ;;  %v7331_v0 = vsel %vm5587_vm13, %v7326_v44, %v7330_v45  ;;  %v7264_v14 = vmul.f32 %v7246_v13, %v12436_v23  ;;  %v7344_v42 = vrot.slane %v7262_v59, 1 }
 0x434   : > { %7215 = vmatprep.mubr.f32.mxu1 %v9976_v16  ;;  %v9053_v34 = vpop.f32.mrb[53].mxu1  ;;  %v7256_v36 = vmul.f32 %v7238_v46, %v12436_v23 }
 0x435   : > { %7068 = vmatmul.mubr.f32.gmra.mrb[78].mxu0 %v6949_v56  ;;  %v9054_v32 = vadd.f32 %v9053_v34, %v9052_v19  ;;  %v7348_v31 = vrot.slane %v7264_v14, 1  ;;  %v7345_v8 = vsel %vm5587_vm13, %v13290_v28, %v7344_v42  ;;  %v7343_v63 = vsel %vm5587_vm13, %v13308_v40, %v7344_v42 }
 0x436   : > { %9849 = vmatpush3.bf16.msra.mxu0 %v9848_v26  ;;  %7430 = vmatprep.mubr.f32.mxu0 %v7321_v1  ;;  %v9011_v50 = vpop.f32.mrb[30].mxu0  ;;  %v7332_v60 = vrot.slane %v7256_v36, 1  ;;  %v7347_v23 = vsel %vm5587_vm13, %v7344_v42, %v7346_v51 }
 0x437   : > { %7216 = vmatmul.mubr.f32.gmra.mrb[110].mxu1 %v9976_v16  ;;  %v13527_v9 = vadd.f32 %v9054_v32, %v13401_v29  ;;  %v9012_v61 = vpop.f32.mrb[31].mxu0  ;;  %v7349_v26 = vsel %vm5587_vm13, %v7344_v42, %v7348_v31 }
 0x438   : > { %8085 = vmatprep.mubr.f32.mxu1 %v9976_v16  ;;  %v13535_v29 = vadd.f32 %v9012_v61, %v9011_v50  ;;  %v7333_v52 = vsel %vm5587_vm13, %v7328_v62, %v7332_v60  ;;  %v7337_v27 = vsel %vm5587_vm13, %v7332_v60, %v7336_v6  ;;  %vm8568_vm13 = vcmask 3072  }
 0x439   : > { %7431 = vmatmul.mubr.f32.vlgmr.msra.gmra.mrb[80].mxu0 %v7318_v21 }
 0x43a   : > { %7435 = vmatprep.mubr.f32.mxu0 %v7325_v49 }
 0x43d   : > { %7436 = vmatmul.mubr.f32.gmra.mrb[82].mxu0 %v7323_v57 }
 0x43e   : > { %7440 = vmatprep.mubr.f32.mxu0 %v7329_v35 }
 0x441   : > { %7441 = vmatmul.mubr.f32.gmra.mrb[84].mxu0 %v7327_v48 }
 0x442   : > { %7445 = vmatprep.mubr.f32.mxu0 %v7333_v52 }
 0x445   : > { %7446 = vmatmul.mubr.f32.gmra.mrb[86].mxu0 %v7331_v0 }
 0x446   : > { %7450 = vmatprep.mubr.f32.mxu0 %v7337_v27 }
 0x449   : > { %7451 = vmatmul.mubr.f32.gmra.mrb[88].mxu0 %v7335_v47 }
 0x44a   : > { %7455 = vmatprep.mubr.f32.mxu0 %v7341_v37 }
 0x44d   : > { %7456 = vmatmul.mubr.f32.gmra.mrb[90].mxu0 %v7339_v54 }
 0x44e   : > { %7460 = vmatprep.mubr.f32.mxu0 %v7345_v8 }
 0x451   : > { %7461 = vmatmul.mubr.f32.gmra.mrb[92].mxu0 %v7343_v63 }
 0x452   : > { %7465 = vmatprep.mubr.f32.mxu0 %v7349_v26 }
 0x455   : > { %7466 = vmatmul.mubr.f32.gmra.mrb[94].mxu0 %v7347_v23 }
 0x48a   : > { %v9055_v38 = vpop.f32.mrb[54].mxu1 }
 0x48b   : > { %v9056_v19 = vpop.f32.mrb[55].mxu1 }
 0x48c   : > { %v9057_v56 = vadd.f32 %v9056_v19, %v9055_v38 }
 0x48e   : > { %v5933_v16 = vadd.f32 %v9057_v56, %v13405_v4 }
 0x492   : > { %v9058_v39 = vpop.f32.mrb[56].mxu1 }
 0x493   : > { %v9059_v15 = vpop.f32.mrb[57].mxu1 }
 0x494   : > { %v9060_v28 = vadd.f32 %v9059_v15, %v9058_v39 }
 0x496   : > { %v5938_v34 = vadd.f32 %v9060_v28, %v13409_v17  ;;  %v9061_v1 = vpop.f32.mrb[58].mxu1 }
 0x497   : > { %v9062_v18 = vpop.f32.mrb[59].mxu1 }
 0x498   : > { %v9063_v32 = vadd.f32 %v9062_v18, %v9061_v1 }
 0x49a   : > { %v5943_v40 = vadd.f32 %v9063_v32, %v13430_v43  ;;  %v9064_v7 = vpop.f32.mrb[60].mxu1 }
 0x49b   : > { %v9065_v46 = vpop.f32.mrb[61].mxu1 }
 0x49c   : > { %v9066_v22 = vadd.f32 %v9065_v46, %v9064_v7 }
 0x49e   : > { %v5948_v55 = vadd.f32 %v9066_v22, %v13449_v24  ;;  %v9067_v21 = vpop.f32.mrb[62].mxu1 }
 0x49f   : > { %v9068_v12 = vpop.f32.mrb[63].mxu1 }
 0x4a0   : > { %v9069_v50 = vadd.f32 %v9068_v12, %v9067_v21 }
 0x4a2   : > { %v5953_v4 = vadd.f32 %v9069_v50, %v13535_v29 }
 0x4aa   : > { %v9102_v49 = vpop.f32.mrb[32].mxu0 }
 0x4ab   : > { %v9103_v36 = vpop.f32.mrb[33].mxu0 }
 0x4ac   : > { %v9104_v10 = vadd.f32 %v9103_v36, %v9102_v49  ;;  %v9158_v61 = vpop.f32.mrb[64].mxu1 }
 0x4ad   : > { %v9159_v17 = vpop.f32.mrb[65].mxu1 }
 0x4ae   : > { %v6203_v11 = vadd.f32 %v9104_v10, %v13407_v5  ;;  %v9105_v25 = vpop.f32.mrb[34].mxu0  ;;  %v9160_v62 = vadd.f32 %v9159_v17, %v9158_v61 }
 0x4af   : > { %v9106_v43 = vpop.f32.mrb[35].mxu0 }
 0x4b0   : > { %v9107_v57 = vadd.f32 %v9106_v43, %v9105_v25  ;;  %v6439_v3 = vadd.f32 %v9160_v62, %v6203_v11  ;;  %v9161_v35 = vpop.f32.mrb[66].mxu1 }
 0x4b1   : > { %v9162_v60 = vpop.f32.mrb[67].mxu1 }
 0x4b2   : > { %v6204_v24 = vadd.f32 %v9107_v57, %v13417_v41  ;;  %v9108_v30 = vpop.f32.mrb[36].mxu0  ;;  %v9163_v2 = vadd.f32 %v9162_v60, %v9161_v35 }
 0x4b3   : > { %v9109_v44 = vpop.f32.mrb[37].mxu0 }
 0x4b4   : > { %v9110_v29 = vadd.f32 %v9109_v44, %v9108_v30  ;;  %v6440_v48 = vadd.f32 %v9163_v2, %v6204_v24  ;;  %v9164_v45 = vpop.f32.mrb[68].mxu1 }
 0x4b5   : > { %v9165_v33 = vpop.f32.mrb[69].mxu1 }
 0x4b6   : > { %v6205_v52 = vadd.f32 %v9110_v29, %v13527_v9  ;;  %v9111_v6 = vpop.f32.mrb[38].mxu0  ;;  %v9166_v5 = vadd.f32 %v9165_v33, %v9164_v45 }
 0x4b7   : > { %v9112_v0 = vpop.f32.mrb[39].mxu0 }
 0x4b8   : > { %v9113_v58 = vadd.f32 %v9112_v0, %v9111_v6  ;;  %v6441_v13 = vadd.f32 %v9166_v5, %v6205_v52  ;;  %v9167_v27 = vpop.f32.mrb[70].mxu1 }
 0x4b9   : > { %v9168_v59 = vpop.f32.mrb[71].mxu1 }
 0x4ba   : > { %v6206_v14 = vadd.f32 %v9113_v58, %v5933_v16  ;;  %v9114_v53 = vpop.f32.mrb[40].mxu0  ;;  %v9169_v47 = vadd.f32 %v9168_v59, %v9167_v27 }
 0x4bb   : > { %v9115_v41 = vpop.f32.mrb[41].mxu0 }
 0x4bc   : > { %v9116_v37 = vadd.f32 %v9115_v41, %v9114_v53  ;;  %v6442_v20 = vadd.f32 %v9169_v47, %v6206_v14  ;;  %v7974_v47 = vld [vmem:[%s14215_s7 + $0x18] sm:$0xff] }
 0x4bd   : > { %v9170_v42 = vpop.f32.mrb[72].mxu1 }
 0x4be   : > { %v9171_v31 = vpop.f32.mrb[73].mxu1  ;;  %v6207_v54 = vadd.f32 %v9116_v37, %v5938_v34 }
 0x4bf   : > { %v9172_v51 = vadd.f32 %v9171_v31, %v9170_v42 }
 0x4c0   : > { %v9117_v8 = vpop.f32.mrb[42].mxu0 }
 0x4c1   : > { %v9118_v26 = vpop.f32.mrb[43].mxu0  ;;  %v13569_v63 = vadd.f32 %v9172_v51, %v6207_v54  ;;  %v7973_v54 = vld [vmem:[%s14215_s7 + $0x10] sm:$0xff] }
 0x4c2   : > { %v9119_v9 = vadd.f32 %v9118_v26, %v9117_v8  ;;  %v9173_v23 = vpop.f32.mrb[74].mxu1 }
 0x4c3   : > { %v9174_v38 = vpop.f32.mrb[75].mxu1 }
 0x4c4   : > { %v6208_v19 = vadd.f32 %v9119_v9, %v5943_v40  ;;  %v9120_v56 = vpop.f32.mrb[44].mxu0  ;;  %v9175_v39 = vadd.f32 %v9174_v38, %v9173_v23 }
 0x4c5   : > { %v9121_v16 = vpop.f32.mrb[45].mxu0 }
 0x4c6   : > { %v9122_v15 = vadd.f32 %v9121_v16, %v9120_v56  ;;  %v13571_v28 = vadd.f32 %v9175_v39, %v6208_v19  ;;  %v9176_v1 = vpop.f32.mrb[76].mxu1 }
 0x4c7   : > { %v9177_v18 = vpop.f32.mrb[77].mxu1 }
 0x4c8   : > { %v6209_v32 = vadd.f32 %v9122_v15, %v5948_v55  ;;  %v9123_v7 = vpop.f32.mrb[46].mxu0  ;;  %v9178_v34 = vadd.f32 %v9177_v18, %v9176_v1 }
 0x4c9   : > { %v9124_v46 = vpop.f32.mrb[47].mxu0 }
 0x4ca   : > { %v9125_v22 = vadd.f32 %v9124_v46, %v9123_v7  ;;  %v13573_v21 = vadd.f32 %v9178_v34, %v6209_v32  ;;  %v9179_v12 = vpop.f32.mrb[78].mxu1 }
 0x4cb   : > { %v9180_v50 = vpop.f32.mrb[79].mxu1 }
 0x4cc   : > { %v6210_v49 = vadd.f32 %v9125_v22, %v5953_v4  ;;  %v9214_v36 = vpop.f32.mrb[48].mxu0  ;;  %v9181_v40 = vadd.f32 %v9180_v50, %v9179_v12 }
 0x4cd   : > { %v9215_v10 = vpop.f32.mrb[49].mxu0 }
 0x4ce   : > { %v9216_v61 = vadd.f32 %v9215_v10, %v9214_v36  ;;  %v13575_v17 = vadd.f32 %v9181_v40, %v6210_v49  ;;  %v9270_v11 = vpop.f32.mrb[80].mxu1 }
 0x4cf   : > { %v9271_v25 = vpop.f32.mrb[81].mxu1 }
 0x4d0   : > { %v6587_v62 = vadd.f32 %v9216_v61, %v6439_v3  ;;  %v9217_v43 = vpop.f32.mrb[50].mxu0  ;;  %v9272_v55 = vadd.f32 %v9271_v25, %v9270_v11  ;;  %v7976_v61 = vld [vmem:[%s14215_s7 + $0x28] sm:$0xff]  ;;  %v7975_v11 = vld [vmem:[%s14215_s7 + $0x20] sm:$0xff] }
 0x4d1   : > { %v9218_v57 = vpop.f32.mrb[51].mxu0 }
 0x4d2   : > { %v9219_v35 = vadd.f32 %v9218_v57, %v9217_v43  ;;  %v13577_v60 = vadd.f32 %v9272_v55, %v6587_v62  ;;  %v9273_v24 = vpop.f32.mrb[82].mxu1  ;;  %v7977_v55 = vld [vmem:[%s14215_s7 + $0x30] sm:$0xff]  ;;  %v7980_v57 = vld [vmem:[%s14215_s7 + $0x48] sm:$0xff] }
 0x4d3   : > { %v9274_v30 = vpop.f32.mrb[83].mxu1 }
 0x4d4   : > { %v6588_v2 = vadd.f32 %v9219_v35, %v6440_v48  ;;  %v9220_v44 = vpop.f32.mrb[52].mxu0  ;;  %v9275_v4 = vadd.f32 %v9274_v30, %v9273_v24  ;;  %v7972_v48 = vld [vmem:[%s14215_s7 + $0x8] sm:$0xff]  ;;  %v7982_v35 = vld [vmem:[%s14215_s7 + $0x58] sm:$0xff]  ;;  %v9856_v30 = vpack.c.bf16 %v7977_v55, %v7975_v11 }
 0x4d5   : > { %v9221_v29 = vpop.f32.mrb[53].mxu0  ;;  %v9850_v31 = vpack.c.bf16 %v7974_v47, %v7972_v48  ;;  %v7985_v48 = vld [vmem:[%s14215_s7 + $0x70] sm:$0xff] }
 0x4d6   : > { %v9222_v45 = vadd.f32 %v9221_v29, %v9220_v44  ;;  %v13579_v33 = vadd.f32 %v9275_v4, %v6588_v2  ;;  %v9276_v52 = vpop.f32.mrb[84].mxu1  ;;  %v9858_v2 = vpack.c.bf16 %v7982_v35, %v7980_v57  ;;  %v7979_v44 = vld [vmem:[%s14215_s7 + $0x40] sm:$0xff]  ;;  %v7981_v4 = vld [vmem:[%s14215_s7 + $0x50] sm:$0xff]  ;;  %v7984_v29 = vld [vmem:[%s14215_s7 + $0x68] sm:$0xff] }
 0x4d7   : > { %v9277_v6 = vpop.f32.mrb[85].mxu1  ;;  %9851 = vmatprep.subr.bf16.mxu1 %v9850_v31 }
 0x4d8   : > { %v6589_v5 = vadd.f32 %v9222_v45, %v6441_v13  ;;  %v9223_v0 = vpop.f32.mrb[54].mxu0  ;;  %v9278_v3 = vadd.f32 %v9277_v6, %v9276_v52  ;;  %v7971_v13 = vld [vmem:[%s14215_s7] sm:$0xff] }
 0x4d9   : > { %v9224_v58 = vpop.f32.mrb[55].mxu0  ;;  %v9852_v51 = vpack.c.bf16 %v7973_v54, %v7971_v13 }
 0x4da   : > { %v9225_v27 = vadd.f32 %v9224_v58, %v9223_v0  ;;  %v13581_v59 = vadd.f32 %v9278_v3, %v6589_v5  ;;  %v9279_v14 = vpop.f32.mrb[86].mxu1  ;;  %v7986_v5 = vld [vmem:[%s14215_s7 + $0x78] sm:$0xff]  ;;  %v9860_v3 = vpack.c.bf16 %v7981_v4, %v7979_v44 }
 0x4db   : > { %v9280_v53 = vpop.f32.mrb[87].mxu1  ;;  %9853 = vmatpush1.bf16.msra.mxu1 %v9852_v51 }
 0x4dc   : > { %v6590_v41 = vadd.f32 %v9225_v27, %v6442_v20  ;;  %v9226_v37 = vpop.f32.mrb[56].mxu0  ;;  %v9281_v42 = vadd.f32 %v9280_v53, %v9279_v14  ;;  %v9862_v53 = vpack.c.bf16 %v7986_v5, %v7984_v29 }
 0x4dd   : > { %v9227_v8 = vpop.f32.mrb[57].mxu0 }
 0x4de   : > { %v9228_v26 = vadd.f32 %v9227_v8, %v9226_v37  ;;  %v13595_v9 = vadd.f32 %v9281_v42, %v6590_v41  ;;  %v9282_v23 = vpop.f32.mrb[88].mxu1 }
 0x4df   : > { %v9283_v38 = vpop.f32.mrb[89].mxu1 }
 0x4e0   : > { %v6591_v19 = vadd.f32 %v9228_v26, %v13569_v63  ;;  %v9229_v56 = vpop.f32.mrb[58].mxu0  ;;  %v9284_v20 = vadd.f32 %v9283_v38, %v9282_v23 }
 0x4e1   : > { %v9230_v39 = vpop.f32.mrb[59].mxu0 }
 0x4e2   : > { %v9231_v16 = vadd.f32 %v9230_v39, %v9229_v56  ;;  %v13598_v15 = vadd.f32 %v9284_v20, %v6591_v19  ;;  %v9285_v1 = vpop.f32.mrb[90].mxu1 }
 0x4e3   : > { %v9286_v18 = vpop.f32.mrb[91].mxu1 }
 0x4e4   : > { %v6592_v32 = vadd.f32 %v9231_v16, %v13571_v28  ;;  %v9232_v7 = vpop.f32.mrb[60].mxu0  ;;  %v9287_v34 = vadd.f32 %v9286_v18, %v9285_v1  ;;  %v7978_v28 = vld [vmem:[%s14215_s7 + $0x38] sm:$0xff]  ;;  %v8225_v1 = vld [vmem:[%s14216_s8 + $0x80] sm:$0xff]  ;;  %v8226_v18 = vld [vmem:[%s14216_s8 + $0x88] sm:$0xff] }
 0x4e5   : > { %v9233_v46 = vpop.f32.mrb[61].mxu0 }
 0x4e6   : > { %v9234_v22 = vadd.f32 %v9233_v46, %v9232_v7  ;;  %v13601_v12 = vadd.f32 %v9287_v34, %v6592_v32  ;;  %v9288_v50 = vpop.f32.mrb[92].mxu1  ;;  %v9866_v46 = vpack.c.bf16 %v8226_v18, %v8225_v1  ;;  %v13702_v1 = vld [vmem:[%s14212_s4 + $0x1] ss:$0 sm:$0xff] }
 0x4e7   : > { %v9289_v49 = vpop.f32.mrb[93].mxu1 }
 0x4e8   : > { %v6593_v63 = vadd.f32 %v9234_v22, %v13573_v21  ;;  %v9235_v36 = vpop.f32.mrb[62].mxu0  ;;  %v9290_v40 = vadd.f32 %v9289_v49, %v9288_v50  ;;  %v9854_v21 = vpack.c.bf16 %v7978_v28, %v7976_v61  ;;  %v8210_v22 = vld [vmem:[%s14216_s8 + $0x8] sm:$0xff]  ;;  %v8227_v50 = vld [vmem:[%s14216_s8 + $0x90] sm:$0xff]  ;;  %v8228_v49 = vld [vmem:[%s14216_s8 + $0x98] sm:$0xff]  ;;  %9867 = vmatprep.subr.bf16.mxu0 %v9866_v46 }
 0x4e9   : > { %v9236_v10 = vpop.f32.mrb[63].mxu0 }
 0x4ea   : > { %v9237_v25 = vadd.f32 %v9236_v10, %v9235_v36  ;;  %v13613_v62 = vadd.f32 %v9290_v40, %v6593_v63  ;;  %v9291_v43 = vpop.f32.mrb[94].mxu1  ;;  %9855 = vmatprep.subr.bf16.mxu1 %v9854_v21  ;;  %v9870_v40 = vpack.c.bf16 %v8228_v49, %v8227_v50  ;;  %v8212_v10 = vld [vmem:[%s14216_s8 + $0x18] sm:$0xff] }
 0x4eb   : > { %v9292_v24 = vpop.f32.mrb[95].mxu1  ;;  %9857 = vmatpush1.bf16.msra.mxu1 %v9856_v30  ;;  %v14403_v50 = vld [vmem:[#allocation10_spill] sm:$0xff] }
 0x4ec   : > { %v6594_v45 = vadd.f32 %v9237_v25, %v13575_v17  ;;  %v9326_v52 = vpop.f32.mrb[64].mxu0  ;;  %v9293_v6 = vadd.f32 %v9292_v24, %v9291_v43  ;;  %9859 = vmatprep.subr.bf16.mxu1 %v9858_v2  ;;  %v7983_v17 = vld [vmem:[%s14215_s7 + $0x60] sm:$0xff] }
 0x4ed   : > { %v9327_v0 = vpop.f32.mrb[65].mxu0  ;;  %v9864_v31 = vpack.c.bf16 %v7985_v48, %v7983_v17 }
 0x4ee   : > { %v9328_v58 = vadd.f32 %v9327_v0, %v9326_v52  ;;  %v13637_v27 = vadd.f32 %v9293_v6, %v6594_v45  ;;  %v9382_v14 = vpop.f32.mrb[96].mxu1 }
 0x4ef   : > { %v9383_v47 = vpop.f32.mrb[97].mxu1  ;;  %9861 = vmatpush1.bf16.msra.mxu1 %v9860_v3 }
 0x4f0   : > { %v7073_v13 = vadd.f32 %v9328_v58, %v13577_v60  ;;  %v9329_v41 = vpop.f32.mrb[66].mxu0  ;;  %v9384_v37 = vadd.f32 %v9383_v47, %v9382_v14  ;;  %9863 = vmatprep.subr.bf16.mxu1 %v9862_v53 }
 0x4f1   : > { %v9330_v42 = vpop.f32.mrb[67].mxu0 }
 0x4f2   : > { %v9331_v54 = vadd.f32 %v9330_v42, %v9329_v41  ;;  %v13646_v8 = vadd.f32 %v9384_v37, %v7073_v13  ;;  %v9385_v51 = vpop.f32.mrb[98].mxu1 }
 0x4f3   : > { %v9386_v26 = vpop.f32.mrb[99].mxu1  ;;  %9865 = vmatpush1.bf16.msra.mxu1 %v9864_v31 }
 0x4f4   : > { %v7074_v23 = vadd.f32 %v9331_v54, %v13579_v33  ;;  %v9332_v38 = vpop.f32.mrb[68].mxu0  ;;  %v9387_v19 = vadd.f32 %v9386_v26, %v9385_v51  ;;  %v8209_v33 = vld [vmem:[%s14216_s8] sm:$0xff] }
 0x4f5   : > { %v9333_v56 = vpop.f32.mrb[69].mxu0  ;;  %v9868_v36 = vpack.c.bf16 %v8210_v22, %v8209_v33 }
 0x4f6   : > { %v9334_v20 = vadd.f32 %v9333_v56, %v9332_v38  ;;  %v13649_v39 = vadd.f32 %v9387_v19, %v7074_v23  ;;  %v9388_v60 = vpop.f32.mrb[100].mxu1 }
 0x4f7   : > { %v9389_v16 = vpop.f32.mrb[101].mxu1  ;;  %9869 = vmatpush3.bf16.msra.mxu0 %v9868_v36 }
 0x4f8   : > { %v7075_v32 = vadd.f32 %v9334_v20, %v13581_v59  ;;  %v9335_v7 = vpop.f32.mrb[70].mxu0  ;;  %v9390_v34 = vadd.f32 %v9389_v16, %v9388_v60  ;;  %v8211_v59 = vld [vmem:[%s14216_s8 + $0x10] sm:$0xff]  ;;  %9871 = vmatprep.subr.bf16.mxu0 %v9870_v40 }
 0x4f9   : > { %v9336_v63 = vpop.f32.mrb[71].mxu0  ;;  %v9872_v43 = vpack.c.bf16 %v8212_v10, %v8211_v59 }
 0x4fa   : > { %v9337_v61 = vadd.f32 %v9336_v63, %v9335_v7  ;;  %v13676_v28 = vadd.f32 %v9390_v34, %v7075_v32  ;;  %v9391_v11 = vpop.f32.mrb[102].mxu1 }
 0x4fb   : > { %v9392_v25 = vpop.f32.mrb[103].mxu1  ;;  %9873 = vmatpush3.bf16.msra.mxu0 %v9872_v43 }
 0x4fc   : > { %v7076_v21 = vadd.f32 %v9337_v61, %v13595_v9  ;;  %v9338_v55 = vpop.f32.mrb[72].mxu0  ;;  %v9393_v57 = vadd.f32 %v9392_v25, %v9391_v11 }
 0x4fd   : > { %v9339_v35 = vpop.f32.mrb[73].mxu0 }
 0x4fe   : > { %v9340_v24 = vadd.f32 %v9339_v35, %v9338_v55  ;;  %v13679_v30 = vadd.f32 %v9393_v57, %v7076_v21  ;;  %v9394_v2 = vpop.f32.mrb[104].mxu1 }
 0x4ff   : > { %v9395_v44 = vpop.f32.mrb[105].mxu1 }
 0x500   : > { %v7077_v4 = vadd.f32 %v9340_v24, %v13598_v15  ;;  %v9341_v29 = vpop.f32.mrb[74].mxu0  ;;  %v9396_v45 = vadd.f32 %v9395_v44, %v9394_v2 }
 0x501   : > { %v9342_v52 = vpop.f32.mrb[75].mxu0 }
 0x502   : > { %v9343_v6 = vadd.f32 %v9342_v52, %v9341_v29  ;;  %v13682_v5 = vadd.f32 %v9396_v45, %v7077_v4  ;;  %v9397_v0 = vpop.f32.mrb[106].mxu1 }
 0x503   : > { %v9398_v9 = vpop.f32.mrb[107].mxu1 }
 0x504   : > { %v7078_v3 = vadd.f32 %v9343_v6, %v13601_v12  ;;  %v9344_v58 = vpop.f32.mrb[76].mxu0  ;;  %v9399_v14 = vadd.f32 %v9398_v9, %v9397_v0 }
 0x505   : > { %v9345_v53 = vpop.f32.mrb[77].mxu0 }
 0x506   : > { %v9346_v17 = vadd.f32 %v9345_v53, %v9344_v58  ;;  %v13685_v48 = vadd.f32 %v9399_v14, %v7078_v3  ;;  %v9400_v47 = vpop.f32.mrb[108].mxu1 }
 0x507   : > { %v9401_v13 = vpop.f32.mrb[109].mxu1 }
 0x508   : > { %v7079_v15 = vadd.f32 %v9346_v17, %v13613_v62  ;;  %v9347_v41 = vpop.f32.mrb[78].mxu0  ;;  %v9402_v37 = vadd.f32 %v9401_v13, %v9400_v47  ;;  %v13696_v62 = vld [vmem:[%s14212_s4] ss:$0 sm:$0xff] }
 0x509   : > { %v9348_v42 = vpop.f32.mrb[79].mxu0 }
 0x50a   : > { %v9349_v31 = vadd.f32 %v9348_v42, %v9347_v41  ;;  %v13688_v54 = vadd.f32 %v9402_v37, %v7079_v15  ;;  %v9403_v51 = vpop.f32.mrb[110].mxu1 }
 0x50b   : > { %v9404_v26 = vpop.f32.mrb[111].mxu1 }
 0x50c   : > { %v7080_v12 = vadd.f32 %v9349_v31, %v13637_v27  ;;  %v9438_v23 = vpop.f32.mrb[80].mxu0  ;;  %v9405_v38 = vadd.f32 %v9404_v26, %v9403_v51 }
 0x50d   : > { %v9439_v19 = vpop.f32.mrb[81].mxu0 }
 0x50e   : > { %v9440_v56 = vadd.f32 %v9439_v19, %v9438_v23  ;;  %v13691_v20 = vadd.f32 %v9405_v38, %v7080_v12 }
 0x510   : > { %v7471_v60 = vadd.f32 %v9440_v56, %v13646_v8  ;;  %v9441_v16 = vpop.f32.mrb[82].mxu0 }
 0x511   : > { %v9442_v27 = vpop.f32.mrb[83].mxu0 }
 0x512   : > { %v7484_v18 = vmul.f32 %v13696_v62, %v7471_v60  ;;  %v9443_v33 = vadd.f32 %v9442_v27, %v9441_v16 }
 0x514   : > { %v7497_v32 = vadd.f32 %v13702_v1, %v7484_v18  ;;  %v7472_v7 = vadd.f32 %v9443_v33, %v13649_v39  ;;  %v9444_v34 = vpop.f32.mrb[84].mxu0 }
 0x515   : > { %v9445_v46 = vpop.f32.mrb[85].mxu0 }
 0x516   : > { %v7513_v22 = vcombine.high %v7497_v32, %v7497_v32  ;;  %v7520_v8 = vrot.slane %v7497_v32, %v14403_v50  ;;  %v7485_v49 = vmul.f32 %v13696_v62, %v7472_v7  ;;  %v9446_v63 = vadd.f32 %v9445_v46, %v9444_v34 }
 0x518   : > { %v7527_v36 = vrot.slane %v7513_v22, %v14403_v50  ;;  %v7528_v40 = vcombine.high %v7520_v8, %v7520_v8  ;;  %v7682_v59 = vsel %vm7681_vm14, %v7520_v8, -inf  ;;  %v7498_v10 = vadd.f32 %v13702_v1, %v7485_v49  ;;  %v9447_v61 = vpop.f32.mrb[86].mxu0 }
 0x519   : > { %v7683_v11 = vrot.slane %v7682_v59, 4  ;;  %v7473_v39 = vadd.f32 %v9446_v63, %v13676_v28  ;;  %v9448_v25 = vpop.f32.mrb[87].mxu0 }
 0x51a   : > { %v7529_v43 = vcombine.high %v7527_v36, %v7527_v36  ;;  %v7689_v21 = vsel %vm7681_vm14, %v7528_v40, -inf  ;;  %v7696_v55 = vsel %vm7681_vm14, %v7527_v36, -inf  ;;  %v7530_v57 = vcombine.high %v7498_v10, %v7498_v10 }
 0x51b   : > { %v7684_v35 = vmax.f32 %v7682_v59, %v7683_v11  ;;  %v7690_v24 = vrot.slane %v7689_v21, 4  ;;  %v7697_v2 = vrot.slane %v7696_v55, 4  ;;  %v7537_v44 = vrot.slane %v7498_v10, %v14403_v50 }
 0x51c   : > { %v7703_v4 = vsel %vm7681_vm14, %v7529_v43, -inf  ;;  %v7544_v29 = vrot.slane %v7530_v57, %v14403_v50  ;;  %v7486_v45 = vmul.f32 %v13696_v62, %v7473_v39  ;;  %v9449_v28 = vadd.f32 %v9448_v25, %v9447_v61  ;;  %v13719_v52 = vpop.f32.mrb[88].mxu0 }
 0x51d   : > { %v7685_v6 = vrot.slane %v7684_v35, 2  ;;  %v7691_v0 = vmax.f32 %v7689_v21, %v7690_v24  ;;  %v7698_v9 = vmax.f32 %v7696_v55, %v7697_v2  ;;  %v7704_v3 = vrot.slane %v7703_v4, 4  ;;  %v13721_v58 = vpop.f32.mrb[89].mxu0 }
 0x51e   : > { %v7545_v14 = vcombine.high %v7537_v44, %v7537_v44  ;;  %v7546_v53 = vcombine.high %v7544_v29, %v7544_v29  ;;  %v7710_v17 = vsel %vm7681_vm14, %v7537_v44, -inf  ;;  %v7724_v47 = vsel %vm7681_vm14, %v7544_v29, -inf }
 0x51f   : > { %v7686_v13 = vmax.f32 %v7684_v35, %v7685_v6  ;;  %v7692_v15 = vrot.slane %v7691_v0, 2  ;;  %v7699_v41 = vrot.slane %v7698_v9, 2  ;;  %v7705_v37 = vmax.f32 %v7703_v4, %v7704_v3 }
 0x520   : > { %v7711_v42 = vrot.slane %v7710_v17, 4  ;;  %v7717_v31 = vsel %vm7681_vm14, %v7545_v14, -inf  ;;  %v7725_v51 = vrot.slane %v7724_v47, 4  ;;  %v7731_v26 = vsel %vm7681_vm14, %v7546_v53, -inf  ;;  %v13727_v12 = vpop.f32.mrb[90].mxu0 }
 0x521   : > { %v7687_v23 = vrot.slane %v7686_v13, 1  ;;  %v7693_v38 = vmax.f32 %v7691_v0, %v7692_v15  ;;  %v7700_v19 = vmax.f32 %v7698_v9, %v7699_v41  ;;  %v7706_v56 = vrot.slane %v7705_v37, 2  ;;  %v13729_v60 = vpop.f32.mrb[91].mxu0 }
 0x522   : > { %v7712_v16 = vmax.f32 %v7710_v17, %v7711_v42  ;;  %v7718_v27 = vrot.slane %v7717_v31, 4  ;;  %v7726_v18 = vmax.f32 %v7724_v47, %v7725_v51  ;;  %v7732_v33 = vrot.slane %v7731_v26, 4 }
 0x523   : > { %v7688_v32 = vmax.f32 %v7686_v13, %v7687_v23  ;;  %v7694_v7 = vrot.slane %v7693_v38, 1  ;;  %v7701_v34 = vrot.slane %v7700_v19, 1  ;;  %v7707_v46 = vmax.f32 %v7705_v37, %v7706_v56 }
 0x524   : > { %v7713_v22 = vrot.slane %v7712_v16, 2  ;;  %v7719_v8 = vmax.f32 %v7717_v31, %v7718_v27  ;;  %v7727_v49 = vrot.slane %v7726_v18, 2  ;;  %v7733_v63 = vmax.f32 %v7731_v26, %v7732_v33  ;;  %v13731_v36 = vpop.f32.mrb[92].mxu0 }
 0x525   : > { %v7695_v40 = vmax.f32 %v7693_v38, %v7694_v7  ;;  %v7702_v59 = vmax.f32 %v7700_v19, %v7701_v34  ;;  %v7708_v10 = vrot.slane %v7707_v46, 1  ;;  %v7907_v61 = vsel %vm7906_vm15, %v7688_v32, -inf  ;;  %v13734_v11 = vpop.f32.mrb[93].mxu0 }
 0x526   : > { %v7714_v39 = vmax.f32 %v7712_v16, %v7713_v22  ;;  %v7720_v25 = vrot.slane %v7719_v8, 2  ;;  %v7728_v43 = vmax.f32 %v7726_v18, %v7727_v49  ;;  %v7734_v21 = vrot.slane %v7733_v63, 2 }
 0x527   : > { %v7709_v55 = vmax.f32 %v7707_v46, %v7708_v10  ;;  %v7910_v57 = vsel %vm7906_vm15, %v7695_v40, -inf  ;;  %v7913_v35 = vsel %vm7906_vm15, %v7702_v59, -inf  ;;  %v7499_v24 = vadd.f32 %v13702_v1, %v7486_v45 }
 0x528   : > { %v7715_v2 = vrot.slane %v7714_v39, 1  ;;  %v7721_v44 = vmax.f32 %v7719_v8, %v7720_v25  ;;  %v7729_v4 = vrot.slane %v7728_v43, 1  ;;  %v7735_v29 = vmax.f32 %v7733_v63, %v7734_v21  ;;  %v13739_v6 = vpop.f32.mrb[94].mxu0 }
 0x529   : > { %v13742_v0 = vsel %vm7906_vm15, %v7709_v55, -inf  ;;  %v7547_v9 = vcombine.high %v7499_v24, %v7499_v24  ;;  %v7554_v3 = vrot.slane %v7499_v24, %v14403_v50  ;;  %v7474_v14 = vadd.f32 %v9449_v28, %v13679_v30  ;;  %v13746_v53 = vpop.f32.mrb[95].mxu0 }
 0x52a   : > { %v7716_v17 = vmax.f32 %v7714_v39, %v7715_v2  ;;  %v7722_v47 = vrot.slane %v7721_v44, 1  ;;  %v7730_v13 = vmax.f32 %v7728_v43, %v7729_v4  ;;  %v7736_v45 = vrot.slane %v7735_v29, 1 }
 0x52b   : > { %v7561_v15 = vrot.slane %v7547_v9, %v14403_v50  ;;  %v7562_v41 = vcombine.high %v7554_v3, %v7554_v3  ;;  %v7738_v37 = vsel %vm7681_vm14, %v7554_v3, -inf  ;;  %v7487_v42 = vmul.f32 %v13696_v62, %v7474_v14 }
 0x52c   : > { %v7723_v31 = vmax.f32 %v7721_v44, %v7722_v47  ;;  %v7737_v51 = vmax.f32 %v7735_v29, %v7736_v45  ;;  %v7908_v26 = vsel %vm7906_vm15, %v7716_v17, -inf  ;;  %v7914_v23 = vsel %vm7906_vm15, %v7730_v13, -inf }
 0x52d   : > { %v7909_v30 = vmax.f32 %v7907_v61, %v7908_v26  ;;  %v7915_v28 = vmax.f32 %v7913_v35, %v7914_v23  ;;  %v7563_v38 = vcombine.high %v7561_v15, %v7561_v15  ;;  %v7739_v19 = vrot.slane %v7738_v37, 4 }
 0x52e   : > { %v7911_v56 = vsel %vm7906_vm15, %v7723_v31, -inf  ;;  %v13755_v16 = vsel %vm7906_vm15, %v7737_v51, -inf  ;;  %v7745_v27 = vsel %vm7681_vm14, %v7562_v41, -inf  ;;  %v7752_v18 = vsel %vm7681_vm14, %v7561_v15, -inf }
 0x52f   : > { %v7912_v33 = vmax.f32 %v7910_v57, %v7911_v56  ;;  %v13759_v32 = vmax.f32 %v7909_v30, 0.0  ;;  %v13761_v7 = vmax.f32 %v7915_v28, 0.0  ;;  %v7740_v34 = vmax.f32 %v7738_v37, %v7739_v19 }
 0x530   : > { %v7746_v46 = vrot.slane %v7745_v27, 4  ;;  %v7753_v22 = vrot.slane %v7752_v18, 4  ;;  %v7759_v8 = vsel %vm7681_vm14, %v7563_v38, -inf  ;;  %v7500_v49 = vadd.f32 %v13702_v1, %v7487_v42 }
 0x531   : > { %v13765_v63 = vmax.f32 %v7912_v33, 0.0  ;;  %v7741_v40 = vrot.slane %v7740_v34, 2  ;;  %v7760_v59 = vrot.slane %v7759_v8, 4  ;;  %v9452_v10 = vadd.f32 %v13721_v58, %v13719_v52 }
 0x532   : > { %v7747_v61 = vmax.f32 %v7745_v27, %v7746_v46  ;;  %v7754_v39 = vmax.f32 %v7752_v18, %v7753_v22  ;;  %v7564_v25 = vcombine.high %v7500_v49, %v7500_v49  ;;  %v7571_v43 = vrot.slane %v7500_v49, %v14403_v50 }
 0x533   : > { %v7742_v21 = vmax.f32 %v7740_v34, %v7741_v40  ;;  %v7761_v55 = vmax.f32 %v7759_v8, %v7760_v59  ;;  %v7475_v57 = vadd.f32 %v9452_v10, %v13682_v5  ;;  %v9455_v35 = vadd.f32 %v13729_v60, %v13727_v12 }
 0x534   : > { %v7748_v24 = vrot.slane %v7747_v61, 2  ;;  %v7755_v2 = vrot.slane %v7754_v39, 2  ;;  %v7578_v44 = vrot.slane %v7564_v25, %v14403_v50  ;;  %v7579_v4 = vcombine.high %v7571_v43, %v7571_v43 }
 0x535   : > { %v7743_v29 = vrot.slane %v7742_v21, 1  ;;  %v7762_v9 = vrot.slane %v7761_v55, 2  ;;  %v7766_v52 = vsel %vm7681_vm14, %v7571_v43, -inf  ;;  %v7488_v58 = vmul.f32 %v13696_v62, %v7475_v57 }
 0x536   : > { %v7749_v3 = vmax.f32 %v7747_v61, %v7748_v24  ;;  %v7756_v14 = vmax.f32 %v7754_v39, %v7755_v2  ;;  %v7580_v17 = vcombine.high %v7578_v44, %v7578_v44  ;;  %v7767_v47 = vrot.slane %v7766_v52, 4 }
 0x537   : > { %v7744_v13 = vmax.f32 %v7742_v21, %v7743_v29  ;;  %v13776_v5 = vmax.f32 %v7761_v55, %v7762_v9  ;;  %v7773_v12 = vsel %vm7681_vm14, %v7579_v4, -inf  ;;  %v7780_v60 = vsel %vm7681_vm14, %v7578_v44, -inf }
 0x538   : > { %v7750_v45 = vrot.slane %v7749_v3, 1  ;;  %v7757_v15 = vrot.slane %v7756_v14, 1  ;;  %v7768_v41 = vmax.f32 %v7766_v52, %v7767_v47  ;;  %v7774_v37 = vrot.slane %v7773_v12, 4 }
 0x539   : > { %v7919_v42 = vsel %vm7906_vm15, %v7744_v13, -inf  ;;  %v7781_v31 = vrot.slane %v7780_v60, 4  ;;  %v7787_v51 = vsel %vm7681_vm14, %v7580_v17, -inf  ;;  %v7501_v26 = vadd.f32 %v13702_v1, %v7488_v58 }
 0x53a   : > { %v13783_v23 = vmax.f32 %v7749_v3, %v7750_v45  ;;  %v13785_v30 = vmax.f32 %v7756_v14, %v7757_v15  ;;  %v7769_v28 = vrot.slane %v7768_v41, 2  ;;  %v7775_v38 = vmax.f32 %v7773_v12, %v7774_v37 }
 0x53b   : > { %v7782_v19 = vmax.f32 %v7780_v60, %v7781_v31  ;;  %v7788_v56 = vrot.slane %v7787_v51, 4  ;;  %v7581_v27 = vcombine.high %v7501_v26, %v7501_v26  ;;  %v7588_v18 = vrot.slane %v7501_v26, %v14403_v50 }
 0x53c   : > { %v7770_v33 = vmax.f32 %v7768_v41, %v7769_v28  ;;  %v7776_v34 = vrot.slane %v7775_v38, 2  ;;  %v7476_v46 = vadd.f32 %v9455_v35, %v13685_v48  ;;  %v9458_v22 = vadd.f32 %v13734_v11, %v13731_v36 }
 0x53d   : > { %v7783_v8 = vrot.slane %v7782_v19, 2  ;;  %v7789_v49 = vmax.f32 %v7787_v51, %v7788_v56  ;;  %v7595_v40 = vrot.slane %v7581_v27, %v14403_v50  ;;  %v7596_v59 = vcombine.high %v7588_v18, %v7588_v18 }
 0x53e   : > { %v7771_v10 = vrot.slane %v7770_v33, 1  ;;  %v7777_v61 = vmax.f32 %v7775_v38, %v7776_v34  ;;  %v7794_v39 = vsel %vm7681_vm14, %v7588_v18, -inf  ;;  %v7489_v25 = vmul.f32 %v13696_v62, %v7476_v46 }
 0x53f   : > { %v7784_v43 = vmax.f32 %v7782_v19, %v7783_v8  ;;  %v7790_v21 = vrot.slane %v7789_v49, 2  ;;  %v7597_v55 = vcombine.high %v7595_v40, %v7595_v40  ;;  %v7795_v57 = vrot.slane %v7794_v39, 4 }
 0x540   : > { %v7772_v24 = vmax.f32 %v7770_v33, %v7771_v10  ;;  %v7778_v48 = vrot.slane %v7777_v61, 1  ;;  %v7801_v35 = vsel %vm7681_vm14, %v7596_v59, -inf  ;;  %v7808_v36 = vsel %vm7681_vm14, %v7595_v40, -inf }
 0x541   : > { %v7785_v11 = vrot.slane %v7784_v43, 1  ;;  %v13796_v2 = vmax.f32 %v7789_v49, %v7790_v21  ;;  %v7796_v44 = vmax.f32 %v7794_v39, %v7795_v57  ;;  %v7802_v4 = vrot.slane %v7801_v35, 4 }
 0x542   : > { %v13798_v29 = vmax.f32 %v7777_v61, %v7778_v48  ;;  %v7920_v9 = vsel %vm7906_vm15, %v7772_v24, -inf  ;;  %v7809_v52 = vrot.slane %v7808_v36, 4  ;;  %v7815_v58 = vsel %vm7681_vm14, %v7597_v55, -inf }
 0x543   : > { %v13802_v3 = vmax.f32 %v7784_v43, %v7785_v11  ;;  %v7921_v14 = vmax.f32 %v7919_v42, %v7920_v9  ;;  %v7797_v17 = vrot.slane %v7796_v44, 2  ;;  %v7803_v47 = vmax.f32 %v7801_v35, %v7802_v4 }
 0x544   : > { %v7810_v13 = vmax.f32 %v7808_v36, %v7809_v52  ;;  %v7816_v12 = vrot.slane %v7815_v58, 4  ;;  %v7502_v60 = vadd.f32 %v13702_v1, %v7489_v25  ;;  %v7477_v45 = vadd.f32 %v9458_v22, %v13688_v54 }
 0x545   : > { %v13806_v15 = vmax.f32 %v7921_v14, 0.0  ;;  %v7798_v41 = vmax.f32 %v7796_v44, %v7797_v17  ;;  %v7804_v37 = vrot.slane %v7803_v47, 2  ;;  %v9461_v31 = vadd.f32 %v13746_v53, %v13739_v6 }
 0x546   : > { %v7811_v51 = vrot.slane %v7810_v13, 2  ;;  %v7817_v26 = vmax.f32 %v7815_v58, %v7816_v12  ;;  %v7598_v28 = vcombine.high %v7502_v60, %v7502_v60  ;;  %v7605_v42 = vrot.slane %v7502_v60, %v14403_v50 }
 0x547   : > { %v7799_v38 = vrot.slane %v7798_v41, 1  ;;  %v7805_v19 = vmax.f32 %v7803_v47, %v7804_v37  ;;  %v7490_v56 = vmul.f32 %v13696_v62, %v7477_v45  ;;  %v7478_v27 = vadd.f32 %v9461_v31, %v13691_v20 }
 0x548   : > { %v7812_v18 = vmax.f32 %v7810_v13, %v7811_v51  ;;  %v7818_v54 = vrot.slane %v7817_v26, 2  ;;  %v7612_v33 = vrot.slane %v7598_v28, %v14403_v50  ;;  %v7613_v34 = vcombine.high %v7605_v42, %v7605_v42 }
 0x549   : > { %v7800_v46 = vmax.f32 %v7798_v41, %v7799_v38  ;;  %v7806_v22 = vrot.slane %v7805_v19, 1  ;;  %v7822_v6 = vsel %vm7681_vm14, %v7605_v42, -inf  ;;  %v7503_v53 = vadd.f32 %v13702_v1, %v7490_v56 }
 0x54a   : > { %v7813_v8 = vrot.slane %v7812_v18, 1  ;;  %v7819_v49 = vmax.f32 %v7817_v26, %v7818_v54  ;;  %v7614_v40 = vcombine.high %v7612_v33, %v7612_v33  ;;  %v7823_v59 = vrot.slane %v7822_v6, 4 }
 0x54b   : > { %v7807_v10 = vmax.f32 %v7805_v19, %v7806_v22  ;;  %v7931_v61 = vsel %vm7906_vm15, %v7800_v46, -inf  ;;  %v7829_v20 = vsel %vm7681_vm14, %v7613_v34, -inf  ;;  %v7836_v39 = vsel %vm7681_vm14, %v7612_v33, -inf }
 0x54c   : > { %v7814_v25 = vmax.f32 %v7812_v18, %v7813_v8  ;;  %v7820_v43 = vrot.slane %v7819_v49, 1  ;;  %v7824_v21 = vmax.f32 %v7822_v6, %v7823_v59  ;;  %v7830_v55 = vrot.slane %v7829_v20, 4 }
 0x54d   : > { %v7934_v57 = vsel %vm7906_vm15, %v7807_v10, -inf  ;;  %v7837_v24 = vrot.slane %v7836_v39, 4  ;;  %v7843_v48 = vsel %vm7681_vm14, %v7614_v40, -inf  ;;  %v7615_v35 = vcombine.high %v7503_v53, %v7503_v53 }
 0x54e   : > { %v13821_v36 = vmax.f32 %v7819_v49, %v7820_v43  ;;  %v13824_v11 = vsel %vm7906_vm15, %v7814_v25, -inf  ;;  %v7825_v44 = vrot.slane %v7824_v21, 2  ;;  %v7831_v4 = vmax.f32 %v7829_v20, %v7830_v55 }
 0x54f   : > { %v7838_v9 = vmax.f32 %v7836_v39, %v7837_v24  ;;  %v7844_v52 = vrot.slane %v7843_v48, 4  ;;  %v7622_v58 = vrot.slane %v7503_v53, %v14403_v50  ;;  %v7629_v14 = vrot.slane %v7615_v35, %v14403_v50 }
 0x550   : > { %v7826_v17 = vmax.f32 %v7824_v21, %v7825_v44  ;;  %v7832_v47 = vrot.slane %v7831_v4, 2  ;;  %v7491_v13 = vmul.f32 %v13696_v62, %v7478_v27  ;;  %v7764_v12 = vrot.slane %v13776_v5, 1 }
 0x551   : > { %v7839_v60 = vrot.slane %v7838_v9, 2  ;;  %v7845_v45 = vmax.f32 %v7843_v48, %v7844_v52  ;;  %v7630_v41 = vcombine.high %v7622_v58, %v7622_v58  ;;  %v7631_v37 = vcombine.high %v7629_v14, %v7629_v14 }
 0x552   : > { %v7827_v31 = vrot.slane %v7826_v17, 1  ;;  %v7833_v51 = vmax.f32 %v7831_v4, %v7832_v47  ;;  %v7850_v26 = vsel %vm7681_vm14, %v7622_v58, -inf  ;;  %v7864_v28 = vsel %vm7681_vm14, %v7629_v14, -inf }
 0x553   : > { %v7840_v42 = vmax.f32 %v7838_v9, %v7839_v60  ;;  %v7846_v38 = vrot.slane %v7845_v45, 2  ;;  %v7851_v19 = vrot.slane %v7850_v26, 4  ;;  %v7857_v56 = vsel %vm7681_vm14, %v7630_v41, -inf }
 0x554   : > { %v7828_v18 = vmax.f32 %v7826_v17, %v7827_v31  ;;  %v7834_v54 = vrot.slane %v7833_v51, 1  ;;  %v7858_v62 = vrot.slane %v7857_v56, 4  ;;  %v7865_v27 = vrot.slane %v7864_v28, 4 }
 0x555   : > { %v7841_v33 = vrot.slane %v7840_v42, 1  ;;  %v7847_v34 = vmax.f32 %v7845_v45, %v7846_v38  ;;  %v7852_v46 = vmax.f32 %v7850_v26, %v7851_v19  ;;  %v13834_v22 = vsel %vm7681_vm14, %v7631_v37, -inf }
 0x556   : > { %v7835_v6 = vmax.f32 %v7833_v51, %v7834_v54  ;;  %v7932_v53 = vsel %vm7906_vm15, %v7828_v18, -inf  ;;  %v7859_v8 = vmax.f32 %v7857_v56, %v7858_v62  ;;  %v7866_v49 = vmax.f32 %v7864_v28, %v7865_v27 }
 0x557   : > { %v7842_v40 = vmax.f32 %v7840_v42, %v7841_v33  ;;  %v7848_v59 = vrot.slane %v7847_v34, 1  ;;  %v7933_v10 = vmax.f32 %v7931_v61, %v7932_v53  ;;  %v7853_v20 = vrot.slane %v7852_v46, 2 }
 0x558   : > { %v7935_v39 = vsel %vm7906_vm15, %v7835_v6, -inf  ;;  %v7860_v25 = vrot.slane %v7859_v8, 2  ;;  %v7867_v43 = vrot.slane %v7866_v49, 2  ;;  %v7872_v21 = vrot.slane %v13834_v22, 4 }
 0x559   : > { %v13839_v55 = vmax.f32 %v7847_v34, %v7848_v59  ;;  %v7936_v24 = vmax.f32 %v7934_v57, %v7935_v39  ;;  %v13842_v48 = vsel %vm7906_vm15, %v7842_v40, -inf  ;;  %v13844_v35 = vmax.f32 %v7933_v10, 0.0 }
 0x55a   : > { %v7854_v44 = vmax.f32 %v7852_v46, %v7853_v20  ;;  %v7861_v4 = vmax.f32 %v7859_v8, %v7860_v25  ;;  %v7868_v9 = vmax.f32 %v7866_v49, %v7867_v43  ;;  %v7504_v61 = vadd.f32 %v13702_v1, %v7491_v13 }
 0x55b   : > { %v13847_v52 = vmax.f32 %v7936_v24, 0.0  ;;  %v7765_v58 = vmax.f32 %v13776_v5, %v7764_v12  ;;  %v7792_v14 = vrot.slane %v13796_v2, 1  ;;  %v7918_v17 = vmax.f32 %v13742_v0, %v13755_v16 }
 0x55c   : > { %v7855_v57 = vrot.slane %v7854_v44, 1  ;;  %v7862_v47 = vrot.slane %v7861_v4, 1  ;;  %v7632_v60 = vcombine.high %v7504_v61, %v7504_v61  ;;  %v7639_v45 = vrot.slane %v7504_v61, %v14403_v50 }
 0x55d   : > { %v7793_v41 = vmax.f32 %v13796_v2, %v7792_v14  ;;  %v7922_v37 = vsel %vm7906_vm15, %v13783_v23, -inf  ;;  %v7923_v1 = vsel %vm7906_vm15, %v13798_v29, -inf  ;;  %v7925_v5 = vsel %vm7906_vm15, %v13785_v30, -inf }
 0x55e   : > { %v7856_v13 = vmax.f32 %v7854_v44, %v7855_v57  ;;  %v7646_v12 = vrot.slane %v7632_v60, %v14403_v50  ;;  %v7647_v0 = vcombine.high %v7639_v45, %v7639_v45  ;;  %v7878_v16 = vsel %vm7681_vm14, %v7639_v45, -inf }
 0x55f   : > { %v7879_v31 = vrot.slane %v7878_v16, 4  ;;  %v7924_v51 = vmax.f32 %v7922_v37, %v7923_v1  ;;  %v7926_v2 = vsel %vm7906_vm15, %v13802_v3, -inf  ;;  %v7928_v26 = vsel %vm7906_vm15, %v7765_v58, -inf  ;;  %v9977_v1 = vld [vmem:[#allocation2] sm:$0xff] }
 0x560   : > { %v7648_v23 = vcombine.high %v7646_v12, %v7646_v12  ;;  %v7885_v28 = vsel %vm7681_vm14, %v7647_v0, -inf  ;;  %v7892_v29 = vsel %vm7681_vm14, %v7646_v12, -inf  ;;  %v7927_v42 = vmax.f32 %v7925_v5, %v7926_v2 }
 0x561   : > { %v7880_v30 = vmax.f32 %v7878_v16, %v7879_v31  ;;  %v7886_v38 = vrot.slane %v7885_v28, 4  ;;  %v7893_v19 = vrot.slane %v7892_v29, 4  ;;  %v7929_v50 = vsel %vm7906_vm15, %v7793_v41, -inf }
 0x562   : > { %v7899_v56 = vsel %vm7681_vm14, %v7648_v23, -inf  ;;  %v7930_v18 = vmax.f32 %v7928_v26, %v7929_v50  ;;  %v7958_v54 = vmax.f32 %v7918_v17, 0.0  ;;  %v7960_v62 = vmax.f32 %v7924_v51, 0.0 }
 0x563   : > { %v7881_v27 = vrot.slane %v7880_v30, 2  ;;  %v7887_v3 = vmax.f32 %v7885_v28, %v7886_v38  ;;  %v7894_v33 = vmax.f32 %v7892_v29, %v7893_v19  ;;  %v7900_v34 = vrot.slane %v7899_v56, 4 }
 0x564   : > { %v7961_v46 = vmax.f32 %v7927_v42, 0.0  ;;  %v7962_v6 = vmax.f32 %v7930_v18, 0.0  ;;  %v8003_v53 = vsel %vm1678_vm3, %v13765_v63, %v13759_v32  ;;  %v7863_v8 = vmax.f32 %v7861_v4, %v7862_v47 }
 0x565   : > { %v7882_v49 = vmax.f32 %v7880_v30, %v7881_v27  ;;  %v7888_v40 = vrot.slane %v7887_v3, 2  ;;  %v7895_v59 = vrot.slane %v7894_v33, 2  ;;  %v8004_v10 = vsel %vm1680_vm4, %v13761_v7, %v8003_v53 }
 0x566   : > { %v8005_v20 = vsel %vm1682_vm5, %v7958_v54, %v8004_v10  ;;  %v7869_v39 = vrot.slane %v7868_v9, 1  ;;  %v7873_v25 = vmax.f32 %v13834_v22, %v7872_v21  ;;  %v7901_v43 = vmax.f32 %v7899_v56, %v7900_v34  ;;  %v8229_v34 = vld [vmem:[%s14216_s8 + $0xa0] sm:$0xff] }
 0x567   : > { %v7883_v24 = vrot.slane %v7882_v49, 1  ;;  %v7889_v44 = vmax.f32 %v7887_v3, %v7888_v40  ;;  %v7896_v61 = vmax.f32 %v7894_v33, %v7895_v59  ;;  %v8006_v58 = vsel %vm1684_vm6, %v13806_v15, %v8005_v20  ;;  %v8232_v40 = vld [vmem:[%s14216_s8 + $0xb8] sm:$0xff]  ;;  %v8215_v20 = vld [vmem:[%s14216_s8 + $0x30] sm:$0xff] }
 0x568   : > { %v8007_v32 = vsel %vm1686_vm7, %v7960_v62, %v8006_v58  ;;  %v7870_v63 = vmax.f32 %v7868_v9, %v7869_v39  ;;  %v7874_v4 = vrot.slane %v7873_v25, 2  ;;  %v7902_v14 = vrot.slane %v7901_v43, 2  ;;  %v8216_v39 = vld [vmem:[%s14216_s8 + $0x38] sm:$0xff]  ;;  %v8218_v58 = vld [vmem:[%s14216_s8 + $0x48] sm:$0xff] }
 0x569   : > { %v7884_v17 = vmax.f32 %v7882_v49, %v7883_v24  ;;  %v7890_v57 = vrot.slane %v7889_v44, 1  ;;  %v8008_v7 = vsel %vm1688_vm8, %v7961_v46, %v8007_v32  ;;  %v7897_v47 = vrot.slane %v7896_v61, 1  ;;  %v8230_v46 = vld [vmem:[%s14216_s8 + $0xa8] sm:$0xff]  ;;  %v8231_v49 = vld [vmem:[%s14216_s8 + $0xb0] sm:$0xff] }
 0x56a   : > { %v8009_v60 = vsel %vm1690_vm9, %v7962_v6, %v8008_v7  ;;  %v7875_v22 = vmax.f32 %v7873_v25, %v7874_v4  ;;  %v7903_v21 = vmax.f32 %v7901_v43, %v7902_v14  ;;  %v7939_v45 = vmax.f32 %v13824_v11, %v13842_v48  ;;  %v8213_v6 = vld [vmem:[%s14216_s8 + $0x20] sm:$0xff]  ;;  %v8234_v43 = vld [vmem:[%s14216_s8 + $0xc8] sm:$0xff]  ;;  %v8235_v32 = vld [vmem:[%s14216_s8 + $0xd0] sm:$0xff] }
 0x56b   : > { %8950 = vmatmul.mubr.msk.f32.vlgmr.msra.gmra.mrb[112].mxu1 %vm7906_vm15, %v8009_v60  ;;  %v7891_v15 = vmax.f32 %v7889_v44, %v7890_v57  ;;  %v7898_v41 = vmax.f32 %v7896_v61, %v7897_v47  ;;  %v7940_v9 = vsel %vm7906_vm15, %v13821_v36, -inf  ;;  %v7941_v37 = vsel %vm7906_vm15, %v13839_v55, -inf  ;;  %v8233_v25 = vld [vmem:[%s14216_s8 + $0xc0] sm:$0xff]  ;;  %v8220_v57 = vld [vmem:[%s14216_s8 + $0x58] sm:$0xff]  ;;  %v8238_v47 = vld [vmem:[%s14216_s8 + $0xe8] sm:$0xff] }
 0x56c   : > { %8091 = vmatprep.mubr.f32.mxu1 %v9977_v1  ;;  %v7876_v5 = vrot.slane %v7875_v22, 1  ;;  %v7904_v12 = vrot.slane %v7903_v21, 1  ;;  %v7942_v0 = vmax.f32 %v7940_v9, %v7941_v37  ;;  %v7943_v16 = vsel %vm7906_vm15, %v7856_v13, -inf  ;;  %v8217_v61 = vld [vmem:[%s14216_s8 + $0x40] sm:$0xff]  ;;  %v8223_v1 = vld [vmem:[%s14216_s8 + $0x70] sm:$0xff] }
 0x56d   : > { %v7944_v31 = vsel %vm7906_vm15, %v7884_v17, -inf  ;;  %v7946_v11 = vsel %vm7906_vm15, %v7863_v8, -inf  ;;  %v7947_v48 = vsel %vm7906_vm15, %v7891_v15, -inf  ;;  %v7949_v51 = vsel %vm7906_vm15, %v7870_v63, -inf  ;;  %v8214_v8 = vld [vmem:[%s14216_s8 + $0x28] sm:$0xff]  ;;  %v8236_v63 = vld [vmem:[%s14216_s8 + $0xd8] sm:$0xff] }
 0x56e   : > { %v7877_v2 = vmax.f32 %v7875_v22, %v7876_v5  ;;  %v7905_v36 = vmax.f32 %v7903_v21, %v7904_v12  ;;  %v7945_v26 = vmax.f32 %v7943_v16, %v7944_v31  ;;  %v7948_v23 = vmax.f32 %v7946_v11, %v7947_v48  ;;  %v8219_v17 = vld [vmem:[%s14216_s8 + $0x50] sm:$0xff]  ;;  %v8237_v7 = vld [vmem:[%s14216_s8 + $0xe0] sm:$0xff]  ;;  %v8224_v5 = vld [vmem:[%s14216_s8 + $0x78] sm:$0xff] }
 0x56f   : > { %v7950_v55 = vsel %vm7906_vm15, %v7898_v41, -inf  ;;  %v7965_v28 = vmax.f32 %v7939_v45, 0.0  ;;  %v7966_v29 = vmax.f32 %v7942_v0, 0.0  ;;  %v8010_v13 = vsel %vm1678_vm3, %v13847_v52, %v13844_v35  ;;  %v8221_v21 = vld [vmem:[%s14216_s8 + $0x60] sm:$0xff]  ;;  %v8222_v45 = vld [vmem:[%s14216_s8 + $0x68] sm:$0xff]  ;;  %v8239_v15 = vld [vmem:[%s14216_s8 + $0xf0] sm:$0xff] }
 0x570   : > { %v7951_v42 = vmax.f32 %v7949_v51, %v7950_v55  ;;  %v7952_v30 = vsel %vm7906_vm15, %v7877_v2, -inf  ;;  %v7953_v38 = vsel %vm7906_vm15, %v7905_v36, -inf  ;;  %v7967_v19 = vmax.f32 %v7945_v26, 0.0  ;;  %v8240_v41 = vld [vmem:[%s14216_s8 + $0xf8] sm:$0xff] }
 0x571   : > { %v7954_v50 = vmax.f32 %v7952_v30, %v7953_v38  ;;  %v7968_v56 = vmax.f32 %v7948_v23, 0.0  ;;  %v8011_v18 = vsel %vm1680_vm4, %v7965_v28, %v8010_v13  ;;  %v9874_v53 = vpack.c.bf16 %v8230_v46, %v8229_v34  ;;  %v8115_v23 = vld [vmem:[%s427_s26] sm:$0x3] }
 0x572   : > { %v7969_v54 = vmax.f32 %v7951_v42, 0.0  ;;  %v8012_v62 = vsel %vm1682_vm5, %v7966_v29, %v8011_v18  ;;  %v9876_v59 = vpack.c.bf16 %v8214_v8, %v8213_v6  ;;  %v9878_v10 = vpack.c.bf16 %v8232_v40, %v8231_v49  ;;  %v14404_v42 = vld [vmem:[#allocation5_spill] sm:$0xff] }
 0x573   : > { %v7970_v27 = vmax.f32 %v7954_v50, 0.0  ;;  %v8013_v3 = vsel %vm1684_vm6, %v7967_v19, %v8012_v62  ;;  %9875 = vmatprep.subr.bf16.mxu0 %v9874_v53  ;;  %v9880_v24 = vpack.c.bf16 %v8216_v39, %v8215_v20  ;;  %v9882_v44 = vpack.c.bf16 %v8234_v43, %v8233_v25  ;;  %v14405_v19 = vld [vmem:[#allocation6_spill] sm:$0xff]  ;;  %v8134_v8 = vld [vmem:[%s14213_s5 + $0x28] sm:$0xff]  ;;  %v8133_v39 = vld [vmem:[%s14213_s5 + $0x20] sm:$0xff] }
 0x574   : > { %v8014_v33 = vsel %vm1686_vm7, %v7968_v56, %v8013_v3  ;;  %9877 = vmatpush3.bf16.msra.mxu0 %v9876_v59  ;;  %v9884_v4 = vpack.c.bf16 %v8218_v58, %v8217_v61  ;;  %v9886_v14 = vpack.c.bf16 %v8236_v63, %v8235_v32  ;;  %v9888_v60 = vpack.c.bf16 %v8220_v57, %v8219_v17  ;;  %v8131_v53 = vld [vmem:[%s14213_s5 + $0x10] sm:$0xff]  ;;  %v8136_v25 = vld [vmem:[%s14213_s5 + $0x38] sm:$0xff]  ;;  %v8138_v32 = vld [vmem:[%s14213_s5 + $0x48] sm:$0xff] }
 0x575   : > { %v8015_v35 = vsel %vm1688_vm8, %v7969_v54, %v8014_v33  ;;  %9879 = vmatprep.subr.bf16.mxu0 %v9878_v10  ;;  %v9890_v22 = vpack.c.bf16 %v8238_v47, %v8237_v7  ;;  %v9892_v9 = vpack.c.bf16 %v8222_v45, %v8221_v21  ;;  %v9894_v37 = vpack.c.bf16 %v8240_v41, %v8239_v15  ;;  %v8130_v33 = vld [vmem:[%s14213_s5 + $0x8] sm:$0xff]  ;;  %v8135_v58 = vld [vmem:[%s14213_s5 + $0x30] sm:$0xff]  ;;  %v8137_v57 = vld [vmem:[%s14213_s5 + $0x40] sm:$0xff] }
 0x576   : > { %v8016_v52 = vsel %vm1690_vm9, %v7970_v27, %v8015_v35  ;;  %v9896_v12 = vpack.c.bf16 %v8224_v5, %v8223_v1  ;;  %v8120_v30 = vrot.slane %v8115_v23, %v14404_v42  ;;  %v8124_v50 = vrot.slane %v8115_v23, %v14405_v19  ;;  %v8129_v27 = vld [vmem:[%s14213_s5] sm:$0xff]  ;;  %v8132_v35 = vld [vmem:[%s14213_s5 + $0x18] sm:$0xff]  ;;  %v8139_v45 = vld [vmem:[%s14213_s5 + $0x50] sm:$0xff] }
 0x577   : > { %8951 = vmatmul.mubr.msk.f32.gmra.mrb[112].mxu1 %vm7906_vm15, %v8016_v52  ;;  %v8140_v7 = vld [vmem:[%s14213_s5 + $0x58] sm:$0xff]  ;;  %v8142_v15 = vld [vmem:[%s14213_s5 + $0x68] sm:$0xff]  ;;  %v8141_v5 = vld [vmem:[%s14213_s5 + $0x60] sm:$0xff] }
 0x578   : > { %9881 = vmatpush3.bf16.msra.mxu0 %v9880_v24  ;;  %v8150_v19 = vld [vmem:[%s14213_s5 + $0xa8] sm:$0xff] }
 0x579   : > { %9883 = vmatprep.subr.bf16.mxu0 %v9882_v44 }
 0x57c   : > { %9885 = vmatpush3.bf16.msra.mxu0 %v9884_v4 }
 0x57d   : > { %9887 = vmatprep.subr.bf16.mxu0 %v9886_v14 }
 0x580   : > { %9889 = vmatpush3.bf16.msra.mxu0 %v9888_v60 }
 0x581   : > { %9891 = vmatprep.subr.bf16.mxu0 %v9890_v22 }
 0x584   : > { %9893 = vmatpush3.bf16.msra.mxu0 %v9892_v9 }
 0x585   : > { %9895 = vmatprep.subr.bf16.mxu0 %v9894_v37 }
 0x588   : > { %9897 = vmatpush3.bf16.msra.mxu0 %v9896_v12  ;;  %v8144_v12 = vld [vmem:[%s14213_s5 + $0x78] sm:$0xff] }
 0x64a   : > { %v8093_v0 = vpop.f32.mrb[112].mxu1 }
 0x64b   : > { %v8099_v16 = vrot.slane %v8093_v0, 4  ;;  %v8095_v31 = vpop.f32.mrb[113].mxu1 }
 0x64c   : > { %v8106_v11 = vrot.slane %v8095_v31, 4 }
 0x64d   : > { %v8100_v48 = vadd.f32 %v8099_v16, %v8093_v0 }
 0x64e   : > { %v8107_v51 = vadd.f32 %v8106_v11, %v8095_v31 }
 0x64f   : > { %v8101_v2 = vrot.slane %v8100_v48, 2 }
 0x650   : > { %v8108_v36 = vrot.slane %v8107_v51, 2 }
 0x651   : > { %v8102_v26 = vadd.f32 %v8101_v2, %v8100_v48  ;;  %v8143_v48 = vld [vmem:[%s14213_s5 + $0x70] sm:$0xff] }
 0x652   : > { %v8109_v55 = vadd.f32 %v8108_v36, %v8107_v51  ;;  %v8146_v51 = vld [vmem:[%s14213_s5 + $0x88] sm:$0xff] }
 0x653   : > { %v8103_v28 = vrot.slane %v8102_v26, 1 }
 0x654   : > { %v8110_v29 = vrot.slane %v8109_v55, 1 }
 0x655   : > { %v8104_v13 = vadd.f32 %v8103_v28, %v8102_v26  ;;  %v8148_v28 = vld [vmem:[%s14213_s5 + $0x98] sm:$0xff] }
 0x656   : > { %v8111_v38 = vadd.f32 %v8110_v29, %v8109_v55  ;;  %v8145_v55 = vld [vmem:[%s14213_s5 + $0x80] sm:$0xff] }
 0x657   : > { %v8113_v56 = vmul.f32 0.0625, %v8104_v13 }
 0x658   : > { %v8114_v18 = vmul.f32 0.0625, %v8111_v38  ;;  %v8147_v38 = vld [vmem:[%s14213_s5 + $0x90] sm:$0xff] }
 0x659   : > { %v8127_v54 = vadd.f32 %v8120_v30, %v8113_v56 }
 0x65a   : > { %v8128_v62 = vadd.f32 %v8124_v50, %v8114_v18 }
 0x65b   : > { %v13989_v3 = vrot.slane %v8127_v54, %v14404_v42 }
 0x65c   : > { %v13998_v52 = vrot.slane %v8128_v62, %v14404_v42  ;;  %v8149_v62 = vld [vmem:[%s14213_s5 + $0xa0] sm:$0xff] }
 0x65d   : > { %v8161_v34 = vadd.f32 %v13989_v3, %v8129_v27  ;;  %v8163_v59 = vadd.f32 %v13989_v3, %v8131_v53  ;;  %v8165_v24 = vadd.f32 %v13989_v3, %v8133_v39  ;;  %v8167_v4 = vadd.f32 %v13989_v3, %v8135_v58  ;;  %v8152_v27 = vld [vmem:[%s14213_s5 + $0xb8] sm:$0xf] }
 0x65e   : > { %v8162_v46 = vadd.f32 %v13998_v52, %v8130_v33  ;;  %v8164_v6 = vadd.f32 %v13998_v52, %v8132_v35  ;;  %v8166_v20 = vadd.f32 %v13998_v52, %v8134_v8  ;;  %v8168_v61 = vadd.f32 %v13998_v52, %v8136_v25 }
 0x65f   : > { %v8185_v40 = vmax.f32 %v8161_v34, 0.0  ;;  %v8187_v43 = vmax.f32 %v8163_v59, 0.0  ;;  %v8189_v63 = vmax.f32 %v8165_v24, 0.0  ;;  %v8170_v17 = vadd.f32 %v13998_v52, %v8138_v32 }
 0x660   : > { %v8186_v49 = vmax.f32 %v8162_v46, 0.0  ;;  %v8188_v10 = vmax.f32 %v8164_v6, 0.0  ;;  %v8190_v44 = vmax.f32 %v8166_v20, 0.0  ;;  %v8192_v14 = vmax.f32 %v8168_v61, 0.0  ;;  %v8151_v6 = vld [vmem:[%s14213_s5 + $0xb0] sm:$0xf] }
 0x661   : > { %v8191_v47 = vmax.f32 %v8167_v4, 0.0  ;;  %v8169_v60 = vadd.f32 %v13989_v3, %v8137_v57  ;;  %v8194_v22 = vmax.f32 %v8170_v17, 0.0  ;;  %v8172_v21 = vadd.f32 %v13998_v52, %v8140_v7 }
 0x662   : > { %8312 = vmatprep.mubr.f32.mxu0 %v8186_v49  ;;  %v8171_v9 = vadd.f32 %v13989_v3, %v8139_v45  ;;  %v8174_v1 = vadd.f32 %v13998_v52, %v8142_v15  ;;  %v8173_v16 = vadd.f32 %v13989_v3, %v8141_v5  ;;  %v8176_v11 = vadd.f32 %v13998_v52, %v8144_v12 }
 0x663   : > { %8313 = vmatmul.mubr.f32.vlgmr.msra.gmra.mrb[96].mxu0 %v8185_v40  ;;  %v8193_v41 = vmax.f32 %v8169_v60, 0.0  ;;  %v8196_v37 = vmax.f32 %v8172_v21, 0.0  ;;  %v8175_v36 = vadd.f32 %v13989_v3, %v8143_v48  ;;  %v8178_v23 = vadd.f32 %v13998_v52, %v8146_v51 }
 0x664   : > { %8317 = vmatprep.mubr.f32.mxu0 %v8188_v10  ;;  %v8195_v0 = vmax.f32 %v8171_v9, 0.0  ;;  %v8198_v31 = vmax.f32 %v8174_v1, 0.0  ;;  %v8197_v2 = vmax.f32 %v8173_v16, 0.0  ;;  %v8200_v26 = vmax.f32 %v8176_v11, 0.0 }
 0x665   : > { %v8199_v29 = vmax.f32 %v8175_v36, 0.0  ;;  %v8177_v13 = vadd.f32 %v13989_v3, %v8145_v55  ;;  %v8202_v42 = vmax.f32 %v8178_v23, 0.0  ;;  %v8180_v30 = vadd.f32 %v13998_v52, %v8148_v28 }
 0x666   : > { %v8179_v56 = vadd.f32 %v13989_v3, %v8147_v38  ;;  %v8182_v54 = vadd.f32 %v13998_v52, %v8150_v19  ;;  %v8181_v35 = vadd.f32 %v13989_v3, %v8149_v62  ;;  %v8184_v46 = vadd.f32 %v13998_v52, %v8152_v27  ;;  %v14090_v52 = vld [vmem:[%s14217_s9] ss:$0 sm:$0xff] }
 0x667   : > { %8318 = vmatmul.mubr.f32.gmra.mrb[98].mxu0 %v8187_v43  ;;  %v8201_v50 = vmax.f32 %v8177_v13, 0.0  ;;  %v8204_v18 = vmax.f32 %v8180_v30, 0.0  ;;  %v8183_v8 = vadd.f32 %v13989_v3, %v8151_v6  ;;  %v14096_v3 = vld [vmem:[%s14218_s10] ss:$0 sm:$0xff] }
 0x668   : > { %8322 = vmatprep.mubr.f32.mxu0 %v8190_v44  ;;  %v8203_v33 = vmax.f32 %v8179_v56, 0.0  ;;  %v8206_v34 = vmax.f32 %v8182_v54, 0.0  ;;  %v8205_v53 = vmax.f32 %v8181_v35, 0.0  ;;  %v8208_v49 = vmax.f32 %v8184_v46, 0.0 }
 0x669   : > { %v8207_v40 = vmax.f32 %v8183_v8, 0.0 }
 0x66b   : > { %8323 = vmatmul.mubr.f32.gmra.mrb[100].mxu0 %v8189_v63 }
 0x66c   : > { %8327 = vmatprep.mubr.f32.mxu0 %v8192_v14 }
 0x66f   : > { %8328 = vmatmul.mubr.f32.gmra.mrb[102].mxu0 %v8191_v47 }
 0x670   : > { %8332 = vmatprep.mubr.f32.mxu0 %v8194_v22 }
 0x673   : > { %8333 = vmatmul.mubr.f32.gmra.mrb[104].mxu0 %v8193_v41 }
 0x674   : > { %8337 = vmatprep.mubr.f32.mxu0 %v8196_v37 }
 0x677   : > { %8338 = vmatmul.mubr.f32.gmra.mrb[106].mxu0 %v8195_v0 }
 0x678   : > { %8342 = vmatprep.mubr.f32.mxu0 %v8198_v31 }
 0x67b   : > { %8343 = vmatmul.mubr.f32.gmra.mrb[108].mxu0 %v8197_v2 }
 0x67c   : > { %8347 = vmatprep.mubr.f32.mxu0 %v8200_v26 }
 0x67f   : > { %8348 = vmatmul.mubr.f32.gmra.mrb[110].mxu0 %v8199_v29 }
 0x680   : > { %8352 = vmatprep.mubr.f32.mxu0 %v8202_v42 }
 0x683   : > { %8353 = vmatmul.mubr.f32.gmra.mrb[112].mxu0 %v8201_v50 }
 0x684   : > { %8357 = vmatprep.mubr.f32.mxu0 %v8204_v18 }
 0x687   : > { %8358 = vmatmul.mubr.f32.gmra.mrb[114].mxu0 %v8203_v33 }
 0x688   : > { %8362 = vmatprep.mubr.f32.mxu0 %v8206_v34 }
 0x68b   : > { %8363 = vmatmul.mubr.f32.gmra.mrb[116].mxu0 %v8205_v53 }
 0x68c   : > { %8367 = vmatprep.mubr.f32.mxu0 %v8208_v49 }
 0x68f   : > { %8368 = vmatmul.mubr.f32.gmra.mrb[118].mxu0 %v8207_v40 }
 0x736   : > { %v9494_v59 = vpop.f32.mrb[96].mxu0 }
 0x737   : > { %v9495_v10 = vpop.f32.mrb[97].mxu0 }
 0x738   : > { %v9496_v20 = vadd.f32 %v9495_v10, %v9494_v59 }
 0x73a   : > { %v9497_v39 = vpop.f32.mrb[98].mxu0  ;;  %v8315_v25 = vadd.f32 %v9496_v20, %v14090_v52 }
 0x73b   : > { %v9498_v43 = vpop.f32.mrb[99].mxu0 }
 0x73c   : > { %v9499_v24 = vadd.f32 %v9498_v43, %v9497_v39  ;;  %v8373_v44 = vmax.f32 %v8315_v25, 0.0 }
 0x73e   : > { %v8320_v61 = vadd.f32 %v9499_v24, %v14090_v52  ;;  %v9500_v58 = vpop.f32.mrb[100].mxu0  ;;  %v8392_v32 = vmul.f32 %v14096_v3, %v8373_v44 }
 0x73f   : > { %v9501_v63 = vpop.f32.mrb[101].mxu0 }
 0x740   : > { %v8374_v4 = vmax.f32 %v8320_v61, 0.0  ;;  %v9502_v14 = vadd.f32 %v9501_v63, %v9500_v58  ;;  %8404 = vadd.xlane.f32.xlu0 %v8392_v32  ;;  %v14122_v63 = vld [vmem:[#allocation3] ss:$0 sm:$0xff] }
 0x742   : > { %v9503_v17 = vpop.f32.mrb[102].mxu0  ;;  %v8393_v57 = vmul.f32 %v14096_v3, %v8374_v4  ;;  %v8325_v7 = vadd.f32 %v9502_v14, %v14090_v52 }
 0x743   : > { %v9504_v47 = vpop.f32.mrb[103].mxu0 }
 0x744   : > { %v9505_v60 = vadd.f32 %v9504_v47, %v9503_v17  ;;  %8406 = vadd.xlane.f32.xlu0 %v8393_v57  ;;  %v8375_v22 = vmax.f32 %v8325_v7, 0.0 }
 0x746   : > { %v8330_v21 = vadd.f32 %v9505_v60, %v14090_v52  ;;  %v9506_v45 = vpop.f32.mrb[104].mxu0  ;;  %v8394_v15 = vmul.f32 %v14096_v3, %v8375_v22 }
 0x747   : > { %v9507_v41 = vpop.f32.mrb[105].mxu0 }
 0x748   : > { %v8376_v9 = vmax.f32 %v8330_v21, 0.0  ;;  %v9508_v37 = vadd.f32 %v9507_v41, %v9506_v45  ;;  %8408 = vadd.xlane.f32.xlu1 %v8394_v15 }
 0x74a   : > { %v8335_v1 = vadd.f32 %v9508_v37, %v14090_v52  ;;  %v9509_v5 = vpop.f32.mrb[106].mxu0  ;;  %v8395_v12 = vmul.f32 %v14096_v3, %v8376_v9 }
 0x74b   : > { %v9510_v0 = vpop.f32.mrb[107].mxu0 }
 0x74c   : > { %v8377_v16 = vmax.f32 %v8335_v1, 0.0  ;;  %v9511_v31 = vadd.f32 %v9510_v0, %v9509_v5  ;;  %8410 = vadd.xlane.f32.xlu1 %v8395_v12 }
 0x74e   : > { %v8340_v11 = vadd.f32 %v9511_v31, %v14090_v52  ;;  %v9512_v48 = vpop.f32.mrb[108].mxu0  ;;  %v8396_v51 = vmul.f32 %v14096_v3, %v8377_v16 }
 0x74f   : > { %v9513_v2 = vpop.f32.mrb[109].mxu0 }
 0x750   : > { %v8378_v36 = vmax.f32 %v8340_v11, 0.0  ;;  %v9514_v26 = vadd.f32 %v9513_v2, %v9512_v48  ;;  %8412 = vadd.xlane.f32.xlu0 %v8396_v51 }
 0x752   : > { %v8345_v23 = vadd.f32 %v9514_v26, %v14090_v52  ;;  %v9515_v55 = vpop.f32.mrb[110].mxu0  ;;  %v8397_v28 = vmul.f32 %v14096_v3, %v8378_v36 }
 0x753   : > { %v9516_v29 = vpop.f32.mrb[111].mxu0 }
 0x754   : > { %v8379_v13 = vmax.f32 %v8345_v23, 0.0  ;;  %v9517_v42 = vadd.f32 %v9516_v29, %v9515_v55  ;;  %8414 = vadd.xlane.f32.xlu1 %v8397_v28 }
 0x756   : > { %v8350_v30 = vadd.f32 %v9517_v42, %v14090_v52  ;;  %v9518_v38 = vpop.f32.mrb[112].mxu0  ;;  %v8398_v19 = vmul.f32 %v14096_v3, %v8379_v13 }
 0x757   : > { %v9519_v50 = vpop.f32.mrb[113].mxu0 }
 0x758   : > { %v8380_v56 = vmax.f32 %v8350_v30, 0.0  ;;  %v9520_v18 = vadd.f32 %v9519_v50, %v9518_v38  ;;  %8416 = vadd.xlane.f32.xlu0 %v8398_v19 }
 0x75a   : > { %v8355_v54 = vadd.f32 %v9520_v18, %v14090_v52  ;;  %v9521_v62 = vpop.f32.mrb[114].mxu0  ;;  %v8399_v27 = vmul.f32 %v14096_v3, %v8380_v56 }
 0x75b   : > { %v9522_v33 = vpop.f32.mrb[115].mxu0 }
 0x75c   : > { %v8381_v35 = vmax.f32 %v8355_v54, 0.0  ;;  %v9523_v34 = vadd.f32 %v9522_v33, %v9521_v62  ;;  %8418 = vadd.xlane.f32.xlu1 %v8399_v27 }
 0x75e   : > { %v8360_v46 = vadd.f32 %v9523_v34, %v14090_v52  ;;  %v9524_v6 = vpop.f32.mrb[116].mxu0  ;;  %v8400_v53 = vmul.f32 %v14096_v3, %v8381_v35 }
 0x75f   : > { %v9525_v8 = vpop.f32.mrb[117].mxu0 }
 0x760   : > { %v8382_v49 = vmax.f32 %v8360_v46, 0.0  ;;  %v9526_v40 = vadd.f32 %v9525_v8, %v9524_v6  ;;  %8420 = vadd.xlane.f32.xlu0 %v8400_v53 }
 0x762   : > { %v8365_v59 = vadd.f32 %v9526_v40, %v14090_v52  ;;  %v9527_v10 = vpop.f32.mrb[118].mxu0  ;;  %v8401_v20 = vmul.f32 %v14096_v3, %v8382_v49 }
 0x763   : > { %v9528_v39 = vpop.f32.mrb[119].mxu0 }
 0x764   : > { %v8383_v25 = vmax.f32 %v8365_v59, 0.0  ;;  %v9529_v43 = vadd.f32 %v9528_v39, %v9527_v10  ;;  %8422 = vadd.xlane.f32.xlu1 %v8401_v20 }
 0x766   : > { %v8370_v24 = vadd.f32 %v9529_v43, %v14090_v52  ;;  %v8402_v44 = vmul.f32 %v14096_v3, %v8383_v25 }
 0x768   : > { %v8384_v61 = vmax.f32 %v8370_v24, 0.0  ;;  %8424 = vadd.xlane.f32.xlu0 %v8402_v44 }
 0x76a   : > { %v8403_v58 = vmul.f32 %v14096_v3, %v8384_v61 }
 0x76c   : > { %v8426_v32 = vsel %vm476_vm0, %v8403_v58, 0.0 }
 0x76d   : > { %8427 = vadd.xlane.f32.xlu1 %v8426_v32 }
 0x7cd   : > { %v8405_v4 = vpop.xlane.xlu0 %8404 }
 0x7ce   : > { %v8436_v14 = vadd.f32 %v14122_v63, %v8405_v4 }
 0x7d0   : > { %v8448_v17 = vand.u32 2147483647, %v8436_v14  ;;  %vm8496_vm0 = vcmp.ge.f32.partialorder %v8436_v14, 0.0 }
 0x7d1   : > { %v8407_v57 = vpop.xlane.xlu0 %8406 }
 0x7d2   : > { %v8460_v7 = vsub.f32 0.0, %v8448_v17  ;;  %v14126_v47 = vadd.f32 %v14122_v63, %v8407_v57 }
 0x7d4   : > { %v8472_v52 = vmul.f32 1.442695, %v8460_v7  ;;  %v8449_v60 = vand.u32 2147483647, %v14126_v47  ;;  %vm8497_vm2 = vcmp.ge.f32.partialorder %v14126_v47, 0.0 }
 0x7d5   : > { %v8409_v22 = vpop.xlane.xlu1 %8408 }
 0x7d6   : > { %9911 = vpow2.f32 %v8472_v52  ;;  %v8461_v3 = vsub.f32 0.0, %v8449_v60  ;;  %v14130_v21 = vadd.f32 %v14122_v63, %v8409_v22 }
 0x7d8   : > { %v8474_v45 = vmul.f32 1.442695, %v8461_v3  ;;  %v8450_v15 = vand.u32 2147483647, %v14130_v21  ;;  %vm8498_vm3 = vcmp.ge.f32.partialorder %v14130_v21, 0.0 }
 0x7d9   : > { %v8411_v41 = vpop.xlane.xlu1 %8410 }
 0x7da   : > { %9913 = vpow2.f32 %v8474_v45  ;;  %v8462_v9 = vsub.f32 0.0, %v8450_v15  ;;  %v14134_v37 = vadd.f32 %v14122_v63, %v8411_v41 }
 0x7dc   : > { %v8476_v1 = vmul.f32 1.442695, %v8462_v9  ;;  %v8451_v5 = vand.u32 2147483647, %v14134_v37  ;;  %vm8499_vm4 = vcmp.ge.f32.partialorder %v14134_v37, 0.0 }
 0x7dd   : > { %v8413_v12 = vpop.xlane.xlu0 %8412 }
 0x7de   : > { %9915 = vpow2.f32 %v8476_v1  ;;  %v8463_v0 = vsub.f32 0.0, %v8451_v5  ;;  %v14138_v16 = vadd.f32 %v14122_v63, %v8413_v12 }
 0x7e0   : > { %v9912_v31 = vpop.eup %9911  ;;  %v8478_v11 = vmul.f32 1.442695, %v8463_v0  ;;  %v8452_v48 = vand.u32 2147483647, %v14138_v16  ;;  %vm8500_vm5 = vcmp.ge.f32.partialorder %v14138_v16, 0.0 }
 0x7e1   : > { %v8520_v51 = vadd.f32 1.0, %v9912_v31  ;;  %v8415_v2 = vpop.xlane.xlu1 %8414  ;;  %v8508_v46 = vsel %vm8496_vm0, 1.0, %v9912_v31 }
 0x7e2   : > { %9917 = vpow2.f32 %v8478_v11  ;;  %v8464_v36 = vsub.f32 0.0, %v8452_v48  ;;  %v14142_v26 = vadd.f32 %v14122_v63, %v8415_v2 }
 0x7e3   : > { %9919 = vrcp.f32 %v8520_v51 }
 0x7e4   : > { %v9914_v23 = vpop.eup %9913  ;;  %v8480_v55 = vmul.f32 1.442695, %v8464_v36  ;;  %v8453_v28 = vand.u32 2147483647, %v14142_v26  ;;  %vm8501_vm6 = vcmp.ge.f32.partialorder %v14142_v26, 0.0 }
 0x7e5   : > { %v8521_v29 = vadd.f32 1.0, %v9914_v23  ;;  %v8417_v13 = vpop.xlane.xlu0 %8416  ;;  %v8509_v25 = vsel %vm8497_vm2, 1.0, %v9914_v23 }
 0x7e6   : > { %9921 = vpow2.f32 %v8480_v55  ;;  %v8465_v42 = vsub.f32 0.0, %v8453_v28  ;;  %v14146_v30 = vadd.f32 %v14122_v63, %v8417_v13 }
 0x7e7   : > { %9923 = vrcp.f32 %v8521_v29 }
 0x7e8   : > { %v9916_v38 = vpop.eup %9915  ;;  %v8482_v19 = vmul.f32 1.442695, %v8465_v42  ;;  %v8454_v50 = vand.u32 2147483647, %v14146_v30  ;;  %vm8502_vm7 = vcmp.ge.f32.partialorder %v14146_v30, 0.0 }
 0x7e9   : > { %v8522_v56 = vadd.f32 1.0, %v9916_v38  ;;  %v8419_v18 = vpop.xlane.xlu1 %8418  ;;  %v8510_v57 = vsel %vm8498_vm3, 1.0, %v9916_v38 }
 0x7ea   : > { %9925 = vpow2.f32 %v8482_v19  ;;  %v8466_v54 = vsub.f32 0.0, %v8454_v50  ;;  %v14151_v62 = vadd.f32 %v14122_v63, %v8419_v18 }
 0x7eb   : > { %9927 = vrcp.f32 %v8522_v56 }
 0x7ec   : > { %v9918_v27 = vpop.eup %9917  ;;  %v8484_v33 = vmul.f32 1.442695, %v8466_v54  ;;  %v8455_v35 = vand.u32 2147483647, %v14151_v62  ;;  %vm8503_vm8 = vcmp.ge.f32.partialorder %v14151_v62, 0.0 }
 0x7ed   : > { %v9920_v34 = vpop.eup %9919  ;;  %v8523_v6 = vadd.f32 1.0, %v9918_v27  ;;  %v8421_v53 = vpop.xlane.xlu0 %8420  ;;  %v8511_v41 = vsel %vm8499_vm4, 1.0, %v9918_v27 }
 0x7ee   : > { %v8533_v8 = vmul.f32 %v9920_v34, %v8508_v46  ;;  %9929 = vpow2.f32 %v8484_v33  ;;  %v8467_v49 = vsub.f32 0.0, %v8455_v35  ;;  %v14160_v40 = vadd.f32 %v14122_v63, %v8421_v53 }
 0x7ef   : > { %9931 = vrcp.f32 %v8523_v6 }
 0x7f0   : > { %v9922_v59 = vpop.eup %9921  ;;  %8557 = vst.msk [vmem:[%s14157_s30] sm:$0xff] %vm8556_vm1, %v8533_v8  ;;  %v8486_v10 = vmul.f32 1.442695, %v8467_v49  ;;  %v8456_v20 = vand.u32 2147483647, %v14160_v40  ;;  %vm8504_vm9 = vcmp.ge.f32.partialorder %v14160_v40, 0.0 }
 0x7f1   : > { %v9924_v39 = vpop.eup %9923  ;;  %v8524_v43 = vadd.f32 1.0, %v9922_v59  ;;  %v8423_v24 = vpop.xlane.xlu1 %8422  ;;  %v8512_v48 = vsel %vm8500_vm5, 1.0, %v9922_v59 }
 0x7f2   : > { %v8535_v44 = vmul.f32 %v9924_v39, %v8509_v25  ;;  %9933 = vpow2.f32 %v8486_v10  ;;  %v8468_v61 = vsub.f32 0.0, %v8456_v20  ;;  %v14167_v58 = vadd.f32 %v14122_v63, %v8423_v24 }
 0x7f3   : > { %9935 = vrcp.f32 %v8524_v43 }
 0x7f4   : > { %v9926_v32 = vpop.eup %9925  ;;  %8558 = vst.msk [vmem:[%s14157_s30 + $0x8] sm:$0xff] %vm8556_vm1, %v8535_v44  ;;  %v8488_v4 = vmul.f32 1.442695, %v8468_v61  ;;  %v8457_v14 = vand.u32 2147483647, %v14167_v58  ;;  %vm8505_vm10 = vcmp.ge.f32.partialorder %v14167_v58, 0.0 }
 0x7f5   : > { %v9928_v17 = vpop.eup %9927  ;;  %v8525_v7 = vadd.f32 1.0, %v9926_v32  ;;  %v8425_v47 = vpop.xlane.xlu0 %8424  ;;  %v8513_v28 = vsel %vm8501_vm6, 1.0, %v9926_v32 }
 0x7f6   : > { %v8537_v52 = vmul.f32 %v9928_v17, %v8510_v57  ;;  %9937 = vpow2.f32 %v8488_v4  ;;  %v8469_v60 = vsub.f32 0.0, %v8457_v14  ;;  %v14174_v22 = vadd.f32 %v14122_v63, %v8425_v47 }
 0x7f7   : > { %9939 = vrcp.f32 %v8525_v7 }
 0x7f8   : > { %v9930_v3 = vpop.eup %9929  ;;  %8559 = vst.msk [vmem:[%s14157_s30 + $0x10] sm:$0xff] %vm8556_vm1, %v8537_v52  ;;  %v8490_v21 = vmul.f32 1.442695, %v8469_v60  ;;  %v8458_v45 = vand.u32 2147483647, %v14174_v22  ;;  %vm8506_vm11 = vcmp.ge.f32.partialorder %v14174_v22, 0.0 }
 0x7f9   : > { %v9932_v15 = vpop.eup %9931  ;;  %v8526_v9 = vadd.f32 1.0, %v9930_v3  ;;  %v8514_v19 = vsel %vm8502_vm7, 1.0, %v9930_v3 }
 0x7fa   : > { %v8539_v1 = vmul.f32 %v9932_v15, %v8511_v41  ;;  %9941 = vpow2.f32 %v8490_v21  ;;  %v8470_v5 = vsub.f32 0.0, %v8458_v45  ;;  %v8428_v12 = vpop.xlane.xlu1 %8427 }
 0x7fb   : > { %9943 = vrcp.f32 %v8526_v9  ;;  %v8447_v0 = vadd.f32 %v14122_v63, %v8428_v12 }
 0x7fc   : > { %v9934_v31 = vpop.eup %9933  ;;  %8560 = vst.msk [vmem:[%s14157_s30 + $0x18] sm:$0xff] %vm8556_vm1, %v8539_v1  ;;  %v8492_v37 = vmul.f32 1.442695, %v8470_v5 }
 0x7fd   : > { %v9936_v11 = vpop.eup %9935  ;;  %v8527_v51 = vadd.f32 1.0, %v9934_v31  ;;  %v8459_v2 = vand.u32 2147483647, %v8447_v0  ;;  %v8515_v54 = vsel %vm8503_vm8, 1.0, %v9934_v31  ;;  %vm8507_vm12 = vcmp.ge.f32.partialorder %v8447_v0, 0.0 }
 0x7fe   : > { %v8541_v36 = vmul.f32 %v9936_v11, %v8512_v48  ;;  %9945 = vpow2.f32 %v8492_v37 }
 0x7ff   : > { %9947 = vrcp.f32 %v8527_v51  ;;  %v8471_v23 = vsub.f32 0.0, %v8459_v2 }
 0x800   : > { %v9938_v55 = vpop.eup %9937  ;;  %8561 = vst.msk [vmem:[%s14157_s30 + $0x20] sm:$0xff] %vm8556_vm1, %v8541_v36 }
 0x801   : > { %v9940_v63 = vpop.eup %9939  ;;  %v8528_v29 = vadd.f32 1.0, %v9938_v55  ;;  %v8494_v16 = vmul.f32 1.442695, %v8471_v23  ;;  %v8516_v35 = vsel %vm8504_vm9, 1.0, %v9938_v55 }
 0x802   : > { %v8543_v13 = vmul.f32 %v9940_v63, %v8513_v28 }
 0x803   : > { %9949 = vrcp.f32 %v8528_v29 }
 0x804   : > { %v9942_v42 = vpop.eup %9941  ;;  %8562 = vst.msk [vmem:[%s14157_s30 + $0x28] sm:$0xff] %vm8556_vm1, %v8543_v13  ;;  %9951 = vpow2.f32 %v8494_v16 }
 0x805   : > { %v9944_v38 = vpop.eup %9943  ;;  %v8529_v50 = vadd.f32 1.0, %v9942_v42  ;;  %v8517_v53 = vsel %vm8505_vm10, 1.0, %v9942_v42 }
 0x806   : > { %v8545_v56 = vmul.f32 %v9944_v38, %v8514_v19 }
 0x807   : > { %9953 = vrcp.f32 %v8529_v50 }
 0x808   : > { %v9946_v26 = vpop.eup %9945  ;;  %8563 = vst.msk [vmem:[%s14157_s30 + $0x30] sm:$0xff] %vm8556_vm1, %v8545_v56 }
 0x809   : > { %v9948_v18 = vpop.eup %9947  ;;  %v8530_v27 = vadd.f32 1.0, %v9946_v26  ;;  %v8518_v40 = vsel %vm8506_vm11, 1.0, %v9946_v26 }
 0x80a   : > { %v8547_v33 = vmul.f32 %v9948_v18, %v8515_v54 }
 0x80b   : > { %9955 = vrcp.f32 %v8530_v27 }
 0x80c   : > { %8564 = vst.msk [vmem:[%s14157_s30 + $0x38] sm:$0xff] %vm8556_vm1, %v8547_v33 }
 0x80d   : > { %v9950_v30 = vpop.eup %9949 }
 0x80e   : > { %v9952_v34 = vpop.eup %9951  ;;  %v8549_v46 = vmul.f32 %v9950_v30, %v8516_v35 }
 0x80f   : > { %v8531_v6 = vadd.f32 1.0, %v9952_v34  ;;  %v8519_v20 = vsel %vm8507_vm12, 1.0, %v9952_v34 }
 0x810   : > { %8565 = vst.msk [vmem:[%s14157_s30 + $0x40] sm:$0xff] %vm8556_vm1, %v8549_v46 }
 0x811   : > { %v9954_v62 = vpop.eup %9953  ;;  %9957 = vrcp.f32 %v8531_v6 }
 0x812   : > { %v8551_v8 = vmul.f32 %v9954_v62, %v8517_v53 }
 0x814   : > { %8566 = vst.msk [vmem:[%s14157_s30 + $0x48] sm:$0xff] %vm8556_vm1, %v8551_v8 }
 0x815   : > { %v9956_v49 = vpop.eup %9955 }
 0x816   : > { %v8553_v59 = vmul.f32 %v9956_v49, %v8518_v40 }
 0x818   : > { %8567 = vst.msk [vmem:[%s14157_s30 + $0x50] sm:$0xff] %vm8556_vm1, %v8553_v59 }
 0x81b   : > { %v9958_v10 = vpop.eup %9957 }
 0x81c   : > { %v8555_v39 = vmul.f32 %v9958_v10, %v8519_v20 }
 0x81e   : > { %8569 = vst.msk [vmem:[%s14157_s30 + $0x58] sm:$0xf] %vm8568_vm13, %v8555_v39 }
 0x81f PF: > { %s24_s23 = sadd.s32 1, %s9984_s23  }
 0x820   : > { %p21_p4 = scmp.ge.s32.totalorder %s24_s23, 4  }
 0x822   :  { %23 = sbr.rel (!%p21_p4) target bundleno = 3 (0x3), region = 110 }

</bundles_post_ra>
